<compile_context>
chip_gen: v7x
topology: tpu7x:2x2x1
jax: 0.10.0
libtpu: 0.0.40
codegen_flags: <defaults>
</compile_context>

<pallas_src>
import functools

import jax
import jax.numpy as jnp
from jax.experimental import pallas as pl
from jax.experimental.pallas import tpu as pltpu

VMEM = pltpu.MemorySpace.VMEM


# ----------------------------------------------------------------------------
# Single fused kernel: audio embedding -> conv stack -> BiLSTM -> linear+logsm
# Layout: time-major [T*BP, C], BP = batch padded to 8 sublanes.
# ----------------------------------------------------------------------------
def _fused_forward_kernel(
        # inputs --------------------------------------------------------------
        audio_ref,                             # [T*BP, 80]   time-major audio
        spk_ref,                               # [T*BP, E]    speaker emb tiled over time
        mask_ref,                              # [T*2*BP, 1]  step-s: rows 0:BP fwd valid@s,
                                               #              rows BP:2BP bwd valid@(T-1-s)
        aew_ref, aeb_ref,                      # [80,H], [1,H]
        c1w_ref,                               # [K, E+H, H]  conv1 weight (unsplit)
        c1b_ref, c1s_ref, c1t_ref,             # [1,H] conv1 bias / BN scale / BN shift
        crw_ref,                               # [4, K*H, H]  conv2..5 im2col weights
        crb_ref, crs_ref, crt_ref,             # [4,1,H]
        wih_ref,                               # [H, 8L]  = [wih_fwd | wih_bwd]
        whh_ref,                               # [L, 8L]  = [whh_fwd | whh_bwd]
        bih_ref,                               # [1, 8L]  = [b_fwd   | b_bwd  ]
        flw_ref, flb_ref,                      # [2L,NPAD], [1,NPAD]
        # output --------------------------------------------------------------
        o_ref,                                 # [T*BP, NPAD] log-probs (lane-dense)
        # scratch -------------------------------------------------------------
        xp1_ref,                               # [(T+K-1)*BP, E+H] padded conv1 staging
        y_ref,                                 # [(T+K-1)*BP, K*H] im2col staging (blk 2..5)
        gx_ref,                                # [T*2*BP, 4L] LSTM input gates (bwd reversed)
        h_ref,                                 # [T*BP, 2L]  [hf | hb] outputs
        *, BP, T, E, H, L, K):
    f32 = jnp.float32
    TBP = T * BP
    PB = (K // 2) * BP           # 'same' conv padding rows (multiple of 8)
    CIN1 = E + H

    # ---- audio embedding: one MXU matmul over all BP*T frames ---------------
    ae = jnp.dot(audio_ref[...], aew_ref[...],
                 preferred_element_type=f32) + aeb_ref[...]            # [TBP, H]

    # ---- Conv1DBlock 1: padded single staging buffer, K dots of depth E+H ---
    xp1_ref[...] = jnp.zeros(xp1_ref.shape, f32)
    xp1_ref[PB:PB + TBP, 0:E] = spk_ref[...]       # channel order = [spk | audio_emb]
    xp1_ref[PB:PB + TBP, E:CIN1] = ae
    acc = jnp.zeros((TBP, H), f32)
    for k in range(K):
        acc = acc + jnp.dot(xp1_ref[k * BP:k * BP + TBP, :], c1w_ref[k],
                            preferred_element_type=f32)
    x = jnp.maximum(acc + c1b_ref[...], 0.0) * c1s_ref[...] + c1t_ref[...]

    # ---- Conv1DBlocks 2..5: im2col -> ONE dot of depth K*H per block --------
    y_ref[...] = jnp.zeros(y_ref.shape, f32)       # pad rows stay zero across blocks
    for blk in range(4):
        for k in range(K):
            # band k at time-row offset (K-1-k): Y[PB + t, k] == x[t + k - K//2]
            y_ref[(K - 1 - k) * BP:(K - 1 - k) * BP + TBP, k * H:(k + 1) * H] = x
        z = jnp.dot(y_ref[PB:PB + TBP, :], crw_ref[blk],
                    preferred_element_type=f32)
        x = jnp.maximum(z + crb_ref[blk], 0.0) * crs_ref[blk] + crt_ref[blk]

    # ---- BiLSTM: hoisted input projection (single 8L-wide dot) --------------
    gx = jnp.dot(x, wih_ref[...], preferred_element_type=f32) + bih_ref[...]   # [TBP, 8L]
    # Stage per-step gates: rows 0:BP = fwd gates @ time s, rows BP:2BP = bwd @ T-1-s.
    for s in range(T):
        gx_ref[s * 2 * BP:s * 2 * BP + BP, :] = gx[s * BP:(s + 1) * BP, 0:4 * L]
        gx_ref[s * 2 * BP + BP:(s + 1) * 2 * BP, :] = \
            gx[(T - 1 - s) * BP:(T - s) * BP, 4 * L:8 * L]

    whh = whh_ref[...]                                                  # [L, 8L]
    row_is_fwd = jax.lax.broadcasted_iota(jnp.int32, (2 * BP, 4 * L), 0) < BP
    h_st = jnp.zeros((2 * BP, L), f32)   # rows 0:BP fwd state, BP:2BP bwd state
    c_st = jnp.zeros((2 * BP, L), f32)

    # TODO(synk): for production T (hundreds of frames) switch this static
    # unroll to a chunked lax.fori_loop over a gx_ref/pl.ds view to bound vreg
    # live ranges; at T=16 the full unroll is optimal.
    for s in range(T):
        # one recurrent dot for both directions
        res = jnp.dot(h_st, whh, preferred_element_type=f32)            # [2BP, 8L]
        rec = jnp.where(row_is_fwd, res[:, 0:4 * L], res[:, 4 * L:8 * L])
        g = gx_ref[s * 2 * BP:(s + 1) * 2 * BP, :] + rec                # [2BP, 4L]
        i = jax.nn.sigmoid(g[:, 0:L])                 # PyTorch gate order i,f,g,o
        f = jax.nn.sigmoid(g[:, L:2 * L])
        gg = jnp.tanh(g[:, 2 * L:3 * L])
        o = jax.nn.sigmoid(g[:, 3 * L:4 * L])
        c_new = f * c_st + i * gg
        h_new = o * jnp.tanh(c_new)
        # packed-sequence validity mask (hoisted lane broadcast, select-based)
        m = jnp.broadcast_to(mask_ref[s * 2 * BP:(s + 1) * 2 * BP, :] > 0.5,
                             (2 * BP, L))
        h_st = jnp.where(m, h_new, h_st)
        c_st = jnp.where(m, c_new, c_st)
        out = jnp.where(m, h_new, 0.0)               # padded steps -> 0
        h_ref[s * BP:(s + 1) * BP, 0:L] = out[0:BP, :]              # fwd @ time s
        h_ref[(T - 1 - s) * BP:(T - s) * BP, L:2 * L] = out[BP:2 * BP, :]  # bwd @ T-1-s

    # ---- final linear (single dot over [hf|hb]) + log_softmax ---------------
    logits = jnp.dot(h_ref[...], flw_ref[...],
                     preferred_element_type=f32) + flb_ref[...]
    mx = jnp.max(logits, axis=-1, keepdims=True)
    z = logits - mx
    lse = jnp.log(jnp.sum(jnp.exp(z), axis=-1, keepdims=True))
    o_ref[...] = (z - lse).astype(o_ref.dtype)


# ----------------------------------------------------------------------------
# Parameters (deterministic synthetic init, shapes from Model.__init__)
# ----------------------------------------------------------------------------
def init_params(key, conv_hidden, lstm_size, spk_emb, target_size, num_spk=251):
    keys = iter(jax.random.split(key, 64))

    def nrm(shape, scale=0.1):
        return (scale * jax.random.normal(next(keys), shape)).astype(jnp.float32)

    p = {}
    p["spk_table"] = nrm((num_spk, spk_emb), 1.0)            # nn.Embedding(251, E)
    p["ae_w"] = nrm((80, conv_hidden))                       # nn.Linear(80, H)
    p["ae_b"] = nrm((conv_hidden,))

    convs = []
    in_sizes = [conv_hidden + spk_emb] + [conv_hidden] * 4
    for cin in in_sizes:
        xavier = (2.0 / (cin + conv_hidden)) ** 0.5
        convs.append(dict(
            w=nrm((5, cin, conv_hidden), xavier),            # Conv1d weight [K,Cin,Cout]
            b=nrm((conv_hidden,)),
            gamma=1.0 + nrm((conv_hidden,)),                 # BN affine / running stats
            beta=nrm((conv_hidden,)),
            mean=nrm((conv_hidden,)),
            var=1.0 + jnp.abs(nrm((conv_hidden,))),
        ))
    p["convs"] = convs

    for d in ("lstm_fwd", "lstm_bwd"):
        p[d] = dict(
            wih=nrm((conv_hidden, 4 * lstm_size)),
            whh=nrm((lstm_size, 4 * lstm_size)),
            b=nrm((4 * lstm_size,)),                         # b_ih + b_hh combined
        )

    p["fl_w"] = nrm((2 * lstm_size, target_size))            # nn.Linear(2*L, target)
    p["fl_b"] = nrm((target_size,))
    return p


# ----------------------------------------------------------------------------
# Forward pass: gather / layout / BN folding / weight packing in JAX,
# one fused Pallas kernel for all the real compute.
# ----------------------------------------------------------------------------
def model_forward(params, audio_features, speaker_labels, audio_features_len):
    B, T, F = audio_features.shape
    E = params["spk_table"].shape[1]
    H = params["ae_w"].shape[1]
    L = params["lstm_fwd"]["whh"].shape[0]
    target = params["fl_w"].shape[1]
    K = params["convs"][0]["w"].shape[0]
    BP = ((B + 7) // 8) * 8                                  # sublane-aligned batch
    NPAD = max(128, ((target + 127) // 128) * 128)

    # speaker embedding lookup (gather = glue) + sublane-padded time-major layout
    spk = params["spk_table"][jnp.squeeze(speaker_labels, axis=1)]            # [B, E]
    spk = jnp.pad(spk, ((0, BP - B), (0, 0)))                                 # [BP, E]
    spk_tm = jnp.tile(spk, (T, 1))                                            # [T*BP, E]
    audio_p = jnp.pad(audio_features, ((0, BP - B), (0, 0), (0, 0)))          # [BP, T, F]
    audio_tm = jnp.transpose(audio_p, (1, 0, 2)).reshape(T * BP, F)           # [T*BP, F]

    # per-step validity mask, stacked [fwd@s ; bwd@(T-1-s)] along sublanes
    lens = audio_features_len.astype(jnp.int32)
    t_idx = jnp.arange(T, dtype=jnp.int32)
    fwd_valid = jnp.pad(t_idx[:, None] < lens[None, :], ((0, 0), (0, BP - B)))
    bwd_valid = jnp.pad((T - 1 - t_idx)[:, None] < lens[None, :],
                        ((0, 0), (0, BP - B)))
    mask_st = jnp.stack([fwd_valid, bwd_valid], axis=1)                       # [T, 2, BP]
    mask_st = mask_st.reshape(T * 2 * BP, 1).astype(jnp.float32)

    # fold BatchNorm (eval) into scale/shift
    def bn_fold(blk):
        sc = blk["gamma"] * jax.lax.rsqrt(blk["var"] + 1e-5)
        return sc.reshape(1, -1), (blk["beta"] - blk["mean"] * sc).reshape(1, -1)

    c1 = params["convs"][0]
    c1s, c1t = bn_fold(c1)
    # conv blocks 2..5: im2col weights [4, K*H, H]
    crw = jnp.stack([params["convs"][i]["w"].reshape(K * H, H) for i in range(1, 5)])
    crb = jnp.stack([params["convs"][i]["b"] for i in range(1, 5)])[:, None, :]
    crs = jnp.stack([bn_fold(params["convs"][i])[0] for i in range(1, 5)])
    crt = jnp.stack([bn_fold(params["convs"][i])[1] for i in range(1, 5)])

    # LSTM weights packed side-by-side: [fwd | bwd] along the gate axis
    wih_cat = jnp.concatenate([params["lstm_fwd"]["wih"],
                               params["lstm_bwd"]["wih"]], axis=1)            # [H, 8L]
    whh_cat = jnp.concatenate([params["lstm_fwd"]["whh"],
                               params["lstm_bwd"]["whh"]], axis=1)            # [L, 8L]
    b_cat = jnp.concatenate([params["lstm_fwd"]["b"],
                             params["lstm_bwd"]["b"]]).reshape(1, 8 * L)

    # lane-dense (128-wide) final projection; pad bias = -1e30 keeps softmax exact
    flw = jnp.pad(params["fl_w"], ((0, 0), (0, NPAD - target)))
    flb = jnp.concatenate(
        [params["fl_b"], jnp.full((NPAD - target,), -1e30, jnp.float32)]
    ).reshape(1, NPAD)

    kernel = functools.partial(_fused_forward_kernel,
                               BP=BP, T=T, E=E, H=H, L=L, K=K)
    # TODO(synk): for large B/T, add a batch-tile grid axis (parallel) so v7x's
    # two TensorCores are used and per-tile residency fits the VMEM budget.
    out = pl.pallas_call(
        kernel,
        out_shape=jax.ShapeDtypeStruct((T * BP, NPAD), jnp.float32),
        in_specs=[pl.BlockSpec(memory_space=VMEM)] * 18,
        out_specs=pl.BlockSpec(memory_space=VMEM),
        scratch_shapes=[
            pltpu.VMEM(((T + K - 1) * BP, E + H), jnp.float32),   # conv1 padded staging
            pltpu.VMEM(((T + K - 1) * BP, K * H), jnp.float32),   # im2col staging (blk 2..5)
            pltpu.VMEM((T * 2 * BP, 4 * L), jnp.float32),         # LSTM input gates (staged)
            pltpu.VMEM((T * BP, 2 * L), jnp.float32),             # [hf | hb] outputs
        ],
    )(audio_tm, spk_tm, mask_st,
      params["ae_w"], params["ae_b"].reshape(1, H),
      c1["w"], c1["b"].reshape(1, H), c1s, c1t,
      crw, crb, crs, crt,
      wih_cat, whh_cat, b_cat,
      flw, flb)

    # back to [B, T, target]
    return jnp.transpose(out.reshape(T, BP, NPAD), (1, 0, 2))[:B, :, :target]


model_forward = jax.jit(model_forward)


# ----------------------------------------------------------------------------
if __name__ == "__main__":
    B, T = 2, 16
    conv_hidden, lstm_size, spk_emb, target_size = 32, 32, 16, 44

    key = jax.random.PRNGKey(0)
    k_param, k_audio, k_spk = jax.random.split(key, 3)

    params = init_params(k_param, conv_hidden, lstm_size, spk_emb, target_size)

    audio_features = jax.random.normal(k_audio, (B, T, 80), dtype=jnp.float32)
    speaker_labels = jax.random.randint(k_spk, (B, 1), 0, 251, dtype=jnp.int32)
    # pack_padded_sequence expects descending lengths; max length == T so the
    # pad_packed_sequence output shape matches [B, T, 2*lstm_size].
    audio_features_len = jnp.array([16, 12], dtype=jnp.int32)

    out = model_forward(params, audio_features, speaker_labels, audio_features_len)
    out = jax.block_until_ready(out)

    assert out.shape == (B, T, target_size), out.shape
    assert bool(jnp.all(jnp.isfinite(out)))
    # log_softmax rows must exponentiate-sum to 1
    row_sums = jnp.exp(out).sum(axis=-1)
    assert bool(jnp.all(jnp.abs(row_sums - 1.0) < 1e-4))

    print("KERNEL_OK")
</pallas_src>

<mosaic_0001>
module attributes {stable_mosaic.version = 11 : i64} {
  func.func @_fused_forward_kernel(%arg0: memref<128x80xf32, #tpu.memory_space<vmem>>, %arg1: memref<128x16xf32, #tpu.memory_space<vmem>>, %arg2: memref<256x1xf32, #tpu.memory_space<vmem>>, %arg3: memref<80x32xf32, #tpu.memory_space<vmem>>, %arg4: memref<1x32xf32, #tpu.memory_space<vmem>>, %arg5: memref<5x48x32xf32, #tpu.memory_space<vmem>>, %arg6: memref<1x32xf32, #tpu.memory_space<vmem>>, %arg7: memref<1x32xf32, #tpu.memory_space<vmem>>, %arg8: memref<1x32xf32, #tpu.memory_space<vmem>>, %arg9: memref<4x160x32xf32, #tpu.memory_space<vmem>>, %arg10: memref<4x1x32xf32, #tpu.memory_space<vmem>>, %arg11: memref<4x1x32xf32, #tpu.memory_space<vmem>>, %arg12: memref<4x1x32xf32, #tpu.memory_space<vmem>>, %arg13: memref<32x256xf32, #tpu.memory_space<vmem>>, %arg14: memref<32x256xf32, #tpu.memory_space<vmem>>, %arg15: memref<1x256xf32, #tpu.memory_space<vmem>>, %arg16: memref<64x128xf32, #tpu.memory_space<vmem>>, %arg17: memref<1x128xf32, #tpu.memory_space<vmem>>, %arg18: memref<128x128xf32, #tpu.memory_space<vmem>>, %arg19: memref<160x48xf32, #tpu.memory_space<vmem>>, %arg20: memref<160x160xf32, #tpu.memory_space<vmem>>, %arg21: memref<256x128xf32, #tpu.memory_space<vmem>>, %arg22: memref<128x64xf32, #tpu.memory_space<vmem>>) attributes {dimension_semantics = [], scalar_prefetch = 0 : i64, scratch_operands = 4 : i64, tpu.core_type = #tpu.core_type<tc>} {
    %c0 = arith.constant 0 : index
    %c0_0 = arith.constant 0 : index
    %0 = vector.load %arg0[%c0, %c0_0] : memref<128x80xf32, #tpu.memory_space<vmem>>, vector<128x80xf32>
    %c0_1 = arith.constant 0 : index
    %c0_2 = arith.constant 0 : index
    %1 = vector.load %arg3[%c0_1, %c0_2] : memref<80x32xf32, #tpu.memory_space<vmem>>, vector<80x32xf32>
    %cst = arith.constant dense<0.000000e+00> : vector<128x32xf32>
    %2 = tpu.matmul %0, %1, %cst {dimension_numbers = #tpu.dot_dimension_numbers<[1], [0], [0], [1], [0, 0, 1, 1], [], []>} : vector<128x80xf32>, vector<80x32xf32>, vector<128x32xf32> -> vector<128x32xf32>
    %c0_3 = arith.constant 0 : index
    %c0_4 = arith.constant 0 : index
    %3 = vector.load %arg4[%c0_3, %c0_4] : memref<1x32xf32, #tpu.memory_space<vmem>>, vector<1x32xf32>
    %4 = vector.broadcast %3 : vector<1x32xf32> to vector<128x32xf32>
    %5 = arith.addf %2, %4 : vector<128x32xf32>
    %cst_5 = arith.constant 0.000000e+00 : f32
    %6 = vector.broadcast %cst_5 : f32 to vector<160x48xf32>
    %c0_6 = arith.constant 0 : index
    %c0_7 = arith.constant 0 : index
    %7 = vector.load %arg19[%c0_6, %c0_7] : memref<160x48xf32, #tpu.memory_space<vmem>>, vector<160x48xf32>
    tpu.vector_store %arg19[%c0_6, %c0_7], %6 {strides = array<i32>} : memref<160x48xf32, #tpu.memory_space<vmem>>, vector<160x48xf32>,
    %c0_8 = arith.constant 0 : index
    %c0_9 = arith.constant 0 : index
    %8 = vector.load %arg1[%c0_8, %c0_9] : memref<128x16xf32, #tpu.memory_space<vmem>>, vector<128x16xf32>
    %c16 = arith.constant 16 : index
    %c0_10 = arith.constant 0 : index
    %9 = vector.load %arg19[%c16, %c0_10] : memref<160x48xf32, #tpu.memory_space<vmem>>, vector<128x16xf32>
    tpu.vector_store %arg19[%c16, %c0_10], %8 {strides = array<i32>} : memref<160x48xf32, #tpu.memory_space<vmem>>, vector<128x16xf32>,
    %c16_11 = arith.constant 16 : index
    %c16_12 = arith.constant 16 : index
    %10 = vector.load %arg19[%c16_11, %c16_12] : memref<160x48xf32, #tpu.memory_space<vmem>>, vector<128x32xf32>
    tpu.vector_store %arg19[%c16_11, %c16_12], %5 {strides = array<i32>} : memref<160x48xf32, #tpu.memory_space<vmem>>, vector<128x32xf32>,
    %cst_13 = arith.constant 0.000000e+00 : f32
    %11 = vector.broadcast %cst_13 : f32 to vector<128x32xf32>
    %c0_14 = arith.constant 0 : index
    %c0_15 = arith.constant 0 : index
    %12 = vector.load %arg19[%c0_14, %c0_15] : memref<160x48xf32, #tpu.memory_space<vmem>>, vector<128x48xf32>
    %c0_16 = arith.constant 0 : index
    %c0_17 = arith.constant 0 : index
    %c0_18 = arith.constant 0 : index
    %13 = vector.load %arg5[%c0_16, %c0_17, %c0_18] : memref<5x48x32xf32, #tpu.memory_space<vmem>>, vector<1x48x32xf32>
    %14 = vector.shape_cast %13 : vector<1x48x32xf32> to vector<48x32xf32>
    %cst_19 = arith.constant dense<0.000000e+00> : vector<128x32xf32>
    %15 = tpu.matmul %12, %14, %cst_19 {dimension_numbers = #tpu.dot_dimension_numbers<[1], [0], [0], [1], [0, 0, 1, 1], [], []>} : vector<128x48xf32>, vector<48x32xf32>, vector<128x32xf32> -> vector<128x32xf32>
    %16 = arith.addf %11, %15 : vector<128x32xf32>
    %c8 = arith.constant 8 : index
    %c0_20 = arith.constant 0 : index
    %17 = vector.load %arg19[%c8, %c0_20] : memref<160x48xf32, #tpu.memory_space<vmem>>, vector<128x48xf32>
    %c1 = arith.constant 1 : index
    %c0_21 = arith.constant 0 : index
    %c0_22 = arith.constant 0 : index
    %18 = vector.load %arg5[%c1, %c0_21, %c0_22] : memref<5x48x32xf32, #tpu.memory_space<vmem>>, vector<1x48x32xf32>
    %19 = vector.shape_cast %18 : vector<1x48x32xf32> to vector<48x32xf32>
    %cst_23 = arith.constant dense<0.000000e+00> : vector<128x32xf32>
    %20 = tpu.matmul %17, %19, %cst_23 {dimension_numbers = #tpu.dot_dimension_numbers<[1], [0], [0], [1], [0, 0, 1, 1], [], []>} : vector<128x48xf32>, vector<48x32xf32>, vector<128x32xf32> -> vector<128x32xf32>
    %21 = arith.addf %16, %20 : vector<128x32xf32>
    %c16_24 = arith.constant 16 : index
    %c0_25 = arith.constant 0 : index
    %22 = vector.load %arg19[%c16_24, %c0_25] : memref<160x48xf32, #tpu.memory_space<vmem>>, vector<128x48xf32>
    %c2 = arith.constant 2 : index
    %c0_26 = arith.constant 0 : index
    %c0_27 = arith.constant 0 : index
    %23 = vector.load %arg5[%c2, %c0_26, %c0_27] : memref<5x48x32xf32, #tpu.memory_space<vmem>>, vector<1x48x32xf32>
    %24 = vector.shape_cast %23 : vector<1x48x32xf32> to vector<48x32xf32>
    %cst_28 = arith.constant dense<0.000000e+00> : vector<128x32xf32>
    %25 = tpu.matmul %22, %24, %cst_28 {dimension_numbers = #tpu.dot_dimension_numbers<[1], [0], [0], [1], [0, 0, 1, 1], [], []>} : vector<128x48xf32>, vector<48x32xf32>, vector<128x32xf32> -> vector<128x32xf32>
    %26 = arith.addf %21, %25 : vector<128x32xf32>
    %c24 = arith.constant 24 : index
    %c0_29 = arith.constant 0 : index
    %27 = vector.load %arg19[%c24, %c0_29] : memref<160x48xf32, #tpu.memory_space<vmem>>, vector<128x48xf32>
    %c3 = arith.constant 3 : index
    %c0_30 = arith.constant 0 : index
    %c0_31 = arith.constant 0 : index
    %28 = vector.load %arg5[%c3, %c0_30, %c0_31] : memref<5x48x32xf32, #tpu.memory_space<vmem>>, vector<1x48x32xf32>
    %29 = vector.shape_cast %28 : vector<1x48x32xf32> to vector<48x32xf32>
    %cst_32 = arith.constant dense<0.000000e+00> : vector<128x32xf32>
    %30 = tpu.matmul %27, %29, %cst_32 {dimension_numbers = #tpu.dot_dimension_numbers<[1], [0], [0], [1], [0, 0, 1, 1], [], []>} : vector<128x48xf32>, vector<48x32xf32>, vector<128x32xf32> -> vector<128x32xf32>
    %31 = arith.addf %26, %30 : vector<128x32xf32>
    %c32 = arith.constant 32 : index
    %c0_33 = arith.constant 0 : index
    %32 = vector.load %arg19[%c32, %c0_33] : memref<160x48xf32, #tpu.memory_space<vmem>>, vector<128x48xf32>
    %c4 = arith.constant 4 : index
    %c0_34 = arith.constant 0 : index
    %c0_35 = arith.constant 0 : index
    %33 = vector.load %arg5[%c4, %c0_34, %c0_35] : memref<5x48x32xf32, #tpu.memory_space<vmem>>, vector<1x48x32xf32>
    %34 = vector.shape_cast %33 : vector<1x48x32xf32> to vector<48x32xf32>
    %cst_36 = arith.constant dense<0.000000e+00> : vector<128x32xf32>
    %35 = tpu.matmul %32, %34, %cst_36 {dimension_numbers = #tpu.dot_dimension_numbers<[1], [0], [0], [1], [0, 0, 1, 1], [], []>} : vector<128x48xf32>, vector<48x32xf32>, vector<128x32xf32> -> vector<128x32xf32>
    %36 = arith.addf %31, %35 : vector<128x32xf32>
    %c0_37 = arith.constant 0 : index
    %c0_38 = arith.constant 0 : index
    %37 = vector.load %arg6[%c0_37, %c0_38] : memref<1x32xf32, #tpu.memory_space<vmem>>, vector<1x32xf32>
    %38 = vector.broadcast %37 : vector<1x32xf32> to vector<128x32xf32>
    %39 = arith.addf %36, %38 : vector<128x32xf32>
    %cst_39 = arith.constant 0.000000e+00 : f32
    %40 = vector.broadcast %cst_39 : f32 to vector<128x32xf32>
    %41 = arith.maximumf %39, %40 : vector<128x32xf32>
    %c0_40 = arith.constant 0 : index
    %c0_41 = arith.constant 0 : index
    %42 = vector.load %arg7[%c0_40, %c0_41] : memref<1x32xf32, #tpu.memory_space<vmem>>, vector<1x32xf32>
    %43 = vector.broadcast %42 : vector<1x32xf32> to vector<128x32xf32>
    %44 = arith.mulf %41, %43 : vector<128x32xf32>
    %c0_42 = arith.constant 0 : index
    %c0_43 = arith.constant 0 : index
    %45 = vector.load %arg8[%c0_42, %c0_43] : memref<1x32xf32, #tpu.memory_space<vmem>>, vector<1x32xf32>
    %46 = vector.broadcast %45 : vector<1x32xf32> to vector<128x32xf32>
    %47 = arith.addf %44, %46 : vector<128x32xf32>
    %cst_44 = arith.constant 0.000000e+00 : f32
    %48 = vector.broadcast %cst_44 : f32 to vector<160x160xf32>
    %c0_45 = arith.constant 0 : index
    %c0_46 = arith.constant 0 : index
    %49 = vector.load %arg20[%c0_45, %c0_46] : memref<160x160xf32, #tpu.memory_space<vmem>>, vector<160x160xf32>
    tpu.vector_store %arg20[%c0_45, %c0_46], %48 {strides = array<i32>} : memref<160x160xf32, #tpu.memory_space<vmem>>, vector<160x160xf32>,
    %c32_47 = arith.constant 32 : index
    %c0_48 = arith.constant 0 : index
    %50 = vector.load %arg20[%c32_47, %c0_48] : memref<160x160xf32, #tpu.memory_space<vmem>>, vector<128x32xf32>
    tpu.vector_store %arg20[%c32_47, %c0_48], %47 {strides = array<i32>} : memref<160x160xf32, #tpu.memory_space<vmem>>, vector<128x32xf32>,
    %c24_49 = arith.constant 24 : index
    %c32_50 = arith.constant 32 : index
    %51 = vector.load %arg20[%c24_49, %c32_50] : memref<160x160xf32, #tpu.memory_space<vmem>>, vector<128x32xf32>
    tpu.vector_store %arg20[%c24_49, %c32_50], %47 {strides = array<i32>} : memref<160x160xf32, #tpu.memory_space<vmem>>, vector<128x32xf32>,
    %c16_51 = arith.constant 16 : index
    %c64 = arith.constant 64 : index
    %52 = vector.load %arg20[%c16_51, %c64] : memref<160x160xf32, #tpu.memory_space<vmem>>, vector<128x32xf32>
    tpu.vector_store %arg20[%c16_51, %c64], %47 {strides = array<i32>} : memref<160x160xf32, #tpu.memory_space<vmem>>, vector<128x32xf32>,
    %c8_52 = arith.constant 8 : index
    %c96 = arith.constant 96 : index
    %53 = vector.load %arg20[%c8_52, %c96] : memref<160x160xf32, #tpu.memory_space<vmem>>, vector<128x32xf32>
    tpu.vector_store %arg20[%c8_52, %c96], %47 {strides = array<i32>} : memref<160x160xf32, #tpu.memory_space<vmem>>, vector<128x32xf32>,
    %c0_53 = arith.constant 0 : index
    %c128 = arith.constant 128 : index
    %54 = vector.load %arg20[%c0_53, %c128] : memref<160x160xf32, #tpu.memory_space<vmem>>, vector<128x32xf32>
    tpu.vector_store %arg20[%c0_53, %c128], %47 {strides = array<i32>} : memref<160x160xf32, #tpu.memory_space<vmem>>, vector<128x32xf32>,
    %c16_54 = arith.constant 16 : index
    %c0_55 = arith.constant 0 : index
    %55 = vector.load %arg20[%c16_54, %c0_55] : memref<160x160xf32, #tpu.memory_space<vmem>>, vector<128x160xf32>
    %c0_56 = arith.constant 0 : index
    %c0_57 = arith.constant 0 : index
    %c0_58 = arith.constant 0 : index
    %56 = vector.load %arg9[%c0_56, %c0_57, %c0_58] : memref<4x160x32xf32, #tpu.memory_space<vmem>>, vector<1x160x32xf32>
    %57 = vector.shape_cast %56 : vector<1x160x32xf32> to vector<160x32xf32>
    %cst_59 = arith.constant dense<0.000000e+00> : vector<128x32xf32>
    %58 = tpu.matmul %55, %57, %cst_59 {dimension_numbers = #tpu.dot_dimension_numbers<[1], [0], [0], [1], [0, 0, 1, 1], [], []>} : vector<128x160xf32>, vector<160x32xf32>, vector<128x32xf32> -> vector<128x32xf32>
    %c0_60 = arith.constant 0 : index
    %c0_61 = arith.constant 0 : index
    %c0_62 = arith.constant 0 : index
    %59 = vector.load %arg10[%c0_60, %c0_61, %c0_62] : memref<4x1x32xf32, #tpu.memory_space<vmem>>, vector<1x1x32xf32>
    %60 = vector.shape_cast %59 : vector<1x1x32xf32> to vector<1x32xf32>
    %61 = vector.broadcast %60 : vector<1x32xf32> to vector<128x32xf32>
    %62 = arith.addf %58, %61 : vector<128x32xf32>
    %cst_63 = arith.constant 0.000000e+00 : f32
    %63 = vector.broadcast %cst_63 : f32 to vector<128x32xf32>
    %64 = arith.maximumf %62, %63 : vector<128x32xf32>
    %c0_64 = arith.constant 0 : index
    %c0_65 = arith.constant 0 : index
    %c0_66 = arith.constant 0 : index
    %65 = vector.load %arg11[%c0_64, %c0_65, %c0_66] : memref<4x1x32xf32, #tpu.memory_space<vmem>>, vector<1x1x32xf32>
    %66 = vector.shape_cast %65 : vector<1x1x32xf32> to vector<1x32xf32>
    %67 = vector.broadcast %66 : vector<1x32xf32> to vector<128x32xf32>
    %68 = arith.mulf %64, %67 : vector<128x32xf32>
    %c0_67 = arith.constant 0 : index
    %c0_68 = arith.constant 0 : index
    %c0_69 = arith.constant 0 : index
    %69 = vector.load %arg12[%c0_67, %c0_68, %c0_69] : memref<4x1x32xf32, #tpu.memory_space<vmem>>, vector<1x1x32xf32>
    %70 = vector.shape_cast %69 : vector<1x1x32xf32> to vector<1x32xf32>
    %71 = vector.broadcast %70 : vector<1x32xf32> to vector<128x32xf32>
    %72 = arith.addf %68, %71 : vector<128x32xf32>
    %c32_70 = arith.constant 32 : index
    %c0_71 = arith.constant 0 : index
    %73 = vector.load %arg20[%c32_70, %c0_71] : memref<160x160xf32, #tpu.memory_space<vmem>>, vector<128x32xf32>
    tpu.vector_store %arg20[%c32_70, %c0_71], %72 {strides = array<i32>} : memref<160x160xf32, #tpu.memory_space<vmem>>, vector<128x32xf32>,
    %c24_72 = arith.constant 24 : index
    %c32_73 = arith.constant 32 : index
    %74 = vector.load %arg20[%c24_72, %c32_73] : memref<160x160xf32, #tpu.memory_space<vmem>>, vector<128x32xf32>
    tpu.vector_store %arg20[%c24_72, %c32_73], %72 {strides = array<i32>} : memref<160x160xf32, #tpu.memory_space<vmem>>, vector<128x32xf32>,
    %c16_74 = arith.constant 16 : index
    %c64_75 = arith.constant 64 : index
    %75 = vector.load %arg20[%c16_74, %c64_75] : memref<160x160xf32, #tpu.memory_space<vmem>>, vector<128x32xf32>
    tpu.vector_store %arg20[%c16_74, %c64_75], %72 {strides = array<i32>} : memref<160x160xf32, #tpu.memory_space<vmem>>, vector<128x32xf32>,
    %c8_76 = arith.constant 8 : index
    %c96_77 = arith.constant 96 : index
    %76 = vector.load %arg20[%c8_76, %c96_77] : memref<160x160xf32, #tpu.memory_space<vmem>>, vector<128x32xf32>
    tpu.vector_store %arg20[%c8_76, %c96_77], %72 {strides = array<i32>} : memref<160x160xf32, #tpu.memory_space<vmem>>, vector<128x32xf32>,
    %c0_78 = arith.constant 0 : index
    %c128_79 = arith.constant 128 : index
    %77 = vector.load %arg20[%c0_78, %c128_79] : memref<160x160xf32, #tpu.memory_space<vmem>>, vector<128x32xf32>
    tpu.vector_store %arg20[%c0_78, %c128_79], %72 {strides = array<i32>} : memref<160x160xf32, #tpu.memory_space<vmem>>, vector<128x32xf32>,
    %c16_80 = arith.constant 16 : index
    %c0_81 = arith.constant 0 : index
    %78 = vector.load %arg20[%c16_80, %c0_81] : memref<160x160xf32, #tpu.memory_space<vmem>>, vector<128x160xf32>
    %c1_82 = arith.constant 1 : index
    %c0_83 = arith.constant 0 : index
    %c0_84 = arith.constant 0 : index
    %79 = vector.load %arg9[%c1_82, %c0_83, %c0_84] : memref<4x160x32xf32, #tpu.memory_space<vmem>>, vector<1x160x32xf32>
    %80 = vector.shape_cast %79 : vector<1x160x32xf32> to vector<160x32xf32>
    %cst_85 = arith.constant dense<0.000000e+00> : vector<128x32xf32>
    %81 = tpu.matmul %78, %80, %cst_85 {dimension_numbers = #tpu.dot_dimension_numbers<[1], [0], [0], [1], [0, 0, 1, 1], [], []>} : vector<128x160xf32>, vector<160x32xf32>, vector<128x32xf32> -> vector<128x32xf32>
    %c1_86 = arith.constant 1 : index
    %c0_87 = arith.constant 0 : index
    %c0_88 = arith.constant 0 : index
    %82 = vector.load %arg10[%c1_86, %c0_87, %c0_88] : memref<4x1x32xf32, #tpu.memory_space<vmem>>, vector<1x1x32xf32>
    %83 = vector.shape_cast %82 : vector<1x1x32xf32> to vector<1x32xf32>
    %84 = vector.broadcast %83 : vector<1x32xf32> to vector<128x32xf32>
    %85 = arith.addf %81, %84 : vector<128x32xf32>
    %cst_89 = arith.constant 0.000000e+00 : f32
    %86 = vector.broadcast %cst_89 : f32 to vector<128x32xf32>
    %87 = arith.maximumf %85, %86 : vector<128x32xf32>
    %c1_90 = arith.constant 1 : index
    %c0_91 = arith.constant 0 : index
    %c0_92 = arith.constant 0 : index
    %88 = vector.load %arg11[%c1_90, %c0_91, %c0_92] : memref<4x1x32xf32, #tpu.memory_space<vmem>>, vector<1x1x32xf32>
    %89 = vector.shape_cast %88 : vector<1x1x32xf32> to vector<1x32xf32>
    %90 = vector.broadcast %89 : vector<1x32xf32> to vector<128x32xf32>
    %91 = arith.mulf %87, %90 : vector<128x32xf32>
    %c1_93 = arith.constant 1 : index
    %c0_94 = arith.constant 0 : index
    %c0_95 = arith.constant 0 : index
    %92 = vector.load %arg12[%c1_93, %c0_94, %c0_95] : memref<4x1x32xf32, #tpu.memory_space<vmem>>, vector<1x1x32xf32>
    %93 = vector.shape_cast %92 : vector<1x1x32xf32> to vector<1x32xf32>
    %94 = vector.broadcast %93 : vector<1x32xf32> to vector<128x32xf32>
    %95 = arith.addf %91, %94 : vector<128x32xf32>
    %c32_96 = arith.constant 32 : index
    %c0_97 = arith.constant 0 : index
    %96 = vector.load %arg20[%c32_96, %c0_97] : memref<160x160xf32, #tpu.memory_space<vmem>>, vector<128x32xf32>
    tpu.vector_store %arg20[%c32_96, %c0_97], %95 {strides = array<i32>} : memref<160x160xf32, #tpu.memory_space<vmem>>, vector<128x32xf32>,
    %c24_98 = arith.constant 24 : index
    %c32_99 = arith.constant 32 : index
    %97 = vector.load %arg20[%c24_98, %c32_99] : memref<160x160xf32, #tpu.memory_space<vmem>>, vector<128x32xf32>
    tpu.vector_store %arg20[%c24_98, %c32_99], %95 {strides = array<i32>} : memref<160x160xf32, #tpu.memory_space<vmem>>, vector<128x32xf32>,
    %c16_100 = arith.constant 16 : index
    %c64_101 = arith.constant 64 : index
    %98 = vector.load %arg20[%c16_100, %c64_101] : memref<160x160xf32, #tpu.memory_space<vmem>>, vector<128x32xf32>
    tpu.vector_store %arg20[%c16_100, %c64_101], %95 {strides = array<i32>} : memref<160x160xf32, #tpu.memory_space<vmem>>, vector<128x32xf32>,
    %c8_102 = arith.constant 8 : index
    %c96_103 = arith.constant 96 : index
    %99 = vector.load %arg20[%c8_102, %c96_103] : memref<160x160xf32, #tpu.memory_space<vmem>>, vector<128x32xf32>
    tpu.vector_store %arg20[%c8_102, %c96_103], %95 {strides = array<i32>} : memref<160x160xf32, #tpu.memory_space<vmem>>, vector<128x32xf32>,
    %c0_104 = arith.constant 0 : index
    %c128_105 = arith.constant 128 : index
    %100 = vector.load %arg20[%c0_104, %c128_105] : memref<160x160xf32, #tpu.memory_space<vmem>>, vector<128x32xf32>
    tpu.vector_store %arg20[%c0_104, %c128_105], %95 {strides = array<i32>} : memref<160x160xf32, #tpu.memory_space<vmem>>, vector<128x32xf32>,
    %c16_106 = arith.constant 16 : index
    %c0_107 = arith.constant 0 : index
    %101 = vector.load %arg20[%c16_106, %c0_107] : memref<160x160xf32, #tpu.memory_space<vmem>>, vector<128x160xf32>
    %c2_108 = arith.constant 2 : index
    %c0_109 = arith.constant 0 : index
    %c0_110 = arith.constant 0 : index
    %102 = vector.load %arg9[%c2_108, %c0_109, %c0_110] : memref<4x160x32xf32, #tpu.memory_space<vmem>>, vector<1x160x32xf32>
    %103 = vector.shape_cast %102 : vector<1x160x32xf32> to vector<160x32xf32>
    %cst_111 = arith.constant dense<0.000000e+00> : vector<128x32xf32>
    %104 = tpu.matmul %101, %103, %cst_111 {dimension_numbers = #tpu.dot_dimension_numbers<[1], [0], [0], [1], [0, 0, 1, 1], [], []>} : vector<128x160xf32>, vector<160x32xf32>, vector<128x32xf32> -> vector<128x32xf32>
    %c2_112 = arith.constant 2 : index
    %c0_113 = arith.constant 0 : index
    %c0_114 = arith.constant 0 : index
    %105 = vector.load %arg10[%c2_112, %c0_113, %c0_114] : memref<4x1x32xf32, #tpu.memory_space<vmem>>, vector<1x1x32xf32>
    %106 = vector.shape_cast %105 : vector<1x1x32xf32> to vector<1x32xf32>
    %107 = vector.broadcast %106 : vector<1x32xf32> to vector<128x32xf32>
    %108 = arith.addf %104, %107 : vector<128x32xf32>
    %cst_115 = arith.constant 0.000000e+00 : f32
    %109 = vector.broadcast %cst_115 : f32 to vector<128x32xf32>
    %110 = arith.maximumf %108, %109 : vector<128x32xf32>
    %c2_116 = arith.constant 2 : index
    %c0_117 = arith.constant 0 : index
    %c0_118 = arith.constant 0 : index
    %111 = vector.load %arg11[%c2_116, %c0_117, %c0_118] : memref<4x1x32xf32, #tpu.memory_space<vmem>>, vector<1x1x32xf32>
    %112 = vector.shape_cast %111 : vector<1x1x32xf32> to vector<1x32xf32>
    %113 = vector.broadcast %112 : vector<1x32xf32> to vector<128x32xf32>
    %114 = arith.mulf %110, %113 : vector<128x32xf32>
    %c2_119 = arith.constant 2 : index
    %c0_120 = arith.constant 0 : index
    %c0_121 = arith.constant 0 : index
    %115 = vector.load %arg12[%c2_119, %c0_120, %c0_121] : memref<4x1x32xf32, #tpu.memory_space<vmem>>, vector<1x1x32xf32>
    %116 = vector.shape_cast %115 : vector<1x1x32xf32> to vector<1x32xf32>
    %117 = vector.broadcast %116 : vector<1x32xf32> to vector<128x32xf32>
    %118 = arith.addf %114, %117 : vector<128x32xf32>
    %c32_122 = arith.constant 32 : index
    %c0_123 = arith.constant 0 : index
    %119 = vector.load %arg20[%c32_122, %c0_123] : memref<160x160xf32, #tpu.memory_space<vmem>>, vector<128x32xf32>
    tpu.vector_store %arg20[%c32_122, %c0_123], %118 {strides = array<i32>} : memref<160x160xf32, #tpu.memory_space<vmem>>, vector<128x32xf32>,
    %c24_124 = arith.constant 24 : index
    %c32_125 = arith.constant 32 : index
    %120 = vector.load %arg20[%c24_124, %c32_125] : memref<160x160xf32, #tpu.memory_space<vmem>>, vector<128x32xf32>
    tpu.vector_store %arg20[%c24_124, %c32_125], %118 {strides = array<i32>} : memref<160x160xf32, #tpu.memory_space<vmem>>, vector<128x32xf32>,
    %c16_126 = arith.constant 16 : index
    %c64_127 = arith.constant 64 : index
    %121 = vector.load %arg20[%c16_126, %c64_127] : memref<160x160xf32, #tpu.memory_space<vmem>>, vector<128x32xf32>
    tpu.vector_store %arg20[%c16_126, %c64_127], %118 {strides = array<i32>} : memref<160x160xf32, #tpu.memory_space<vmem>>, vector<128x32xf32>,
    %c8_128 = arith.constant 8 : index
    %c96_129 = arith.constant 96 : index
    %122 = vector.load %arg20[%c8_128, %c96_129] : memref<160x160xf32, #tpu.memory_space<vmem>>, vector<128x32xf32>
    tpu.vector_store %arg20[%c8_128, %c96_129], %118 {strides = array<i32>} : memref<160x160xf32, #tpu.memory_space<vmem>>, vector<128x32xf32>,
    %c0_130 = arith.constant 0 : index
    %c128_131 = arith.constant 128 : index
    %123 = vector.load %arg20[%c0_130, %c128_131] : memref<160x160xf32, #tpu.memory_space<vmem>>, vector<128x32xf32>
    tpu.vector_store %arg20[%c0_130, %c128_131], %118 {strides = array<i32>} : memref<160x160xf32, #tpu.memory_space<vmem>>, vector<128x32xf32>,
    %c16_132 = arith.constant 16 : index
    %c0_133 = arith.constant 0 : index
    %124 = vector.load %arg20[%c16_132, %c0_133] : memref<160x160xf32, #tpu.memory_space<vmem>>, vector<128x160xf32>
    %c3_134 = arith.constant 3 : index
    %c0_135 = arith.constant 0 : index
    %c0_136 = arith.constant 0 : index
    %125 = vector.load %arg9[%c3_134, %c0_135, %c0_136] : memref<4x160x32xf32, #tpu.memory_space<vmem>>, vector<1x160x32xf32>
    %126 = vector.shape_cast %125 : vector<1x160x32xf32> to vector<160x32xf32>
    %cst_137 = arith.constant dense<0.000000e+00> : vector<128x32xf32>
    %127 = tpu.matmul %124, %126, %cst_137 {dimension_numbers = #tpu.dot_dimension_numbers<[1], [0], [0], [1], [0, 0, 1, 1], [], []>} : vector<128x160xf32>, vector<160x32xf32>, vector<128x32xf32> -> vector<128x32xf32>
    %c3_138 = arith.constant 3 : index
    %c0_139 = arith.constant 0 : index
    %c0_140 = arith.constant 0 : index
    %128 = vector.load %arg10[%c3_138, %c0_139, %c0_140] : memref<4x1x32xf32, #tpu.memory_space<vmem>>, vector<1x1x32xf32>
    %129 = vector.shape_cast %128 : vector<1x1x32xf32> to vector<1x32xf32>
    %130 = vector.broadcast %129 : vector<1x32xf32> to vector<128x32xf32>
    %131 = arith.addf %127, %130 : vector<128x32xf32>
    %cst_141 = arith.constant 0.000000e+00 : f32
    %132 = vector.broadcast %cst_141 : f32 to vector<128x32xf32>
    %133 = arith.maximumf %131, %132 : vector<128x32xf32>
    %c3_142 = arith.constant 3 : index
    %c0_143 = arith.constant 0 : index
    %c0_144 = arith.constant 0 : index
    %134 = vector.load %arg11[%c3_142, %c0_143, %c0_144] : memref<4x1x32xf32, #tpu.memory_space<vmem>>, vector<1x1x32xf32>
    %135 = vector.shape_cast %134 : vector<1x1x32xf32> to vector<1x32xf32>
    %136 = vector.broadcast %135 : vector<1x32xf32> to vector<128x32xf32>
    %137 = arith.mulf %133, %136 : vector<128x32xf32>
    %c3_145 = arith.constant 3 : index
    %c0_146 = arith.constant 0 : index
    %c0_147 = arith.constant 0 : index
    %138 = vector.load %arg12[%c3_145, %c0_146, %c0_147] : memref<4x1x32xf32, #tpu.memory_space<vmem>>, vector<1x1x32xf32>
    %139 = vector.shape_cast %138 : vector<1x1x32xf32> to vector<1x32xf32>
    %140 = vector.broadcast %139 : vector<1x32xf32> to vector<128x32xf32>
    %141 = arith.addf %137, %140 : vector<128x32xf32>
    %c0_148 = arith.constant 0 : index
    %c0_149 = arith.constant 0 : index
    %142 = vector.load %arg13[%c0_148, %c0_149] : memref<32x256xf32, #tpu.memory_space<vmem>>, vector<32x256xf32>
    %cst_150 = arith.constant dense<0.000000e+00> : vector<128x256xf32>
    %143 = tpu.matmul %141, %142, %cst_150 {dimension_numbers = #tpu.dot_dimension_numbers<[1], [0], [0], [1], [0, 0, 1, 1], [], []>} : vector<128x32xf32>, vector<32x256xf32>, vector<128x256xf32> -> vector<128x256xf32>
    %c0_151 = arith.constant 0 : index
    %c0_152 = arith.constant 0 : index
    %144 = vector.load %arg15[%c0_151, %c0_152] : memref<1x256xf32, #tpu.memory_space<vmem>>, vector<1x256xf32>
    %145 = vector.broadcast %144 : vector<1x256xf32> to vector<128x256xf32>
    %146 = arith.addf %143, %145 : vector<128x256xf32>
    %147 = vector.extract_strided_slice %146 {offsets = [0, 0], sizes = [8, 128], strides = [1, 1]} : vector<128x256xf32> to vector<8x128xf32>
    %c0_153 = arith.constant 0 : index
    %c0_154 = arith.constant 0 : index
    %148 = vector.load %arg21[%c0_153, %c0_154] : memref<256x128xf32, #tpu.memory_space<vmem>>, vector<8x128xf32>
    tpu.vector_store %arg21[%c0_153, %c0_154], %147 {strides = array<i32>} : memref<256x128xf32, #tpu.memory_space<vmem>>, vector<8x128xf32>,
    %149 = vector.extract_strided_slice %146 {offsets = [120, 128], sizes = [8, 128], strides = [1, 1]} : vector<128x256xf32> to vector<8x128xf32>
    %c8_155 = arith.constant 8 : index
    %c0_156 = arith.constant 0 : index
    %150 = vector.load %arg21[%c8_155, %c0_156] : memref<256x128xf32, #tpu.memory_space<vmem>>, vector<8x128xf32>
    tpu.vector_store %arg21[%c8_155, %c0_156], %149 {strides = array<i32>} : memref<256x128xf32, #tpu.memory_space<vmem>>, vector<8x128xf32>,
    %151 = vector.extract_strided_slice %146 {offsets = [8, 0], sizes = [8, 128], strides = [1, 1]} : vector<128x256xf32> to vector<8x128xf32>
    %c16_157 = arith.constant 16 : index
    %c0_158 = arith.constant 0 : index
    %152 = vector.load %arg21[%c16_157, %c0_158] : memref<256x128xf32, #tpu.memory_space<vmem>>, vector<8x128xf32>
    tpu.vector_store %arg21[%c16_157, %c0_158], %151 {strides = array<i32>} : memref<256x128xf32, #tpu.memory_space<vmem>>, vector<8x128xf32>,
    %153 = vector.extract_strided_slice %146 {offsets = [112, 128], sizes = [8, 128], strides = [1, 1]} : vector<128x256xf32> to vector<8x128xf32>
    %c24_159 = arith.constant 24 : index
    %c0_160 = arith.constant 0 : index
    %154 = vector.load %arg21[%c24_159, %c0_160] : memref<256x128xf32, #tpu.memory_space<vmem>>, vector<8x128xf32>
    tpu.vector_store %arg21[%c24_159, %c0_160], %153 {strides = array<i32>} : memref<256x128xf32, #tpu.memory_space<vmem>>, vector<8x128xf32>,
    %155 = vector.extract_strided_slice %146 {offsets = [16, 0], sizes = [8, 128], strides = [1, 1]} : vector<128x256xf32> to vector<8x128xf32>
    %c32_161 = arith.constant 32 : index
    %c0_162 = arith.constant 0 : index
    %156 = vector.load %arg21[%c32_161, %c0_162] : memref<256x128xf32, #tpu.memory_space<vmem>>, vector<8x128xf32>
    tpu.vector_store %arg21[%c32_161, %c0_162], %155 {strides = array<i32>} : memref<256x128xf32, #tpu.memory_space<vmem>>, vector<8x128xf32>,
    %157 = vector.extract_strided_slice %146 {offsets = [104, 128], sizes = [8, 128], strides = [1, 1]} : vector<128x256xf32> to vector<8x128xf32>
    %c40 = arith.constant 40 : index
    %c0_163 = arith.constant 0 : index
    %158 = vector.load %arg21[%c40, %c0_163] : memref<256x128xf32, #tpu.memory_space<vmem>>, vector<8x128xf32>
    tpu.vector_store %arg21[%c40, %c0_163], %157 {strides = array<i32>} : memref<256x128xf32, #tpu.memory_space<vmem>>, vector<8x128xf32>,
    %159 = vector.extract_strided_slice %146 {offsets = [24, 0], sizes = [8, 128], strides = [1, 1]} : vector<128x256xf32> to vector<8x128xf32>
    %c48 = arith.constant 48 : index
    %c0_164 = arith.constant 0 : index
    %160 = vector.load %arg21[%c48, %c0_164] : memref<256x128xf32, #tpu.memory_space<vmem>>, vector<8x128xf32>
    tpu.vector_store %arg21[%c48, %c0_164], %159 {strides = array<i32>} : memref<256x128xf32, #tpu.memory_space<vmem>>, vector<8x128xf32>,
    %161 = vector.extract_strided_slice %146 {offsets = [96, 128], sizes = [8, 128], strides = [1, 1]} : vector<128x256xf32> to vector<8x128xf32>
    %c56 = arith.constant 56 : index
    %c0_165 = arith.constant 0 : index
    %162 = vector.load %arg21[%c56, %c0_165] : memref<256x128xf32, #tpu.memory_space<vmem>>, vector<8x128xf32>
    tpu.vector_store %arg21[%c56, %c0_165], %161 {strides = array<i32>} : memref<256x128xf32, #tpu.memory_space<vmem>>, vector<8x128xf32>,
    %163 = vector.extract_strided_slice %146 {offsets = [32, 0], sizes = [8, 128], strides = [1, 1]} : vector<128x256xf32> to vector<8x128xf32>
    %c64_166 = arith.constant 64 : index
    %c0_167 = arith.constant 0 : index
    %164 = vector.load %arg21[%c64_166, %c0_167] : memref<256x128xf32, #tpu.memory_space<vmem>>, vector<8x128xf32>
    tpu.vector_store %arg21[%c64_166, %c0_167], %163 {strides = array<i32>} : memref<256x128xf32, #tpu.memory_space<vmem>>, vector<8x128xf32>,
    %165 = vector.extract_strided_slice %146 {offsets = [88, 128], sizes = [8, 128], strides = [1, 1]} : vector<128x256xf32> to vector<8x128xf32>
    %c72 = arith.constant 72 : index
    %c0_168 = arith.constant 0 : index
    %166 = vector.load %arg21[%c72, %c0_168] : memref<256x128xf32, #tpu.memory_space<vmem>>, vector<8x128xf32>
    tpu.vector_store %arg21[%c72, %c0_168], %165 {strides = array<i32>} : memref<256x128xf32, #tpu.memory_space<vmem>>, vector<8x128xf32>,
    %167 = vector.extract_strided_slice %146 {offsets = [40, 0], sizes = [8, 128], strides = [1, 1]} : vector<128x256xf32> to vector<8x128xf32>
    %c80 = arith.constant 80 : index
    %c0_169 = arith.constant 0 : index
    %168 = vector.load %arg21[%c80, %c0_169] : memref<256x128xf32, #tpu.memory_space<vmem>>, vector<8x128xf32>
    tpu.vector_store %arg21[%c80, %c0_169], %167 {strides = array<i32>} : memref<256x128xf32, #tpu.memory_space<vmem>>, vector<8x128xf32>,
    %169 = vector.extract_strided_slice %146 {offsets = [80, 128], sizes = [8, 128], strides = [1, 1]} : vector<128x256xf32> to vector<8x128xf32>
    %c88 = arith.constant 88 : index
    %c0_170 = arith.constant 0 : index
    %170 = vector.load %arg21[%c88, %c0_170] : memref<256x128xf32, #tpu.memory_space<vmem>>, vector<8x128xf32>
    tpu.vector_store %arg21[%c88, %c0_170], %169 {strides = array<i32>} : memref<256x128xf32, #tpu.memory_space<vmem>>, vector<8x128xf32>,
    %171 = vector.extract_strided_slice %146 {offsets = [48, 0], sizes = [8, 128], strides = [1, 1]} : vector<128x256xf32> to vector<8x128xf32>
    %c96_171 = arith.constant 96 : index
    %c0_172 = arith.constant 0 : index
    %172 = vector.load %arg21[%c96_171, %c0_172] : memref<256x128xf32, #tpu.memory_space<vmem>>, vector<8x128xf32>
    tpu.vector_store %arg21[%c96_171, %c0_172], %171 {strides = array<i32>} : memref<256x128xf32, #tpu.memory_space<vmem>>, vector<8x128xf32>,
    %173 = vector.extract_strided_slice %146 {offsets = [72, 128], sizes = [8, 128], strides = [1, 1]} : vector<128x256xf32> to vector<8x128xf32>
    %c104 = arith.constant 104 : index
    %c0_173 = arith.constant 0 : index
    %174 = vector.load %arg21[%c104, %c0_173] : memref<256x128xf32, #tpu.memory_space<vmem>>, vector<8x128xf32>
    tpu.vector_store %arg21[%c104, %c0_173], %173 {strides = array<i32>} : memref<256x128xf32, #tpu.memory_space<vmem>>, vector<8x128xf32>,
    %175 = vector.extract_strided_slice %146 {offsets = [56, 0], sizes = [8, 128], strides = [1, 1]} : vector<128x256xf32> to vector<8x128xf32>
    %c112 = arith.constant 112 : index
    %c0_174 = arith.constant 0 : index
    %176 = vector.load %arg21[%c112, %c0_174] : memref<256x128xf32, #tpu.memory_space<vmem>>, vector<8x128xf32>
    tpu.vector_store %arg21[%c112, %c0_174], %175 {strides = array<i32>} : memref<256x128xf32, #tpu.memory_space<vmem>>, vector<8x128xf32>,
    %177 = vector.extract_strided_slice %146 {offsets = [64, 128], sizes = [8, 128], strides = [1, 1]} : vector<128x256xf32> to vector<8x128xf32>
    %c120 = arith.constant 120 : index
    %c0_175 = arith.constant 0 : index
    %178 = vector.load %arg21[%c120, %c0_175] : memref<256x128xf32, #tpu.memory_space<vmem>>, vector<8x128xf32>
    tpu.vector_store %arg21[%c120, %c0_175], %177 {strides = array<i32>} : memref<256x128xf32, #tpu.memory_space<vmem>>, vector<8x128xf32>,
    %179 = vector.extract_strided_slice %146 {offsets = [64, 0], sizes = [8, 128], strides = [1, 1]} : vector<128x256xf32> to vector<8x128xf32>
    %c128_176 = arith.constant 128 : index
    %c0_177 = arith.constant 0 : index
    %180 = vector.load %arg21[%c128_176, %c0_177] : memref<256x128xf32, #tpu.memory_space<vmem>>, vector<8x128xf32>
    tpu.vector_store %arg21[%c128_176, %c0_177], %179 {strides = array<i32>} : memref<256x128xf32, #tpu.memory_space<vmem>>, vector<8x128xf32>,
    %181 = vector.extract_strided_slice %146 {offsets = [56, 128], sizes = [8, 128], strides = [1, 1]} : vector<128x256xf32> to vector<8x128xf32>
    %c136 = arith.constant 136 : index
    %c0_178 = arith.constant 0 : index
    %182 = vector.load %arg21[%c136, %c0_178] : memref<256x128xf32, #tpu.memory_space<vmem>>, vector<8x128xf32>
    tpu.vector_store %arg21[%c136, %c0_178], %181 {strides = array<i32>} : memref<256x128xf32, #tpu.memory_space<vmem>>, vector<8x128xf32>,
    %183 = vector.extract_strided_slice %146 {offsets = [72, 0], sizes = [8, 128], strides = [1, 1]} : vector<128x256xf32> to vector<8x128xf32>
    %c144 = arith.constant 144 : index
    %c0_179 = arith.constant 0 : index
    %184 = vector.load %arg21[%c144, %c0_179] : memref<256x128xf32, #tpu.memory_space<vmem>>, vector<8x128xf32>
    tpu.vector_store %arg21[%c144, %c0_179], %183 {strides = array<i32>} : memref<256x128xf32, #tpu.memory_space<vmem>>, vector<8x128xf32>,
    %185 = vector.extract_strided_slice %146 {offsets = [48, 128], sizes = [8, 128], strides = [1, 1]} : vector<128x256xf32> to vector<8x128xf32>
    %c152 = arith.constant 152 : index
    %c0_180 = arith.constant 0 : index
    %186 = vector.load %arg21[%c152, %c0_180] : memref<256x128xf32, #tpu.memory_space<vmem>>, vector<8x128xf32>
    tpu.vector_store %arg21[%c152, %c0_180], %185 {strides = array<i32>} : memref<256x128xf32, #tpu.memory_space<vmem>>, vector<8x128xf32>,
    %187 = vector.extract_strided_slice %146 {offsets = [80, 0], sizes = [8, 128], strides = [1, 1]} : vector<128x256xf32> to vector<8x128xf32>
    %c160 = arith.constant 160 : index
    %c0_181 = arith.constant 0 : index
    %188 = vector.load %arg21[%c160, %c0_181] : memref<256x128xf32, #tpu.memory_space<vmem>>, vector<8x128xf32>
    tpu.vector_store %arg21[%c160, %c0_181], %187 {strides = array<i32>} : memref<256x128xf32, #tpu.memory_space<vmem>>, vector<8x128xf32>,
    %189 = vector.extract_strided_slice %146 {offsets = [40, 128], sizes = [8, 128], strides = [1, 1]} : vector<128x256xf32> to vector<8x128xf32>
    %c168 = arith.constant 168 : index
    %c0_182 = arith.constant 0 : index
    %190 = vector.load %arg21[%c168, %c0_182] : memref<256x128xf32, #tpu.memory_space<vmem>>, vector<8x128xf32>
    tpu.vector_store %arg21[%c168, %c0_182], %189 {strides = array<i32>} : memref<256x128xf32, #tpu.memory_space<vmem>>, vector<8x128xf32>,
    %191 = vector.extract_strided_slice %146 {offsets = [88, 0], sizes = [8, 128], strides = [1, 1]} : vector<128x256xf32> to vector<8x128xf32>
    %c176 = arith.constant 176 : index
    %c0_183 = arith.constant 0 : index
    %192 = vector.load %arg21[%c176, %c0_183] : memref<256x128xf32, #tpu.memory_space<vmem>>, vector<8x128xf32>
    tpu.vector_store %arg21[%c176, %c0_183], %191 {strides = array<i32>} : memref<256x128xf32, #tpu.memory_space<vmem>>, vector<8x128xf32>,
    %193 = vector.extract_strided_slice %146 {offsets = [32, 128], sizes = [8, 128], strides = [1, 1]} : vector<128x256xf32> to vector<8x128xf32>
    %c184 = arith.constant 184 : index
    %c0_184 = arith.constant 0 : index
    %194 = vector.load %arg21[%c184, %c0_184] : memref<256x128xf32, #tpu.memory_space<vmem>>, vector<8x128xf32>
    tpu.vector_store %arg21[%c184, %c0_184], %193 {strides = array<i32>} : memref<256x128xf32, #tpu.memory_space<vmem>>, vector<8x128xf32>,
    %195 = vector.extract_strided_slice %146 {offsets = [96, 0], sizes = [8, 128], strides = [1, 1]} : vector<128x256xf32> to vector<8x128xf32>
    %c192 = arith.constant 192 : index
    %c0_185 = arith.constant 0 : index
    %196 = vector.load %arg21[%c192, %c0_185] : memref<256x128xf32, #tpu.memory_space<vmem>>, vector<8x128xf32>
    tpu.vector_store %arg21[%c192, %c0_185], %195 {strides = array<i32>} : memref<256x128xf32, #tpu.memory_space<vmem>>, vector<8x128xf32>,
    %197 = vector.extract_strided_slice %146 {offsets = [24, 128], sizes = [8, 128], strides = [1, 1]} : vector<128x256xf32> to vector<8x128xf32>
    %c200 = arith.constant 200 : index
    %c0_186 = arith.constant 0 : index
    %198 = vector.load %arg21[%c200, %c0_186] : memref<256x128xf32, #tpu.memory_space<vmem>>, vector<8x128xf32>
    tpu.vector_store %arg21[%c200, %c0_186], %197 {strides = array<i32>} : memref<256x128xf32, #tpu.memory_space<vmem>>, vector<8x128xf32>,
    %199 = vector.extract_strided_slice %146 {offsets = [104, 0], sizes = [8, 128], strides = [1, 1]} : vector<128x256xf32> to vector<8x128xf32>
    %c208 = arith.constant 208 : index
    %c0_187 = arith.constant 0 : index
    %200 = vector.load %arg21[%c208, %c0_187] : memref<256x128xf32, #tpu.memory_space<vmem>>, vector<8x128xf32>
    tpu.vector_store %arg21[%c208, %c0_187], %199 {strides = array<i32>} : memref<256x128xf32, #tpu.memory_space<vmem>>, vector<8x128xf32>,
    %201 = vector.extract_strided_slice %146 {offsets = [16, 128], sizes = [8, 128], strides = [1, 1]} : vector<128x256xf32> to vector<8x128xf32>
    %c216 = arith.constant 216 : index
    %c0_188 = arith.constant 0 : index
    %202 = vector.load %arg21[%c216, %c0_188] : memref<256x128xf32, #tpu.memory_space<vmem>>, vector<8x128xf32>
    tpu.vector_store %arg21[%c216, %c0_188], %201 {strides = array<i32>} : memref<256x128xf32, #tpu.memory_space<vmem>>, vector<8x128xf32>,
    %203 = vector.extract_strided_slice %146 {offsets = [112, 0], sizes = [8, 128], strides = [1, 1]} : vector<128x256xf32> to vector<8x128xf32>
    %c224 = arith.constant 224 : index
    %c0_189 = arith.constant 0 : index
    %204 = vector.load %arg21[%c224, %c0_189] : memref<256x128xf32, #tpu.memory_space<vmem>>, vector<8x128xf32>
    tpu.vector_store %arg21[%c224, %c0_189], %203 {strides = array<i32>} : memref<256x128xf32, #tpu.memory_space<vmem>>, vector<8x128xf32>,
    %205 = vector.extract_strided_slice %146 {offsets = [8, 128], sizes = [8, 128], strides = [1, 1]} : vector<128x256xf32> to vector<8x128xf32>
    %c232 = arith.constant 232 : index
    %c0_190 = arith.constant 0 : index
    %206 = vector.load %arg21[%c232, %c0_190] : memref<256x128xf32, #tpu.memory_space<vmem>>, vector<8x128xf32>
    tpu.vector_store %arg21[%c232, %c0_190], %205 {strides = array<i32>} : memref<256x128xf32, #tpu.memory_space<vmem>>, vector<8x128xf32>,
    %207 = vector.extract_strided_slice %146 {offsets = [120, 0], sizes = [8, 128], strides = [1, 1]} : vector<128x256xf32> to vector<8x128xf32>
    %c240 = arith.constant 240 : index
    %c0_191 = arith.constant 0 : index
    %208 = vector.load %arg21[%c240, %c0_191] : memref<256x128xf32, #tpu.memory_space<vmem>>, vector<8x128xf32>
    tpu.vector_store %arg21[%c240, %c0_191], %207 {strides = array<i32>} : memref<256x128xf32, #tpu.memory_space<vmem>>, vector<8x128xf32>,
    %209 = vector.extract_strided_slice %146 {offsets = [0, 128], sizes = [8, 128], strides = [1, 1]} : vector<128x256xf32> to vector<8x128xf32>
    %c248 = arith.constant 248 : index
    %c0_192 = arith.constant 0 : index
    %210 = vector.load %arg21[%c248, %c0_192] : memref<256x128xf32, #tpu.memory_space<vmem>>, vector<8x128xf32>
    tpu.vector_store %arg21[%c248, %c0_192], %209 {strides = array<i32>} : memref<256x128xf32, #tpu.memory_space<vmem>>, vector<8x128xf32>,
    %c0_193 = arith.constant 0 : index
    %c0_194 = arith.constant 0 : index
    %211 = vector.load %arg14[%c0_193, %c0_194] : memref<32x256xf32, #tpu.memory_space<vmem>>, vector<32x256xf32>
    %212 = tpu.iota {dimensions = array<i32: 0>} : vector<16x128xi32>
    %c8_i32 = arith.constant 8 : i32
    %213 = vector.broadcast %c8_i32 : i32 to vector<16x128xi32>
    %214 = arith.cmpi slt, %212, %213 : vector<16x128xi32>
    %cst_195 = arith.constant 0.000000e+00 : f32
    %215 = vector.broadcast %cst_195 : f32 to vector<16x32xf32>
    %cst_196 = arith.constant 0.000000e+00 : f32
    %216 = vector.broadcast %cst_196 : f32 to vector<16x32xf32>
    %cst_197 = arith.constant dense<0.000000e+00> : vector<16x256xf32>
    %217 = tpu.matmul %215, %211, %cst_197 {dimension_numbers = #tpu.dot_dimension_numbers<[1], [0], [0], [1], [0, 0, 1, 1], [], []>} : vector<16x32xf32>, vector<32x256xf32>, vector<16x256xf32> -> vector<16x256xf32>
    %218 = vector.extract_strided_slice %217 {offsets = [0, 0], sizes = [16, 128], strides = [1, 1]} : vector<16x256xf32> to vector<16x128xf32>
    %219 = vector.extract_strided_slice %217 {offsets = [0, 128], sizes = [16, 128], strides = [1, 1]} : vector<16x256xf32> to vector<16x128xf32>
    %220 = arith.select %214, %218, %219 : vector<16x128xi1>, vector<16x128xf32>
    %c0_198 = arith.constant 0 : index
    %c0_199 = arith.constant 0 : index
    %221 = vector.load %arg21[%c0_198, %c0_199] : memref<256x128xf32, #tpu.memory_space<vmem>>, vector<16x128xf32>
    %222 = arith.addf %221, %220 : vector<16x128xf32>
    %223 = vector.extract_strided_slice %222 {offsets = [0, 0], sizes = [16, 32], strides = [1, 1]} : vector<16x128xf32> to vector<16x32xf32>
    %224 = arith.negf %223 : vector<16x32xf32>
    %225 = math.exp %224 : vector<16x32xf32>
    %cst_200 = arith.constant 1.000000e+00 : f32
    %226 = vector.broadcast %cst_200 : f32 to vector<16x32xf32>
    %227 = arith.addf %226, %225 : vector<16x32xf32>
    %228 = arith.divf %226, %227 : vector<16x32xf32>
    %229 = vector.extract_strided_slice %222 {offsets = [0, 32], sizes = [16, 32], strides = [1, 1]} : vector<16x128xf32> to vector<16x32xf32>
    %230 = arith.negf %229 : vector<16x32xf32>
    %231 = math.exp %230 : vector<16x32xf32>
    %cst_201 = arith.constant 1.000000e+00 : f32
    %232 = vector.broadcast %cst_201 : f32 to vector<16x32xf32>
    %233 = arith.addf %232, %231 : vector<16x32xf32>
    %234 = arith.divf %232, %233 : vector<16x32xf32>
    %235 = vector.extract_strided_slice %222 {offsets = [0, 64], sizes = [16, 32], strides = [1, 1]} : vector<16x128xf32> to vector<16x32xf32>
    %236 = math.tanh %235 : vector<16x32xf32>
    %237 = vector.extract_strided_slice %222 {offsets = [0, 96], sizes = [16, 32], strides = [1, 1]} : vector<16x128xf32> to vector<16x32xf32>
    %238 = arith.negf %237 : vector<16x32xf32>
    %239 = math.exp %238 : vector<16x32xf32>
    %cst_202 = arith.constant 1.000000e+00 : f32
    %240 = vector.broadcast %cst_202 : f32 to vector<16x32xf32>
    %241 = arith.addf %240, %239 : vector<16x32xf32>
    %242 = arith.divf %240, %241 : vector<16x32xf32>
    %243 = arith.mulf %234, %216 : vector<16x32xf32>
    %244 = arith.mulf %228, %236 : vector<16x32xf32>
    %245 = arith.addf %243, %244 : vector<16x32xf32>
    %246 = math.tanh %245 : vector<16x32xf32>
    %247 = arith.mulf %242, %246 : vector<16x32xf32>
    %c0_203 = arith.constant 0 : index
    %c0_204 = arith.constant 0 : index
    %248 = vector.load %arg2[%c0_203, %c0_204] : memref<256x1xf32, #tpu.memory_space<vmem>>, vector<16x1xf32>
    %cst_205 = arith.constant 5.000000e-01 : f32
    %249 = vector.broadcast %cst_205 : f32 to vector<16x1xf32>
    %250 = arith.cmpf ogt, %248, %249 : vector<16x1xf32>
    %251 = vector.shape_cast %250 : vector<16x1xi1> to vector<16x1xi1>
    %252 = vector.broadcast %251 : vector<16x1xi1> to vector<16x32xi1>
    %253 = arith.select %252, %247, %215 : vector<16x32xi1>, vector<16x32xf32>
    %254 = arith.select %252, %245, %216 : vector<16x32xi1>, vector<16x32xf32>
    %cst_206 = arith.constant 0.000000e+00 : f32
    %255 = vector.broadcast %cst_206 : f32 to vector<16x32xf32>
    %256 = arith.select %252, %247, %255 : vector<16x32xi1>, vector<16x32xf32>
    %257 = vector.extract_strided_slice %256 {offsets = [0, 0], sizes = [8, 32], strides = [1, 1]} : vector<16x32xf32> to vector<8x32xf32>
    %c0_207 = arith.constant 0 : index
    %c0_208 = arith.constant 0 : index
    %258 = vector.load %arg22[%c0_207, %c0_208] : memref<128x64xf32, #tpu.memory_space<vmem>>, vector<8x32xf32>
    tpu.vector_store %arg22[%c0_207, %c0_208], %257 {strides = array<i32>} : memref<128x64xf32, #tpu.memory_space<vmem>>, vector<8x32xf32>,
    %259 = vector.extract_strided_slice %256 {offsets = [8, 0], sizes = [8, 32], strides = [1, 1]} : vector<16x32xf32> to vector<8x32xf32>
    %c120_209 = arith.constant 120 : index
    %c32_210 = arith.constant 32 : index
    %260 = vector.load %arg22[%c120_209, %c32_210] : memref<128x64xf32, #tpu.memory_space<vmem>>, vector<8x32xf32>
    tpu.vector_store %arg22[%c120_209, %c32_210], %259 {strides = array<i32>} : memref<128x64xf32, #tpu.memory_space<vmem>>, vector<8x32xf32>,
    %cst_211 = arith.constant dense<0.000000e+00> : vector<16x256xf32>
    %261 = tpu.matmul %253, %211, %cst_211 {dimension_numbers = #tpu.dot_dimension_numbers<[1], [0], [0], [1], [0, 0, 1, 1], [], []>} : vector<16x32xf32>, vector<32x256xf32>, vector<16x256xf32> -> vector<16x256xf32>
    %262 = vector.extract_strided_slice %261 {offsets = [0, 0], sizes = [16, 128], strides = [1, 1]} : vector<16x256xf32> to vector<16x128xf32>
    %263 = vector.extract_strided_slice %261 {offsets = [0, 128], sizes = [16, 128], strides = [1, 1]} : vector<16x256xf32> to vector<16x128xf32>
    %264 = arith.select %214, %262, %263 : vector<16x128xi1>, vector<16x128xf32>
    %c16_212 = arith.constant 16 : index
    %c0_213 = arith.constant 0 : index
    %265 = vector.load %arg21[%c16_212, %c0_213] : memref<256x128xf32, #tpu.memory_space<vmem>>, vector<16x128xf32>
    %266 = arith.addf %265, %264 : vector<16x128xf32>
    %267 = vector.extract_strided_slice %266 {offsets = [0, 0], sizes = [16, 32], strides = [1, 1]} : vector<16x128xf32> to vector<16x32xf32>
    %268 = arith.negf %267 : vector<16x32xf32>
    %269 = math.exp %268 : vector<16x32xf32>
    %cst_214 = arith.constant 1.000000e+00 : f32
    %270 = vector.broadcast %cst_214 : f32 to vector<16x32xf32>
    %271 = arith.addf %270, %269 : vector<16x32xf32>
    %272 = arith.divf %270, %271 : vector<16x32xf32>
    %273 = vector.extract_strided_slice %266 {offsets = [0, 32], sizes = [16, 32], strides = [1, 1]} : vector<16x128xf32> to vector<16x32xf32>
    %274 = arith.negf %273 : vector<16x32xf32>
    %275 = math.exp %274 : vector<16x32xf32>
    %cst_215 = arith.constant 1.000000e+00 : f32
    %276 = vector.broadcast %cst_215 : f32 to vector<16x32xf32>
    %277 = arith.addf %276, %275 : vector<16x32xf32>
    %278 = arith.divf %276, %277 : vector<16x32xf32>
    %279 = vector.extract_strided_slice %266 {offsets = [0, 64], sizes = [16, 32], strides = [1, 1]} : vector<16x128xf32> to vector<16x32xf32>
    %280 = math.tanh %279 : vector<16x32xf32>
    %281 = vector.extract_strided_slice %266 {offsets = [0, 96], sizes = [16, 32], strides = [1, 1]} : vector<16x128xf32> to vector<16x32xf32>
    %282 = arith.negf %281 : vector<16x32xf32>
    %283 = math.exp %282 : vector<16x32xf32>
    %cst_216 = arith.constant 1.000000e+00 : f32
    %284 = vector.broadcast %cst_216 : f32 to vector<16x32xf32>
    %285 = arith.addf %284, %283 : vector<16x32xf32>
    %286 = arith.divf %284, %285 : vector<16x32xf32>
    %287 = arith.mulf %278, %254 : vector<16x32xf32>
    %288 = arith.mulf %272, %280 : vector<16x32xf32>
    %289 = arith.addf %287, %288 : vector<16x32xf32>
    %290 = math.tanh %289 : vector<16x32xf32>
    %291 = arith.mulf %286, %290 : vector<16x32xf32>
    %c16_217 = arith.constant 16 : index
    %c0_218 = arith.constant 0 : index
    %292 = vector.load %arg2[%c16_217, %c0_218] : memref<256x1xf32, #tpu.memory_space<vmem>>, vector<16x1xf32>
    %cst_219 = arith.constant 5.000000e-01 : f32
    %293 = vector.broadcast %cst_219 : f32 to vector<16x1xf32>
    %294 = arith.cmpf ogt, %292, %293 : vector<16x1xf32>
    %295 = vector.shape_cast %294 : vector<16x1xi1> to vector<16x1xi1>
    %296 = vector.broadcast %295 : vector<16x1xi1> to vector<16x32xi1>
    %297 = arith.select %296, %291, %253 : vector<16x32xi1>, vector<16x32xf32>
    %298 = arith.select %296, %289, %254 : vector<16x32xi1>, vector<16x32xf32>
    %cst_220 = arith.constant 0.000000e+00 : f32
    %299 = vector.broadcast %cst_220 : f32 to vector<16x32xf32>
    %300 = arith.select %296, %291, %299 : vector<16x32xi1>, vector<16x32xf32>
    %301 = vector.extract_strided_slice %300 {offsets = [0, 0], sizes = [8, 32], strides = [1, 1]} : vector<16x32xf32> to vector<8x32xf32>
    %c8_221 = arith.constant 8 : index
    %c0_222 = arith.constant 0 : index
    %302 = vector.load %arg22[%c8_221, %c0_222] : memref<128x64xf32, #tpu.memory_space<vmem>>, vector<8x32xf32>
    tpu.vector_store %arg22[%c8_221, %c0_222], %301 {strides = array<i32>} : memref<128x64xf32, #tpu.memory_space<vmem>>, vector<8x32xf32>,
    %303 = vector.extract_strided_slice %300 {offsets = [8, 0], sizes = [8, 32], strides = [1, 1]} : vector<16x32xf32> to vector<8x32xf32>
    %c112_223 = arith.constant 112 : index
    %c32_224 = arith.constant 32 : index
    %304 = vector.load %arg22[%c112_223, %c32_224] : memref<128x64xf32, #tpu.memory_space<vmem>>, vector<8x32xf32>
    tpu.vector_store %arg22[%c112_223, %c32_224], %303 {strides = array<i32>} : memref<128x64xf32, #tpu.memory_space<vmem>>, vector<8x32xf32>,
    %cst_225 = arith.constant dense<0.000000e+00> : vector<16x256xf32>
    %305 = tpu.matmul %297, %211, %cst_225 {dimension_numbers = #tpu.dot_dimension_numbers<[1], [0], [0], [1], [0, 0, 1, 1], [], []>} : vector<16x32xf32>, vector<32x256xf32>, vector<16x256xf32> -> vector<16x256xf32>
    %306 = vector.extract_strided_slice %305 {offsets = [0, 0], sizes = [16, 128], strides = [1, 1]} : vector<16x256xf32> to vector<16x128xf32>
    %307 = vector.extract_strided_slice %305 {offsets = [0, 128], sizes = [16, 128], strides = [1, 1]} : vector<16x256xf32> to vector<16x128xf32>
    %308 = arith.select %214, %306, %307 : vector<16x128xi1>, vector<16x128xf32>
    %c32_226 = arith.constant 32 : index
    %c0_227 = arith.constant 0 : index
    %309 = vector.load %arg21[%c32_226, %c0_227] : memref<256x128xf32, #tpu.memory_space<vmem>>, vector<16x128xf32>
    %310 = arith.addf %309, %308 : vector<16x128xf32>
    %311 = vector.extract_strided_slice %310 {offsets = [0, 0], sizes = [16, 32], strides = [1, 1]} : vector<16x128xf32> to vector<16x32xf32>
    %312 = arith.negf %311 : vector<16x32xf32>
    %313 = math.exp %312 : vector<16x32xf32>
    %cst_228 = arith.constant 1.000000e+00 : f32
    %314 = vector.broadcast %cst_228 : f32 to vector<16x32xf32>
    %315 = arith.addf %314, %313 : vector<16x32xf32>
    %316 = arith.divf %314, %315 : vector<16x32xf32>
    %317 = vector.extract_strided_slice %310 {offsets = [0, 32], sizes = [16, 32], strides = [1, 1]} : vector<16x128xf32> to vector<16x32xf32>
    %318 = arith.negf %317 : vector<16x32xf32>
    %319 = math.exp %318 : vector<16x32xf32>
    %cst_229 = arith.constant 1.000000e+00 : f32
    %320 = vector.broadcast %cst_229 : f32 to vector<16x32xf32>
    %321 = arith.addf %320, %319 : vector<16x32xf32>
    %322 = arith.divf %320, %321 : vector<16x32xf32>
    %323 = vector.extract_strided_slice %310 {offsets = [0, 64], sizes = [16, 32], strides = [1, 1]} : vector<16x128xf32> to vector<16x32xf32>
    %324 = math.tanh %323 : vector<16x32xf32>
    %325 = vector.extract_strided_slice %310 {offsets = [0, 96], sizes = [16, 32], strides = [1, 1]} : vector<16x128xf32> to vector<16x32xf32>
    %326 = arith.negf %325 : vector<16x32xf32>
    %327 = math.exp %326 : vector<16x32xf32>
    %cst_230 = arith.constant 1.000000e+00 : f32
    %328 = vector.broadcast %cst_230 : f32 to vector<16x32xf32>
    %329 = arith.addf %328, %327 : vector<16x32xf32>
    %330 = arith.divf %328, %329 : vector<16x32xf32>
    %331 = arith.mulf %322, %298 : vector<16x32xf32>
    %332 = arith.mulf %316, %324 : vector<16x32xf32>
    %333 = arith.addf %331, %332 : vector<16x32xf32>
    %334 = math.tanh %333 : vector<16x32xf32>
    %335 = arith.mulf %330, %334 : vector<16x32xf32>
    %c32_231 = arith.constant 32 : index
    %c0_232 = arith.constant 0 : index
    %336 = vector.load %arg2[%c32_231, %c0_232] : memref<256x1xf32, #tpu.memory_space<vmem>>, vector<16x1xf32>
    %cst_233 = arith.constant 5.000000e-01 : f32
    %337 = vector.broadcast %cst_233 : f32 to vector<16x1xf32>
    %338 = arith.cmpf ogt, %336, %337 : vector<16x1xf32>
    %339 = vector.shape_cast %338 : vector<16x1xi1> to vector<16x1xi1>
    %340 = vector.broadcast %339 : vector<16x1xi1> to vector<16x32xi1>
    %341 = arith.select %340, %335, %297 : vector<16x32xi1>, vector<16x32xf32>
    %342 = arith.select %340, %333, %298 : vector<16x32xi1>, vector<16x32xf32>
    %cst_234 = arith.constant 0.000000e+00 : f32
    %343 = vector.broadcast %cst_234 : f32 to vector<16x32xf32>
    %344 = arith.select %340, %335, %343 : vector<16x32xi1>, vector<16x32xf32>
    %345 = vector.extract_strided_slice %344 {offsets = [0, 0], sizes = [8, 32], strides = [1, 1]} : vector<16x32xf32> to vector<8x32xf32>
    %c16_235 = arith.constant 16 : index
    %c0_236 = arith.constant 0 : index
    %346 = vector.load %arg22[%c16_235, %c0_236] : memref<128x64xf32, #tpu.memory_space<vmem>>, vector<8x32xf32>
    tpu.vector_store %arg22[%c16_235, %c0_236], %345 {strides = array<i32>} : memref<128x64xf32, #tpu.memory_space<vmem>>, vector<8x32xf32>,
    %347 = vector.extract_strided_slice %344 {offsets = [8, 0], sizes = [8, 32], strides = [1, 1]} : vector<16x32xf32> to vector<8x32xf32>
    %c104_237 = arith.constant 104 : index
    %c32_238 = arith.constant 32 : index
    %348 = vector.load %arg22[%c104_237, %c32_238] : memref<128x64xf32, #tpu.memory_space<vmem>>, vector<8x32xf32>
    tpu.vector_store %arg22[%c104_237, %c32_238], %347 {strides = array<i32>} : memref<128x64xf32, #tpu.memory_space<vmem>>, vector<8x32xf32>,
    %cst_239 = arith.constant dense<0.000000e+00> : vector<16x256xf32>
    %349 = tpu.matmul %341, %211, %cst_239 {dimension_numbers = #tpu.dot_dimension_numbers<[1], [0], [0], [1], [0, 0, 1, 1], [], []>} : vector<16x32xf32>, vector<32x256xf32>, vector<16x256xf32> -> vector<16x256xf32>
    %350 = vector.extract_strided_slice %349 {offsets = [0, 0], sizes = [16, 128], strides = [1, 1]} : vector<16x256xf32> to vector<16x128xf32>
    %351 = vector.extract_strided_slice %349 {offsets = [0, 128], sizes = [16, 128], strides = [1, 1]} : vector<16x256xf32> to vector<16x128xf32>
    %352 = arith.select %214, %350, %351 : vector<16x128xi1>, vector<16x128xf32>
    %c48_240 = arith.constant 48 : index
    %c0_241 = arith.constant 0 : index
    %353 = vector.load %arg21[%c48_240, %c0_241] : memref<256x128xf32, #tpu.memory_space<vmem>>, vector<16x128xf32>
    %354 = arith.addf %353, %352 : vector<16x128xf32>
    %355 = vector.extract_strided_slice %354 {offsets = [0, 0], sizes = [16, 32], strides = [1, 1]} : vector<16x128xf32> to vector<16x32xf32>
    %356 = arith.negf %355 : vector<16x32xf32>
    %357 = math.exp %356 : vector<16x32xf32>
    %cst_242 = arith.constant 1.000000e+00 : f32
    %358 = vector.broadcast %cst_242 : f32 to vector<16x32xf32>
    %359 = arith.addf %358, %357 : vector<16x32xf32>
    %360 = arith.divf %358, %359 : vector<16x32xf32>
    %361 = vector.extract_strided_slice %354 {offsets = [0, 32], sizes = [16, 32], strides = [1, 1]} : vector<16x128xf32> to vector<16x32xf32>
    %362 = arith.negf %361 : vector<16x32xf32>
    %363 = math.exp %362 : vector<16x32xf32>
    %cst_243 = arith.constant 1.000000e+00 : f32
    %364 = vector.broadcast %cst_243 : f32 to vector<16x32xf32>
    %365 = arith.addf %364, %363 : vector<16x32xf32>
    %366 = arith.divf %364, %365 : vector<16x32xf32>
    %367 = vector.extract_strided_slice %354 {offsets = [0, 64], sizes = [16, 32], strides = [1, 1]} : vector<16x128xf32> to vector<16x32xf32>
    %368 = math.tanh %367 : vector<16x32xf32>
    %369 = vector.extract_strided_slice %354 {offsets = [0, 96], sizes = [16, 32], strides = [1, 1]} : vector<16x128xf32> to vector<16x32xf32>
    %370 = arith.negf %369 : vector<16x32xf32>
    %371 = math.exp %370 : vector<16x32xf32>
    %cst_244 = arith.constant 1.000000e+00 : f32
    %372 = vector.broadcast %cst_244 : f32 to vector<16x32xf32>
    %373 = arith.addf %372, %371 : vector<16x32xf32>
    %374 = arith.divf %372, %373 : vector<16x32xf32>
    %375 = arith.mulf %366, %342 : vector<16x32xf32>
    %376 = arith.mulf %360, %368 : vector<16x32xf32>
    %377 = arith.addf %375, %376 : vector<16x32xf32>
    %378 = math.tanh %377 : vector<16x32xf32>
    %379 = arith.mulf %374, %378 : vector<16x32xf32>
    %c48_245 = arith.constant 48 : index
    %c0_246 = arith.constant 0 : index
    %380 = vector.load %arg2[%c48_245, %c0_246] : memref<256x1xf32, #tpu.memory_space<vmem>>, vector<16x1xf32>
    %cst_247 = arith.constant 5.000000e-01 : f32
    %381 = vector.broadcast %cst_247 : f32 to vector<16x1xf32>
    %382 = arith.cmpf ogt, %380, %381 : vector<16x1xf32>
    %383 = vector.shape_cast %382 : vector<16x1xi1> to vector<16x1xi1>
    %384 = vector.broadcast %383 : vector<16x1xi1> to vector<16x32xi1>
    %385 = arith.select %384, %379, %341 : vector<16x32xi1>, vector<16x32xf32>
    %386 = arith.select %384, %377, %342 : vector<16x32xi1>, vector<16x32xf32>
    %cst_248 = arith.constant 0.000000e+00 : f32
    %387 = vector.broadcast %cst_248 : f32 to vector<16x32xf32>
    %388 = arith.select %384, %379, %387 : vector<16x32xi1>, vector<16x32xf32>
    %389 = vector.extract_strided_slice %388 {offsets = [0, 0], sizes = [8, 32], strides = [1, 1]} : vector<16x32xf32> to vector<8x32xf32>
    %c24_249 = arith.constant 24 : index
    %c0_250 = arith.constant 0 : index
    %390 = vector.load %arg22[%c24_249, %c0_250] : memref<128x64xf32, #tpu.memory_space<vmem>>, vector<8x32xf32>
    tpu.vector_store %arg22[%c24_249, %c0_250], %389 {strides = array<i32>} : memref<128x64xf32, #tpu.memory_space<vmem>>, vector<8x32xf32>,
    %391 = vector.extract_strided_slice %388 {offsets = [8, 0], sizes = [8, 32], strides = [1, 1]} : vector<16x32xf32> to vector<8x32xf32>
    %c96_251 = arith.constant 96 : index
    %c32_252 = arith.constant 32 : index
    %392 = vector.load %arg22[%c96_251, %c32_252] : memref<128x64xf32, #tpu.memory_space<vmem>>, vector<8x32xf32>
    tpu.vector_store %arg22[%c96_251, %c32_252], %391 {strides = array<i32>} : memref<128x64xf32, #tpu.memory_space<vmem>>, vector<8x32xf32>,
    %cst_253 = arith.constant dense<0.000000e+00> : vector<16x256xf32>
    %393 = tpu.matmul %385, %211, %cst_253 {dimension_numbers = #tpu.dot_dimension_numbers<[1], [0], [0], [1], [0, 0, 1, 1], [], []>} : vector<16x32xf32>, vector<32x256xf32>, vector<16x256xf32> -> vector<16x256xf32>
    %394 = vector.extract_strided_slice %393 {offsets = [0, 0], sizes = [16, 128], strides = [1, 1]} : vector<16x256xf32> to vector<16x128xf32>
    %395 = vector.extract_strided_slice %393 {offsets = [0, 128], sizes = [16, 128], strides = [1, 1]} : vector<16x256xf32> to vector<16x128xf32>
    %396 = arith.select %214, %394, %395 : vector<16x128xi1>, vector<16x128xf32>
    %c64_254 = arith.constant 64 : index
    %c0_255 = arith.constant 0 : index
    %397 = vector.load %arg21[%c64_254, %c0_255] : memref<256x128xf32, #tpu.memory_space<vmem>>, vector<16x128xf32>
    %398 = arith.addf %397, %396 : vector<16x128xf32>
    %399 = vector.extract_strided_slice %398 {offsets = [0, 0], sizes = [16, 32], strides = [1, 1]} : vector<16x128xf32> to vector<16x32xf32>
    %400 = arith.negf %399 : vector<16x32xf32>
    %401 = math.exp %400 : vector<16x32xf32>
    %cst_256 = arith.constant 1.000000e+00 : f32
    %402 = vector.broadcast %cst_256 : f32 to vector<16x32xf32>
    %403 = arith.addf %402, %401 : vector<16x32xf32>
    %404 = arith.divf %402, %403 : vector<16x32xf32>
    %405 = vector.extract_strided_slice %398 {offsets = [0, 32], sizes = [16, 32], strides = [1, 1]} : vector<16x128xf32> to vector<16x32xf32>
    %406 = arith.negf %405 : vector<16x32xf32>
    %407 = math.exp %406 : vector<16x32xf32>
    %cst_257 = arith.constant 1.000000e+00 : f32
    %408 = vector.broadcast %cst_257 : f32 to vector<16x32xf32>
    %409 = arith.addf %408, %407 : vector<16x32xf32>
    %410 = arith.divf %408, %409 : vector<16x32xf32>
    %411 = vector.extract_strided_slice %398 {offsets = [0, 64], sizes = [16, 32], strides = [1, 1]} : vector<16x128xf32> to vector<16x32xf32>
    %412 = math.tanh %411 : vector<16x32xf32>
    %413 = vector.extract_strided_slice %398 {offsets = [0, 96], sizes = [16, 32], strides = [1, 1]} : vector<16x128xf32> to vector<16x32xf32>
    %414 = arith.negf %413 : vector<16x32xf32>
    %415 = math.exp %414 : vector<16x32xf32>
    %cst_258 = arith.constant 1.000000e+00 : f32
    %416 = vector.broadcast %cst_258 : f32 to vector<16x32xf32>
    %417 = arith.addf %416, %415 : vector<16x32xf32>
    %418 = arith.divf %416, %417 : vector<16x32xf32>
    %419 = arith.mulf %410, %386 : vector<16x32xf32>
    %420 = arith.mulf %404, %412 : vector<16x32xf32>
    %421 = arith.addf %419, %420 : vector<16x32xf32>
    %422 = math.tanh %421 : vector<16x32xf32>
    %423 = arith.mulf %418, %422 : vector<16x32xf32>
    %c64_259 = arith.constant 64 : index
    %c0_260 = arith.constant 0 : index
    %424 = vector.load %arg2[%c64_259, %c0_260] : memref<256x1xf32, #tpu.memory_space<vmem>>, vector<16x1xf32>
    %cst_261 = arith.constant 5.000000e-01 : f32
    %425 = vector.broadcast %cst_261 : f32 to vector<16x1xf32>
    %426 = arith.cmpf ogt, %424, %425 : vector<16x1xf32>
    %427 = vector.shape_cast %426 : vector<16x1xi1> to vector<16x1xi1>
    %428 = vector.broadcast %427 : vector<16x1xi1> to vector<16x32xi1>
    %429 = arith.select %428, %423, %385 : vector<16x32xi1>, vector<16x32xf32>
    %430 = arith.select %428, %421, %386 : vector<16x32xi1>, vector<16x32xf32>
    %cst_262 = arith.constant 0.000000e+00 : f32
    %431 = vector.broadcast %cst_262 : f32 to vector<16x32xf32>
    %432 = arith.select %428, %423, %431 : vector<16x32xi1>, vector<16x32xf32>
    %433 = vector.extract_strided_slice %432 {offsets = [0, 0], sizes = [8, 32], strides = [1, 1]} : vector<16x32xf32> to vector<8x32xf32>
    %c32_263 = arith.constant 32 : index
    %c0_264 = arith.constant 0 : index
    %434 = vector.load %arg22[%c32_263, %c0_264] : memref<128x64xf32, #tpu.memory_space<vmem>>, vector<8x32xf32>
    tpu.vector_store %arg22[%c32_263, %c0_264], %433 {strides = array<i32>} : memref<128x64xf32, #tpu.memory_space<vmem>>, vector<8x32xf32>,
    %435 = vector.extract_strided_slice %432 {offsets = [8, 0], sizes = [8, 32], strides = [1, 1]} : vector<16x32xf32> to vector<8x32xf32>
    %c88_265 = arith.constant 88 : index
    %c32_266 = arith.constant 32 : index
    %436 = vector.load %arg22[%c88_265, %c32_266] : memref<128x64xf32, #tpu.memory_space<vmem>>, vector<8x32xf32>
    tpu.vector_store %arg22[%c88_265, %c32_266], %435 {strides = array<i32>} : memref<128x64xf32, #tpu.memory_space<vmem>>, vector<8x32xf32>,
    %cst_267 = arith.constant dense<0.000000e+00> : vector<16x256xf32>
    %437 = tpu.matmul %429, %211, %cst_267 {dimension_numbers = #tpu.dot_dimension_numbers<[1], [0], [0], [1], [0, 0, 1, 1], [], []>} : vector<16x32xf32>, vector<32x256xf32>, vector<16x256xf32> -> vector<16x256xf32>
    %438 = vector.extract_strided_slice %437 {offsets = [0, 0], sizes = [16, 128], strides = [1, 1]} : vector<16x256xf32> to vector<16x128xf32>
    %439 = vector.extract_strided_slice %437 {offsets = [0, 128], sizes = [16, 128], strides = [1, 1]} : vector<16x256xf32> to vector<16x128xf32>
    %440 = arith.select %214, %438, %439 : vector<16x128xi1>, vector<16x128xf32>
    %c80_268 = arith.constant 80 : index
    %c0_269 = arith.constant 0 : index
    %441 = vector.load %arg21[%c80_268, %c0_269] : memref<256x128xf32, #tpu.memory_space<vmem>>, vector<16x128xf32>
    %442 = arith.addf %441, %440 : vector<16x128xf32>
    %443 = vector.extract_strided_slice %442 {offsets = [0, 0], sizes = [16, 32], strides = [1, 1]} : vector<16x128xf32> to vector<16x32xf32>
    %444 = arith.negf %443 : vector<16x32xf32>
    %445 = math.exp %444 : vector<16x32xf32>
    %cst_270 = arith.constant 1.000000e+00 : f32
    %446 = vector.broadcast %cst_270 : f32 to vector<16x32xf32>
    %447 = arith.addf %446, %445 : vector<16x32xf32>
    %448 = arith.divf %446, %447 : vector<16x32xf32>
    %449 = vector.extract_strided_slice %442 {offsets = [0, 32], sizes = [16, 32], strides = [1, 1]} : vector<16x128xf32> to vector<16x32xf32>
    %450 = arith.negf %449 : vector<16x32xf32>
    %451 = math.exp %450 : vector<16x32xf32>
    %cst_271 = arith.constant 1.000000e+00 : f32
    %452 = vector.broadcast %cst_271 : f32 to vector<16x32xf32>
    %453 = arith.addf %452, %451 : vector<16x32xf32>
    %454 = arith.divf %452, %453 : vector<16x32xf32>
    %455 = vector.extract_strided_slice %442 {offsets = [0, 64], sizes = [16, 32], strides = [1, 1]} : vector<16x128xf32> to vector<16x32xf32>
    %456 = math.tanh %455 : vector<16x32xf32>
    %457 = vector.extract_strided_slice %442 {offsets = [0, 96], sizes = [16, 32], strides = [1, 1]} : vector<16x128xf32> to vector<16x32xf32>
    %458 = arith.negf %457 : vector<16x32xf32>
    %459 = math.exp %458 : vector<16x32xf32>
    %cst_272 = arith.constant 1.000000e+00 : f32
    %460 = vector.broadcast %cst_272 : f32 to vector<16x32xf32>
    %461 = arith.addf %460, %459 : vector<16x32xf32>
    %462 = arith.divf %460, %461 : vector<16x32xf32>
    %463 = arith.mulf %454, %430 : vector<16x32xf32>
    %464 = arith.mulf %448, %456 : vector<16x32xf32>
    %465 = arith.addf %463, %464 : vector<16x32xf32>
    %466 = math.tanh %465 : vector<16x32xf32>
    %467 = arith.mulf %462, %466 : vector<16x32xf32>
    %c80_273 = arith.constant 80 : index
    %c0_274 = arith.constant 0 : index
    %468 = vector.load %arg2[%c80_273, %c0_274] : memref<256x1xf32, #tpu.memory_space<vmem>>, vector<16x1xf32>
    %cst_275 = arith.constant 5.000000e-01 : f32
    %469 = vector.broadcast %cst_275 : f32 to vector<16x1xf32>
    %470 = arith.cmpf ogt, %468, %469 : vector<16x1xf32>
    %471 = vector.shape_cast %470 : vector<16x1xi1> to vector<16x1xi1>
    %472 = vector.broadcast %471 : vector<16x1xi1> to vector<16x32xi1>
    %473 = arith.select %472, %467, %429 : vector<16x32xi1>, vector<16x32xf32>
    %474 = arith.select %472, %465, %430 : vector<16x32xi1>, vector<16x32xf32>
    %cst_276 = arith.constant 0.000000e+00 : f32
    %475 = vector.broadcast %cst_276 : f32 to vector<16x32xf32>
    %476 = arith.select %472, %467, %475 : vector<16x32xi1>, vector<16x32xf32>
    %477 = vector.extract_strided_slice %476 {offsets = [0, 0], sizes = [8, 32], strides = [1, 1]} : vector<16x32xf32> to vector<8x32xf32>
    %c40_277 = arith.constant 40 : index
    %c0_278 = arith.constant 0 : index
    %478 = vector.load %arg22[%c40_277, %c0_278] : memref<128x64xf32, #tpu.memory_space<vmem>>, vector<8x32xf32>
    tpu.vector_store %arg22[%c40_277, %c0_278], %477 {strides = array<i32>} : memref<128x64xf32, #tpu.memory_space<vmem>>, vector<8x32xf32>,
    %479 = vector.extract_strided_slice %476 {offsets = [8, 0], sizes = [8, 32], strides = [1, 1]} : vector<16x32xf32> to vector<8x32xf32>
    %c80_279 = arith.constant 80 : index
    %c32_280 = arith.constant 32 : index
    %480 = vector.load %arg22[%c80_279, %c32_280] : memref<128x64xf32, #tpu.memory_space<vmem>>, vector<8x32xf32>
    tpu.vector_store %arg22[%c80_279, %c32_280], %479 {strides = array<i32>} : memref<128x64xf32, #tpu.memory_space<vmem>>, vector<8x32xf32>,
    %cst_281 = arith.constant dense<0.000000e+00> : vector<16x256xf32>
    %481 = tpu.matmul %473, %211, %cst_281 {dimension_numbers = #tpu.dot_dimension_numbers<[1], [0], [0], [1], [0, 0, 1, 1], [], []>} : vector<16x32xf32>, vector<32x256xf32>, vector<16x256xf32> -> vector<16x256xf32>
    %482 = vector.extract_strided_slice %481 {offsets = [0, 0], sizes = [16, 128], strides = [1, 1]} : vector<16x256xf32> to vector<16x128xf32>
    %483 = vector.extract_strided_slice %481 {offsets = [0, 128], sizes = [16, 128], strides = [1, 1]} : vector<16x256xf32> to vector<16x128xf32>
    %484 = arith.select %214, %482, %483 : vector<16x128xi1>, vector<16x128xf32>
    %c96_282 = arith.constant 96 : index
    %c0_283 = arith.constant 0 : index
    %485 = vector.load %arg21[%c96_282, %c0_283] : memref<256x128xf32, #tpu.memory_space<vmem>>, vector<16x128xf32>
    %486 = arith.addf %485, %484 : vector<16x128xf32>
    %487 = vector.extract_strided_slice %486 {offsets = [0, 0], sizes = [16, 32], strides = [1, 1]} : vector<16x128xf32> to vector<16x32xf32>
    %488 = arith.negf %487 : vector<16x32xf32>
    %489 = math.exp %488 : vector<16x32xf32>
    %cst_284 = arith.constant 1.000000e+00 : f32
    %490 = vector.broadcast %cst_284 : f32 to vector<16x32xf32>
    %491 = arith.addf %490, %489 : vector<16x32xf32>
    %492 = arith.divf %490, %491 : vector<16x32xf32>
    %493 = vector.extract_strided_slice %486 {offsets = [0, 32], sizes = [16, 32], strides = [1, 1]} : vector<16x128xf32> to vector<16x32xf32>
    %494 = arith.negf %493 : vector<16x32xf32>
    %495 = math.exp %494 : vector<16x32xf32>
    %cst_285 = arith.constant 1.000000e+00 : f32
    %496 = vector.broadcast %cst_285 : f32 to vector<16x32xf32>
    %497 = arith.addf %496, %495 : vector<16x32xf32>
    %498 = arith.divf %496, %497 : vector<16x32xf32>
    %499 = vector.extract_strided_slice %486 {offsets = [0, 64], sizes = [16, 32], strides = [1, 1]} : vector<16x128xf32> to vector<16x32xf32>
    %500 = math.tanh %499 : vector<16x32xf32>
    %501 = vector.extract_strided_slice %486 {offsets = [0, 96], sizes = [16, 32], strides = [1, 1]} : vector<16x128xf32> to vector<16x32xf32>
    %502 = arith.negf %501 : vector<16x32xf32>
    %503 = math.exp %502 : vector<16x32xf32>
    %cst_286 = arith.constant 1.000000e+00 : f32
    %504 = vector.broadcast %cst_286 : f32 to vector<16x32xf32>
    %505 = arith.addf %504, %503 : vector<16x32xf32>
    %506 = arith.divf %504, %505 : vector<16x32xf32>
    %507 = arith.mulf %498, %474 : vector<16x32xf32>
    %508 = arith.mulf %492, %500 : vector<16x32xf32>
    %509 = arith.addf %507, %508 : vector<16x32xf32>
    %510 = math.tanh %509 : vector<16x32xf32>
    %511 = arith.mulf %506, %510 : vector<16x32xf32>
    %c96_287 = arith.constant 96 : index
    %c0_288 = arith.constant 0 : index
    %512 = vector.load %arg2[%c96_287, %c0_288] : memref<256x1xf32, #tpu.memory_space<vmem>>, vector<16x1xf32>
    %cst_289 = arith.constant 5.000000e-01 : f32
    %513 = vector.broadcast %cst_289 : f32 to vector<16x1xf32>
    %514 = arith.cmpf ogt, %512, %513 : vector<16x1xf32>
    %515 = vector.shape_cast %514 : vector<16x1xi1> to vector<16x1xi1>
    %516 = vector.broadcast %515 : vector<16x1xi1> to vector<16x32xi1>
    %517 = arith.select %516, %511, %473 : vector<16x32xi1>, vector<16x32xf32>
    %518 = arith.select %516, %509, %474 : vector<16x32xi1>, vector<16x32xf32>
    %cst_290 = arith.constant 0.000000e+00 : f32
    %519 = vector.broadcast %cst_290 : f32 to vector<16x32xf32>
    %520 = arith.select %516, %511, %519 : vector<16x32xi1>, vector<16x32xf32>
    %521 = vector.extract_strided_slice %520 {offsets = [0, 0], sizes = [8, 32], strides = [1, 1]} : vector<16x32xf32> to vector<8x32xf32>
    %c48_291 = arith.constant 48 : index
    %c0_292 = arith.constant 0 : index
    %522 = vector.load %arg22[%c48_291, %c0_292] : memref<128x64xf32, #tpu.memory_space<vmem>>, vector<8x32xf32>
    tpu.vector_store %arg22[%c48_291, %c0_292], %521 {strides = array<i32>} : memref<128x64xf32, #tpu.memory_space<vmem>>, vector<8x32xf32>,
    %523 = vector.extract_strided_slice %520 {offsets = [8, 0], sizes = [8, 32], strides = [1, 1]} : vector<16x32xf32> to vector<8x32xf32>
    %c72_293 = arith.constant 72 : index
    %c32_294 = arith.constant 32 : index
    %524 = vector.load %arg22[%c72_293, %c32_294] : memref<128x64xf32, #tpu.memory_space<vmem>>, vector<8x32xf32>
    tpu.vector_store %arg22[%c72_293, %c32_294], %523 {strides = array<i32>} : memref<128x64xf32, #tpu.memory_space<vmem>>, vector<8x32xf32>,
    %cst_295 = arith.constant dense<0.000000e+00> : vector<16x256xf32>
    %525 = tpu.matmul %517, %211, %cst_295 {dimension_numbers = #tpu.dot_dimension_numbers<[1], [0], [0], [1], [0, 0, 1, 1], [], []>} : vector<16x32xf32>, vector<32x256xf32>, vector<16x256xf32> -> vector<16x256xf32>
    %526 = vector.extract_strided_slice %525 {offsets = [0, 0], sizes = [16, 128], strides = [1, 1]} : vector<16x256xf32> to vector<16x128xf32>
    %527 = vector.extract_strided_slice %525 {offsets = [0, 128], sizes = [16, 128], strides = [1, 1]} : vector<16x256xf32> to vector<16x128xf32>
    %528 = arith.select %214, %526, %527 : vector<16x128xi1>, vector<16x128xf32>
    %c112_296 = arith.constant 112 : index
    %c0_297 = arith.constant 0 : index
    %529 = vector.load %arg21[%c112_296, %c0_297] : memref<256x128xf32, #tpu.memory_space<vmem>>, vector<16x128xf32>
    %530 = arith.addf %529, %528 : vector<16x128xf32>
    %531 = vector.extract_strided_slice %530 {offsets = [0, 0], sizes = [16, 32], strides = [1, 1]} : vector<16x128xf32> to vector<16x32xf32>
    %532 = arith.negf %531 : vector<16x32xf32>
    %533 = math.exp %532 : vector<16x32xf32>
    %cst_298 = arith.constant 1.000000e+00 : f32
    %534 = vector.broadcast %cst_298 : f32 to vector<16x32xf32>
    %535 = arith.addf %534, %533 : vector<16x32xf32>
    %536 = arith.divf %534, %535 : vector<16x32xf32>
    %537 = vector.extract_strided_slice %530 {offsets = [0, 32], sizes = [16, 32], strides = [1, 1]} : vector<16x128xf32> to vector<16x32xf32>
    %538 = arith.negf %537 : vector<16x32xf32>
    %539 = math.exp %538 : vector<16x32xf32>
    %cst_299 = arith.constant 1.000000e+00 : f32
    %540 = vector.broadcast %cst_299 : f32 to vector<16x32xf32>
    %541 = arith.addf %540, %539 : vector<16x32xf32>
    %542 = arith.divf %540, %541 : vector<16x32xf32>
    %543 = vector.extract_strided_slice %530 {offsets = [0, 64], sizes = [16, 32], strides = [1, 1]} : vector<16x128xf32> to vector<16x32xf32>
    %544 = math.tanh %543 : vector<16x32xf32>
    %545 = vector.extract_strided_slice %530 {offsets = [0, 96], sizes = [16, 32], strides = [1, 1]} : vector<16x128xf32> to vector<16x32xf32>
    %546 = arith.negf %545 : vector<16x32xf32>
    %547 = math.exp %546 : vector<16x32xf32>
    %cst_300 = arith.constant 1.000000e+00 : f32
    %548 = vector.broadcast %cst_300 : f32 to vector<16x32xf32>
    %549 = arith.addf %548, %547 : vector<16x32xf32>
    %550 = arith.divf %548, %549 : vector<16x32xf32>
    %551 = arith.mulf %542, %518 : vector<16x32xf32>
    %552 = arith.mulf %536, %544 : vector<16x32xf32>
    %553 = arith.addf %551, %552 : vector<16x32xf32>
    %554 = math.tanh %553 : vector<16x32xf32>
    %555 = arith.mulf %550, %554 : vector<16x32xf32>
    %c112_301 = arith.constant 112 : index
    %c0_302 = arith.constant 0 : index
    %556 = vector.load %arg2[%c112_301, %c0_302] : memref<256x1xf32, #tpu.memory_space<vmem>>, vector<16x1xf32>
    %cst_303 = arith.constant 5.000000e-01 : f32
    %557 = vector.broadcast %cst_303 : f32 to vector<16x1xf32>
    %558 = arith.cmpf ogt, %556, %557 : vector<16x1xf32>
    %559 = vector.shape_cast %558 : vector<16x1xi1> to vector<16x1xi1>
    %560 = vector.broadcast %559 : vector<16x1xi1> to vector<16x32xi1>
    %561 = arith.select %560, %555, %517 : vector<16x32xi1>, vector<16x32xf32>
    %562 = arith.select %560, %553, %518 : vector<16x32xi1>, vector<16x32xf32>
    %cst_304 = arith.constant 0.000000e+00 : f32
    %563 = vector.broadcast %cst_304 : f32 to vector<16x32xf32>
    %564 = arith.select %560, %555, %563 : vector<16x32xi1>, vector<16x32xf32>
    %565 = vector.extract_strided_slice %564 {offsets = [0, 0], sizes = [8, 32], strides = [1, 1]} : vector<16x32xf32> to vector<8x32xf32>
    %c56_305 = arith.constant 56 : index
    %c0_306 = arith.constant 0 : index
    %566 = vector.load %arg22[%c56_305, %c0_306] : memref<128x64xf32, #tpu.memory_space<vmem>>, vector<8x32xf32>
    tpu.vector_store %arg22[%c56_305, %c0_306], %565 {strides = array<i32>} : memref<128x64xf32, #tpu.memory_space<vmem>>, vector<8x32xf32>,
    %567 = vector.extract_strided_slice %564 {offsets = [8, 0], sizes = [8, 32], strides = [1, 1]} : vector<16x32xf32> to vector<8x32xf32>
    %c64_307 = arith.constant 64 : index
    %c32_308 = arith.constant 32 : index
    %568 = vector.load %arg22[%c64_307, %c32_308] : memref<128x64xf32, #tpu.memory_space<vmem>>, vector<8x32xf32>
    tpu.vector_store %arg22[%c64_307, %c32_308], %567 {strides = array<i32>} : memref<128x64xf32, #tpu.memory_space<vmem>>, vector<8x32xf32>,
    %cst_309 = arith.constant dense<0.000000e+00> : vector<16x256xf32>
    %569 = tpu.matmul %561, %211, %cst_309 {dimension_numbers = #tpu.dot_dimension_numbers<[1], [0], [0], [1], [0, 0, 1, 1], [], []>} : vector<16x32xf32>, vector<32x256xf32>, vector<16x256xf32> -> vector<16x256xf32>
    %570 = vector.extract_strided_slice %569 {offsets = [0, 0], sizes = [16, 128], strides = [1, 1]} : vector<16x256xf32> to vector<16x128xf32>
    %571 = vector.extract_strided_slice %569 {offsets = [0, 128], sizes = [16, 128], strides = [1, 1]} : vector<16x256xf32> to vector<16x128xf32>
    %572 = arith.select %214, %570, %571 : vector<16x128xi1>, vector<16x128xf32>
    %c128_310 = arith.constant 128 : index
    %c0_311 = arith.constant 0 : index
    %573 = vector.load %arg21[%c128_310, %c0_311] : memref<256x128xf32, #tpu.memory_space<vmem>>, vector<16x128xf32>
    %574 = arith.addf %573, %572 : vector<16x128xf32>
    %575 = vector.extract_strided_slice %574 {offsets = [0, 0], sizes = [16, 32], strides = [1, 1]} : vector<16x128xf32> to vector<16x32xf32>
    %576 = arith.negf %575 : vector<16x32xf32>
    %577 = math.exp %576 : vector<16x32xf32>
    %cst_312 = arith.constant 1.000000e+00 : f32
    %578 = vector.broadcast %cst_312 : f32 to vector<16x32xf32>
    %579 = arith.addf %578, %577 : vector<16x32xf32>
    %580 = arith.divf %578, %579 : vector<16x32xf32>
    %581 = vector.extract_strided_slice %574 {offsets = [0, 32], sizes = [16, 32], strides = [1, 1]} : vector<16x128xf32> to vector<16x32xf32>
    %582 = arith.negf %581 : vector<16x32xf32>
    %583 = math.exp %582 : vector<16x32xf32>
    %cst_313 = arith.constant 1.000000e+00 : f32
    %584 = vector.broadcast %cst_313 : f32 to vector<16x32xf32>
    %585 = arith.addf %584, %583 : vector<16x32xf32>
    %586 = arith.divf %584, %585 : vector<16x32xf32>
    %587 = vector.extract_strided_slice %574 {offsets = [0, 64], sizes = [16, 32], strides = [1, 1]} : vector<16x128xf32> to vector<16x32xf32>
    %588 = math.tanh %587 : vector<16x32xf32>
    %589 = vector.extract_strided_slice %574 {offsets = [0, 96], sizes = [16, 32], strides = [1, 1]} : vector<16x128xf32> to vector<16x32xf32>
    %590 = arith.negf %589 : vector<16x32xf32>
    %591 = math.exp %590 : vector<16x32xf32>
    %cst_314 = arith.constant 1.000000e+00 : f32
    %592 = vector.broadcast %cst_314 : f32 to vector<16x32xf32>
    %593 = arith.addf %592, %591 : vector<16x32xf32>
    %594 = arith.divf %592, %593 : vector<16x32xf32>
    %595 = arith.mulf %586, %562 : vector<16x32xf32>
    %596 = arith.mulf %580, %588 : vector<16x32xf32>
    %597 = arith.addf %595, %596 : vector<16x32xf32>
    %598 = math.tanh %597 : vector<16x32xf32>
    %599 = arith.mulf %594, %598 : vector<16x32xf32>
    %c128_315 = arith.constant 128 : index
    %c0_316 = arith.constant 0 : index
    %600 = vector.load %arg2[%c128_315, %c0_316] : memref<256x1xf32, #tpu.memory_space<vmem>>, vector<16x1xf32>
    %cst_317 = arith.constant 5.000000e-01 : f32
    %601 = vector.broadcast %cst_317 : f32 to vector<16x1xf32>
    %602 = arith.cmpf ogt, %600, %601 : vector<16x1xf32>
    %603 = vector.shape_cast %602 : vector<16x1xi1> to vector<16x1xi1>
    %604 = vector.broadcast %603 : vector<16x1xi1> to vector<16x32xi1>
    %605 = arith.select %604, %599, %561 : vector<16x32xi1>, vector<16x32xf32>
    %606 = arith.select %604, %597, %562 : vector<16x32xi1>, vector<16x32xf32>
    %cst_318 = arith.constant 0.000000e+00 : f32
    %607 = vector.broadcast %cst_318 : f32 to vector<16x32xf32>
    %608 = arith.select %604, %599, %607 : vector<16x32xi1>, vector<16x32xf32>
    %609 = vector.extract_strided_slice %608 {offsets = [0, 0], sizes = [8, 32], strides = [1, 1]} : vector<16x32xf32> to vector<8x32xf32>
    %c64_319 = arith.constant 64 : index
    %c0_320 = arith.constant 0 : index
    %610 = vector.load %arg22[%c64_319, %c0_320] : memref<128x64xf32, #tpu.memory_space<vmem>>, vector<8x32xf32>
    tpu.vector_store %arg22[%c64_319, %c0_320], %609 {strides = array<i32>} : memref<128x64xf32, #tpu.memory_space<vmem>>, vector<8x32xf32>,
    %611 = vector.extract_strided_slice %608 {offsets = [8, 0], sizes = [8, 32], strides = [1, 1]} : vector<16x32xf32> to vector<8x32xf32>
    %c56_321 = arith.constant 56 : index
    %c32_322 = arith.constant 32 : index
    %612 = vector.load %arg22[%c56_321, %c32_322] : memref<128x64xf32, #tpu.memory_space<vmem>>, vector<8x32xf32>
    tpu.vector_store %arg22[%c56_321, %c32_322], %611 {strides = array<i32>} : memref<128x64xf32, #tpu.memory_space<vmem>>, vector<8x32xf32>,
    %cst_323 = arith.constant dense<0.000000e+00> : vector<16x256xf32>
    %613 = tpu.matmul %605, %211, %cst_323 {dimension_numbers = #tpu.dot_dimension_numbers<[1], [0], [0], [1], [0, 0, 1, 1], [], []>} : vector<16x32xf32>, vector<32x256xf32>, vector<16x256xf32> -> vector<16x256xf32>
    %614 = vector.extract_strided_slice %613 {offsets = [0, 0], sizes = [16, 128], strides = [1, 1]} : vector<16x256xf32> to vector<16x128xf32>
    %615 = vector.extract_strided_slice %613 {offsets = [0, 128], sizes = [16, 128], strides = [1, 1]} : vector<16x256xf32> to vector<16x128xf32>
    %616 = arith.select %214, %614, %615 : vector<16x128xi1>, vector<16x128xf32>
    %c144_324 = arith.constant 144 : index
    %c0_325 = arith.constant 0 : index
    %617 = vector.load %arg21[%c144_324, %c0_325] : memref<256x128xf32, #tpu.memory_space<vmem>>, vector<16x128xf32>
    %618 = arith.addf %617, %616 : vector<16x128xf32>
    %619 = vector.extract_strided_slice %618 {offsets = [0, 0], sizes = [16, 32], strides = [1, 1]} : vector<16x128xf32> to vector<16x32xf32>
    %620 = arith.negf %619 : vector<16x32xf32>
    %621 = math.exp %620 : vector<16x32xf32>
    %cst_326 = arith.constant 1.000000e+00 : f32
    %622 = vector.broadcast %cst_326 : f32 to vector<16x32xf32>
    %623 = arith.addf %622, %621 : vector<16x32xf32>
    %624 = arith.divf %622, %623 : vector<16x32xf32>
    %625 = vector.extract_strided_slice %618 {offsets = [0, 32], sizes = [16, 32], strides = [1, 1]} : vector<16x128xf32> to vector<16x32xf32>
    %626 = arith.negf %625 : vector<16x32xf32>
    %627 = math.exp %626 : vector<16x32xf32>
    %cst_327 = arith.constant 1.000000e+00 : f32
    %628 = vector.broadcast %cst_327 : f32 to vector<16x32xf32>
    %629 = arith.addf %628, %627 : vector<16x32xf32>
    %630 = arith.divf %628, %629 : vector<16x32xf32>
    %631 = vector.extract_strided_slice %618 {offsets = [0, 64], sizes = [16, 32], strides = [1, 1]} : vector<16x128xf32> to vector<16x32xf32>
    %632 = math.tanh %631 : vector<16x32xf32>
    %633 = vector.extract_strided_slice %618 {offsets = [0, 96], sizes = [16, 32], strides = [1, 1]} : vector<16x128xf32> to vector<16x32xf32>
    %634 = arith.negf %633 : vector<16x32xf32>
    %635 = math.exp %634 : vector<16x32xf32>
    %cst_328 = arith.constant 1.000000e+00 : f32
    %636 = vector.broadcast %cst_328 : f32 to vector<16x32xf32>
    %637 = arith.addf %636, %635 : vector<16x32xf32>
    %638 = arith.divf %636, %637 : vector<16x32xf32>
    %639 = arith.mulf %630, %606 : vector<16x32xf32>
    %640 = arith.mulf %624, %632 : vector<16x32xf32>
    %641 = arith.addf %639, %640 : vector<16x32xf32>
    %642 = math.tanh %641 : vector<16x32xf32>
    %643 = arith.mulf %638, %642 : vector<16x32xf32>
    %c144_329 = arith.constant 144 : index
    %c0_330 = arith.constant 0 : index
    %644 = vector.load %arg2[%c144_329, %c0_330] : memref<256x1xf32, #tpu.memory_space<vmem>>, vector<16x1xf32>
    %cst_331 = arith.constant 5.000000e-01 : f32
    %645 = vector.broadcast %cst_331 : f32 to vector<16x1xf32>
    %646 = arith.cmpf ogt, %644, %645 : vector<16x1xf32>
    %647 = vector.shape_cast %646 : vector<16x1xi1> to vector<16x1xi1>
    %648 = vector.broadcast %647 : vector<16x1xi1> to vector<16x32xi1>
    %649 = arith.select %648, %643, %605 : vector<16x32xi1>, vector<16x32xf32>
    %650 = arith.select %648, %641, %606 : vector<16x32xi1>, vector<16x32xf32>
    %cst_332 = arith.constant 0.000000e+00 : f32
    %651 = vector.broadcast %cst_332 : f32 to vector<16x32xf32>
    %652 = arith.select %648, %643, %651 : vector<16x32xi1>, vector<16x32xf32>
    %653 = vector.extract_strided_slice %652 {offsets = [0, 0], sizes = [8, 32], strides = [1, 1]} : vector<16x32xf32> to vector<8x32xf32>
    %c72_333 = arith.constant 72 : index
    %c0_334 = arith.constant 0 : index
    %654 = vector.load %arg22[%c72_333, %c0_334] : memref<128x64xf32, #tpu.memory_space<vmem>>, vector<8x32xf32>
    tpu.vector_store %arg22[%c72_333, %c0_334], %653 {strides = array<i32>} : memref<128x64xf32, #tpu.memory_space<vmem>>, vector<8x32xf32>,
    %655 = vector.extract_strided_slice %652 {offsets = [8, 0], sizes = [8, 32], strides = [1, 1]} : vector<16x32xf32> to vector<8x32xf32>
    %c48_335 = arith.constant 48 : index
    %c32_336 = arith.constant 32 : index
    %656 = vector.load %arg22[%c48_335, %c32_336] : memref<128x64xf32, #tpu.memory_space<vmem>>, vector<8x32xf32>
    tpu.vector_store %arg22[%c48_335, %c32_336], %655 {strides = array<i32>} : memref<128x64xf32, #tpu.memory_space<vmem>>, vector<8x32xf32>,
    %cst_337 = arith.constant dense<0.000000e+00> : vector<16x256xf32>
    %657 = tpu.matmul %649, %211, %cst_337 {dimension_numbers = #tpu.dot_dimension_numbers<[1], [0], [0], [1], [0, 0, 1, 1], [], []>} : vector<16x32xf32>, vector<32x256xf32>, vector<16x256xf32> -> vector<16x256xf32>
    %658 = vector.extract_strided_slice %657 {offsets = [0, 0], sizes = [16, 128], strides = [1, 1]} : vector<16x256xf32> to vector<16x128xf32>
    %659 = vector.extract_strided_slice %657 {offsets = [0, 128], sizes = [16, 128], strides = [1, 1]} : vector<16x256xf32> to vector<16x128xf32>
    %660 = arith.select %214, %658, %659 : vector<16x128xi1>, vector<16x128xf32>
    %c160_338 = arith.constant 160 : index
    %c0_339 = arith.constant 0 : index
    %661 = vector.load %arg21[%c160_338, %c0_339] : memref<256x128xf32, #tpu.memory_space<vmem>>, vector<16x128xf32>
    %662 = arith.addf %661, %660 : vector<16x128xf32>
    %663 = vector.extract_strided_slice %662 {offsets = [0, 0], sizes = [16, 32], strides = [1, 1]} : vector<16x128xf32> to vector<16x32xf32>
    %664 = arith.negf %663 : vector<16x32xf32>
    %665 = math.exp %664 : vector<16x32xf32>
    %cst_340 = arith.constant 1.000000e+00 : f32
    %666 = vector.broadcast %cst_340 : f32 to vector<16x32xf32>
    %667 = arith.addf %666, %665 : vector<16x32xf32>
    %668 = arith.divf %666, %667 : vector<16x32xf32>
    %669 = vector.extract_strided_slice %662 {offsets = [0, 32], sizes = [16, 32], strides = [1, 1]} : vector<16x128xf32> to vector<16x32xf32>
    %670 = arith.negf %669 : vector<16x32xf32>
    %671 = math.exp %670 : vector<16x32xf32>
    %cst_341 = arith.constant 1.000000e+00 : f32
    %672 = vector.broadcast %cst_341 : f32 to vector<16x32xf32>
    %673 = arith.addf %672, %671 : vector<16x32xf32>
    %674 = arith.divf %672, %673 : vector<16x32xf32>
    %675 = vector.extract_strided_slice %662 {offsets = [0, 64], sizes = [16, 32], strides = [1, 1]} : vector<16x128xf32> to vector<16x32xf32>
    %676 = math.tanh %675 : vector<16x32xf32>
    %677 = vector.extract_strided_slice %662 {offsets = [0, 96], sizes = [16, 32], strides = [1, 1]} : vector<16x128xf32> to vector<16x32xf32>
    %678 = arith.negf %677 : vector<16x32xf32>
    %679 = math.exp %678 : vector<16x32xf32>
    %cst_342 = arith.constant 1.000000e+00 : f32
    %680 = vector.broadcast %cst_342 : f32 to vector<16x32xf32>
    %681 = arith.addf %680, %679 : vector<16x32xf32>
    %682 = arith.divf %680, %681 : vector<16x32xf32>
    %683 = arith.mulf %674, %650 : vector<16x32xf32>
    %684 = arith.mulf %668, %676 : vector<16x32xf32>
    %685 = arith.addf %683, %684 : vector<16x32xf32>
    %686 = math.tanh %685 : vector<16x32xf32>
    %687 = arith.mulf %682, %686 : vector<16x32xf32>
    %c160_343 = arith.constant 160 : index
    %c0_344 = arith.constant 0 : index
    %688 = vector.load %arg2[%c160_343, %c0_344] : memref<256x1xf32, #tpu.memory_space<vmem>>, vector<16x1xf32>
    %cst_345 = arith.constant 5.000000e-01 : f32
    %689 = vector.broadcast %cst_345 : f32 to vector<16x1xf32>
    %690 = arith.cmpf ogt, %688, %689 : vector<16x1xf32>
    %691 = vector.shape_cast %690 : vector<16x1xi1> to vector<16x1xi1>
    %692 = vector.broadcast %691 : vector<16x1xi1> to vector<16x32xi1>
    %693 = arith.select %692, %687, %649 : vector<16x32xi1>, vector<16x32xf32>
    %694 = arith.select %692, %685, %650 : vector<16x32xi1>, vector<16x32xf32>
    %cst_346 = arith.constant 0.000000e+00 : f32
    %695 = vector.broadcast %cst_346 : f32 to vector<16x32xf32>
    %696 = arith.select %692, %687, %695 : vector<16x32xi1>, vector<16x32xf32>
    %697 = vector.extract_strided_slice %696 {offsets = [0, 0], sizes = [8, 32], strides = [1, 1]} : vector<16x32xf32> to vector<8x32xf32>
    %c80_347 = arith.constant 80 : index
    %c0_348 = arith.constant 0 : index
    %698 = vector.load %arg22[%c80_347, %c0_348] : memref<128x64xf32, #tpu.memory_space<vmem>>, vector<8x32xf32>
    tpu.vector_store %arg22[%c80_347, %c0_348], %697 {strides = array<i32>} : memref<128x64xf32, #tpu.memory_space<vmem>>, vector<8x32xf32>,
    %699 = vector.extract_strided_slice %696 {offsets = [8, 0], sizes = [8, 32], strides = [1, 1]} : vector<16x32xf32> to vector<8x32xf32>
    %c40_349 = arith.constant 40 : index
    %c32_350 = arith.constant 32 : index
    %700 = vector.load %arg22[%c40_349, %c32_350] : memref<128x64xf32, #tpu.memory_space<vmem>>, vector<8x32xf32>
    tpu.vector_store %arg22[%c40_349, %c32_350], %699 {strides = array<i32>} : memref<128x64xf32, #tpu.memory_space<vmem>>, vector<8x32xf32>,
    %cst_351 = arith.constant dense<0.000000e+00> : vector<16x256xf32>
    %701 = tpu.matmul %693, %211, %cst_351 {dimension_numbers = #tpu.dot_dimension_numbers<[1], [0], [0], [1], [0, 0, 1, 1], [], []>} : vector<16x32xf32>, vector<32x256xf32>, vector<16x256xf32> -> vector<16x256xf32>
    %702 = vector.extract_strided_slice %701 {offsets = [0, 0], sizes = [16, 128], strides = [1, 1]} : vector<16x256xf32> to vector<16x128xf32>
    %703 = vector.extract_strided_slice %701 {offsets = [0, 128], sizes = [16, 128], strides = [1, 1]} : vector<16x256xf32> to vector<16x128xf32>
    %704 = arith.select %214, %702, %703 : vector<16x128xi1>, vector<16x128xf32>
    %c176_352 = arith.constant 176 : index
    %c0_353 = arith.constant 0 : index
    %705 = vector.load %arg21[%c176_352, %c0_353] : memref<256x128xf32, #tpu.memory_space<vmem>>, vector<16x128xf32>
    %706 = arith.addf %705, %704 : vector<16x128xf32>
    %707 = vector.extract_strided_slice %706 {offsets = [0, 0], sizes = [16, 32], strides = [1, 1]} : vector<16x128xf32> to vector<16x32xf32>
    %708 = arith.negf %707 : vector<16x32xf32>
    %709 = math.exp %708 : vector<16x32xf32>
    %cst_354 = arith.constant 1.000000e+00 : f32
    %710 = vector.broadcast %cst_354 : f32 to vector<16x32xf32>
    %711 = arith.addf %710, %709 : vector<16x32xf32>
    %712 = arith.divf %710, %711 : vector<16x32xf32>
    %713 = vector.extract_strided_slice %706 {offsets = [0, 32], sizes = [16, 32], strides = [1, 1]} : vector<16x128xf32> to vector<16x32xf32>
    %714 = arith.negf %713 : vector<16x32xf32>
    %715 = math.exp %714 : vector<16x32xf32>
    %cst_355 = arith.constant 1.000000e+00 : f32
    %716 = vector.broadcast %cst_355 : f32 to vector<16x32xf32>
    %717 = arith.addf %716, %715 : vector<16x32xf32>
    %718 = arith.divf %716, %717 : vector<16x32xf32>
    %719 = vector.extract_strided_slice %706 {offsets = [0, 64], sizes = [16, 32], strides = [1, 1]} : vector<16x128xf32> to vector<16x32xf32>
    %720 = math.tanh %719 : vector<16x32xf32>
    %721 = vector.extract_strided_slice %706 {offsets = [0, 96], sizes = [16, 32], strides = [1, 1]} : vector<16x128xf32> to vector<16x32xf32>
    %722 = arith.negf %721 : vector<16x32xf32>
    %723 = math.exp %722 : vector<16x32xf32>
    %cst_356 = arith.constant 1.000000e+00 : f32
    %724 = vector.broadcast %cst_356 : f32 to vector<16x32xf32>
    %725 = arith.addf %724, %723 : vector<16x32xf32>
    %726 = arith.divf %724, %725 : vector<16x32xf32>
    %727 = arith.mulf %718, %694 : vector<16x32xf32>
    %728 = arith.mulf %712, %720 : vector<16x32xf32>
    %729 = arith.addf %727, %728 : vector<16x32xf32>
    %730 = math.tanh %729 : vector<16x32xf32>
    %731 = arith.mulf %726, %730 : vector<16x32xf32>
    %c176_357 = arith.constant 176 : index
    %c0_358 = arith.constant 0 : index
    %732 = vector.load %arg2[%c176_357, %c0_358] : memref<256x1xf32, #tpu.memory_space<vmem>>, vector<16x1xf32>
    %cst_359 = arith.constant 5.000000e-01 : f32
    %733 = vector.broadcast %cst_359 : f32 to vector<16x1xf32>
    %734 = arith.cmpf ogt, %732, %733 : vector<16x1xf32>
    %735 = vector.shape_cast %734 : vector<16x1xi1> to vector<16x1xi1>
    %736 = vector.broadcast %735 : vector<16x1xi1> to vector<16x32xi1>
    %737 = arith.select %736, %731, %693 : vector<16x32xi1>, vector<16x32xf32>
    %738 = arith.select %736, %729, %694 : vector<16x32xi1>, vector<16x32xf32>
    %cst_360 = arith.constant 0.000000e+00 : f32
    %739 = vector.broadcast %cst_360 : f32 to vector<16x32xf32>
    %740 = arith.select %736, %731, %739 : vector<16x32xi1>, vector<16x32xf32>
    %741 = vector.extract_strided_slice %740 {offsets = [0, 0], sizes = [8, 32], strides = [1, 1]} : vector<16x32xf32> to vector<8x32xf32>
    %c88_361 = arith.constant 88 : index
    %c0_362 = arith.constant 0 : index
    %742 = vector.load %arg22[%c88_361, %c0_362] : memref<128x64xf32, #tpu.memory_space<vmem>>, vector<8x32xf32>
    tpu.vector_store %arg22[%c88_361, %c0_362], %741 {strides = array<i32>} : memref<128x64xf32, #tpu.memory_space<vmem>>, vector<8x32xf32>,
    %743 = vector.extract_strided_slice %740 {offsets = [8, 0], sizes = [8, 32], strides = [1, 1]} : vector<16x32xf32> to vector<8x32xf32>
    %c32_363 = arith.constant 32 : index
    %c32_364 = arith.constant 32 : index
    %744 = vector.load %arg22[%c32_363, %c32_364] : memref<128x64xf32, #tpu.memory_space<vmem>>, vector<8x32xf32>
    tpu.vector_store %arg22[%c32_363, %c32_364], %743 {strides = array<i32>} : memref<128x64xf32, #tpu.memory_space<vmem>>, vector<8x32xf32>,
    %cst_365 = arith.constant dense<0.000000e+00> : vector<16x256xf32>
    %745 = tpu.matmul %737, %211, %cst_365 {dimension_numbers = #tpu.dot_dimension_numbers<[1], [0], [0], [1], [0, 0, 1, 1], [], []>} : vector<16x32xf32>, vector<32x256xf32>, vector<16x256xf32> -> vector<16x256xf32>
    %746 = vector.extract_strided_slice %745 {offsets = [0, 0], sizes = [16, 128], strides = [1, 1]} : vector<16x256xf32> to vector<16x128xf32>
    %747 = vector.extract_strided_slice %745 {offsets = [0, 128], sizes = [16, 128], strides = [1, 1]} : vector<16x256xf32> to vector<16x128xf32>
    %748 = arith.select %214, %746, %747 : vector<16x128xi1>, vector<16x128xf32>
    %c192_366 = arith.constant 192 : index
    %c0_367 = arith.constant 0 : index
    %749 = vector.load %arg21[%c192_366, %c0_367] : memref<256x128xf32, #tpu.memory_space<vmem>>, vector<16x128xf32>
    %750 = arith.addf %749, %748 : vector<16x128xf32>
    %751 = vector.extract_strided_slice %750 {offsets = [0, 0], sizes = [16, 32], strides = [1, 1]} : vector<16x128xf32> to vector<16x32xf32>
    %752 = arith.negf %751 : vector<16x32xf32>
    %753 = math.exp %752 : vector<16x32xf32>
    %cst_368 = arith.constant 1.000000e+00 : f32
    %754 = vector.broadcast %cst_368 : f32 to vector<16x32xf32>
    %755 = arith.addf %754, %753 : vector<16x32xf32>
    %756 = arith.divf %754, %755 : vector<16x32xf32>
    %757 = vector.extract_strided_slice %750 {offsets = [0, 32], sizes = [16, 32], strides = [1, 1]} : vector<16x128xf32> to vector<16x32xf32>
    %758 = arith.negf %757 : vector<16x32xf32>
    %759 = math.exp %758 : vector<16x32xf32>
    %cst_369 = arith.constant 1.000000e+00 : f32
    %760 = vector.broadcast %cst_369 : f32 to vector<16x32xf32>
    %761 = arith.addf %760, %759 : vector<16x32xf32>
    %762 = arith.divf %760, %761 : vector<16x32xf32>
    %763 = vector.extract_strided_slice %750 {offsets = [0, 64], sizes = [16, 32], strides = [1, 1]} : vector<16x128xf32> to vector<16x32xf32>
    %764 = math.tanh %763 : vector<16x32xf32>
    %765 = vector.extract_strided_slice %750 {offsets = [0, 96], sizes = [16, 32], strides = [1, 1]} : vector<16x128xf32> to vector<16x32xf32>
    %766 = arith.negf %765 : vector<16x32xf32>
    %767 = math.exp %766 : vector<16x32xf32>
    %cst_370 = arith.constant 1.000000e+00 : f32
    %768 = vector.broadcast %cst_370 : f32 to vector<16x32xf32>
    %769 = arith.addf %768, %767 : vector<16x32xf32>
    %770 = arith.divf %768, %769 : vector<16x32xf32>
    %771 = arith.mulf %762, %738 : vector<16x32xf32>
    %772 = arith.mulf %756, %764 : vector<16x32xf32>
    %773 = arith.addf %771, %772 : vector<16x32xf32>
    %774 = math.tanh %773 : vector<16x32xf32>
    %775 = arith.mulf %770, %774 : vector<16x32xf32>
    %c192_371 = arith.constant 192 : index
    %c0_372 = arith.constant 0 : index
    %776 = vector.load %arg2[%c192_371, %c0_372] : memref<256x1xf32, #tpu.memory_space<vmem>>, vector<16x1xf32>
    %cst_373 = arith.constant 5.000000e-01 : f32
    %777 = vector.broadcast %cst_373 : f32 to vector<16x1xf32>
    %778 = arith.cmpf ogt, %776, %777 : vector<16x1xf32>
    %779 = vector.shape_cast %778 : vector<16x1xi1> to vector<16x1xi1>
    %780 = vector.broadcast %779 : vector<16x1xi1> to vector<16x32xi1>
    %781 = arith.select %780, %775, %737 : vector<16x32xi1>, vector<16x32xf32>
    %782 = arith.select %780, %773, %738 : vector<16x32xi1>, vector<16x32xf32>
    %cst_374 = arith.constant 0.000000e+00 : f32
    %783 = vector.broadcast %cst_374 : f32 to vector<16x32xf32>
    %784 = arith.select %780, %775, %783 : vector<16x32xi1>, vector<16x32xf32>
    %785 = vector.extract_strided_slice %784 {offsets = [0, 0], sizes = [8, 32], strides = [1, 1]} : vector<16x32xf32> to vector<8x32xf32>
    %c96_375 = arith.constant 96 : index
    %c0_376 = arith.constant 0 : index
    %786 = vector.load %arg22[%c96_375, %c0_376] : memref<128x64xf32, #tpu.memory_space<vmem>>, vector<8x32xf32>
    tpu.vector_store %arg22[%c96_375, %c0_376], %785 {strides = array<i32>} : memref<128x64xf32, #tpu.memory_space<vmem>>, vector<8x32xf32>,
    %787 = vector.extract_strided_slice %784 {offsets = [8, 0], sizes = [8, 32], strides = [1, 1]} : vector<16x32xf32> to vector<8x32xf32>
    %c24_377 = arith.constant 24 : index
    %c32_378 = arith.constant 32 : index
    %788 = vector.load %arg22[%c24_377, %c32_378] : memref<128x64xf32, #tpu.memory_space<vmem>>, vector<8x32xf32>
    tpu.vector_store %arg22[%c24_377, %c32_378], %787 {strides = array<i32>} : memref<128x64xf32, #tpu.memory_space<vmem>>, vector<8x32xf32>,
    %cst_379 = arith.constant dense<0.000000e+00> : vector<16x256xf32>
    %789 = tpu.matmul %781, %211, %cst_379 {dimension_numbers = #tpu.dot_dimension_numbers<[1], [0], [0], [1], [0, 0, 1, 1], [], []>} : vector<16x32xf32>, vector<32x256xf32>, vector<16x256xf32> -> vector<16x256xf32>
    %790 = vector.extract_strided_slice %789 {offsets = [0, 0], sizes = [16, 128], strides = [1, 1]} : vector<16x256xf32> to vector<16x128xf32>
    %791 = vector.extract_strided_slice %789 {offsets = [0, 128], sizes = [16, 128], strides = [1, 1]} : vector<16x256xf32> to vector<16x128xf32>
    %792 = arith.select %214, %790, %791 : vector<16x128xi1>, vector<16x128xf32>
    %c208_380 = arith.constant 208 : index
    %c0_381 = arith.constant 0 : index
    %793 = vector.load %arg21[%c208_380, %c0_381] : memref<256x128xf32, #tpu.memory_space<vmem>>, vector<16x128xf32>
    %794 = arith.addf %793, %792 : vector<16x128xf32>
    %795 = vector.extract_strided_slice %794 {offsets = [0, 0], sizes = [16, 32], strides = [1, 1]} : vector<16x128xf32> to vector<16x32xf32>
    %796 = arith.negf %795 : vector<16x32xf32>
    %797 = math.exp %796 : vector<16x32xf32>
    %cst_382 = arith.constant 1.000000e+00 : f32
    %798 = vector.broadcast %cst_382 : f32 to vector<16x32xf32>
    %799 = arith.addf %798, %797 : vector<16x32xf32>
    %800 = arith.divf %798, %799 : vector<16x32xf32>
    %801 = vector.extract_strided_slice %794 {offsets = [0, 32], sizes = [16, 32], strides = [1, 1]} : vector<16x128xf32> to vector<16x32xf32>
    %802 = arith.negf %801 : vector<16x32xf32>
    %803 = math.exp %802 : vector<16x32xf32>
    %cst_383 = arith.constant 1.000000e+00 : f32
    %804 = vector.broadcast %cst_383 : f32 to vector<16x32xf32>
    %805 = arith.addf %804, %803 : vector<16x32xf32>
    %806 = arith.divf %804, %805 : vector<16x32xf32>
    %807 = vector.extract_strided_slice %794 {offsets = [0, 64], sizes = [16, 32], strides = [1, 1]} : vector<16x128xf32> to vector<16x32xf32>
    %808 = math.tanh %807 : vector<16x32xf32>
    %809 = vector.extract_strided_slice %794 {offsets = [0, 96], sizes = [16, 32], strides = [1, 1]} : vector<16x128xf32> to vector<16x32xf32>
    %810 = arith.negf %809 : vector<16x32xf32>
    %811 = math.exp %810 : vector<16x32xf32>
    %cst_384 = arith.constant 1.000000e+00 : f32
    %812 = vector.broadcast %cst_384 : f32 to vector<16x32xf32>
    %813 = arith.addf %812, %811 : vector<16x32xf32>
    %814 = arith.divf %812, %813 : vector<16x32xf32>
    %815 = arith.mulf %806, %782 : vector<16x32xf32>
    %816 = arith.mulf %800, %808 : vector<16x32xf32>
    %817 = arith.addf %815, %816 : vector<16x32xf32>
    %818 = math.tanh %817 : vector<16x32xf32>
    %819 = arith.mulf %814, %818 : vector<16x32xf32>
    %c208_385 = arith.constant 208 : index
    %c0_386 = arith.constant 0 : index
    %820 = vector.load %arg2[%c208_385, %c0_386] : memref<256x1xf32, #tpu.memory_space<vmem>>, vector<16x1xf32>
    %cst_387 = arith.constant 5.000000e-01 : f32
    %821 = vector.broadcast %cst_387 : f32 to vector<16x1xf32>
    %822 = arith.cmpf ogt, %820, %821 : vector<16x1xf32>
    %823 = vector.shape_cast %822 : vector<16x1xi1> to vector<16x1xi1>
    %824 = vector.broadcast %823 : vector<16x1xi1> to vector<16x32xi1>
    %825 = arith.select %824, %819, %781 : vector<16x32xi1>, vector<16x32xf32>
    %826 = arith.select %824, %817, %782 : vector<16x32xi1>, vector<16x32xf32>
    %cst_388 = arith.constant 0.000000e+00 : f32
    %827 = vector.broadcast %cst_388 : f32 to vector<16x32xf32>
    %828 = arith.select %824, %819, %827 : vector<16x32xi1>, vector<16x32xf32>
    %829 = vector.extract_strided_slice %828 {offsets = [0, 0], sizes = [8, 32], strides = [1, 1]} : vector<16x32xf32> to vector<8x32xf32>
    %c104_389 = arith.constant 104 : index
    %c0_390 = arith.constant 0 : index
    %830 = vector.load %arg22[%c104_389, %c0_390] : memref<128x64xf32, #tpu.memory_space<vmem>>, vector<8x32xf32>
    tpu.vector_store %arg22[%c104_389, %c0_390], %829 {strides = array<i32>} : memref<128x64xf32, #tpu.memory_space<vmem>>, vector<8x32xf32>,
    %831 = vector.extract_strided_slice %828 {offsets = [8, 0], sizes = [8, 32], strides = [1, 1]} : vector<16x32xf32> to vector<8x32xf32>
    %c16_391 = arith.constant 16 : index
    %c32_392 = arith.constant 32 : index
    %832 = vector.load %arg22[%c16_391, %c32_392] : memref<128x64xf32, #tpu.memory_space<vmem>>, vector<8x32xf32>
    tpu.vector_store %arg22[%c16_391, %c32_392], %831 {strides = array<i32>} : memref<128x64xf32, #tpu.memory_space<vmem>>, vector<8x32xf32>,
    %cst_393 = arith.constant dense<0.000000e+00> : vector<16x256xf32>
    %833 = tpu.matmul %825, %211, %cst_393 {dimension_numbers = #tpu.dot_dimension_numbers<[1], [0], [0], [1], [0, 0, 1, 1], [], []>} : vector<16x32xf32>, vector<32x256xf32>, vector<16x256xf32> -> vector<16x256xf32>
    %834 = vector.extract_strided_slice %833 {offsets = [0, 0], sizes = [16, 128], strides = [1, 1]} : vector<16x256xf32> to vector<16x128xf32>
    %835 = vector.extract_strided_slice %833 {offsets = [0, 128], sizes = [16, 128], strides = [1, 1]} : vector<16x256xf32> to vector<16x128xf32>
    %836 = arith.select %214, %834, %835 : vector<16x128xi1>, vector<16x128xf32>
    %c224_394 = arith.constant 224 : index
    %c0_395 = arith.constant 0 : index
    %837 = vector.load %arg21[%c224_394, %c0_395] : memref<256x128xf32, #tpu.memory_space<vmem>>, vector<16x128xf32>
    %838 = arith.addf %837, %836 : vector<16x128xf32>
    %839 = vector.extract_strided_slice %838 {offsets = [0, 0], sizes = [16, 32], strides = [1, 1]} : vector<16x128xf32> to vector<16x32xf32>
    %840 = arith.negf %839 : vector<16x32xf32>
    %841 = math.exp %840 : vector<16x32xf32>
    %cst_396 = arith.constant 1.000000e+00 : f32
    %842 = vector.broadcast %cst_396 : f32 to vector<16x32xf32>
    %843 = arith.addf %842, %841 : vector<16x32xf32>
    %844 = arith.divf %842, %843 : vector<16x32xf32>
    %845 = vector.extract_strided_slice %838 {offsets = [0, 32], sizes = [16, 32], strides = [1, 1]} : vector<16x128xf32> to vector<16x32xf32>
    %846 = arith.negf %845 : vector<16x32xf32>
    %847 = math.exp %846 : vector<16x32xf32>
    %cst_397 = arith.constant 1.000000e+00 : f32
    %848 = vector.broadcast %cst_397 : f32 to vector<16x32xf32>
    %849 = arith.addf %848, %847 : vector<16x32xf32>
    %850 = arith.divf %848, %849 : vector<16x32xf32>
    %851 = vector.extract_strided_slice %838 {offsets = [0, 64], sizes = [16, 32], strides = [1, 1]} : vector<16x128xf32> to vector<16x32xf32>
    %852 = math.tanh %851 : vector<16x32xf32>
    %853 = vector.extract_strided_slice %838 {offsets = [0, 96], sizes = [16, 32], strides = [1, 1]} : vector<16x128xf32> to vector<16x32xf32>
    %854 = arith.negf %853 : vector<16x32xf32>
    %855 = math.exp %854 : vector<16x32xf32>
    %cst_398 = arith.constant 1.000000e+00 : f32
    %856 = vector.broadcast %cst_398 : f32 to vector<16x32xf32>
    %857 = arith.addf %856, %855 : vector<16x32xf32>
    %858 = arith.divf %856, %857 : vector<16x32xf32>
    %859 = arith.mulf %850, %826 : vector<16x32xf32>
    %860 = arith.mulf %844, %852 : vector<16x32xf32>
    %861 = arith.addf %859, %860 : vector<16x32xf32>
    %862 = math.tanh %861 : vector<16x32xf32>
    %863 = arith.mulf %858, %862 : vector<16x32xf32>
    %c224_399 = arith.constant 224 : index
    %c0_400 = arith.constant 0 : index
    %864 = vector.load %arg2[%c224_399, %c0_400] : memref<256x1xf32, #tpu.memory_space<vmem>>, vector<16x1xf32>
    %cst_401 = arith.constant 5.000000e-01 : f32
    %865 = vector.broadcast %cst_401 : f32 to vector<16x1xf32>
    %866 = arith.cmpf ogt, %864, %865 : vector<16x1xf32>
    %867 = vector.shape_cast %866 : vector<16x1xi1> to vector<16x1xi1>
    %868 = vector.broadcast %867 : vector<16x1xi1> to vector<16x32xi1>
    %869 = arith.select %868, %863, %825 : vector<16x32xi1>, vector<16x32xf32>
    %870 = arith.select %868, %861, %826 : vector<16x32xi1>, vector<16x32xf32>
    %cst_402 = arith.constant 0.000000e+00 : f32
    %871 = vector.broadcast %cst_402 : f32 to vector<16x32xf32>
    %872 = arith.select %868, %863, %871 : vector<16x32xi1>, vector<16x32xf32>
    %873 = vector.extract_strided_slice %872 {offsets = [0, 0], sizes = [8, 32], strides = [1, 1]} : vector<16x32xf32> to vector<8x32xf32>
    %c112_403 = arith.constant 112 : index
    %c0_404 = arith.constant 0 : index
    %874 = vector.load %arg22[%c112_403, %c0_404] : memref<128x64xf32, #tpu.memory_space<vmem>>, vector<8x32xf32>
    tpu.vector_store %arg22[%c112_403, %c0_404], %873 {strides = array<i32>} : memref<128x64xf32, #tpu.memory_space<vmem>>, vector<8x32xf32>,
    %875 = vector.extract_strided_slice %872 {offsets = [8, 0], sizes = [8, 32], strides = [1, 1]} : vector<16x32xf32> to vector<8x32xf32>
    %c8_405 = arith.constant 8 : index
    %c32_406 = arith.constant 32 : index
    %876 = vector.load %arg22[%c8_405, %c32_406] : memref<128x64xf32, #tpu.memory_space<vmem>>, vector<8x32xf32>
    tpu.vector_store %arg22[%c8_405, %c32_406], %875 {strides = array<i32>} : memref<128x64xf32, #tpu.memory_space<vmem>>, vector<8x32xf32>,
    %cst_407 = arith.constant dense<0.000000e+00> : vector<16x256xf32>
    %877 = tpu.matmul %869, %211, %cst_407 {dimension_numbers = #tpu.dot_dimension_numbers<[1], [0], [0], [1], [0, 0, 1, 1], [], []>} : vector<16x32xf32>, vector<32x256xf32>, vector<16x256xf32> -> vector<16x256xf32>
    %878 = vector.extract_strided_slice %877 {offsets = [0, 0], sizes = [16, 128], strides = [1, 1]} : vector<16x256xf32> to vector<16x128xf32>
    %879 = vector.extract_strided_slice %877 {offsets = [0, 128], sizes = [16, 128], strides = [1, 1]} : vector<16x256xf32> to vector<16x128xf32>
    %880 = arith.select %214, %878, %879 : vector<16x128xi1>, vector<16x128xf32>
    %c240_408 = arith.constant 240 : index
    %c0_409 = arith.constant 0 : index
    %881 = vector.load %arg21[%c240_408, %c0_409] : memref<256x128xf32, #tpu.memory_space<vmem>>, vector<16x128xf32>
    %882 = arith.addf %881, %880 : vector<16x128xf32>
    %883 = vector.extract_strided_slice %882 {offsets = [0, 0], sizes = [16, 32], strides = [1, 1]} : vector<16x128xf32> to vector<16x32xf32>
    %884 = arith.negf %883 : vector<16x32xf32>
    %885 = math.exp %884 : vector<16x32xf32>
    %cst_410 = arith.constant 1.000000e+00 : f32
    %886 = vector.broadcast %cst_410 : f32 to vector<16x32xf32>
    %887 = arith.addf %886, %885 : vector<16x32xf32>
    %888 = arith.divf %886, %887 : vector<16x32xf32>
    %889 = vector.extract_strided_slice %882 {offsets = [0, 32], sizes = [16, 32], strides = [1, 1]} : vector<16x128xf32> to vector<16x32xf32>
    %890 = arith.negf %889 : vector<16x32xf32>
    %891 = math.exp %890 : vector<16x32xf32>
    %cst_411 = arith.constant 1.000000e+00 : f32
    %892 = vector.broadcast %cst_411 : f32 to vector<16x32xf32>
    %893 = arith.addf %892, %891 : vector<16x32xf32>
    %894 = arith.divf %892, %893 : vector<16x32xf32>
    %895 = vector.extract_strided_slice %882 {offsets = [0, 64], sizes = [16, 32], strides = [1, 1]} : vector<16x128xf32> to vector<16x32xf32>
    %896 = math.tanh %895 : vector<16x32xf32>
    %897 = vector.extract_strided_slice %882 {offsets = [0, 96], sizes = [16, 32], strides = [1, 1]} : vector<16x128xf32> to vector<16x32xf32>
    %898 = arith.negf %897 : vector<16x32xf32>
    %899 = math.exp %898 : vector<16x32xf32>
    %cst_412 = arith.constant 1.000000e+00 : f32
    %900 = vector.broadcast %cst_412 : f32 to vector<16x32xf32>
    %901 = arith.addf %900, %899 : vector<16x32xf32>
    %902 = arith.divf %900, %901 : vector<16x32xf32>
    %903 = arith.mulf %894, %870 : vector<16x32xf32>
    %904 = arith.mulf %888, %896 : vector<16x32xf32>
    %905 = arith.addf %903, %904 : vector<16x32xf32>
    %906 = math.tanh %905 : vector<16x32xf32>
    %907 = arith.mulf %902, %906 : vector<16x32xf32>
    %c240_413 = arith.constant 240 : index
    %c0_414 = arith.constant 0 : index
    %908 = vector.load %arg2[%c240_413, %c0_414] : memref<256x1xf32, #tpu.memory_space<vmem>>, vector<16x1xf32>
    %cst_415 = arith.constant 5.000000e-01 : f32
    %909 = vector.broadcast %cst_415 : f32 to vector<16x1xf32>
    %910 = arith.cmpf ogt, %908, %909 : vector<16x1xf32>
    %911 = vector.shape_cast %910 : vector<16x1xi1> to vector<16x1xi1>
    %912 = vector.broadcast %911 : vector<16x1xi1> to vector<16x32xi1>
    %cst_416 = arith.constant 0.000000e+00 : f32
    %913 = vector.broadcast %cst_416 : f32 to vector<16x32xf32>
    %914 = arith.select %912, %907, %913 : vector<16x32xi1>, vector<16x32xf32>
    %915 = vector.extract_strided_slice %914 {offsets = [0, 0], sizes = [8, 32], strides = [1, 1]} : vector<16x32xf32> to vector<8x32xf32>
    %c120_417 = arith.constant 120 : index
    %c0_418 = arith.constant 0 : index
    %916 = vector.load %arg22[%c120_417, %c0_418] : memref<128x64xf32, #tpu.memory_space<vmem>>, vector<8x32xf32>
    tpu.vector_store %arg22[%c120_417, %c0_418], %915 {strides = array<i32>} : memref<128x64xf32, #tpu.memory_space<vmem>>, vector<8x32xf32>,
    %917 = vector.extract_strided_slice %914 {offsets = [8, 0], sizes = [8, 32], strides = [1, 1]} : vector<16x32xf32> to vector<8x32xf32>
    %c0_419 = arith.constant 0 : index
    %c32_420 = arith.constant 32 : index
    %918 = vector.load %arg22[%c0_419, %c32_420] : memref<128x64xf32, #tpu.memory_space<vmem>>, vector<8x32xf32>
    tpu.vector_store %arg22[%c0_419, %c32_420], %917 {strides = array<i32>} : memref<128x64xf32, #tpu.memory_space<vmem>>, vector<8x32xf32>,
    %c0_421 = arith.constant 0 : index
    %c0_422 = arith.constant 0 : index
    %919 = vector.load %arg22[%c0_421, %c0_422] : memref<128x64xf32, #tpu.memory_space<vmem>>, vector<128x64xf32>
    %c0_423 = arith.constant 0 : index
    %c0_424 = arith.constant 0 : index
    %920 = vector.load %arg16[%c0_423, %c0_424] : memref<64x128xf32, #tpu.memory_space<vmem>>, vector<64x128xf32>
    %cst_425 = arith.constant dense<0.000000e+00> : vector<128x128xf32>
    %921 = tpu.matmul %919, %920, %cst_425 {dimension_numbers = #tpu.dot_dimension_numbers<[1], [0], [0], [1], [0, 0, 1, 1], [], []>} : vector<128x64xf32>, vector<64x128xf32>, vector<128x128xf32> -> vector<128x128xf32>
    %c0_426 = arith.constant 0 : index
    %c0_427 = arith.constant 0 : index
    %922 = vector.load %arg17[%c0_426, %c0_427] : memref<1x128xf32, #tpu.memory_space<vmem>>, vector<1x128xf32>
    %923 = vector.broadcast %922 : vector<1x128xf32> to vector<128x128xf32>
    %924 = arith.addf %921, %923 : vector<128x128xf32>
    %cst_428 = arith.constant dense<0xFF800000> : vector<128xf32>
    %925 = vector.multi_reduction <maximumf>, %924, %cst_428 [1] : vector<128x128xf32> to vector<128xf32>
    %926 = vector.shape_cast %925 : vector<128xf32> to vector<128x1xf32>
    %927 = vector.broadcast %926 : vector<128x1xf32> to vector<128x128xf32>
    %928 = arith.subf %924, %927 : vector<128x128xf32>
    %929 = math.exp %928 : vector<128x128xf32>
    %cst_429 = arith.constant dense<0.000000e+00> : vector<128xf32>
    %930 = vector.multi_reduction <add>, %929, %cst_429 [1] : vector<128x128xf32> to vector<128xf32>
    %931 = vector.shape_cast %930 : vector<128xf32> to vector<128x1xf32>
    %932 = math.log %931 : vector<128x1xf32>
    %933 = vector.broadcast %932 : vector<128x1xf32> to vector<128x128xf32>
    %934 = arith.subf %928, %933 : vector<128x128xf32>
    %c0_430 = arith.constant 0 : index
    %c0_431 = arith.constant 0 : index
    %935 = vector.load %arg18[%c0_430, %c0_431] : memref<128x128xf32, #tpu.memory_space<vmem>>, vector<128x128xf32>
    tpu.vector_store %arg18[%c0_430, %c0_431], %934 {strides = array<i32>} : memref<128x128xf32, #tpu.memory_space<vmem>>, vector<128x128xf32>,
    return
  }
}

</mosaic_0001>

<bundles_post_ra>
// kernel: model_forward.1
= control target key start
LH: loop header
LB: loop body
LE: loop exit
PB: predicated region body
PF: predicated region fallthrough
CT: control target
= control target key end

     0   :  { %vm92_vm0 = vcmask 654336   ;;  %vm286_vm1 = vcmask 392192   ;;  %vm323_vm2 = vcmask 130048   ;;  %v8784_v33 = vmov 0.0   ;;  %s8785_s28 = smov 16   ;;  %s12308_s3 = inlined_call_operand.vmem [shape: f32[80,32], index: 3, kind: input, shape index: {}]   ;;  %s12309_s0 = inlined_call_operand.vmem [shape: f32[128,80], index: 0, kind: input, shape index: {}]   ;;  %s12310_s5 = inlined_call_operand.vmem [shape: f32[5,48,32], index: 5, kind: input, shape index: {}]   ;;  %s12311_s1 = inlined_call_operand.vmem [shape: f32[128,16], index: 1, kind: input, shape index: {}]   ;;  %s12312_s4 = inlined_call_operand.vmem [shape: f32[1,32], index: 4, kind: input, shape index: {}]   ;;  %s12313_s9 = inlined_call_operand.vmem [shape: f32[4,160,32], index: 9, kind: input, shape index: {}]   ;;  %s12314_s6 = inlined_call_operand.vmem [shape: f32[1,32], index: 6, kind: input, shape index: {}]   ;;  %s12315_s7 = inlined_call_operand.vmem [shape: f32[1,32], index: 7, kind: input, shape index: {}]   ;;  %s12316_s8 = inlined_call_operand.vmem [shape: f32[1,32], index: 8, kind: input, shape index: {}]   ;;  %s12317_s10 = inlined_call_operand.vmem [shape: f32[4,1,32], index: 10, kind: input, shape index: {}]   ;;  %s12318_s11 = inlined_call_operand.vmem [shape: f32[4,1,32], index: 11, kind: input, shape index: {}]   ;;  %s12319_s12 = inlined_call_operand.vmem [shape: f32[4,1,32], index: 12, kind: input, shape index: {}]   ;;  %s12320_s13 = inlined_call_operand.vmem [shape: f32[32,256], index: 13, kind: input, shape index: {}]   ;;  %s12321_s14 = inlined_call_operand.vmem [shape: f32[32,256], index: 14, kind: input, shape index: {}]   ;;  %s12322_s15 = inlined_call_operand.vmem [shape: f32[1,256], index: 15, kind: input, shape index: {}]   ;;  %s12323_s2 = inlined_call_operand.vmem [shape: f32[256,1], index: 2, kind: input, shape index: {}]   ;;  %s12324_s16 = inlined_call_operand.vmem [shape: f32[64,128], index: 16, kind: input, shape index: {}]   ;;  %s12325_s17 = inlined_call_operand.vmem [shape: f32[1,128], index: 17, kind: input, shape index: {}]   ;;  %s12326_s18 = inlined_call_operand.vmem [shape: f32[128,128], index: 18, kind: output, shape index: {}]  }
   0x1   :  { %12371 = sst [smem:[#allocation29_spill]] %s12308_s3  ;;  %289 = vst.msk [vmem:[#allocation2 + $0x10] sm:$0xff] %vm286_vm1, %v8784_v33  ;;  %v307_v34 = vld [vmem:[%s12311_s1] sm:$0xff]  ;;  %287 = vst.msk [vmem:[#allocation2] sm:$0xff] %vm286_vm1, %v8784_v33  ;;  %v309_v39 = vld [vmem:[%s12311_s1 + $0x10] sm:$0xff]  ;;  %vm404_vm3 = vcmask 392320  }
   0x2   :  { %12372 = sst [smem:[#allocation30_spill]] %s12309_s0  ;;  %s12374_s29 = sld [smem:[#allocation29_spill]]  ;;  %288 = vst.msk [vmem:[#allocation2 + $0x8] sm:$0xff] %vm286_vm1, %v8784_v33  ;;  %290 = vst.msk [vmem:[#allocation2 + $0x18] sm:$0xff] %vm286_vm1, %v8784_v33  ;;  %v308_v42 = vld [vmem:[%s12311_s1 + $0x8] sm:$0xff]  ;;  %v310_v45 = vld [vmem:[%s12311_s1 + $0x18] sm:$0xff] }
   0x3   :  { %12373 = sst [smem:[#allocation31_spill]] %s12310_s5  ;;  %s12375_s27 = sld [smem:[#allocation30_spill]]  ;;  %291 = vst.msk [vmem:[#allocation2 + $0x20] sm:$0xff] %vm286_vm1, %v8784_v33  ;;  %292 = vst.msk [vmem:[#allocation2 + $0x28] sm:$0xff] %vm286_vm1, %v8784_v33  ;;  %v311_v46 = vld [vmem:[%s12311_s1 + $0x20] sm:$0xff]  ;;  %v312_v52 = vld [vmem:[%s12311_s1 + $0x28] sm:$0xff] }
   0x4   :  { %s12376_s26 = sld [smem:[#allocation31_spill]]  ;;  %293 = vst.msk [vmem:[#allocation2 + $0x30] sm:$0xff] %vm286_vm1, %v8784_v33  ;;  %294 = vst.msk [vmem:[#allocation2 + $0x38] sm:$0xff] %vm286_vm1, %v8784_v33  ;;  %v9082_v47 = vld [vmem:[%s12312_s4] ss:$0 sm:$0xff]  ;;  %v313_v54 = vld [vmem:[%s12311_s1 + $0x30] sm:$0xff] }
   0x5   :  { %295 = vst.msk [vmem:[#allocation2 + $0x40] sm:$0xff] %vm286_vm1, %v8784_v33  ;;  %296 = vst.msk [vmem:[#allocation2 + $0x48] sm:$0xff] %vm286_vm1, %v8784_v33  ;;  %v314_v57 = vld [vmem:[%s12311_s1 + $0x38] sm:$0xff]  ;;  %v315_v59 = vld [vmem:[%s12311_s1 + $0x40] sm:$0xff]  ;;  %vm12369_vm4 = vcmask 261120   ;;  %s8789_s5 = smov 32  }
   0x6   :  { %297 = vst.msk [vmem:[#allocation2 + $0x50] sm:$0xff] %vm286_vm1, %v8784_v33  ;;  %298 = vst.msk [vmem:[#allocation2 + $0x58] sm:$0xff] %vm286_vm1, %v8784_v33  ;;  %v316_v63 = vld [vmem:[%s12311_s1 + $0x48] sm:$0xff]  ;;  %vm1759_vm5 = vcmask 785920   ;;  %vm1824_vm6 = vcmask 1048320   ;;  %vm12359_vm7 = vcmask 523520  }
   0x7   :  { %299 = vst.msk [vmem:[#allocation2 + $0x60] sm:$0xff] %vm286_vm1, %v8784_v33  ;;  %300 = vst.msk [vmem:[#allocation2 + $0x68] sm:$0xff] %vm286_vm1, %v8784_v33 }
   0x8   :  { %v75_v0 = vld [vmem:[%s12374_s29] sm:$0xff]  ;;  %v76_v1 = vld [vmem:[%s12374_s29 + $0x8] sm:$0xff]  ;;  %v77_v2 = vld [vmem:[%s12374_s29 + $0x10] sm:$0xff]  ;;  %301 = vst.msk [vmem:[#allocation2 + $0x70] sm:$0xff] %vm286_vm1, %v8784_v33 }
   0x9   :  { %v8031_v3 = vpack.c.bf16 %v76_v1, %v75_v0  ;;  %v78_v4 = vld [vmem:[%s12374_s29 + $0x18] sm:$0xff]  ;;  %v79_v6 = vld [vmem:[%s12374_s29 + $0x20] sm:$0xff]  ;;  %v80_v7 = vld [vmem:[%s12374_s29 + $0x28] sm:$0xff]  ;;  %302 = vst.msk [vmem:[#allocation2 + $0x78] sm:$0xff] %vm286_vm1, %v8784_v33 }
   0xa   :  { %v8035_v5 = vpack.c.bf16 %v78_v4, %v77_v2  ;;  %v59_v8 = vld [vmem:[%s12375_s27] sm:$0xff]  ;;  %v8039_v9 = vpack.c.bf16 %v80_v7, %v79_v6  ;;  %v81_v10 = vld [vmem:[%s12374_s29 + $0x30] sm:$0xff]  ;;  %v82_v11 = vld [vmem:[%s12374_s29 + $0x38] sm:$0xff]  ;;  %303 = vst.msk [vmem:[#allocation2 + $0x80] sm:$0xff] %vm286_vm1, %v8784_v33 }
   0xb   :  { %8032 = vmatprep.subr.bf16.mxu0 %v8031_v3  ;;  %7787 = vmatprep.mubr.msk.f32.mxu0 %vm92_vm0, %v59_v8  ;;  %v8043_v12 = vpack.c.bf16 %v82_v11, %v81_v10  ;;  %v83_v13 = vld [vmem:[%s12374_s29 + $0x40] sm:$0xff]  ;;  %v84_v14 = vld [vmem:[%s12374_s29 + $0x48] sm:$0xff]  ;;  %v61_v17 = vld [vmem:[%s12375_s27 + $0x10] sm:$0xff]  ;;  %304 = vst.msk [vmem:[#allocation2 + $0x88] sm:$0xff] %vm286_vm1, %v8784_v33 }
   0xc   :  { %8034 = vmatpush3.bf16.msra.mxu0 %v8031_v3  ;;  %v8047_v15 = vpack.c.bf16 %v84_v14, %v83_v13  ;;  %v60_v16 = vld [vmem:[%s12375_s27 + $0x8] sm:$0xff]  ;;  %v62_v18 = vld [vmem:[%s12375_s27 + $0x18] sm:$0xff]  ;;  %v63_v19 = vld [vmem:[%s12375_s27 + $0x20] sm:$0xff]  ;;  %305 = vst.msk [vmem:[#allocation2 + $0x90] sm:$0xff] %vm286_vm1, %v8784_v33 }
   0xd   :  { %8036 = vmatprep.subr.bf16.mxu0 %v8035_v5  ;;  %v64_v20 = vld [vmem:[%s12375_s27 + $0x28] sm:$0xff]  ;;  %v65_v21 = vld [vmem:[%s12375_s27 + $0x30] sm:$0xff]  ;;  %v66_v22 = vld [vmem:[%s12375_s27 + $0x38] sm:$0xff]  ;;  %306 = vst.msk [vmem:[#allocation2 + $0x98] sm:$0xff] %vm286_vm1, %v8784_v33 }
   0xe   :  { %v67_v23 = vld [vmem:[%s12375_s27 + $0x40] sm:$0xff]  ;;  %v68_v24 = vld [vmem:[%s12375_s27 + $0x48] sm:$0xff]  ;;  %v69_v25 = vld [vmem:[%s12375_s27 + $0x50] sm:$0xff]  ;;  %1573 = vst [vmem:[#allocation3] sm:$0xff] %v8784_v33 }
   0xf   :  { %v70_v26 = vld [vmem:[%s12375_s27 + $0x58] sm:$0xff]  ;;  %v71_v27 = vld [vmem:[%s12375_s27 + $0x60] sm:$0xff]  ;;  %v72_v28 = vld [vmem:[%s12375_s27 + $0x68] sm:$0xff]  ;;  %1578 = vst [vmem:[#allocation3 + $0x20] sm:$0xff] %v8784_v33 }
  0x10   :  { %8038 = vmatpush3.bf16.msra.mxu0 %v8035_v5  ;;  %v73_v29 = vld [vmem:[%s12375_s27 + $0x70] sm:$0xff]  ;;  %v74_v30 = vld [vmem:[%s12375_s27 + $0x78] sm:$0xff]  ;;  %1580 = vst [vmem:[#allocation3 + $0x30] sm:$0xff] %v8784_v33  ;;  %1582 = vst [vmem:[#allocation3 + $0x40] sm:$0xff] %v8784_v33 }
  0x11   :  { %8040 = vmatprep.subr.bf16.mxu0 %v8039_v9  ;;  %v7260_v31 = vld [vmem:[%s12376_s26 + $0x30] sm:$0xff]  ;;  %v7261_v32 = vld [vmem:[%s12376_s26 + $0x38] sm:$0xff]  ;;  %1584 = vst [vmem:[#allocation3 + $0x50] sm:$0xff] %v8784_v33  ;;  %1586 = vst [vmem:[#allocation3 + $0x60] sm:$0xff] %v8784_v33 }
  0x12   :  { %1588 = vst [vmem:[#allocation3 + $0x70] sm:$0xff] %v8784_v33  ;;  %1590 = vst [vmem:[#allocation3 + $0x80] sm:$0xff] %v8784_v33  ;;  %v8051_v35 = vpack.c.bf16 %v7261_v32, %v7260_v31  ;;  %v7262_v36 = vld [vmem:[%s12376_s26 + $0x40] sm:$0xff]  ;;  %v7263_v37 = vld [vmem:[%s12376_s26 + $0x48] sm:$0xff] }
  0x13   :  { %1592 = vst [vmem:[#allocation3 + $0x90] sm:$0xff] %v8784_v33  ;;  %1594 = vst [vmem:[#allocation3 + $0xa0] sm:$0xff] %v8784_v33  ;;  %v8055_v38 = vpack.c.bf16 %v7263_v37, %v7262_v36  ;;  %v7264_v40 = vld [vmem:[%s12376_s26 + $0x50] sm:$0xff]  ;;  %v7265_v41 = vld [vmem:[%s12376_s26 + $0x58] sm:$0xff] }
  0x14   :  { %8042 = vmatpush3.bf16.msra.mxu0 %v8039_v9  ;;  %1596 = vst [vmem:[#allocation3 + $0xb0] sm:$0xff] %v8784_v33  ;;  %1598 = vst [vmem:[#allocation3 + $0xc0] sm:$0xff] %v8784_v33  ;;  %8052 = vmatprep.subr.bf16.mxu1 %v8051_v35  ;;  %v8059_v43 = vpack.c.bf16 %v7265_v41, %v7264_v40  ;;  %v9067_v44 = vld [vmem:[#allocation2 + $0x8] sm:$0xff]  ;;  %v437_v48 = vld [vmem:[%s12376_s26] sm:$0xff] }
  0x15   :  { %8044 = vmatprep.subr.bf16.mxu0 %v8043_v12  ;;  %1600 = vst [vmem:[#allocation3 + $0xd0] sm:$0xff] %v8784_v33  ;;  %1602 = vst [vmem:[#allocation3 + $0xe0] sm:$0xff] %v8784_v33  ;;  %8054 = vmatpush3.bf16.msra.mxu1 %v8051_v35  ;;  %v438_v49 = vld [vmem:[%s12376_s26 + $0x8] sm:$0xff]  ;;  %v317_v1 = vld [vmem:[%s12311_s1 + $0x50] sm:$0xff] }
  0x16   :  { %1604 = vst [vmem:[#allocation3 + $0xf0] sm:$0xff] %v8784_v33  ;;  %1606 = vst [vmem:[#allocation3 + $0x100] sm:$0xff] %v8784_v33  ;;  %8056 = vmatprep.subr.bf16.mxu1 %v8055_v38  ;;  %7823 = vmatprep.mubr.msk.f32.mxu1 %vm286_vm1, %v9067_v44  ;;  %v9090_v51 = vpack.c.bf16 %v438_v49, %v437_v48  ;;  %v318_v5 = vld [vmem:[%s12311_s1 + $0x58] sm:$0xff]  ;;  %v319_v7 = vld [vmem:[%s12311_s1 + $0x60] sm:$0xff] }
  0x17   :  { %1608 = vst [vmem:[#allocation3 + $0x110] sm:$0xff] %v8784_v33  ;;  %324 = vst.msk [vmem:[#allocation2 + $0x10] sm:$0xff] %vm323_vm2, %v307_v34  ;;  %v320_v11 = vld [vmem:[%s12311_s1 + $0x68] sm:$0xff]  ;;  %v321_v13 = vld [vmem:[%s12311_s1 + $0x70] sm:$0xff] }
  0x18   :  { %8046 = vmatpush3.bf16.msra.mxu0 %v8043_v12  ;;  %326 = vst.msk [vmem:[#allocation2 + $0x20] sm:$0xff] %vm323_vm2, %v309_v39  ;;  %325 = vst.msk [vmem:[#allocation2 + $0x18] sm:$0xff] %vm323_vm2, %v308_v42  ;;  %v439_v34 = vld [vmem:[%s12376_s26 + $0x10] sm:$0xff]  ;;  %v440_v35 = vld [vmem:[%s12376_s26 + $0x18] sm:$0xff] }
  0x19   :  { %8048 = vmatprep.subr.bf16.mxu0 %v8047_v15  ;;  %8058 = vmatpush3.bf16.msra.mxu1 %v8055_v38  ;;  %327 = vst.msk [vmem:[#allocation2 + $0x28] sm:$0xff] %vm323_vm2, %v310_v45  ;;  %328 = vst.msk [vmem:[#allocation2 + $0x30] sm:$0xff] %vm323_vm2, %v311_v46  ;;  %v8067_v36 = vpack.c.bf16 %v440_v35, %v439_v34  ;;  %v441_v40 = vld [vmem:[%s12376_s26 + $0x20] sm:$0xff]  ;;  %v442_v41 = vld [vmem:[%s12376_s26 + $0x28] sm:$0xff] }
  0x1a   :  { %8060 = vmatprep.subr.bf16.mxu1 %v8059_v43  ;;  %329 = vst.msk [vmem:[#allocation2 + $0x38] sm:$0xff] %vm323_vm2, %v312_v52  ;;  %330 = vst.msk [vmem:[#allocation2 + $0x40] sm:$0xff] %vm323_vm2, %v313_v54  ;;  %v7298_v48 = vld [vmem:[%s12376_s26 + $0x60] sm:$0xff]  ;;  %v7299_v49 = vld [vmem:[%s12376_s26 + $0x68] sm:$0xff] }
  0x1b   :  { %331 = vst.msk [vmem:[#allocation2 + $0x48] sm:$0xff] %vm323_vm2, %v314_v57  ;;  %332 = vst.msk [vmem:[#allocation2 + $0x50] sm:$0xff] %vm323_vm2, %v315_v59  ;;  %v8075_v54 = vpack.c.bf16 %v7299_v49, %v7298_v48  ;;  %v1039_v34 = vld [vmem:[#allocation2 + $0x90] sm:$0xff]  ;;  %v1271_v35 = vld [vmem:[#allocation2 + $0x98] sm:$0xff] }
  0x1c   :  { %8050 = vmatpush3.bf16.msra.mxu0 %v8047_v15  ;;  %333 = vst.msk [vmem:[#allocation2 + $0x58] sm:$0xff] %vm323_vm2, %v316_v63  ;;  %334 = vst.msk [vmem:[#allocation2 + $0x60] sm:$0xff] %vm323_vm2, %v317_v1  ;;  %v1897_v49 = vld [vmem:[%s12313_s9 + $0x40] sm:$0xff] }
  0x1d   :  { %8062 = vmatpush3.bf16.msra.mxu1 %v8059_v43  ;;  %335 = vst.msk [vmem:[#allocation2 + $0x68] sm:$0xff] %vm323_vm2, %v318_v5  ;;  %336 = vst.msk [vmem:[#allocation2 + $0x70] sm:$0xff] %vm323_vm2, %v319_v7 }
  0x1e   :  { %8064 = vmatprep.subr.bf16.mxu1 %v9090_v51  ;;  %337 = vst.msk [vmem:[#allocation2 + $0x78] sm:$0xff] %vm323_vm2, %v320_v11  ;;  %338 = vst.msk [vmem:[#allocation2 + $0x80] sm:$0xff] %vm323_vm2, %v321_v13  ;;  %v7303_v13 = vld [vmem:[%s12376_s26 + $0x88] sm:$0xff] }
  0x1f   :  { %7788 = vmatmul.mubr.msk.f32.vlgmr.msra.gmra.mrb[0].mxu0 %vm92_vm0, %v60_v16  ;;  %1579 = vst.msk [vmem:[#allocation3 + $0x28] sm:$0xff] %vm12369_vm4, %v8784_v33  ;;  %1581 = vst.msk [vmem:[#allocation3 + $0x38] sm:$0xff] %vm12369_vm4, %v8784_v33 }
  0x20   :  { %7790 = vmatprep.mubr.msk.f32.mxu0 %vm92_vm0, %v61_v17  ;;  %1583 = vst.msk [vmem:[#allocation3 + $0x48] sm:$0xff] %vm12369_vm4, %v8784_v33  ;;  %1585 = vst.msk [vmem:[#allocation3 + $0x58] sm:$0xff] %vm12369_vm4, %v8784_v33 }
  0x21   :  { %1587 = vst.msk [vmem:[#allocation3 + $0x68] sm:$0xff] %vm12369_vm4, %v8784_v33  ;;  %1589 = vst.msk [vmem:[#allocation3 + $0x78] sm:$0xff] %vm12369_vm4, %v8784_v33 }
  0x22   :  { %1591 = vst.msk [vmem:[#allocation3 + $0x88] sm:$0xff] %vm12369_vm4, %v8784_v33  ;;  %1593 = vst.msk [vmem:[#allocation3 + $0x98] sm:$0xff] %vm12369_vm4, %v8784_v33 }
  0x23   :  { %7791 = vmatmul.mubr.msk.f32.gmra.mrb[2].mxu0 %vm92_vm0, %v62_v18  ;;  %v322_v18 = vld [vmem:[%s12311_s1 + $0x78] sm:$0xff]  ;;  %1595 = vst.msk [vmem:[#allocation3 + $0xa8] sm:$0xff] %vm12369_vm4, %v8784_v33  ;;  %1597 = vst.msk [vmem:[#allocation3 + $0xb8] sm:$0xff] %vm12369_vm4, %v8784_v33 }
  0x24   :  { %7793 = vmatprep.mubr.msk.f32.mxu0 %vm92_vm0, %v63_v19  ;;  %339 = vst.msk [vmem:[#allocation2 + $0x88] sm:$0xff] %vm323_vm2, %v322_v18  ;;  %v7323_v18 = vld [vmem:[%s12376_s26 + $0xa8] sm:$0xff] }
  0x25   :  { %1599 = vst.msk [vmem:[#allocation3 + $0xc8] sm:$0xff] %vm12369_vm4, %v8784_v33  ;;  %1601 = vst.msk [vmem:[#allocation3 + $0xd8] sm:$0xff] %vm12369_vm4, %v8784_v33 }
  0x26   :  { %1603 = vst.msk [vmem:[#allocation3 + $0xe8] sm:$0xff] %vm12369_vm4, %v8784_v33  ;;  %1605 = vst.msk [vmem:[#allocation3 + $0xf8] sm:$0xff] %vm12369_vm4, %v8784_v33 }
  0x27   :  { %7794 = vmatmul.mubr.msk.f32.gmra.mrb[4].mxu0 %vm92_vm0, %v64_v20  ;;  %1607 = vst.msk [vmem:[#allocation3 + $0x108] sm:$0xff] %vm12369_vm4, %v8784_v33  ;;  %1609 = vst.msk [vmem:[#allocation3 + $0x118] sm:$0xff] %vm12369_vm4, %v8784_v33  ;;  %v1891_v33 = vld [vmem:[%s12313_s9 + $0x10] sm:$0xff] }
  0x28   :  { %7796 = vmatprep.mubr.msk.f32.mxu0 %vm92_vm0, %v65_v21 }
  0x2b   :  { %7797 = vmatmul.mubr.msk.f32.gmra.mrb[6].mxu0 %vm92_vm0, %v66_v22 }
  0x2c   :  { %7799 = vmatprep.mubr.msk.f32.mxu0 %vm92_vm0, %v67_v23 }
  0x2f   :  { %7800 = vmatmul.mubr.msk.f32.gmra.mrb[8].mxu0 %vm92_vm0, %v68_v24 }
  0x30   :  { %7802 = vmatprep.mubr.msk.f32.mxu0 %vm92_vm0, %v69_v25 }
  0x33   :  { %7803 = vmatmul.mubr.msk.f32.gmra.mrb[10].mxu0 %vm92_vm0, %v70_v26 }
  0x34   :  { %7805 = vmatprep.mubr.msk.f32.mxu0 %vm92_vm0, %v71_v27 }
  0x37   :  { %7806 = vmatmul.mubr.msk.f32.gmra.mrb[12].mxu0 %vm92_vm0, %v72_v28 }
  0x38   :  { %7808 = vmatprep.mubr.msk.f32.mxu0 %vm92_vm0, %v73_v29 }
  0x3b   :  { %7809 = vmatmul.mubr.msk.f32.gmra.mrb[14].mxu0 %vm92_vm0, %v74_v30 }
  0xf2   :  { %v7789_v50 = vpop.f32.mrb[0].mxu0 }
  0xf3   :  { %v207_v53 = vpop.f32.mrb[1].mxu0  ;;  %v213_v60 = vadd.f32 %v7789_v50, %v9082_v47 }
  0xf4   :  { %v208_v55 = vadd.f32 %v9082_v47, %v207_v53 }
  0xf6   :  { %v7792_v56 = vpop.f32.mrb[2].mxu0  ;;  %356 = vrot.lane.b32.xlu0 %v208_v55, %s8785_s28 }
  0xf7   :  { %v217_v58 = vpop.f32.mrb[3].mxu0  ;;  %v223_v2 = vadd.f32 %v7792_v56, %v9082_v47 }
  0xf8   :  { %v218_v61 = vadd.f32 %v9082_v47, %v217_v58 }
  0xfa   :  { %v7795_v62 = vpop.f32.mrb[4].mxu0  ;;  %360 = vrot.lane.b32.xlu1 %v218_v61, %s8785_s28  ;;  %358 = vrot.lane.b32.xlu0 %v213_v60, %s8785_s28 }
  0xfb   :  { %v227_v0 = vpop.f32.mrb[5].mxu0  ;;  %v233_v8 = vadd.f32 %v7795_v62, %v9082_v47 }
  0xfc   :  { %v228_v3 = vadd.f32 %v9082_v47, %v227_v0 }
  0xfe   :  { %v7798_v4 = vpop.f32.mrb[6].mxu0  ;;  %362 = vrot.lane.b32.xlu1 %v223_v2, %s8785_s28  ;;  %364 = vrot.lane.b32.xlu0 %v228_v3, %s8785_s28 }
  0xff   :  { %v237_v6 = vpop.f32.mrb[7].mxu0  ;;  %v243_v14 = vadd.f32 %v7798_v4, %v9082_v47 }
 0x100   :  { %v238_v9 = vadd.f32 %v9082_v47, %v237_v6 }
 0x102   :  { %v7801_v10 = vpop.f32.mrb[8].mxu0  ;;  %366 = vrot.lane.b32.xlu1 %v233_v8, %s8785_s28  ;;  %368 = vrot.lane.b32.xlu0 %v238_v9, %s8785_s28  ;;  %v421_v8 = vld [vmem:[#allocation2] sm:$0xff]  ;;  %v7300_v9 = vld [vmem:[%s12376_s26 + $0x70] sm:$0xff] }
 0x103   :  { %v247_v12 = vpop.f32.mrb[9].mxu0  ;;  %v253_v19 = vadd.f32 %v7801_v10, %v9082_v47  ;;  %v7301_v10 = vld [vmem:[%s12376_s26 + $0x78] sm:$0xff] }
 0x104   :  { %v248_v15 = vadd.f32 %v9082_v47, %v247_v12  ;;  %v8079_v11 = vpack.c.bf16 %v7301_v10, %v7300_v9  ;;  %v7302_v12 = vld [vmem:[%s12376_s26 + $0x80] sm:$0xff] }
 0x105   :  { %v9551_v10 = vld [vmem:[%s12316_s8] ss:$0 sm:$0xff]  ;;  %s8788_s8 = smov 64  }
 0x106   :  { %v7804_v16 = vpop.f32.mrb[10].mxu0  ;;  %370 = vrot.lane.b32.xlu1 %v243_v14, %s8785_s28  ;;  %372 = vrot.lane.b32.xlu0 %v248_v15, %s8785_s28  ;;  %v8083_v14 = vpack.c.bf16 %v7303_v13, %v7302_v12  ;;  %v7320_v15 = vld [vmem:[%s12376_s26 + $0x90] sm:$0xff] }
 0x107   :  { %v257_v17 = vpop.f32.mrb[11].mxu0  ;;  %v263_v23 = vadd.f32 %v7804_v16, %v9082_v47  ;;  %v7321_v16 = vld [vmem:[%s12376_s26 + $0x98] sm:$0xff] }
 0x108   :  { %v258_v20 = vadd.f32 %v9082_v47, %v257_v17  ;;  %v7322_v17 = vld [vmem:[%s12376_s26 + $0xa0] sm:$0xff] }
 0x10a   :  { %v7807_v21 = vpop.f32.mrb[12].mxu0  ;;  %374 = vrot.lane.b32.xlu1 %v253_v19, %s8785_s28  ;;  %376 = vrot.lane.b32.xlu0 %v258_v20, %s8785_s28  ;;  %v8091_v19 = vpack.c.bf16 %v7323_v18, %v7322_v17  ;;  %v7324_v20 = vld [vmem:[%s12376_s26 + $0xb0] sm:$0xff] }
 0x10b   :  { %v267_v22 = vpop.f32.mrb[13].mxu0  ;;  %v273_v27 = vadd.f32 %v7807_v21, %v9082_v47  ;;  %v7325_v21 = vld [vmem:[%s12376_s26 + $0xb8] sm:$0xff] }
 0x10c   :  { %v268_v24 = vadd.f32 %v9082_v47, %v267_v22  ;;  %v8095_v22 = vpack.c.bf16 %v7325_v21, %v7324_v20 }
 0x10e   :  { %v7810_v25 = vpop.f32.mrb[14].mxu0  ;;  %378 = vrot.lane.b32.xlu1 %v263_v23, %s8785_s28  ;;  %380 = vrot.lane.b32.xlu0 %v268_v24, %s8785_s28  ;;  %v7342_v23 = vld [vmem:[%s12376_s26 + $0xc0] sm:$0xff]  ;;  %v7343_v24 = vld [vmem:[%s12376_s26 + $0xc8] sm:$0xff] }
 0x10f   :  { %v277_v26 = vpop.f32.mrb[15].mxu0  ;;  %v283_v29 = vadd.f32 %v7810_v25, %v9082_v47  ;;  %v8099_v25 = vpack.c.bf16 %v7343_v24, %v7342_v23 }
 0x110   :  { %v278_v28 = vadd.f32 %v9082_v47, %v277_v26  ;;  %v8071_v47 = vpack.c.bf16 %v442_v41, %v441_v40  ;;  %v1892_v40 = vld [vmem:[%s12313_s9 + $0x18] sm:$0xff] }
 0x111   :  { %v8115_v41 = vpack.c.bf16 %v1892_v40, %v1891_v33 }
 0x112   :  { %382 = vrot.lane.b32.xlu1 %v273_v27, %s8785_s28  ;;  %384 = vrot.lane.b32.xlu0 %v278_v28, %s8785_s28  ;;  %v7344_v27 = vld [vmem:[%s12376_s26 + $0xd0] sm:$0xff]  ;;  %v7345_v28 = vld [vmem:[%s12376_s26 + $0xd8] sm:$0xff] }
 0x116   :  { %386 = vrot.lane.b32.xlu1 %v283_v29, %s8785_s28  ;;  %v8103_v29 = vpack.c.bf16 %v7345_v28, %v7344_v27 }
 0x168   :  { %v357_v30 = vpop.permute.xlu0 %356 }
 0x169   :  { %405 = vst.msk [vmem:[#allocation2 + $0x10] sm:$0xff] %vm404_vm3, %v357_v30  ;;  %v7346_v30 = vld [vmem:[%s12376_s26 + $0xe0] sm:$0xff] }
 0x16c   :  { %v361_v31 = vpop.permute.xlu1 %360  ;;  %v359_v32 = vpop.permute.xlu0 %358 }
 0x16d   :  { %407 = vst.msk [vmem:[#allocation2 + $0x20] sm:$0xff] %vm404_vm3, %v361_v31  ;;  %406 = vst.msk [vmem:[#allocation2 + $0x18] sm:$0xff] %vm404_vm3, %v359_v32  ;;  %v7347_v31 = vld [vmem:[%s12376_s26 + $0xe8] sm:$0xff] }
 0x16e   :  { %v8107_v32 = vpack.c.bf16 %v7347_v31, %v7346_v30 }
 0x170   :  { %v363_v37 = vpop.permute.xlu1 %362  ;;  %v365_v38 = vpop.permute.xlu0 %364  ;;  %v9178_v39 = vld [vmem:[#allocation2 + $0x10] sm:$0xff] }
 0x171   :  { %408 = vst.msk [vmem:[#allocation2 + $0x28] sm:$0xff] %vm404_vm3, %v363_v37  ;;  %409 = vst.msk [vmem:[#allocation2 + $0x30] sm:$0xff] %vm404_vm3, %v365_v38  ;;  %7824 = vmatmul.mubr.msk.f32.vlgmr.msra.gmra.mrb[0].mxu1 %vm286_vm1, %v9178_v39  ;;  %v1890_v37 = vld [vmem:[%s12313_s9 + $0x8] sm:$0xff] }
 0x172   :  { %8066 = vmatpush3.bf16.msra.mxu1 %v9090_v51 }
 0x173   :  { %8068 = vmatprep.subr.bf16.mxu1 %v8067_v36 }
 0x174   :  { %v367_v42 = vpop.permute.xlu1 %366  ;;  %v369_v43 = vpop.permute.xlu0 %368  ;;  %v9191_v45 = vld [vmem:[#allocation2 + $0x18] sm:$0xff]  ;;  %v9193_v46 = vld [vmem:[#allocation2 + $0x20] sm:$0xff] }
 0x175   :  { %410 = vst.msk [vmem:[#allocation2 + $0x38] sm:$0xff] %vm404_vm3, %v367_v42  ;;  %411 = vst.msk [vmem:[#allocation2 + $0x40] sm:$0xff] %vm404_vm3, %v369_v43  ;;  %7826 = vmatprep.mubr.msk.f32.mxu1 %vm286_vm1, %v9191_v45  ;;  %v1893_v42 = vld [vmem:[%s12313_s9 + $0x20] sm:$0xff]  ;;  %v1894_v43 = vld [vmem:[%s12313_s9 + $0x28] sm:$0xff] }
 0x176   :  { %7827 = vmatmul.mubr.msk.f32.gmra.mrb[2].mxu1 %vm286_vm1, %v9193_v46 }
 0x177   :  { %8070 = vmatpush3.bf16.msra.mxu1 %v8067_v36  ;;  %v1889_v36 = vld [vmem:[%s12313_s9] sm:$0xff] }
 0x178   :  { %v371_v50 = vpop.permute.xlu1 %370  ;;  %v373_v51 = vpop.permute.xlu0 %372  ;;  %v9207_v52 = vld [vmem:[#allocation2 + $0x28] sm:$0xff]  ;;  %v9209_v53 = vld [vmem:[#allocation2 + $0x30] sm:$0xff]  ;;  %8072 = vmatprep.subr.bf16.mxu1 %v8071_v47  ;;  %v8112_v38 = vpack.c.bf16 %v1890_v37, %v1889_v36 }
 0x179   :  { %412 = vst.msk [vmem:[#allocation2 + $0x48] sm:$0xff] %vm404_vm3, %v371_v50  ;;  %413 = vst.msk [vmem:[#allocation2 + $0x50] sm:$0xff] %vm404_vm3, %v373_v51  ;;  %7829 = vmatprep.mubr.msk.f32.mxu1 %vm286_vm1, %v9207_v52  ;;  %v1898_v50 = vld [vmem:[%s12313_s9 + $0x48] sm:$0xff] }
 0x17a   :  { %7830 = vmatmul.mubr.msk.f32.gmra.mrb[4].mxu1 %vm286_vm1, %v9209_v53  ;;  %v8124_v51 = vpack.c.bf16 %v1898_v50, %v1897_v49 }
 0x17b   :  { %8074 = vmatpush3.bf16.msra.mxu1 %v8071_v47  ;;  %v1896_v47 = vld [vmem:[%s12313_s9 + $0x38] sm:$0xff] }
 0x17c   :  { %v375_v55 = vpop.permute.xlu1 %374  ;;  %v377_v56 = vpop.permute.xlu0 %376  ;;  %v9217_v57 = vld [vmem:[#allocation2 + $0x38] sm:$0xff]  ;;  %v9219_v58 = vld [vmem:[#allocation2 + $0x40] sm:$0xff]  ;;  %8076 = vmatprep.subr.bf16.mxu1 %v8075_v54 }
 0x17d   :  { %414 = vst.msk [vmem:[#allocation2 + $0x58] sm:$0xff] %vm404_vm3, %v375_v55  ;;  %415 = vst.msk [vmem:[#allocation2 + $0x60] sm:$0xff] %vm404_vm3, %v377_v56  ;;  %7832 = vmatprep.mubr.msk.f32.mxu1 %vm286_vm1, %v9217_v57  ;;  %v1901_v55 = vld [vmem:[%s12313_s9 + $0x60] sm:$0xff]  ;;  %v1902_v56 = vld [vmem:[%s12313_s9 + $0x68] sm:$0xff] }
 0x17e   :  { %7833 = vmatmul.mubr.msk.f32.gmra.mrb[6].mxu1 %vm286_vm1, %v9219_v58 }
 0x180   :  { %v379_v59 = vpop.permute.xlu1 %378  ;;  %v381_v60 = vpop.permute.xlu0 %380  ;;  %v9227_v61 = vld [vmem:[#allocation2 + $0x48] sm:$0xff]  ;;  %v9229_v62 = vld [vmem:[#allocation2 + $0x50] sm:$0xff] }
 0x181   :  { %416 = vst.msk [vmem:[#allocation2 + $0x68] sm:$0xff] %vm404_vm3, %v379_v59  ;;  %417 = vst.msk [vmem:[#allocation2 + $0x70] sm:$0xff] %vm404_vm3, %v381_v60  ;;  %7835 = vmatprep.mubr.msk.f32.mxu1 %vm286_vm1, %v9227_v61  ;;  %v1904_v59 = vld [vmem:[%s12313_s9 + $0x78] sm:$0xff] }
 0x182   :  { %7836 = vmatmul.mubr.msk.f32.gmra.mrb[8].mxu1 %vm286_vm1, %v9229_v62 }
 0x184   :  { %v383_v63 = vpop.permute.xlu1 %382  ;;  %v385_v0 = vpop.permute.xlu0 %384  ;;  %v9237_v1 = vld [vmem:[#allocation2 + $0x58] sm:$0xff]  ;;  %v9239_v2 = vld [vmem:[#allocation2 + $0x60] sm:$0xff] }
 0x185   :  { %418 = vst.msk [vmem:[#allocation2 + $0x78] sm:$0xff] %vm404_vm3, %v383_v63  ;;  %419 = vst.msk [vmem:[#allocation2 + $0x80] sm:$0xff] %vm404_vm3, %v385_v0  ;;  %7838 = vmatprep.mubr.msk.f32.mxu1 %vm286_vm1, %v9237_v1  ;;  %v9532_v0 = vld [vmem:[%s12314_s6] ss:$0 sm:$0xff] }
 0x186   :  { %7839 = vmatmul.mubr.msk.f32.gmra.mrb[10].mxu1 %vm286_vm1, %v9239_v2 }
 0x188   :  { %v387_v3 = vpop.permute.xlu1 %386  ;;  %v9247_v4 = vld [vmem:[#allocation2 + $0x68] sm:$0xff]  ;;  %v9249_v5 = vld [vmem:[#allocation2 + $0x70] sm:$0xff] }
 0x189   :  { %420 = vst.msk [vmem:[#allocation2 + $0x88] sm:$0xff] %vm404_vm3, %v387_v3  ;;  %7841 = vmatprep.mubr.msk.f32.mxu1 %vm286_vm1, %v9247_v4  ;;  %v1908_v3 = vld [vmem:[%s12313_s9 + $0x98] sm:$0xff] }
 0x18a   :  { %7842 = vmatmul.mubr.msk.f32.gmra.mrb[12].mxu1 %vm286_vm1, %v9249_v5 }
 0x18c   :  { %v9256_v6 = vld [vmem:[#allocation2 + $0x78] sm:$0xff]  ;;  %v9258_v7 = vld [vmem:[#allocation2 + $0x80] sm:$0xff] }
 0x18d   :  { %7844 = vmatprep.mubr.msk.f32.mxu1 %vm286_vm1, %v9256_v6 }
 0x18e   :  { %7845 = vmatmul.mubr.msk.f32.gmra.mrb[14].mxu1 %vm286_vm1, %v9258_v7 }
 0x18f   :  { %7859 = vmatprep.mubr.msk.f32.mxu1 %vm286_vm1, %v421_v8 }
 0x190   :  { %v807_v26 = vld [vmem:[#allocation2 + $0x88] sm:$0xff] }
 0x192   :  { %7860 = vmatmul.mubr.msk.f32.vlgmr.msra.gmra.mrb[0].mxu1 %vm286_vm1, %v9067_v44  ;;  %v8087_v44 = vpack.c.bf16 %v7321_v16, %v7320_v15 }
 0x193   :  { %8078 = vmatpush3.bf16.msra.mxu1 %v8075_v54  ;;  %7862 = vmatprep.mubr.msk.f32.mxu1 %vm286_vm1, %v9178_v39 }
 0x194   :  { %8080 = vmatprep.subr.bf16.mxu1 %v8079_v11 }
 0x196   :  { %7863 = vmatmul.mubr.msk.f32.gmra.mrb[2].mxu1 %vm286_vm1, %v9191_v45 }
 0x197   :  { %7865 = vmatprep.mubr.msk.f32.mxu1 %vm286_vm1, %v9193_v46  ;;  %8082 = vmatpush3.bf16.msra.mxu1 %v8079_v11 }
 0x198   :  { %8084 = vmatprep.subr.bf16.mxu1 %v8083_v14 }
 0x19a   :  { %7866 = vmatmul.mubr.msk.f32.gmra.mrb[4].mxu1 %vm286_vm1, %v9207_v52 }
 0x19b   :  { %7868 = vmatprep.mubr.msk.f32.mxu1 %vm286_vm1, %v9209_v53  ;;  %8086 = vmatpush3.bf16.msra.mxu1 %v8083_v14 }
 0x19c   :  { %8088 = vmatprep.subr.bf16.mxu1 %v8087_v44 }
 0x19e   :  { %7869 = vmatmul.mubr.msk.f32.gmra.mrb[6].mxu1 %vm286_vm1, %v9217_v57 }
 0x19f   :  { %7871 = vmatprep.mubr.msk.f32.mxu1 %vm286_vm1, %v9219_v58 }
 0x1a2   :  { %7872 = vmatmul.mubr.msk.f32.gmra.mrb[8].mxu1 %vm286_vm1, %v9227_v61 }
 0x1a3   :  { %7874 = vmatprep.mubr.msk.f32.mxu1 %vm286_vm1, %v9229_v62 }
 0x1a6   :  { %7875 = vmatmul.mubr.msk.f32.gmra.mrb[10].mxu1 %vm286_vm1, %v9237_v1 }
 0x1a7   :  { %7877 = vmatprep.mubr.msk.f32.mxu1 %vm286_vm1, %v9239_v2 }
 0x1aa   :  { %7878 = vmatmul.mubr.msk.f32.gmra.mrb[12].mxu1 %vm286_vm1, %v9247_v4 }
 0x1ab   :  { %7880 = vmatprep.mubr.msk.f32.mxu1 %vm286_vm1, %v9249_v5 }
 0x1ae   :  { %7881 = vmatmul.mubr.msk.f32.gmra.mrb[14].mxu1 %vm286_vm1, %v9256_v6 }
 0x1af   :  { %7895 = vmatprep.mubr.msk.f32.mxu1 %vm286_vm1, %v9178_v39  ;;  %v8786_v39 = vmov 0.0|0.0  }
 0x1b0   :  { %8111 = vmatprep.subr.bf16.mxu0 %v8786_v39 }
 0x1b1   :  { %8113 = vmatpush1.bf16.msra.mxu0 %v8112_v38 }
 0x1b2   :  { %7896 = vmatmul.mubr.msk.f32.vlgmr.msra.gmra.mrb[0].mxu1 %vm286_vm1, %v9191_v45  ;;  %8114 = vmatprep.subr.bf16.mxu0 %v8786_v39 }
 0x1b3   :  { %8090 = vmatpush3.bf16.msra.mxu1 %v8087_v44  ;;  %7898 = vmatprep.mubr.msk.f32.mxu1 %vm286_vm1, %v9193_v46 }
 0x1b4   :  { %8092 = vmatprep.subr.bf16.mxu1 %v8091_v19 }
 0x1b5   :  { %8116 = vmatpush1.bf16.msra.mxu0 %v8115_v41 }
 0x1b6   :  { %7899 = vmatmul.mubr.msk.f32.gmra.mrb[2].mxu1 %vm286_vm1, %v9207_v52  ;;  %8117 = vmatprep.subr.bf16.mxu0 %v8786_v39 }
 0x1b7   :  { %7901 = vmatprep.mubr.msk.f32.mxu1 %vm286_vm1, %v9209_v53  ;;  %8094 = vmatpush3.bf16.msra.mxu1 %v8091_v19 }
 0x1b8   :  { %8096 = vmatprep.subr.bf16.mxu1 %v8095_v22 }
 0x1ba   :  { %7902 = vmatmul.mubr.msk.f32.gmra.mrb[4].mxu1 %vm286_vm1, %v9217_v57 }
 0x1bb   :  { %7904 = vmatprep.mubr.msk.f32.mxu1 %vm286_vm1, %v9219_v58  ;;  %8098 = vmatpush3.bf16.msra.mxu1 %v8095_v22 }
 0x1bc   :  { %8100 = vmatprep.subr.bf16.mxu1 %v8099_v25 }
 0x1be   :  { %7905 = vmatmul.mubr.msk.f32.gmra.mrb[6].mxu1 %vm286_vm1, %v9227_v61 }
 0x1bf   :  { %7907 = vmatprep.mubr.msk.f32.mxu1 %vm286_vm1, %v9229_v62 }
 0x1c2   :  { %7908 = vmatmul.mubr.msk.f32.gmra.mrb[8].mxu1 %vm286_vm1, %v9237_v1 }
 0x1c3   :  { %7910 = vmatprep.mubr.msk.f32.mxu1 %vm286_vm1, %v9239_v2 }
 0x1c6   :  { %7911 = vmatmul.mubr.msk.f32.gmra.mrb[10].mxu1 %vm286_vm1, %v9247_v4 }
 0x1c7   :  { %7913 = vmatprep.mubr.msk.f32.mxu1 %vm286_vm1, %v9249_v5 }
 0x1ca   :  { %7914 = vmatmul.mubr.msk.f32.gmra.mrb[12].mxu1 %vm286_vm1, %v9256_v6 }
 0x1cb   :  { %7916 = vmatprep.mubr.msk.f32.mxu1 %vm286_vm1, %v9258_v7 }
 0x1ce   :  { %7917 = vmatmul.mubr.msk.f32.gmra.mrb[14].mxu1 %vm286_vm1, %v807_v26 }
 0x1cf   :  { %7931 = vmatprep.mubr.msk.f32.mxu1 %vm286_vm1, %v9191_v45  ;;  %v8118_v45 = vpack.c.bf16 %v1894_v43, %v1893_v42 }
 0x1d1   :  { %8119 = vmatpush1.bf16.msra.mxu0 %v8118_v45 }
 0x1d2   :  { %7932 = vmatmul.mubr.msk.f32.vlgmr.msra.gmra.mrb[0].mxu1 %vm286_vm1, %v9193_v46  ;;  %8120 = vmatprep.subr.bf16.mxu0 %v8786_v39 }
 0x1d3   :  { %8102 = vmatpush3.bf16.msra.mxu1 %v8099_v25  ;;  %7934 = vmatprep.mubr.msk.f32.mxu1 %vm286_vm1, %v9207_v52 }
 0x1d4   :  { %8104 = vmatprep.subr.bf16.mxu1 %v8103_v29 }
 0x1d6   :  { %7935 = vmatmul.mubr.msk.f32.gmra.mrb[2].mxu1 %vm286_vm1, %v9209_v53 }
 0x1d7   :  { %7937 = vmatprep.mubr.msk.f32.mxu1 %vm286_vm1, %v9217_v57  ;;  %8106 = vmatpush3.bf16.msra.mxu1 %v8103_v29 }
 0x1d8   :  { %8108 = vmatprep.subr.bf16.mxu1 %v8107_v32 }
 0x1da   :  { %7938 = vmatmul.mubr.msk.f32.gmra.mrb[4].mxu1 %vm286_vm1, %v9219_v58 }
 0x1db   :  { %7940 = vmatprep.mubr.msk.f32.mxu1 %vm286_vm1, %v9227_v61  ;;  %8110 = vmatpush3.bf16.msra.mxu1 %v8107_v32 }
 0x1dc   :  { %8171 = vmatprep.subr.bf16.mxu1 %v8786_v39 }
 0x1de   :  { %7941 = vmatmul.mubr.msk.f32.gmra.mrb[6].mxu1 %vm286_vm1, %v9229_v62 }
 0x1df   :  { %7943 = vmatprep.mubr.msk.f32.mxu1 %vm286_vm1, %v9237_v1 }
 0x1e2   :  { %7944 = vmatmul.mubr.msk.f32.gmra.mrb[8].mxu1 %vm286_vm1, %v9239_v2 }
 0x1e3   :  { %7946 = vmatprep.mubr.msk.f32.mxu1 %vm286_vm1, %v9247_v4 }
 0x1e6   :  { %7947 = vmatmul.mubr.msk.f32.gmra.mrb[10].mxu1 %vm286_vm1, %v9249_v5 }
 0x1e7   :  { %7949 = vmatprep.mubr.msk.f32.mxu1 %vm286_vm1, %v9256_v6 }
 0x1ea   :  { %7950 = vmatmul.mubr.msk.f32.gmra.mrb[12].mxu1 %vm286_vm1, %v9258_v7 }
 0x1eb   :  { %7952 = vmatprep.mubr.msk.f32.mxu1 %vm286_vm1, %v807_v26 }
 0x1ee   :  { %7953 = vmatmul.mubr.msk.f32.gmra.mrb[14].mxu1 %vm286_vm1, %v1039_v34 }
 0x1ef   :  { %7967 = vmatprep.mubr.msk.f32.mxu1 %vm286_vm1, %v9193_v46  ;;  %v1895_v46 = vld [vmem:[%s12313_s9 + $0x30] sm:$0xff] }
 0x1f0   :  { %v8121_v48 = vpack.c.bf16 %v1896_v47, %v1895_v46 }
 0x1f2   :  { %7968 = vmatmul.mubr.msk.f32.vlgmr.msra.gmra.mrb[0].mxu1 %vm286_vm1, %v9207_v52  ;;  %8122 = vmatpush1.bf16.msra.mxu0 %v8121_v48  ;;  %v1899_v52 = vld [vmem:[%s12313_s9 + $0x50] sm:$0xff] }
 0x1f3   :  { %7970 = vmatprep.mubr.msk.f32.mxu1 %vm286_vm1, %v9209_v53  ;;  %8123 = vmatprep.subr.bf16.mxu0 %v8786_v39  ;;  %v1900_v53 = vld [vmem:[%s12313_s9 + $0x58] sm:$0xff] }
 0x1f4   :  { %v8127_v54 = vpack.c.bf16 %v1900_v53, %v1899_v52 }
 0x1f6   :  { %7971 = vmatmul.mubr.msk.f32.gmra.mrb[2].mxu1 %vm286_vm1, %v9217_v57  ;;  %8125 = vmatpush1.bf16.msra.mxu0 %v8124_v51  ;;  %v8130_v57 = vpack.c.bf16 %v1902_v56, %v1901_v55 }
 0x1f7   :  { %7973 = vmatprep.mubr.msk.f32.mxu1 %vm286_vm1, %v9219_v58  ;;  %8126 = vmatprep.subr.bf16.mxu0 %v8786_v39  ;;  %v1903_v58 = vld [vmem:[%s12313_s9 + $0x70] sm:$0xff] }
 0x1f8   :  { %v8133_v60 = vpack.c.bf16 %v1904_v59, %v1903_v58 }
 0x1fa   :  { %7974 = vmatmul.mubr.msk.f32.gmra.mrb[4].mxu1 %vm286_vm1, %v9227_v61  ;;  %8128 = vmatpush1.bf16.msra.mxu0 %v8127_v54  ;;  %v1905_v61 = vld [vmem:[%s12313_s9 + $0x80] sm:$0xff] }
 0x1fb   :  { %7976 = vmatprep.mubr.msk.f32.mxu1 %vm286_vm1, %v9229_v62  ;;  %8129 = vmatprep.subr.bf16.mxu0 %v8786_v39  ;;  %v1906_v62 = vld [vmem:[%s12313_s9 + $0x88] sm:$0xff] }
 0x1fc   :  { %v8136_v63 = vpack.c.bf16 %v1906_v62, %v1905_v61 }
 0x1fe   :  { %7977 = vmatmul.mubr.msk.f32.gmra.mrb[6].mxu1 %vm286_vm1, %v9237_v1  ;;  %8131 = vmatpush1.bf16.msra.mxu0 %v8130_v57 }
 0x1ff   :  { %7979 = vmatprep.mubr.msk.f32.mxu1 %vm286_vm1, %v9239_v2  ;;  %8132 = vmatprep.subr.bf16.mxu0 %v8786_v39  ;;  %v1907_v2 = vld [vmem:[%s12313_s9 + $0x90] sm:$0xff] }
 0x202   :  { %7980 = vmatmul.mubr.msk.f32.gmra.mrb[8].mxu1 %vm286_vm1, %v9247_v4  ;;  %8134 = vmatpush1.bf16.msra.mxu0 %v8133_v60 }
 0x203   :  { %7982 = vmatprep.mubr.msk.f32.mxu1 %vm286_vm1, %v9249_v5  ;;  %8135 = vmatprep.subr.bf16.mxu0 %v8786_v39 }
 0x206   :  { %7983 = vmatmul.mubr.msk.f32.gmra.mrb[10].mxu1 %vm286_vm1, %v9256_v6  ;;  %8137 = vmatpush1.bf16.msra.mxu0 %v8136_v63  ;;  %v8139_v6 = vpack.c.bf16 %v1908_v3, %v1907_v2 }
 0x207   :  { %7985 = vmatprep.mubr.msk.f32.mxu1 %vm286_vm1, %v9258_v7  ;;  %8138 = vmatprep.subr.bf16.mxu0 %v8786_v39  ;;  %v9545_v7 = vld [vmem:[%s12315_s7] ss:$0 sm:$0xff]  ;;  %s8787_s7 = smov 96  }
 0x20a   :  { %7986 = vmatmul.mubr.msk.f32.gmra.mrb[12].mxu1 %vm286_vm1, %v807_v26  ;;  %8140 = vmatpush1.bf16.msra.mxu0 %v8139_v6 }
 0x20b   :  { %7988 = vmatprep.mubr.msk.f32.mxu1 %vm286_vm1, %v1039_v34  ;;  %8141 = vmatprep.subr.bf16.mxu0 %v8786_v39 }
 0x20e   :  { %7989 = vmatmul.mubr.msk.f32.gmra.mrb[14].mxu1 %vm286_vm1, %v1271_v35 }
 0x2c5   :  { %v7969_v1 = vpop.f32.mrb[0].mxu1 }
 0x2c6   :  { %v1496_v4 = vadd.f32 %v7969_v1, %v9532_v0  ;;  %v1393_v5 = vpop.f32.mrb[1].mxu1 }
 0x2c7   :  { %v1495_v8 = vadd.f32 %v9532_v0, %v1393_v5 }
 0x2c8   :  { %v1512_v9 = vmax.f32 %v1496_v4, 0.0 }
 0x2c9   :  { %v1511_v11 = vmax.f32 %v1495_v8, 0.0  ;;  %v7972_v12 = vpop.f32.mrb[2].mxu1 }
 0x2ca   :  { %v1535_v13 = vmul.f32 %v9545_v7, %v1512_v9  ;;  %v1498_v14 = vadd.f32 %v7972_v12, %v9532_v0  ;;  %v1403_v15 = vpop.f32.mrb[3].mxu1 }
 0x2cb   :  { %v1534_v16 = vmul.f32 %v9545_v7, %v1511_v11  ;;  %v1497_v44 = vadd.f32 %v9532_v0, %v1403_v15 }
 0x2cc   :  { %v1558_v17 = vadd.f32 %v9551_v10, %v1535_v13  ;;  %v1514_v18 = vmax.f32 %v1498_v14, 0.0 }
 0x2cd   :  { %v9560_v19 = vadd.f32 %v9551_v10, %v1534_v16  ;;  %v1513_v20 = vmax.f32 %v1497_v44, 0.0  ;;  %v7975_v21 = vpop.f32.mrb[4].mxu1 }
 0x2ce   :  { %1615 = vst.msk [vmem:[#allocation3 + $0x50] sm:$0xff] %vm12369_vm4, %v1558_v17  ;;  %v1537_v22 = vmul.f32 %v9545_v7, %v1514_v18  ;;  %v1500_v23 = vadd.f32 %v7975_v21, %v9532_v0  ;;  %1778 = vrot.lane.b32.xlu1 %v1558_v17, %s8787_s7  ;;  %v1413_v24 = vpop.f32.mrb[5].mxu1 }
 0x2cf   :  { %12377 = vst [vmem:[#allocation6_spill] sm:$0xff] %v9560_v19  ;;  %1614 = vst.msk [vmem:[#allocation3 + $0x40] sm:$0xff] %vm12369_vm4, %v9560_v19  ;;  %v1536_v25 = vmul.f32 %v9545_v7, %v1513_v20  ;;  %v1499_v26 = vadd.f32 %v9532_v0, %v1413_v24  ;;  %1711 = vrot.lane.b32.xlu0 %v9560_v19, %s8788_s8 }
 0x2d0   :  { %v9573_v27 = vadd.f32 %v9551_v10, %v1537_v22  ;;  %v1516_v28 = vmax.f32 %v1500_v23, 0.0 }
 0x2d1   :  { %v9576_v29 = vadd.f32 %v9551_v10, %v1536_v25  ;;  %v1515_v30 = vmax.f32 %v1499_v26, 0.0  ;;  %v7978_v31 = vpop.f32.mrb[6].mxu1 }
 0x2d2   :  { %1844 = vst.msk [vmem:[#allocation3 + $0x38] sm:$0xff] %vm12369_vm4, %v9573_v27  ;;  %1617 = vst.msk [vmem:[#allocation3 + $0x70] sm:$0xff] %vm12369_vm4, %v9573_v27  ;;  %v1539_v32 = vmul.f32 %v9545_v7, %v1516_v28  ;;  %v1502_v34 = vadd.f32 %v7978_v31, %v9532_v0  ;;  %1713 = vrot.lane.b32.xlu1 %v1558_v17, %s8788_s8  ;;  %v1423_v35 = vpop.f32.mrb[7].mxu1 }
 0x2d3   :  { %1843 = vst.msk [vmem:[#allocation3 + $0x28] sm:$0xff] %vm12369_vm4, %v9576_v29  ;;  %1616 = vst.msk [vmem:[#allocation3 + $0x60] sm:$0xff] %vm12369_vm4, %v9576_v29  ;;  %v1538_v36 = vmul.f32 %v9545_v7, %v1515_v30  ;;  %v1501_v37 = vadd.f32 %v9532_v0, %v1423_v35  ;;  %1646 = vrot.lane.b32.xlu0 %v9560_v19, %s8789_s5 }
 0x2d4   :  { %v9594_v38 = vadd.f32 %v9551_v10, %v1539_v32  ;;  %v1518_v33 = vmax.f32 %v1502_v34, 0.0 }
 0x2d5   :  { %v9597_v40 = vadd.f32 %v9551_v10, %v1538_v36  ;;  %v1517_v41 = vmax.f32 %v1501_v37, 0.0  ;;  %v7981_v42 = vpop.f32.mrb[8].mxu1 }
 0x2d6   :  { %1846 = vst.msk [vmem:[#allocation3 + $0x58] sm:$0xff] %vm12369_vm4, %v9594_v38  ;;  %1619 = vst.msk [vmem:[#allocation3 + $0x90] sm:$0xff] %vm12369_vm4, %v9594_v38  ;;  %v1541_v43 = vmul.f32 %v9545_v7, %v1518_v33  ;;  %v1504_v45 = vadd.f32 %v7981_v42, %v9532_v0  ;;  %1648 = vrot.lane.b32.xlu1 %v1558_v17, %s8789_s5  ;;  %v1433_v46 = vpop.f32.mrb[9].mxu1 }
 0x2d7   :  { %1845 = vst.msk [vmem:[#allocation3 + $0x48] sm:$0xff] %vm12369_vm4, %v9597_v40  ;;  %1618 = vst.msk [vmem:[#allocation3 + $0x80] sm:$0xff] %vm12369_vm4, %v9597_v40  ;;  %v1540_v47 = vmul.f32 %v9545_v7, %v1517_v41  ;;  %v1503_v48 = vadd.f32 %v9532_v0, %v1433_v46  ;;  %1780 = vrot.lane.b32.xlu0 %v9576_v29, %s8787_s7 }
 0x2d8   :  { %v9615_v49 = vadd.f32 %v9551_v10, %v1541_v43  ;;  %v1520_v50 = vmax.f32 %v1504_v45, 0.0 }
 0x2d9   :  { %v9618_v51 = vadd.f32 %v9551_v10, %v1540_v47  ;;  %v1519_v52 = vmax.f32 %v1503_v48, 0.0  ;;  %v7984_v53 = vpop.f32.mrb[10].mxu1  ;;  %v1860_v31 = vld [vmem:[#allocation3 + $0x38] sm:$0xff] }
 0x2da   :  { %1848 = vst.msk [vmem:[#allocation3 + $0x78] sm:$0xff] %vm12369_vm4, %v9615_v49  ;;  %1621 = vst.msk [vmem:[#allocation3 + $0xb0] sm:$0xff] %vm12369_vm4, %v9615_v49  ;;  %v1543_v54 = vmul.f32 %v9545_v7, %v1520_v50  ;;  %v1506_v55 = vadd.f32 %v7984_v53, %v9532_v0  ;;  %1782 = vrot.lane.b32.xlu1 %v9573_v27, %s8787_s7  ;;  %v1443_v56 = vpop.f32.mrb[11].mxu1  ;;  %v1858_v57 = vld [vmem:[#allocation3 + $0x28] sm:$0xff] }
 0x2db   :  { %1847 = vst.msk [vmem:[#allocation3 + $0x68] sm:$0xff] %vm12369_vm4, %v9618_v51  ;;  %1620 = vst.msk [vmem:[#allocation3 + $0xa0] sm:$0xff] %vm12369_vm4, %v9618_v51  ;;  %v1542_v58 = vmul.f32 %v9545_v7, %v1519_v52  ;;  %v1505_v59 = vadd.f32 %v9532_v0, %v1443_v56  ;;  %1715 = vrot.lane.b32.xlu0 %v9576_v29, %s8788_s8  ;;  %7368 = vmatprep.mubr.msk.f32.mxu0 %vm12369_vm4, %v1858_v57 }
 0x2dc   :  { %v1566_v60 = vadd.f32 %v9551_v10, %v1543_v54  ;;  %v1522_v61 = vmax.f32 %v1506_v55, 0.0 }
 0x2dd   :  { %v1565_v62 = vadd.f32 %v9551_v10, %v1542_v58  ;;  %v1521_v63 = vmax.f32 %v1505_v59, 0.0  ;;  %v7987_v1 = vpop.f32.mrb[12].mxu1  ;;  %v1864_v42 = vld [vmem:[#allocation3 + $0x58] sm:$0xff] }
 0x2de   :  { %1850 = vst.msk [vmem:[#allocation3 + $0x98] sm:$0xff] %vm12369_vm4, %v1566_v60  ;;  %1623 = vst.msk [vmem:[#allocation3 + $0xd0] sm:$0xff] %vm12369_vm4, %v1566_v60  ;;  %v1545_v2 = vmul.f32 %v9545_v7, %v1522_v61  ;;  %v1508_v3 = vadd.f32 %v7987_v1, %v9532_v0  ;;  %1717 = vrot.lane.b32.xlu1 %v9573_v27, %s8788_s8  ;;  %v1453_v4 = vpop.f32.mrb[13].mxu1 }
 0x2df   :  { %1849 = vst.msk [vmem:[#allocation3 + $0x88] sm:$0xff] %vm12369_vm4, %v1565_v62  ;;  %1622 = vst.msk [vmem:[#allocation3 + $0xc0] sm:$0xff] %vm12369_vm4, %v1565_v62  ;;  %v1544_v5 = vmul.f32 %v9545_v7, %v1521_v63  ;;  %v1507_v6 = vadd.f32 %v9532_v0, %v1453_v4  ;;  %1650 = vrot.lane.b32.xlu0 %v9576_v29, %s8789_s5 }
 0x2e0   :  { %v1568_v8 = vadd.f32 %v9551_v10, %v1545_v2  ;;  %v1524_v9 = vmax.f32 %v1508_v3, 0.0 }
 0x2e1   :  { %v1567_v11 = vadd.f32 %v9551_v10, %v1544_v5  ;;  %v1523_v12 = vmax.f32 %v1507_v6, 0.0  ;;  %v7990_v13 = vpop.f32.mrb[14].mxu1  ;;  %v1868_v53 = vld [vmem:[#allocation3 + $0x78] sm:$0xff] }
 0x2e2   :  { %1852 = vst.msk [vmem:[#allocation3 + $0xb8] sm:$0xff] %vm12369_vm4, %v1568_v8  ;;  %1625 = vst.msk [vmem:[#allocation3 + $0xf0] sm:$0xff] %vm12369_vm4, %v1568_v8  ;;  %v1547_v14 = vmul.f32 %v9545_v7, %v1524_v9  ;;  %v1510_v15 = vadd.f32 %v7990_v13, %v9532_v0  ;;  %1652 = vrot.lane.b32.xlu1 %v9573_v27, %s8789_s5  ;;  %v1463_v16 = vpop.f32.mrb[15].mxu1 }
 0x2e3   :  { %1851 = vst.msk [vmem:[#allocation3 + $0xa8] sm:$0xff] %vm12369_vm4, %v1567_v11  ;;  %1624 = vst.msk [vmem:[#allocation3 + $0xe0] sm:$0xff] %vm12369_vm4, %v1567_v11  ;;  %v1546_v44 = vmul.f32 %v9545_v7, %v1523_v12  ;;  %v1509_v17 = vadd.f32 %v9532_v0, %v1463_v16  ;;  %1784 = vrot.lane.b32.xlu0 %v9597_v40, %s8787_s7 }
 0x2e4   :  { %v1570_v18 = vadd.f32 %v9551_v10, %v1547_v14  ;;  %v1526_v20 = vmax.f32 %v1510_v15, 0.0 }
 0x2e5   :  { %v1569_v21 = vadd.f32 %v9551_v10, %v1546_v44  ;;  %v1525_v22 = vmax.f32 %v1509_v17, 0.0  ;;  %v1872_v63 = vld [vmem:[#allocation3 + $0x98] sm:$0xff] }
 0x2e6   :  { %1854 = vst.msk [vmem:[#allocation3 + $0xd8] sm:$0xff] %vm12369_vm4, %v1570_v18  ;;  %1627 = vst.msk [vmem:[#allocation3 + $0x110] sm:$0xff] %vm12369_vm4, %v1570_v18  ;;  %v1549_v23 = vmul.f32 %v9545_v7, %v1526_v20  ;;  %1786 = vrot.lane.b32.xlu1 %v9594_v38, %s8787_s7  ;;  %v1870_v59 = vld [vmem:[#allocation3 + $0x88] sm:$0xff] }
 0x2e7   :  { %1853 = vst.msk [vmem:[#allocation3 + $0xc8] sm:$0xff] %vm12369_vm4, %v1569_v21  ;;  %1626 = vst.msk [vmem:[#allocation3 + $0x100] sm:$0xff] %vm12369_vm4, %v1569_v21  ;;  %v1548_v0 = vmul.f32 %v9545_v7, %v1525_v22  ;;  %1719 = vrot.lane.b32.xlu0 %v9597_v40, %s8788_s8 }
 0x2e8   :  { %v9678_v24 = vadd.f32 %v9551_v10, %v1549_v23 }
 0x2e9   :  { %v1571_v25 = vadd.f32 %v9551_v10, %v1548_v0  ;;  %v1876_v12 = vld [vmem:[#allocation3 + $0xb8] sm:$0xff] }
 0x2ea   :  { %12378 = vst [vmem:[#allocation7_spill] sm:$0xff] %v9678_v24  ;;  %1856 = vst.msk [vmem:[#allocation3 + $0xf8] sm:$0xff] %vm12369_vm4, %v9678_v24  ;;  %1721 = vrot.lane.b32.xlu1 %v9594_v38, %s8788_s8  ;;  %v1874_v6 = vld [vmem:[#allocation3 + $0xa8] sm:$0xff] }
 0x2eb   :  { %1855 = vst.msk [vmem:[#allocation3 + $0xe8] sm:$0xff] %vm12369_vm4, %v1571_v25  ;;  %1654 = vrot.lane.b32.xlu0 %v9597_v40, %s8789_s5 }
 0x2ed   :  { %v1880_v22 = vld [vmem:[#allocation3 + $0xd8] sm:$0xff] }
 0x2ee   :  { %1656 = vrot.lane.b32.xlu1 %v9594_v38, %s8789_s5  ;;  %v1862_v38 = vld [vmem:[#allocation3 + $0x48] sm:$0xff] }
 0x2ef   :  { %1788 = vrot.lane.b32.xlu0 %v9618_v51, %s8787_s7  ;;  %v1878_v17 = vld [vmem:[#allocation3 + $0xc8] sm:$0xff] }
 0x2f2   :  { %1790 = vrot.lane.b32.xlu1 %v9615_v49, %s8787_s7 }
 0x2f3   :  { %1723 = vrot.lane.b32.xlu0 %v9618_v51, %s8788_s8 }
 0x2f6   :  { %1725 = vrot.lane.b32.xlu1 %v9615_v49, %s8788_s8 }
 0x2f7   :  { %1658 = vrot.lane.b32.xlu0 %v9618_v51, %s8789_s5 }
 0x2fa   :  { %1660 = vrot.lane.b32.xlu1 %v9615_v49, %s8789_s5  ;;  %v1866_v49 = vld [vmem:[#allocation3 + $0x68] sm:$0xff] }
 0x2fb   :  { %1792 = vrot.lane.b32.xlu0 %v1565_v62, %s8787_s7 }
 0x2fe   :  { %1794 = vrot.lane.b32.xlu1 %v1566_v60, %s8787_s7 }
 0x2ff   :  { %1727 = vrot.lane.b32.xlu0 %v1565_v62, %s8788_s8 }
 0x302   :  { %1729 = vrot.lane.b32.xlu1 %v1566_v60, %s8788_s8 }
 0x303   :  { %1662 = vrot.lane.b32.xlu0 %v1565_v62, %s8789_s5 }
 0x306   :  { %1664 = vrot.lane.b32.xlu1 %v1566_v60, %s8789_s5 }
 0x307   :  { %1796 = vrot.lane.b32.xlu0 %v1567_v11, %s8787_s7 }
 0x30a   :  { %1798 = vrot.lane.b32.xlu1 %v1568_v8, %s8787_s7 }
 0x30b   :  { %1731 = vrot.lane.b32.xlu0 %v1567_v11, %s8788_s8 }
 0x30e   :  { %1733 = vrot.lane.b32.xlu1 %v1568_v8, %s8788_s8 }
 0x30f   :  { %1666 = vrot.lane.b32.xlu0 %v1567_v11, %s8789_s5 }
 0x312   :  { %1668 = vrot.lane.b32.xlu1 %v1568_v8, %s8789_s5 }
 0x313   :  { %1800 = vrot.lane.b32.xlu0 %v1569_v21, %s8787_s7 }
 0x316   :  { %1802 = vrot.lane.b32.xlu1 %v1570_v18, %s8787_s7 }
 0x317   :  { %1735 = vrot.lane.b32.xlu0 %v1569_v21, %s8788_s8 }
 0x31a   :  { %1737 = vrot.lane.b32.xlu1 %v1570_v18, %s8788_s8 }
 0x31b   :  { %1670 = vrot.lane.b32.xlu0 %v1569_v21, %s8789_s5 }
 0x31e   :  { %1672 = vrot.lane.b32.xlu1 %v1570_v18, %s8789_s5 }
 0x31f   :  { %1804 = vrot.lane.b32.xlu0 %v1571_v25, %s8787_s7 }
 0x322   :  { %1806 = vrot.lane.b32.xlu1 %v9678_v24, %s8787_s7 }
 0x323   :  { %1739 = vrot.lane.b32.xlu0 %v1571_v25, %s8788_s8 }
 0x326   :  { %1741 = vrot.lane.b32.xlu1 %v9678_v24, %s8788_s8 }
 0x327   :  { %1674 = vrot.lane.b32.xlu0 %v1571_v25, %s8789_s5 }
 0x340   :  { %v1779_v7 = vpop.permute.xlu1 %1778 }
 0x341   :  { %v1712_v10 = vpop.permute.xlu0 %1711 }
 0x342   :  { %1760 = vst.msk [vmem:[#allocation3 + $0x20] sm:$0xff] %vm1759_vm5, %v1712_v10 }
 0x343   :  { %1826 = vst.msk [vmem:[#allocation3 + $0x20] sm:$0xff] %vm1824_vm6, %v1779_v7 }
 0x344   :  { %v1714_v26 = vpop.permute.xlu1 %1713 }
 0x345   :  { %v1647_v27 = vpop.permute.xlu0 %1646 }
 0x346   :  { %1695 = vst.msk [vmem:[#allocation3 + $0x30] sm:$0xff] %vm12359_vm7, %v1647_v27 }
 0x347   :  { %1761 = vst.msk [vmem:[#allocation3 + $0x30] sm:$0xff] %vm1759_vm5, %v1714_v26  ;;  %v1882_v26 = vld [vmem:[#allocation3 + $0xe8] sm:$0xff] }
 0x348   :  { %v1649_v28 = vpop.permute.xlu1 %1648 }
 0x349   :  { %1696 = vst.msk [vmem:[#allocation3 + $0x40] sm:$0xff] %vm12359_vm7, %v1649_v28  ;;  %v1781_v29 = vpop.permute.xlu0 %1780 }
 0x34a   :  { %1827 = vst.msk [vmem:[#allocation3 + $0x30] sm:$0xff] %vm1824_vm6, %v1781_v29  ;;  %v1857_v30 = vld [vmem:[#allocation3 + $0x20] sm:$0xff] }
 0x34b   :  { %2029 = vmatmul.mubr.f32.vlgmr.msra.gmra.mrb[16].mxu0 %v1857_v30  ;;  %v1884_v30 = vld [vmem:[#allocation3 + $0xf8] sm:$0xff] }
 0x34c   :  { %v1783_v32 = vpop.permute.xlu1 %1782  ;;  %7369 = vmatprep.mubr.msk.f32.mxu0 %vm12369_vm4, %v1860_v31 }
 0x34d   :  { %v1716_v34 = vpop.permute.xlu0 %1715 }
 0x34e   :  { %1762 = vst.msk [vmem:[#allocation3 + $0x40] sm:$0xff] %vm1759_vm5, %v1716_v34  ;;  %v9784_v34 = vld [vmem:[#allocation3 + $0x108] sm:$0xff] }
 0x34f   :  { %1828 = vst.msk [vmem:[#allocation3 + $0x40] sm:$0xff] %vm1824_vm6, %v1783_v32 }
 0x350   :  { %v1718_v35 = vpop.permute.xlu1 %1717 }
 0x351   :  { %v1651_v36 = vpop.permute.xlu0 %1650  ;;  %v1859_v37 = vld [vmem:[#allocation3 + $0x30] sm:$0xff] }
 0x352   :  { %1697 = vst.msk [vmem:[#allocation3 + $0x50] sm:$0xff] %vm12359_vm7, %v1651_v36  ;;  %2034 = vmatmul.mubr.f32.gmra.mrb[18].mxu0 %v1859_v37 }
 0x353   :  { %1763 = vst.msk [vmem:[#allocation3 + $0x50] sm:$0xff] %vm1759_vm5, %v1718_v35  ;;  %7370 = vmatprep.mubr.msk.f32.mxu0 %vm12369_vm4, %v1862_v38  ;;  %v9790_v38 = vld [vmem:[#allocation3 + $0x118] sm:$0xff] }
 0x354   :  { %v1653_v33 = vpop.permute.xlu1 %1652 }
 0x355   :  { %1698 = vst.msk [vmem:[#allocation3 + $0x60] sm:$0xff] %vm12359_vm7, %v1653_v33  ;;  %v1785_v40 = vpop.permute.xlu0 %1784 }
 0x356   :  { %1829 = vst.msk [vmem:[#allocation3 + $0x50] sm:$0xff] %vm1824_vm6, %v1785_v40  ;;  %v1861_v41 = vld [vmem:[#allocation3 + $0x40] sm:$0xff] }
 0x357   :  { %2039 = vmatmul.mubr.f32.gmra.mrb[20].mxu0 %v1861_v41  ;;  %v7386_v41 = vld [vmem:[%s12313_s9 + $0xa0] sm:$0xff] }
 0x358   :  { %v1787_v43 = vpop.permute.xlu1 %1786  ;;  %7371 = vmatprep.mubr.msk.f32.mxu0 %vm12369_vm4, %v1864_v42  ;;  %v7387_v42 = vld [vmem:[%s12313_s9 + $0xa8] sm:$0xff] }
 0x359   :  { %v1720_v45 = vpop.permute.xlu0 %1719 }
 0x35a   :  { %1764 = vst.msk [vmem:[#allocation3 + $0x60] sm:$0xff] %vm1759_vm5, %v1720_v45  ;;  %v7388_v45 = vld [vmem:[%s12313_s9 + $0xb0] sm:$0xff] }
 0x35b   :  { %1830 = vst.msk [vmem:[#allocation3 + $0x60] sm:$0xff] %vm1824_vm6, %v1787_v43  ;;  %v8142_v43 = vpack.c.bf16 %v7387_v42, %v7386_v41 }
 0x35c   :  { %v1722_v46 = vpop.permute.xlu1 %1721 }
 0x35d   :  { %v1655_v47 = vpop.permute.xlu0 %1654  ;;  %v1863_v48 = vld [vmem:[#allocation3 + $0x50] sm:$0xff]  ;;  %8143 = vmatpush1.bf16.msra.mxu0 %v8142_v43 }
 0x35e   :  { %1699 = vst.msk [vmem:[#allocation3 + $0x70] sm:$0xff] %vm12359_vm7, %v1655_v47  ;;  %2044 = vmatmul.mubr.f32.gmra.mrb[22].mxu0 %v1863_v48  ;;  %8144 = vmatprep.subr.bf16.mxu0 %v8786_v39  ;;  %v7390_v48 = vld [vmem:[%s12313_s9 + $0xc0] sm:$0xff] }
 0x35f   :  { %1765 = vst.msk [vmem:[#allocation3 + $0x70] sm:$0xff] %vm1759_vm5, %v1722_v46  ;;  %7372 = vmatprep.mubr.msk.f32.mxu0 %vm12369_vm4, %v1866_v49  ;;  %v7389_v46 = vld [vmem:[%s12313_s9 + $0xb8] sm:$0xff]  ;;  %v7391_v49 = vld [vmem:[%s12313_s9 + $0xc8] sm:$0xff] }
 0x360   :  { %v1657_v50 = vpop.permute.xlu1 %1656  ;;  %v8145_v47 = vpack.c.bf16 %v7389_v46, %v7388_v45 }
 0x361   :  { %1700 = vst.msk [vmem:[#allocation3 + $0x80] sm:$0xff] %vm12359_vm7, %v1657_v50  ;;  %v1789_v51 = vpop.permute.xlu0 %1788  ;;  %v7392_v50 = vld [vmem:[%s12313_s9 + $0xd0] sm:$0xff] }
 0x362   :  { %1831 = vst.msk [vmem:[#allocation3 + $0x70] sm:$0xff] %vm1824_vm6, %v1789_v51  ;;  %v1865_v52 = vld [vmem:[#allocation3 + $0x60] sm:$0xff]  ;;  %8146 = vmatpush1.bf16.msra.mxu0 %v8145_v47  ;;  %v8148_v51 = vpack.c.bf16 %v7391_v49, %v7390_v48 }
 0x363   :  { %2049 = vmatmul.mubr.f32.gmra.mrb[24].mxu0 %v1865_v52  ;;  %8147 = vmatprep.subr.bf16.mxu0 %v8786_v39  ;;  %v7393_v52 = vld [vmem:[%s12313_s9 + $0xd8] sm:$0xff] }
 0x364   :  { %v1791_v54 = vpop.permute.xlu1 %1790  ;;  %7373 = vmatprep.mubr.msk.f32.mxu0 %vm12369_vm4, %v1868_v53  ;;  %v8151_v53 = vpack.c.bf16 %v7393_v52, %v7392_v50 }
 0x365   :  { %v1724_v55 = vpop.permute.xlu0 %1723 }
 0x366   :  { %1766 = vst.msk [vmem:[#allocation3 + $0x80] sm:$0xff] %vm1759_vm5, %v1724_v55  ;;  %8149 = vmatpush1.bf16.msra.mxu0 %v8148_v51  ;;  %v7395_v55 = vld [vmem:[%s12313_s9 + $0xe8] sm:$0xff] }
 0x367   :  { %1832 = vst.msk [vmem:[#allocation3 + $0x80] sm:$0xff] %vm1824_vm6, %v1791_v54  ;;  %8150 = vmatprep.subr.bf16.mxu0 %v8786_v39  ;;  %v7394_v54 = vld [vmem:[%s12313_s9 + $0xe0] sm:$0xff] }
 0x368   :  { %v1726_v56 = vpop.permute.xlu1 %1725 }
 0x369   :  { %v1659_v57 = vpop.permute.xlu0 %1658  ;;  %v1867_v58 = vld [vmem:[#allocation3 + $0x70] sm:$0xff] }
 0x36a   :  { %1701 = vst.msk [vmem:[#allocation3 + $0x90] sm:$0xff] %vm12359_vm7, %v1659_v57  ;;  %2054 = vmatmul.mubr.f32.gmra.mrb[26].mxu0 %v1867_v58  ;;  %v7396_v57 = vld [vmem:[%s12313_s9 + $0xf0] sm:$0xff]  ;;  %v7397_v58 = vld [vmem:[%s12313_s9 + $0xf8] sm:$0xff] }
 0x36b   :  { %1767 = vst.msk [vmem:[#allocation3 + $0x90] sm:$0xff] %vm1759_vm5, %v1726_v56  ;;  %7374 = vmatprep.mubr.msk.f32.mxu0 %vm12369_vm4, %v1870_v59  ;;  %8152 = vmatpush1.bf16.msra.mxu0 %v8151_v53  ;;  %v8154_v56 = vpack.c.bf16 %v7395_v55, %v7394_v54  ;;  %v8157_v59 = vpack.c.bf16 %v7397_v58, %v7396_v57 }
 0x36c   :  { %v1661_v60 = vpop.permute.xlu1 %1660  ;;  %8153 = vmatprep.subr.bf16.mxu0 %v8786_v39 }
 0x36d   :  { %1702 = vst.msk [vmem:[#allocation3 + $0xa0] sm:$0xff] %vm12359_vm7, %v1661_v60  ;;  %v1793_v61 = vpop.permute.xlu0 %1792  ;;  %v7398_v60 = vld [vmem:[%s12313_s9 + $0x100] sm:$0xff] }
 0x36e   :  { %1833 = vst.msk [vmem:[#allocation3 + $0x90] sm:$0xff] %vm1824_vm6, %v1793_v61  ;;  %v1869_v62 = vld [vmem:[#allocation3 + $0x80] sm:$0xff]  ;;  %v7399_v61 = vld [vmem:[%s12313_s9 + $0x108] sm:$0xff] }
 0x36f   :  { %2059 = vmatmul.mubr.f32.gmra.mrb[28].mxu0 %v1869_v62  ;;  %v8160_v62 = vpack.c.bf16 %v7399_v61, %v7398_v60 }
 0x370   :  { %v1795_v1 = vpop.permute.xlu1 %1794  ;;  %7375 = vmatprep.mubr.msk.f32.mxu0 %vm12369_vm4, %v1872_v63  ;;  %8155 = vmatpush1.bf16.msra.mxu0 %v8154_v56  ;;  %v7400_v63 = vld [vmem:[%s12313_s9 + $0x110] sm:$0xff] }
 0x371   :  { %v1728_v2 = vpop.permute.xlu0 %1727  ;;  %8156 = vmatprep.subr.bf16.mxu0 %v8786_v39 }
 0x372   :  { %1768 = vst.msk [vmem:[#allocation3 + $0xa0] sm:$0xff] %vm1759_vm5, %v1728_v2 }
 0x373   :  { %1834 = vst.msk [vmem:[#allocation3 + $0xa0] sm:$0xff] %vm1824_vm6, %v1795_v1  ;;  %v7401_v1 = vld [vmem:[%s12313_s9 + $0x118] sm:$0xff] }
 0x374   :  { %v1730_v3 = vpop.permute.xlu1 %1729  ;;  %8158 = vmatpush1.bf16.msra.mxu0 %v8157_v59  ;;  %v8163_v2 = vpack.c.bf16 %v7401_v1, %v7400_v63 }
 0x375   :  { %v1663_v4 = vpop.permute.xlu0 %1662  ;;  %v1871_v5 = vld [vmem:[#allocation3 + $0x90] sm:$0xff]  ;;  %8159 = vmatprep.subr.bf16.mxu0 %v8786_v39 }
 0x376   :  { %1703 = vst.msk [vmem:[#allocation3 + $0xb0] sm:$0xff] %vm12359_vm7, %v1663_v4  ;;  %2064 = vmatmul.mubr.f32.gmra.mrb[30].mxu0 %v1871_v5  ;;  %v7402_v5 = vld [vmem:[%s12313_s9 + $0x120] sm:$0xff] }
 0x377   :  { %1769 = vst.msk [vmem:[#allocation3 + $0xb0] sm:$0xff] %vm1759_vm5, %v1730_v3  ;;  %7376 = vmatprep.mubr.msk.f32.mxu0 %vm12369_vm4, %v1874_v6  ;;  %v9853_v3 = vld [vmem:[%s12317_s10] ss:$0 sm:$0xff]  ;;  %v7403_v6 = vld [vmem:[%s12313_s9 + $0x128] sm:$0xff] }
 0x378   :  { %v1665_v8 = vpop.permute.xlu1 %1664  ;;  %8161 = vmatpush1.bf16.msra.mxu0 %v8160_v62 }
 0x379   :  { %1704 = vst.msk [vmem:[#allocation3 + $0xc0] sm:$0xff] %vm12359_vm7, %v1665_v8  ;;  %v1797_v9 = vpop.permute.xlu0 %1796  ;;  %8162 = vmatprep.subr.bf16.mxu0 %v8786_v39 }
 0x37a   :  { %1835 = vst.msk [vmem:[#allocation3 + $0xb0] sm:$0xff] %vm1824_vm6, %v1797_v9  ;;  %v1873_v11 = vld [vmem:[#allocation3 + $0xa0] sm:$0xff] }
 0x37b   :  { %2069 = vmatmul.mubr.f32.gmra.mrb[32].mxu0 %v1873_v11  ;;  %v8166_v11 = vpack.c.bf16 %v7403_v6, %v7402_v5 }
 0x37c   :  { %v1799_v13 = vpop.permute.xlu1 %1798  ;;  %7377 = vmatprep.mubr.msk.f32.mxu0 %vm12369_vm4, %v1876_v12  ;;  %8164 = vmatpush1.bf16.msra.mxu0 %v8163_v2  ;;  %v9865_v12 = vld [vmem:[%s12318_s11] ss:$0 sm:$0xff] }
 0x37d   :  { %v1732_v14 = vpop.permute.xlu0 %1731  ;;  %8165 = vmatprep.subr.bf16.mxu0 %v8786_v39 }
 0x37e   :  { %1770 = vst.msk [vmem:[#allocation3 + $0xc0] sm:$0xff] %vm1759_vm5, %v1732_v14  ;;  %v9870_v14 = vld [vmem:[%s12319_s12] ss:$0 sm:$0xff] }
 0x37f   :  { %1836 = vst.msk [vmem:[#allocation3 + $0xc0] sm:$0xff] %vm1824_vm6, %v1799_v13 }
 0x380   :  { %v1734_v15 = vpop.permute.xlu1 %1733  ;;  %8167 = vmatpush1.bf16.msra.mxu0 %v8166_v11 }
 0x381   :  { %v1667_v16 = vpop.permute.xlu0 %1666  ;;  %v1875_v44 = vld [vmem:[#allocation3 + $0xb0] sm:$0xff]  ;;  %8168 = vmatprep.subr.bf16.mxu0 %v8786_v39 }
 0x382   :  { %1705 = vst.msk [vmem:[#allocation3 + $0xd0] sm:$0xff] %vm12359_vm7, %v1667_v16  ;;  %2074 = vmatmul.mubr.f32.gmra.mrb[34].mxu0 %v1875_v44  ;;  %v7404_v16 = vld [vmem:[%s12313_s9 + $0x130] sm:$0xff]  ;;  %v7405_v44 = vld [vmem:[%s12313_s9 + $0x138] sm:$0xff] }
 0x383   :  { %1771 = vst.msk [vmem:[#allocation3 + $0xd0] sm:$0xff] %vm1759_vm5, %v1734_v15  ;;  %7378 = vmatprep.mubr.msk.f32.mxu0 %vm12369_vm4, %v1878_v17  ;;  %v8169_v17 = vpack.c.bf16 %v7405_v44, %v7404_v16 }
 0x384   :  { %v1669_v18 = vpop.permute.xlu1 %1668 }
 0x385   :  { %1706 = vst.msk [vmem:[#allocation3 + $0xe0] sm:$0xff] %vm12359_vm7, %v1669_v18  ;;  %v1801_v20 = vpop.permute.xlu0 %1800  ;;  %8170 = vmatpush1.bf16.msra.mxu0 %v8169_v17 }
 0x386   :  { %1837 = vst.msk [vmem:[#allocation3 + $0xd0] sm:$0xff] %vm1824_vm6, %v1801_v20  ;;  %v1877_v21 = vld [vmem:[#allocation3 + $0xc0] sm:$0xff]  ;;  %8201 = vmatprep.subr.bf16.mxu0 %v8786_v39 }
 0x387   :  { %2079 = vmatmul.mubr.f32.gmra.mrb[36].mxu0 %v1877_v21 }
 0x388   :  { %v1803_v23 = vpop.permute.xlu1 %1802  ;;  %7379 = vmatprep.mubr.msk.f32.mxu0 %vm12369_vm4, %v1880_v22 }
 0x389   :  { %v1736_v0 = vpop.permute.xlu0 %1735 }
 0x38a   :  { %1772 = vst.msk [vmem:[#allocation3 + $0xe0] sm:$0xff] %vm1759_vm5, %v1736_v0 }
 0x38b   :  { %1838 = vst.msk [vmem:[#allocation3 + $0xe0] sm:$0xff] %vm1824_vm6, %v1803_v23 }
 0x38c   :  { %v1738_v25 = vpop.permute.xlu1 %1737 }
 0x38d   :  { %v1671_v7 = vpop.permute.xlu0 %1670  ;;  %v1879_v10 = vld [vmem:[#allocation3 + $0xd0] sm:$0xff] }
 0x38e   :  { %1707 = vst.msk [vmem:[#allocation3 + $0xf0] sm:$0xff] %vm12359_vm7, %v1671_v7  ;;  %2084 = vmatmul.mubr.f32.gmra.mrb[38].mxu0 %v1879_v10 }
 0x38f   :  { %1773 = vst.msk [vmem:[#allocation3 + $0xf0] sm:$0xff] %vm1759_vm5, %v1738_v25  ;;  %7380 = vmatprep.mubr.msk.f32.mxu0 %vm12369_vm4, %v1882_v26 }
 0x390   :  { %v1673_v27 = vpop.permute.xlu1 %1672 }
 0x391   :  { %1708 = vst.msk [vmem:[#allocation3 + $0x100] sm:$0xff] %vm12359_vm7, %v1673_v27  ;;  %v1805_v28 = vpop.permute.xlu0 %1804 }
 0x392   :  { %1839 = vst.msk [vmem:[#allocation3 + $0xf0] sm:$0xff] %vm1824_vm6, %v1805_v28  ;;  %v1881_v29 = vld [vmem:[#allocation3 + $0xe0] sm:$0xff] }
 0x393   :  { %2089 = vmatmul.mubr.f32.gmra.mrb[40].mxu0 %v1881_v29 }
 0x394   :  { %v1807_v31 = vpop.permute.xlu1 %1806  ;;  %7381 = vmatprep.mubr.msk.f32.mxu0 %vm12369_vm4, %v1884_v30 }
 0x395   :  { %v1740_v32 = vpop.permute.xlu0 %1739 }
 0x396   :  { %1774 = vst.msk [vmem:[#allocation3 + $0x100] sm:$0xff] %vm1759_vm5, %v1740_v32 }
 0x397   :  { %1840 = vst.msk [vmem:[#allocation3 + $0x100] sm:$0xff] %vm1824_vm6, %v1807_v31 }
 0x398   :  { %v1742_v37 = vpop.permute.xlu1 %1741 }
 0x399   :  { %v1675_v35 = vpop.permute.xlu0 %1674  ;;  %v1883_v36 = vld [vmem:[#allocation3 + $0xf0] sm:$0xff] }
 0x39a   :  { %1709 = vst.msk [vmem:[#allocation3 + $0x110] sm:$0xff] %vm12359_vm7, %v1675_v35  ;;  %2094 = vmatmul.mubr.f32.gmra.mrb[42].mxu0 %v1883_v36 }
 0x39b   :  { %1775 = vst.msk [vmem:[#allocation3 + $0x110] sm:$0xff] %vm1759_vm5, %v1742_v37  ;;  %7382 = vmatprep.mubr.msk.f32.mxu0 %vm12369_vm4, %v9784_v34 }
 0x39e   :  { %v1885_v33 = vld [vmem:[#allocation3 + $0x100] sm:$0xff] }
 0x39f   :  { %2099 = vmatmul.mubr.f32.gmra.mrb[44].mxu0 %v1885_v33 }
 0x3a0   :  { %7383 = vmatprep.mubr.msk.f32.mxu0 %vm12369_vm4, %v9790_v38 }
 0x3a2   :  { %v1887_v40 = vld [vmem:[#allocation3 + $0x110] sm:$0xff] }
 0x3a3   :  { %2104 = vmatmul.mubr.f32.gmra.mrb[46].mxu0 %v1887_v40 }
 0x41e   :  { %v2030_v4 = vpop.f32.mrb[16].mxu0 }
 0x41f   :  { %v2031_v8 = vadd.f32 %v9853_v3, %v2030_v4  ;;  %v2032_v9 = vpop.f32.mrb[17].mxu0 }
 0x421   :  { %v2109_v13 = vmax.f32 %v2031_v8, 0.0 }
 0x423   :  { %v2132_v15 = vmul.f32 %v9865_v12, %v2109_v13 }
 0x425   :  { %v9881_v18 = vadd.f32 %v9870_v14, %v2132_v15  ;;  %v2035_v20 = vpop.f32.mrb[18].mxu0 }
 0x426   :  { %v2036_v21 = vadd.f32 %v9853_v3, %v2035_v20  ;;  %v2037_v22 = vpop.f32.mrb[19].mxu0 }
 0x427   :  { %12379 = vst [vmem:[#allocation8_spill] sm:$0xff] %v9881_v18  ;;  %2171 = vst.msk [vmem:[#allocation3 + $0x40] sm:$0xff] %vm12369_vm4, %v9881_v18  ;;  %2267 = vrot.lane.b32.xlu0 %v9881_v18, %s8788_s8 }
 0x428   :  { %v2110_v23 = vmax.f32 %v2036_v21, 0.0 }
 0x42a   :  { %v2133_v0 = vmul.f32 %v9865_v12, %v2110_v23  ;;  %v2040_v25 = vpop.f32.mrb[20].mxu0 }
 0x42b   :  { %v2041_v7 = vadd.f32 %v9853_v3, %v2040_v25  ;;  %v2042_v10 = vpop.f32.mrb[21].mxu0  ;;  %2203 = vrot.lane.b32.xlu0 %v9881_v18, %s8789_s5 }
 0x42c   :  { %v2156_v26 = vadd.f32 %v9870_v14, %v2133_v0 }
 0x42d   :  { %v2111_v27 = vmax.f32 %v2041_v7, 0.0 }
 0x42e   :  { %2172 = vst.msk [vmem:[#allocation3 + $0x50] sm:$0xff] %vm12369_vm4, %v2156_v26  ;;  %2333 = vrot.lane.b32.xlu1 %v2156_v26, %s8787_s7 }
 0x42f   :  { %v2134_v28 = vmul.f32 %v9865_v12, %v2111_v27 }
 0x431   :  { %v2157_v29 = vadd.f32 %v9870_v14, %v2134_v28  ;;  %v2045_v30 = vpop.f32.mrb[22].mxu0 }
 0x432   :  { %v2046_v31 = vadd.f32 %v9853_v3, %v2045_v30  ;;  %v2047_v32 = vpop.f32.mrb[23].mxu0  ;;  %2269 = vrot.lane.b32.xlu1 %v2156_v26, %s8788_s8 }
 0x433   :  { %2397 = vst.msk [vmem:[#allocation3 + $0x28] sm:$0xff] %vm12369_vm4, %v2157_v29  ;;  %2173 = vst.msk [vmem:[#allocation3 + $0x60] sm:$0xff] %vm12369_vm4, %v2157_v29  ;;  %2335 = vrot.lane.b32.xlu0 %v2157_v29, %s8787_s7 }
 0x434   :  { %v2112_v35 = vmax.f32 %v2046_v31, 0.0 }
 0x436   :  { %v2135_v36 = vmul.f32 %v9865_v12, %v2112_v35  ;;  %v2050_v37 = vpop.f32.mrb[24].mxu0  ;;  %2205 = vrot.lane.b32.xlu1 %v2156_v26, %s8789_s5 }
 0x437   :  { %v2051_v33 = vadd.f32 %v9853_v3, %v2050_v37  ;;  %v2052_v40 = vpop.f32.mrb[25].mxu0  ;;  %2271 = vrot.lane.b32.xlu0 %v2157_v29, %s8788_s8 }
 0x438   :  { %v2158_v41 = vadd.f32 %v9870_v14, %v2135_v36 }
 0x439   :  { %v2113_v42 = vmax.f32 %v2051_v33, 0.0 }
 0x43a   :  { %2398 = vst.msk [vmem:[#allocation3 + $0x38] sm:$0xff] %vm12369_vm4, %v2158_v41  ;;  %2174 = vst.msk [vmem:[#allocation3 + $0x70] sm:$0xff] %vm12369_vm4, %v2158_v41  ;;  %2337 = vrot.lane.b32.xlu1 %v2158_v41, %s8787_s7  ;;  %v2412_v43 = vld [vmem:[#allocation3 + $0x28] sm:$0xff] }
 0x43b   :  { %v2136_v45 = vmul.f32 %v9865_v12, %v2113_v42  ;;  %2207 = vrot.lane.b32.xlu0 %v2157_v29, %s8789_s5  ;;  %7408 = vmatprep.mubr.msk.f32.mxu0 %vm12369_vm4, %v2412_v43 }
 0x43d   :  { %v2159_v46 = vadd.f32 %v9870_v14, %v2136_v45  ;;  %v2055_v47 = vpop.f32.mrb[26].mxu0 }
 0x43e   :  { %v2056_v48 = vadd.f32 %v9853_v3, %v2055_v47  ;;  %v2057_v49 = vpop.f32.mrb[27].mxu0  ;;  %2273 = vrot.lane.b32.xlu1 %v2158_v41, %s8788_s8 }
 0x43f   :  { %2399 = vst.msk [vmem:[#allocation3 + $0x48] sm:$0xff] %vm12369_vm4, %v2159_v46  ;;  %2175 = vst.msk [vmem:[#allocation3 + $0x80] sm:$0xff] %vm12369_vm4, %v2159_v46  ;;  %2339 = vrot.lane.b32.xlu0 %v2159_v46, %s8787_s7 }
 0x440   :  { %v2114_v50 = vmax.f32 %v2056_v48, 0.0 }
 0x442   :  { %v2137_v51 = vmul.f32 %v9865_v12, %v2114_v50  ;;  %v2060_v52 = vpop.f32.mrb[28].mxu0  ;;  %2209 = vrot.lane.b32.xlu1 %v2158_v41, %s8789_s5 }
 0x443   :  { %v2061_v53 = vadd.f32 %v9853_v3, %v2060_v52  ;;  %v2062_v54 = vpop.f32.mrb[29].mxu0  ;;  %2275 = vrot.lane.b32.xlu0 %v2159_v46, %s8788_s8 }
 0x444   :  { %v2160_v55 = vadd.f32 %v9870_v14, %v2137_v51 }
 0x445   :  { %v2115_v56 = vmax.f32 %v2061_v53, 0.0 }
 0x446   :  { %2400 = vst.msk [vmem:[#allocation3 + $0x58] sm:$0xff] %vm12369_vm4, %v2160_v55  ;;  %2176 = vst.msk [vmem:[#allocation3 + $0x90] sm:$0xff] %vm12369_vm4, %v2160_v55  ;;  %2341 = vrot.lane.b32.xlu1 %v2160_v55, %s8787_s7 }
 0x447   :  { %v2138_v57 = vmul.f32 %v9865_v12, %v2115_v56  ;;  %2211 = vrot.lane.b32.xlu0 %v2159_v46, %s8789_s5 }
 0x449   :  { %v2161_v58 = vadd.f32 %v9870_v14, %v2138_v57  ;;  %v2065_v59 = vpop.f32.mrb[30].mxu0 }
 0x44a   :  { %v2066_v60 = vadd.f32 %v9853_v3, %v2065_v59  ;;  %v2067_v61 = vpop.f32.mrb[31].mxu0  ;;  %2277 = vrot.lane.b32.xlu1 %v2160_v55, %s8788_s8 }
 0x44b   :  { %2401 = vst.msk [vmem:[#allocation3 + $0x68] sm:$0xff] %vm12369_vm4, %v2161_v58  ;;  %2177 = vst.msk [vmem:[#allocation3 + $0xa0] sm:$0xff] %vm12369_vm4, %v2161_v58  ;;  %2343 = vrot.lane.b32.xlu0 %v2161_v58, %s8787_s7 }
 0x44c   :  { %v2116_v62 = vmax.f32 %v2066_v60, 0.0 }
 0x44e   :  { %v2139_v63 = vmul.f32 %v9865_v12, %v2116_v62  ;;  %v2070_v1 = vpop.f32.mrb[32].mxu0  ;;  %2213 = vrot.lane.b32.xlu1 %v2160_v55, %s8789_s5 }
 0x44f   :  { %v2071_v2 = vadd.f32 %v9853_v3, %v2070_v1  ;;  %v2072_v4 = vpop.f32.mrb[33].mxu0  ;;  %2279 = vrot.lane.b32.xlu0 %v2161_v58, %s8788_s8 }
 0x450   :  { %v2162_v5 = vadd.f32 %v9870_v14, %v2139_v63  ;;  %v2414_v63 = vld [vmem:[#allocation3 + $0x38] sm:$0xff] }
 0x451   :  { %v2117_v6 = vmax.f32 %v2071_v2, 0.0 }
 0x452   :  { %2402 = vst.msk [vmem:[#allocation3 + $0x78] sm:$0xff] %vm12369_vm4, %v2162_v5  ;;  %2178 = vst.msk [vmem:[#allocation3 + $0xb0] sm:$0xff] %vm12369_vm4, %v2162_v5  ;;  %2345 = vrot.lane.b32.xlu1 %v2162_v5, %s8787_s7 }
 0x453   :  { %v2140_v8 = vmul.f32 %v9865_v12, %v2117_v6  ;;  %2215 = vrot.lane.b32.xlu0 %v2161_v58, %s8789_s5 }
 0x455   :  { %v2163_v9 = vadd.f32 %v9870_v14, %v2140_v8  ;;  %v2075_v11 = vpop.f32.mrb[34].mxu0 }
 0x456   :  { %v2076_v13 = vadd.f32 %v9853_v3, %v2075_v11  ;;  %v2077_v15 = vpop.f32.mrb[35].mxu0  ;;  %2281 = vrot.lane.b32.xlu1 %v2162_v5, %s8788_s8 }
 0x457   :  { %2403 = vst.msk [vmem:[#allocation3 + $0x88] sm:$0xff] %vm12369_vm4, %v2163_v9  ;;  %2179 = vst.msk [vmem:[#allocation3 + $0xc0] sm:$0xff] %vm12369_vm4, %v2163_v9  ;;  %2347 = vrot.lane.b32.xlu0 %v2163_v9, %s8787_s7  ;;  %v2418_v15 = vld [vmem:[#allocation3 + $0x58] sm:$0xff] }
 0x458   :  { %v2118_v16 = vmax.f32 %v2076_v13, 0.0 }
 0x45a   :  { %v2141_v44 = vmul.f32 %v9865_v12, %v2118_v16  ;;  %v2080_v17 = vpop.f32.mrb[36].mxu0  ;;  %2217 = vrot.lane.b32.xlu1 %v2162_v5, %s8789_s5  ;;  %v2416_v5 = vld [vmem:[#allocation3 + $0x48] sm:$0xff] }
 0x45b   :  { %v2081_v20 = vadd.f32 %v9853_v3, %v2080_v17  ;;  %v2082_v21 = vpop.f32.mrb[37].mxu0  ;;  %2283 = vrot.lane.b32.xlu0 %v2163_v9, %s8788_s8 }
 0x45c   :  { %v2164_v22 = vadd.f32 %v9870_v14, %v2141_v44 }
 0x45d   :  { %v2119_v23 = vmax.f32 %v2081_v20, 0.0  ;;  %v2420_v20 = vld [vmem:[#allocation3 + $0x68] sm:$0xff] }
 0x45e   :  { %2404 = vst.msk [vmem:[#allocation3 + $0x98] sm:$0xff] %vm12369_vm4, %v2164_v22  ;;  %2180 = vst.msk [vmem:[#allocation3 + $0xd0] sm:$0xff] %vm12369_vm4, %v2164_v22  ;;  %2349 = vrot.lane.b32.xlu1 %v2164_v22, %s8787_s7 }
 0x45f   :  { %v2142_v0 = vmul.f32 %v9865_v12, %v2119_v23  ;;  %2219 = vrot.lane.b32.xlu0 %v2163_v9, %s8789_s5 }
 0x461   :  { %v2165_v25 = vadd.f32 %v9870_v14, %v2142_v0  ;;  %v2085_v7 = vpop.f32.mrb[38].mxu0 }
 0x462   :  { %v2086_v10 = vadd.f32 %v9853_v3, %v2085_v7  ;;  %v2087_v26 = vpop.f32.mrb[39].mxu0  ;;  %2285 = vrot.lane.b32.xlu1 %v2164_v22, %s8788_s8  ;;  %v2422_v7 = vld [vmem:[#allocation3 + $0x78] sm:$0xff] }
 0x463   :  { %2405 = vst.msk [vmem:[#allocation3 + $0xa8] sm:$0xff] %vm12369_vm4, %v2165_v25  ;;  %2181 = vst.msk [vmem:[#allocation3 + $0xe0] sm:$0xff] %vm12369_vm4, %v2165_v25  ;;  %2351 = vrot.lane.b32.xlu0 %v2165_v25, %s8787_s7 }
 0x464   :  { %v2120_v27 = vmax.f32 %v2086_v10, 0.0 }
 0x466   :  { %v2143_v28 = vmul.f32 %v9865_v12, %v2120_v27  ;;  %2221 = vrot.lane.b32.xlu1 %v2164_v22, %s8789_s5  ;;  %v2090_v29 = vpop.f32.mrb[40].mxu0 }
 0x467   :  { %v2091_v30 = vadd.f32 %v9853_v3, %v2090_v29  ;;  %2287 = vrot.lane.b32.xlu0 %v2165_v25, %s8788_s8  ;;  %v2092_v31 = vpop.f32.mrb[41].mxu0 }
 0x468   :  { %v2166_v32 = vadd.f32 %v9870_v14, %v2143_v28  ;;  %v2424_v28 = vld [vmem:[#allocation3 + $0x88] sm:$0xff] }
 0x469   :  { %v2121_v35 = vmax.f32 %v2091_v30, 0.0 }
 0x46a   :  { %2406 = vst.msk [vmem:[#allocation3 + $0xb8] sm:$0xff] %vm12369_vm4, %v2166_v32  ;;  %2182 = vst.msk [vmem:[#allocation3 + $0xf0] sm:$0xff] %vm12369_vm4, %v2166_v32  ;;  %2353 = vrot.lane.b32.xlu1 %v2166_v32, %s8787_s7 }
 0x46b   :  { %v2144_v36 = vmul.f32 %v9865_v12, %v2121_v35  ;;  %2223 = vrot.lane.b32.xlu0 %v2165_v25, %s8789_s5 }
 0x46d   :  { %v2167_v37 = vadd.f32 %v9870_v14, %v2144_v36  ;;  %v2095_v33 = vpop.f32.mrb[42].mxu0  ;;  %v2426_v36 = vld [vmem:[#allocation3 + $0x98] sm:$0xff] }
 0x46e   :  { %v2096_v40 = vadd.f32 %v9853_v3, %v2095_v33  ;;  %2289 = vrot.lane.b32.xlu1 %v2166_v32, %s8788_s8  ;;  %v2097_v41 = vpop.f32.mrb[43].mxu0 }
 0x46f   :  { %2407 = vst.msk [vmem:[#allocation3 + $0xc8] sm:$0xff] %vm12369_vm4, %v2167_v37  ;;  %2183 = vst.msk [vmem:[#allocation3 + $0x100] sm:$0xff] %vm12369_vm4, %v2167_v37  ;;  %2355 = vrot.lane.b32.xlu0 %v2167_v37, %s8787_s7  ;;  %v2428_v41 = vld [vmem:[#allocation3 + $0xa8] sm:$0xff] }
 0x470   :  { %v2122_v42 = vmax.f32 %v2096_v40, 0.0 }
 0x472   :  { %v2145_v43 = vmul.f32 %v9865_v12, %v2122_v42  ;;  %2225 = vrot.lane.b32.xlu1 %v2166_v32, %s8789_s5  ;;  %v2100_v45 = vpop.f32.mrb[44].mxu0 }
 0x473   :  { %v2101_v46 = vadd.f32 %v9853_v3, %v2100_v45  ;;  %v2102_v47 = vpop.f32.mrb[45].mxu0  ;;  %2291 = vrot.lane.b32.xlu0 %v2167_v37, %s8788_s8 }
 0x474   :  { %v2168_v48 = vadd.f32 %v9870_v14, %v2145_v43 }
 0x475   :  { %v2123_v49 = vmax.f32 %v2101_v46, 0.0 }
 0x476   :  { %2408 = vst.msk [vmem:[#allocation3 + $0xd8] sm:$0xff] %vm12369_vm4, %v2168_v48  ;;  %2184 = vst.msk [vmem:[#allocation3 + $0x110] sm:$0xff] %vm12369_vm4, %v2168_v48  ;;  %v2105_v50 = vpop.f32.mrb[46].mxu0  ;;  %2357 = vrot.lane.b32.xlu1 %v2168_v48, %s8787_s7 }
 0x477   :  { %v2146_v51 = vmul.f32 %v9865_v12, %v2123_v49  ;;  %v2106_v52 = vadd.f32 %v9853_v3, %v2105_v50  ;;  %v2107_v53 = vpop.f32.mrb[47].mxu0  ;;  %2227 = vrot.lane.b32.xlu0 %v2167_v37, %s8789_s5 }
 0x479   :  { %v2169_v54 = vadd.f32 %v9870_v14, %v2146_v51  ;;  %v2124_v55 = vmax.f32 %v2106_v52, 0.0  ;;  %v2432_v52 = vld [vmem:[#allocation3 + $0xc8] sm:$0xff] }
 0x47a   :  { %2293 = vrot.lane.b32.xlu1 %v2168_v48, %s8788_s8 }
 0x47b   :  { %2409 = vst.msk [vmem:[#allocation3 + $0xe8] sm:$0xff] %vm12369_vm4, %v2169_v54  ;;  %v2147_v56 = vmul.f32 %v9865_v12, %v2124_v55  ;;  %2359 = vrot.lane.b32.xlu0 %v2169_v54, %s8787_s7 }
 0x47d   :  { %v10001_v57 = vadd.f32 %v9870_v14, %v2147_v56 }
 0x47e   :  { %2229 = vrot.lane.b32.xlu1 %v2168_v48, %s8789_s5  ;;  %v2430_v48 = vld [vmem:[#allocation3 + $0xb8] sm:$0xff] }
 0x47f   :  { %12380 = vst [vmem:[#allocation9_spill] sm:$0xff] %v10001_v57  ;;  %2410 = vst.msk [vmem:[#allocation3 + $0xf8] sm:$0xff] %vm12369_vm4, %v10001_v57  ;;  %2295 = vrot.lane.b32.xlu0 %v2169_v54, %s8788_s8 }
 0x482   :  { %2361 = vrot.lane.b32.xlu1 %v10001_v57, %s8787_s7 }
 0x483   :  { %2231 = vrot.lane.b32.xlu0 %v2169_v54, %s8789_s5 }
 0x486   :  { %2297 = vrot.lane.b32.xlu1 %v10001_v57, %s8788_s8 }
 0x499   :  { %v2268_v3 = vpop.permute.xlu0 %2267 }
 0x49a   :  { %2315 = vst.msk [vmem:[#allocation3 + $0x20] sm:$0xff] %vm1759_vm5, %v2268_v3 }
 0x49d   :  { %v2204_v12 = vpop.permute.xlu0 %2203 }
 0x49e   :  { %2251 = vst.msk [vmem:[#allocation3 + $0x30] sm:$0xff] %vm12359_vm7, %v2204_v12  ;;  %v2434_v12 = vld [vmem:[#allocation3 + $0xd8] sm:$0xff] }
 0x4a0   :  { %v2334_v14 = vpop.permute.xlu1 %2333 }
 0x4a1   :  { %2380 = vst.msk [vmem:[#allocation3 + $0x20] sm:$0xff] %vm1824_vm6, %v2334_v14 }
 0x4a4   :  { %v2270_v58 = vpop.permute.xlu1 %2269 }
 0x4a5   :  { %2316 = vst.msk [vmem:[#allocation3 + $0x30] sm:$0xff] %vm1759_vm5, %v2270_v58  ;;  %v2336_v59 = vpop.permute.xlu0 %2335 }
 0x4a6   :  { %2381 = vst.msk [vmem:[#allocation3 + $0x30] sm:$0xff] %vm1824_vm6, %v2336_v59 }
 0x4a8   :  { %v2206_v60 = vpop.permute.xlu1 %2205  ;;  %v2411_v61 = vld [vmem:[#allocation3 + $0x20] sm:$0xff] }
 0x4a9   :  { %2252 = vst.msk [vmem:[#allocation3 + $0x40] sm:$0xff] %vm12359_vm7, %v2206_v60  ;;  %v2272_v62 = vpop.permute.xlu0 %2271  ;;  %2585 = vmatmul.mubr.f32.vlgmr.msra.gmra.mrb[48].mxu0 %v2411_v61  ;;  %v2436_v60 = vld [vmem:[#allocation3 + $0xe8] sm:$0xff] }
 0x4aa   :  { %2317 = vst.msk [vmem:[#allocation3 + $0x40] sm:$0xff] %vm1759_vm5, %v2272_v62  ;;  %7409 = vmatprep.mubr.msk.f32.mxu0 %vm12369_vm4, %v2414_v63 }
 0x4ac   :  { %v2338_v1 = vpop.permute.xlu1 %2337 }
 0x4ad   :  { %2382 = vst.msk [vmem:[#allocation3 + $0x40] sm:$0xff] %vm1824_vm6, %v2338_v1  ;;  %v2208_v2 = vpop.permute.xlu0 %2207  ;;  %v2413_v4 = vld [vmem:[#allocation3 + $0x30] sm:$0xff] }
 0x4ae   :  { %2253 = vst.msk [vmem:[#allocation3 + $0x50] sm:$0xff] %vm12359_vm7, %v2208_v2  ;;  %2590 = vmatmul.mubr.f32.gmra.mrb[50].mxu0 %v2413_v4  ;;  %v2438_v4 = vld [vmem:[#allocation3 + $0xf8] sm:$0xff] }
 0x4af   :  { %7410 = vmatprep.mubr.msk.f32.mxu0 %vm12369_vm4, %v2416_v5 }
 0x4b0   :  { %v2274_v6 = vpop.permute.xlu1 %2273 }
 0x4b1   :  { %2318 = vst.msk [vmem:[#allocation3 + $0x50] sm:$0xff] %vm1759_vm5, %v2274_v6  ;;  %v2340_v8 = vpop.permute.xlu0 %2339 }
 0x4b2   :  { %2383 = vst.msk [vmem:[#allocation3 + $0x50] sm:$0xff] %vm1824_vm6, %v2340_v8 }
 0x4b4   :  { %v2210_v9 = vpop.permute.xlu1 %2209  ;;  %v2415_v11 = vld [vmem:[#allocation3 + $0x40] sm:$0xff] }
 0x4b5   :  { %2254 = vst.msk [vmem:[#allocation3 + $0x60] sm:$0xff] %vm12359_vm7, %v2210_v9  ;;  %v2276_v13 = vpop.permute.xlu0 %2275  ;;  %2595 = vmatmul.mubr.f32.gmra.mrb[52].mxu0 %v2415_v11 }
 0x4b6   :  { %2319 = vst.msk [vmem:[#allocation3 + $0x60] sm:$0xff] %vm1759_vm5, %v2276_v13  ;;  %7411 = vmatprep.mubr.msk.f32.mxu0 %vm12369_vm4, %v2418_v15  ;;  %v7428_v15 = vld [vmem:[%s12313_s9 + $0x140] sm:$0xff] }
 0x4b8   :  { %v2342_v16 = vpop.permute.xlu1 %2341 }
 0x4b9   :  { %2384 = vst.msk [vmem:[#allocation3 + $0x60] sm:$0xff] %vm1824_vm6, %v2342_v16  ;;  %v2212_v44 = vpop.permute.xlu0 %2211  ;;  %v2417_v17 = vld [vmem:[#allocation3 + $0x50] sm:$0xff]  ;;  %v7429_v16 = vld [vmem:[%s12313_s9 + $0x148] sm:$0xff] }
 0x4ba   :  { %2255 = vst.msk [vmem:[#allocation3 + $0x70] sm:$0xff] %vm12359_vm7, %v2212_v44  ;;  %2600 = vmatmul.mubr.f32.gmra.mrb[54].mxu0 %v2417_v17  ;;  %v8172_v44 = vpack.c.bf16 %v7429_v16, %v7428_v15 }
 0x4bb   :  { %7412 = vmatprep.mubr.msk.f32.mxu0 %vm12369_vm4, %v2420_v20  ;;  %v7432_v20 = vld [vmem:[%s12313_s9 + $0x160] sm:$0xff] }
 0x4bc   :  { %v2278_v21 = vpop.permute.xlu1 %2277  ;;  %8173 = vmatpush1.bf16.msra.mxu1 %v8172_v44 }
 0x4bd   :  { %2320 = vst.msk [vmem:[#allocation3 + $0x70] sm:$0xff] %vm1759_vm5, %v2278_v21  ;;  %v2344_v22 = vpop.permute.xlu0 %2343  ;;  %8174 = vmatprep.subr.bf16.mxu1 %v8786_v39  ;;  %v7433_v21 = vld [vmem:[%s12313_s9 + $0x168] sm:$0xff] }
 0x4be   :  { %2385 = vst.msk [vmem:[#allocation3 + $0x70] sm:$0xff] %vm1824_vm6, %v2344_v22  ;;  %v8178_v22 = vpack.c.bf16 %v7433_v21, %v7432_v20 }
 0x4c0   :  { %v2214_v23 = vpop.permute.xlu1 %2213  ;;  %v2419_v0 = vld [vmem:[#allocation3 + $0x60] sm:$0xff] }
 0x4c1   :  { %2256 = vst.msk [vmem:[#allocation3 + $0x80] sm:$0xff] %vm12359_vm7, %v2214_v23  ;;  %v2280_v25 = vpop.permute.xlu0 %2279  ;;  %2605 = vmatmul.mubr.f32.gmra.mrb[56].mxu0 %v2419_v0  ;;  %v7434_v23 = vld [vmem:[%s12313_s9 + $0x170] sm:$0xff]  ;;  %v7435_v0 = vld [vmem:[%s12313_s9 + $0x178] sm:$0xff] }
 0x4c2   :  { %2321 = vst.msk [vmem:[#allocation3 + $0x80] sm:$0xff] %vm1759_vm5, %v2280_v25  ;;  %7413 = vmatprep.mubr.msk.f32.mxu0 %vm12369_vm4, %v2422_v7  ;;  %v8181_v25 = vpack.c.bf16 %v7435_v0, %v7434_v23  ;;  %v7436_v7 = vld [vmem:[%s12313_s9 + $0x180] sm:$0xff] }
 0x4c4   :  { %v2346_v10 = vpop.permute.xlu1 %2345 }
 0x4c5   :  { %2386 = vst.msk [vmem:[#allocation3 + $0x80] sm:$0xff] %vm1824_vm6, %v2346_v10  ;;  %v2216_v26 = vpop.permute.xlu0 %2215  ;;  %v2421_v27 = vld [vmem:[#allocation3 + $0x70] sm:$0xff]  ;;  %v7437_v10 = vld [vmem:[%s12313_s9 + $0x188] sm:$0xff] }
 0x4c6   :  { %2257 = vst.msk [vmem:[#allocation3 + $0x90] sm:$0xff] %vm12359_vm7, %v2216_v26  ;;  %2610 = vmatmul.mubr.f32.gmra.mrb[58].mxu0 %v2421_v27  ;;  %v8184_v26 = vpack.c.bf16 %v7437_v10, %v7436_v7  ;;  %v7438_v27 = vld [vmem:[%s12313_s9 + $0x190] sm:$0xff] }
 0x4c7   :  { %7414 = vmatprep.mubr.msk.f32.mxu0 %vm12369_vm4, %v2424_v28  ;;  %v7439_v28 = vld [vmem:[%s12313_s9 + $0x198] sm:$0xff] }
 0x4c8   :  { %v2282_v29 = vpop.permute.xlu1 %2281 }
 0x4c9   :  { %2322 = vst.msk [vmem:[#allocation3 + $0x90] sm:$0xff] %vm1759_vm5, %v2282_v29  ;;  %v2348_v30 = vpop.permute.xlu0 %2347  ;;  %v8187_v29 = vpack.c.bf16 %v7439_v28, %v7438_v27 }
 0x4ca   :  { %2387 = vst.msk [vmem:[#allocation3 + $0x90] sm:$0xff] %vm1824_vm6, %v2348_v30  ;;  %v7440_v30 = vld [vmem:[%s12313_s9 + $0x1a0] sm:$0xff] }
 0x4cc   :  { %v2218_v31 = vpop.permute.xlu1 %2217  ;;  %v2423_v32 = vld [vmem:[#allocation3 + $0x80] sm:$0xff] }
 0x4cd   :  { %2258 = vst.msk [vmem:[#allocation3 + $0xa0] sm:$0xff] %vm12359_vm7, %v2218_v31  ;;  %v2284_v35 = vpop.permute.xlu0 %2283  ;;  %2615 = vmatmul.mubr.f32.gmra.mrb[60].mxu0 %v2423_v32  ;;  %v7441_v31 = vld [vmem:[%s12313_s9 + $0x1a8] sm:$0xff] }
 0x4ce   :  { %2323 = vst.msk [vmem:[#allocation3 + $0xa0] sm:$0xff] %vm1759_vm5, %v2284_v35  ;;  %7415 = vmatprep.mubr.msk.f32.mxu0 %vm12369_vm4, %v2426_v36  ;;  %v8190_v32 = vpack.c.bf16 %v7441_v31, %v7440_v30  ;;  %v7442_v35 = vld [vmem:[%s12313_s9 + $0x1b0] sm:$0xff]  ;;  %v7443_v36 = vld [vmem:[%s12313_s9 + $0x1b8] sm:$0xff] }
 0x4d0   :  { %v2350_v37 = vpop.permute.xlu1 %2349 }
 0x4d1   :  { %2388 = vst.msk [vmem:[#allocation3 + $0xa0] sm:$0xff] %vm1824_vm6, %v2350_v37  ;;  %v2220_v33 = vpop.permute.xlu0 %2219  ;;  %v2425_v40 = vld [vmem:[#allocation3 + $0x90] sm:$0xff]  ;;  %v8193_v37 = vpack.c.bf16 %v7443_v36, %v7442_v35 }
 0x4d2   :  { %2259 = vst.msk [vmem:[#allocation3 + $0xb0] sm:$0xff] %vm12359_vm7, %v2220_v33  ;;  %2620 = vmatmul.mubr.f32.gmra.mrb[62].mxu0 %v2425_v40  ;;  %v10133_v33 = vld [vmem:[%s12317_s10 + $0x1] ss:$0 sm:$0xff] }
 0x4d3   :  { %7416 = vmatprep.mubr.msk.f32.mxu0 %vm12369_vm4, %v2428_v41  ;;  %v7444_v40 = vld [vmem:[%s12313_s9 + $0x1c0] sm:$0xff]  ;;  %v7445_v41 = vld [vmem:[%s12313_s9 + $0x1c8] sm:$0xff] }
 0x4d4   :  { %v2286_v42 = vpop.permute.xlu1 %2285 }
 0x4d5   :  { %2324 = vst.msk [vmem:[#allocation3 + $0xb0] sm:$0xff] %vm1759_vm5, %v2286_v42  ;;  %v2352_v43 = vpop.permute.xlu0 %2351 }
 0x4d6   :  { %2389 = vst.msk [vmem:[#allocation3 + $0xb0] sm:$0xff] %vm1824_vm6, %v2352_v43  ;;  %v8196_v43 = vpack.c.bf16 %v7445_v41, %v7444_v40 }
 0x4d8   :  { %v2222_v45 = vpop.permute.xlu1 %2221  ;;  %v2427_v46 = vld [vmem:[#allocation3 + $0xa0] sm:$0xff] }
 0x4d9   :  { %2260 = vst.msk [vmem:[#allocation3 + $0xc0] sm:$0xff] %vm12359_vm7, %v2222_v45  ;;  %v2288_v47 = vpop.permute.xlu0 %2287  ;;  %2625 = vmatmul.mubr.f32.gmra.mrb[64].mxu0 %v2427_v46 }
 0x4da   :  { %2325 = vst.msk [vmem:[#allocation3 + $0xc0] sm:$0xff] %vm1759_vm5, %v2288_v47  ;;  %7417 = vmatprep.mubr.msk.f32.mxu0 %vm12369_vm4, %v2430_v48  ;;  %v10146_v47 = vld [vmem:[%s12318_s11 + $0x1] ss:$0 sm:$0xff] }
 0x4dc   :  { %v2354_v49 = vpop.permute.xlu1 %2353 }
 0x4dd   :  { %2390 = vst.msk [vmem:[#allocation3 + $0xc0] sm:$0xff] %vm1824_vm6, %v2354_v49  ;;  %v2224_v50 = vpop.permute.xlu0 %2223  ;;  %v2429_v51 = vld [vmem:[#allocation3 + $0xb0] sm:$0xff] }
 0x4de   :  { %2261 = vst.msk [vmem:[#allocation3 + $0xd0] sm:$0xff] %vm12359_vm7, %v2224_v50  ;;  %2630 = vmatmul.mubr.f32.gmra.mrb[66].mxu0 %v2429_v51  ;;  %v7446_v49 = vld [vmem:[%s12313_s9 + $0x1d0] sm:$0xff]  ;;  %v7447_v50 = vld [vmem:[%s12313_s9 + $0x1d8] sm:$0xff]  ;;  %v10158_v51 = vld [vmem:[%s12319_s12 + $0x1] ss:$0 sm:$0xff] }
 0x4df   :  { %7418 = vmatprep.mubr.msk.f32.mxu0 %vm12369_vm4, %v2432_v52  ;;  %v8199_v52 = vpack.c.bf16 %v7447_v50, %v7446_v49 }
 0x4e0   :  { %v2290_v53 = vpop.permute.xlu1 %2289 }
 0x4e1   :  { %2326 = vst.msk [vmem:[#allocation3 + $0xd0] sm:$0xff] %vm1759_vm5, %v2290_v53  ;;  %v2356_v54 = vpop.permute.xlu0 %2355 }
 0x4e2   :  { %2391 = vst.msk [vmem:[#allocation3 + $0xd0] sm:$0xff] %vm1824_vm6, %v2356_v54 }
 0x4e4   :  { %v2226_v55 = vpop.permute.xlu1 %2225  ;;  %v2431_v56 = vld [vmem:[#allocation3 + $0xc0] sm:$0xff] }
 0x4e5   :  { %2262 = vst.msk [vmem:[#allocation3 + $0xe0] sm:$0xff] %vm12359_vm7, %v2226_v55  ;;  %v2292_v3 = vpop.permute.xlu0 %2291  ;;  %2635 = vmatmul.mubr.f32.gmra.mrb[68].mxu0 %v2431_v56 }
 0x4e6   :  { %2327 = vst.msk [vmem:[#allocation3 + $0xe0] sm:$0xff] %vm1759_vm5, %v2292_v3  ;;  %7419 = vmatprep.mubr.msk.f32.mxu0 %vm12369_vm4, %v2434_v12 }
 0x4e8   :  { %v2358_v14 = vpop.permute.xlu1 %2357 }
 0x4e9   :  { %2392 = vst.msk [vmem:[#allocation3 + $0xe0] sm:$0xff] %vm1824_vm6, %v2358_v14  ;;  %v2228_v58 = vpop.permute.xlu0 %2227  ;;  %v2433_v59 = vld [vmem:[#allocation3 + $0xd0] sm:$0xff] }
 0x4ea   :  { %2263 = vst.msk [vmem:[#allocation3 + $0xf0] sm:$0xff] %vm12359_vm7, %v2228_v58  ;;  %2640 = vmatmul.mubr.f32.gmra.mrb[70].mxu0 %v2433_v59 }
 0x4eb   :  { %7420 = vmatprep.mubr.msk.f32.mxu0 %vm12369_vm4, %v2436_v60 }
 0x4ec   :  { %v2294_v61 = vpop.permute.xlu1 %2293 }
 0x4ed   :  { %2328 = vst.msk [vmem:[#allocation3 + $0xf0] sm:$0xff] %vm1759_vm5, %v2294_v61  ;;  %v2360_v62 = vpop.permute.xlu0 %2359 }
 0x4ee   :  { %2393 = vst.msk [vmem:[#allocation3 + $0xf0] sm:$0xff] %vm1824_vm6, %v2360_v62 }
 0x4f0   :  { %v2230_v63 = vpop.permute.xlu1 %2229  ;;  %v2435_v1 = vld [vmem:[#allocation3 + $0xe0] sm:$0xff] }
 0x4f1   :  { %2264 = vst.msk [vmem:[#allocation3 + $0x100] sm:$0xff] %vm12359_vm7, %v2230_v63  ;;  %v2296_v2 = vpop.permute.xlu0 %2295  ;;  %2645 = vmatmul.mubr.f32.gmra.mrb[72].mxu0 %v2435_v1 }
 0x4f2   :  { %2329 = vst.msk [vmem:[#allocation3 + $0x100] sm:$0xff] %vm1759_vm5, %v2296_v2  ;;  %7421 = vmatprep.mubr.msk.f32.mxu0 %vm12369_vm4, %v2438_v4 }
 0x4f4   :  { %v2362_v5 = vpop.permute.xlu1 %2361 }
 0x4f5   :  { %2394 = vst.msk [vmem:[#allocation3 + $0x100] sm:$0xff] %vm1824_vm6, %v2362_v5  ;;  %v2232_v6 = vpop.permute.xlu0 %2231  ;;  %v2437_v8 = vld [vmem:[#allocation3 + $0xf0] sm:$0xff] }
 0x4f6   :  { %2265 = vst.msk [vmem:[#allocation3 + $0x110] sm:$0xff] %vm12359_vm7, %v2232_v6  ;;  %2650 = vmatmul.mubr.f32.gmra.mrb[74].mxu0 %v2437_v8 }
 0x4f7   :  { %7422 = vmatprep.mubr.msk.f32.mxu0 %vm12369_vm4, %v9784_v34  ;;  %v7430_v34 = vld [vmem:[%s12313_s9 + $0x150] sm:$0xff] }
 0x4f8   :  { %v2298_v9 = vpop.permute.xlu1 %2297 }
 0x4f9   :  { %2330 = vst.msk [vmem:[#allocation3 + $0x110] sm:$0xff] %vm1759_vm5, %v2298_v9 }
 0x4fc   :  { %v2439_v11 = vld [vmem:[#allocation3 + $0x100] sm:$0xff] }
 0x4fd   :  { %2655 = vmatmul.mubr.f32.gmra.mrb[76].mxu0 %v2439_v11 }
 0x4fe   :  { %7423 = vmatprep.mubr.msk.f32.mxu0 %vm12369_vm4, %v9790_v38  ;;  %v7431_v38 = vld [vmem:[%s12313_s9 + $0x158] sm:$0xff] }
 0x4ff   :  { %v8175_v17 = vpack.c.bf16 %v7431_v38, %v7430_v34 }
 0x500   :  { %v2441_v13 = vld [vmem:[#allocation3 + $0x110] sm:$0xff] }
 0x501   :  { %2660 = vmatmul.mubr.f32.gmra.mrb[78].mxu0 %v2441_v13  ;;  %8176 = vmatpush1.bf16.msra.mxu1 %v8175_v17 }
 0x502   :  { %8177 = vmatprep.subr.bf16.mxu1 %v8786_v39 }
 0x505   :  { %8179 = vmatpush1.bf16.msra.mxu1 %v8178_v22 }
 0x506   :  { %8180 = vmatprep.subr.bf16.mxu1 %v8786_v39 }
 0x509   :  { %8182 = vmatpush1.bf16.msra.mxu1 %v8181_v25 }
 0x50a   :  { %8183 = vmatprep.subr.bf16.mxu1 %v8786_v39 }
 0x50d   :  { %8185 = vmatpush1.bf16.msra.mxu1 %v8184_v26 }
 0x50e   :  { %8186 = vmatprep.subr.bf16.mxu1 %v8786_v39 }
 0x511   :  { %8188 = vmatpush1.bf16.msra.mxu1 %v8187_v29 }
 0x512   :  { %8189 = vmatprep.subr.bf16.mxu1 %v8786_v39 }
 0x515   :  { %8191 = vmatpush1.bf16.msra.mxu1 %v8190_v32 }
 0x516   :  { %8192 = vmatprep.subr.bf16.mxu1 %v8786_v39 }
 0x519   :  { %8194 = vmatpush1.bf16.msra.mxu1 %v8193_v37 }
 0x51a   :  { %8195 = vmatprep.subr.bf16.mxu1 %v8786_v39 }
 0x51d   :  { %8197 = vmatpush1.bf16.msra.mxu1 %v8196_v43 }
 0x51e   :  { %8198 = vmatprep.subr.bf16.mxu1 %v8786_v39 }
 0x521   :  { %8200 = vmatpush1.bf16.msra.mxu1 %v8199_v52 }
 0x57c   :  { %v2586_v42 = vpop.f32.mrb[48].mxu0 }
 0x57d   :  { %v2587_v45 = vadd.f32 %v10133_v33, %v2586_v42  ;;  %v2588_v46 = vpop.f32.mrb[49].mxu0 }
 0x57f   :  { %v2665_v48 = vmax.f32 %v2587_v45, 0.0 }
 0x581   :  { %v2689_v53 = vmul.f32 %v10146_v47, %v2665_v48  ;;  %v2591_v54 = vpop.f32.mrb[50].mxu0 }
 0x582   :  { %v2592_v55 = vadd.f32 %v10133_v33, %v2591_v54  ;;  %v2593_v56 = vpop.f32.mrb[51].mxu0 }
 0x583   :  { %v10163_v3 = vadd.f32 %v10158_v51, %v2689_v53 }
 0x584   :  { %v2666_v12 = vmax.f32 %v2592_v55, 0.0 }
 0x585   :  { %12381 = vst [vmem:[#allocation10_spill] sm:$0xff] %v10163_v3  ;;  %2729 = vst.msk [vmem:[#allocation3 + $0x40] sm:$0xff] %vm12369_vm4, %v10163_v3  ;;  %2825 = vrot.lane.b32.xlu0 %v10163_v3, %s8788_s8 }
 0x586   :  { %v2690_v14 = vmul.f32 %v10146_v47, %v2666_v12 }
 0x588   :  { %v2714_v58 = vadd.f32 %v10158_v51, %v2690_v14  ;;  %v2596_v59 = vpop.f32.mrb[52].mxu0 }
 0x589   :  { %v2597_v60 = vadd.f32 %v10133_v33, %v2596_v59  ;;  %v2598_v61 = vpop.f32.mrb[53].mxu0  ;;  %2761 = vrot.lane.b32.xlu0 %v10163_v3, %s8789_s5 }
 0x58a   :  { %2730 = vst.msk [vmem:[#allocation3 + $0x50] sm:$0xff] %vm12369_vm4, %v2714_v58  ;;  %2891 = vrot.lane.b32.xlu1 %v2714_v58, %s8787_s7 }
 0x58b   :  { %v2667_v62 = vmax.f32 %v2597_v60, 0.0 }
 0x58d   :  { %v2691_v63 = vmul.f32 %v10146_v47, %v2667_v62  ;;  %v2601_v1 = vpop.f32.mrb[54].mxu0 }
 0x58e   :  { %v2602_v2 = vadd.f32 %v10133_v33, %v2601_v1  ;;  %v2603_v4 = vpop.f32.mrb[55].mxu0  ;;  %2827 = vrot.lane.b32.xlu1 %v2714_v58, %s8788_s8 }
 0x58f   :  { %v2715_v5 = vadd.f32 %v10158_v51, %v2691_v63 }
 0x590   :  { %v2668_v6 = vmax.f32 %v2602_v2, 0.0 }
 0x591   :  { %2955 = vst.msk [vmem:[#allocation3 + $0x28] sm:$0xff] %vm12369_vm4, %v2715_v5  ;;  %2731 = vst.msk [vmem:[#allocation3 + $0x60] sm:$0xff] %vm12369_vm4, %v2715_v5  ;;  %2893 = vrot.lane.b32.xlu0 %v2715_v5, %s8787_s7 }
 0x592   :  { %v2692_v8 = vmul.f32 %v10146_v47, %v2668_v6  ;;  %2763 = vrot.lane.b32.xlu1 %v2714_v58, %s8789_s5 }
 0x594   :  { %v2716_v9 = vadd.f32 %v10158_v51, %v2692_v8  ;;  %v2606_v11 = vpop.f32.mrb[56].mxu0 }
 0x595   :  { %v2607_v13 = vadd.f32 %v10133_v33, %v2606_v11  ;;  %v2608_v15 = vpop.f32.mrb[57].mxu0  ;;  %2829 = vrot.lane.b32.xlu0 %v2715_v5, %s8788_s8 }
 0x596   :  { %2956 = vst.msk [vmem:[#allocation3 + $0x38] sm:$0xff] %vm12369_vm4, %v2716_v9  ;;  %2732 = vst.msk [vmem:[#allocation3 + $0x70] sm:$0xff] %vm12369_vm4, %v2716_v9  ;;  %2895 = vrot.lane.b32.xlu1 %v2716_v9, %s8787_s7 }
 0x597   :  { %v2669_v16 = vmax.f32 %v2607_v13, 0.0 }
 0x598   :  { %v2970_v44 = vld [vmem:[#allocation3 + $0x28] sm:$0xff] }
 0x599   :  { %v2693_v34 = vmul.f32 %v10146_v47, %v2669_v16  ;;  %v2611_v38 = vpop.f32.mrb[58].mxu0  ;;  %7450 = vmatprep.mubr.msk.f32.mxu1 %vm12369_vm4, %v2970_v44  ;;  %2765 = vrot.lane.b32.xlu0 %v2715_v5, %s8789_s5 }
 0x59a   :  { %v2612_v17 = vadd.f32 %v10133_v33, %v2611_v38  ;;  %v2613_v20 = vpop.f32.mrb[59].mxu0  ;;  %2831 = vrot.lane.b32.xlu1 %v2716_v9, %s8788_s8 }
 0x59b   :  { %v2717_v21 = vadd.f32 %v10158_v51, %v2693_v34 }
 0x59c   :  { %v2670_v22 = vmax.f32 %v2612_v17, 0.0 }
 0x59d   :  { %2957 = vst.msk [vmem:[#allocation3 + $0x48] sm:$0xff] %vm12369_vm4, %v2717_v21  ;;  %2733 = vst.msk [vmem:[#allocation3 + $0x80] sm:$0xff] %vm12369_vm4, %v2717_v21  ;;  %2897 = vrot.lane.b32.xlu0 %v2717_v21, %s8787_s7 }
 0x59e   :  { %v2694_v23 = vmul.f32 %v10146_v47, %v2670_v22  ;;  %2767 = vrot.lane.b32.xlu1 %v2716_v9, %s8789_s5 }
 0x5a0   :  { %v2718_v0 = vadd.f32 %v10158_v51, %v2694_v23  ;;  %v2616_v25 = vpop.f32.mrb[60].mxu0 }
 0x5a1   :  { %v2617_v7 = vadd.f32 %v10133_v33, %v2616_v25  ;;  %v2618_v10 = vpop.f32.mrb[61].mxu0  ;;  %2833 = vrot.lane.b32.xlu0 %v2717_v21, %s8788_s8 }
 0x5a2   :  { %2958 = vst.msk [vmem:[#allocation3 + $0x58] sm:$0xff] %vm12369_vm4, %v2718_v0  ;;  %2734 = vst.msk [vmem:[#allocation3 + $0x90] sm:$0xff] %vm12369_vm4, %v2718_v0  ;;  %2899 = vrot.lane.b32.xlu1 %v2718_v0, %s8787_s7 }
 0x5a3   :  { %v2671_v26 = vmax.f32 %v2617_v7, 0.0 }
 0x5a5   :  { %v2695_v27 = vmul.f32 %v10146_v47, %v2671_v26  ;;  %v2621_v28 = vpop.f32.mrb[62].mxu0  ;;  %2769 = vrot.lane.b32.xlu0 %v2717_v21, %s8789_s5 }
 0x5a6   :  { %v2622_v29 = vadd.f32 %v10133_v33, %v2621_v28  ;;  %v2623_v30 = vpop.f32.mrb[63].mxu0  ;;  %2835 = vrot.lane.b32.xlu1 %v2718_v0, %s8788_s8 }
 0x5a7   :  { %v2719_v31 = vadd.f32 %v10158_v51, %v2695_v27 }
 0x5a8   :  { %v2672_v32 = vmax.f32 %v2622_v29, 0.0 }
 0x5a9   :  { %2959 = vst.msk [vmem:[#allocation3 + $0x68] sm:$0xff] %vm12369_vm4, %v2719_v31  ;;  %2735 = vst.msk [vmem:[#allocation3 + $0xa0] sm:$0xff] %vm12369_vm4, %v2719_v31  ;;  %2901 = vrot.lane.b32.xlu0 %v2719_v31, %s8787_s7 }
 0x5aa   :  { %v2696_v35 = vmul.f32 %v10146_v47, %v2672_v32  ;;  %2771 = vrot.lane.b32.xlu1 %v2718_v0, %s8789_s5  ;;  %v2972_v32 = vld [vmem:[#allocation3 + $0x38] sm:$0xff] }
 0x5ac   :  { %v2720_v36 = vadd.f32 %v10158_v51, %v2696_v35  ;;  %v2626_v37 = vpop.f32.mrb[64].mxu0 }
 0x5ad   :  { %v2627_v40 = vadd.f32 %v10133_v33, %v2626_v37  ;;  %v2628_v41 = vpop.f32.mrb[65].mxu0  ;;  %2837 = vrot.lane.b32.xlu0 %v2719_v31, %s8788_s8 }
 0x5ae   :  { %2960 = vst.msk [vmem:[#allocation3 + $0x78] sm:$0xff] %vm12369_vm4, %v2720_v36  ;;  %2736 = vst.msk [vmem:[#allocation3 + $0xb0] sm:$0xff] %vm12369_vm4, %v2720_v36  ;;  %2903 = vrot.lane.b32.xlu1 %v2720_v36, %s8787_s7 }
 0x5af   :  { %v2673_v42 = vmax.f32 %v2627_v40, 0.0 }
 0x5b1   :  { %v2697_v43 = vmul.f32 %v10146_v47, %v2673_v42  ;;  %v2631_v45 = vpop.f32.mrb[66].mxu0  ;;  %2773 = vrot.lane.b32.xlu0 %v2719_v31, %s8789_s5  ;;  %v2974_v42 = vld [vmem:[#allocation3 + $0x48] sm:$0xff] }
 0x5b2   :  { %v2632_v46 = vadd.f32 %v10133_v33, %v2631_v45  ;;  %v2633_v48 = vpop.f32.mrb[67].mxu0  ;;  %2839 = vrot.lane.b32.xlu1 %v2720_v36, %s8788_s8 }
 0x5b3   :  { %v2721_v49 = vadd.f32 %v10158_v51, %v2697_v43  ;;  %v2976_v48 = vld [vmem:[#allocation3 + $0x58] sm:$0xff] }
 0x5b4   :  { %v2674_v50 = vmax.f32 %v2632_v46, 0.0 }
 0x5b5   :  { %2961 = vst.msk [vmem:[#allocation3 + $0x88] sm:$0xff] %vm12369_vm4, %v2721_v49  ;;  %2737 = vst.msk [vmem:[#allocation3 + $0xc0] sm:$0xff] %vm12369_vm4, %v2721_v49  ;;  %2905 = vrot.lane.b32.xlu0 %v2721_v49, %s8787_s7 }
 0x5b6   :  { %v2698_v52 = vmul.f32 %v10146_v47, %v2674_v50  ;;  %2775 = vrot.lane.b32.xlu1 %v2720_v36, %s8789_s5 }
 0x5b8   :  { %v2722_v53 = vadd.f32 %v10158_v51, %v2698_v52  ;;  %v2636_v54 = vpop.f32.mrb[68].mxu0 }
 0x5b9   :  { %v2637_v55 = vadd.f32 %v10133_v33, %v2636_v54  ;;  %2841 = vrot.lane.b32.xlu0 %v2721_v49, %s8788_s8  ;;  %v2638_v56 = vpop.f32.mrb[69].mxu0 }
 0x5ba   :  { %2962 = vst.msk [vmem:[#allocation3 + $0x98] sm:$0xff] %vm12369_vm4, %v2722_v53  ;;  %2738 = vst.msk [vmem:[#allocation3 + $0xd0] sm:$0xff] %vm12369_vm4, %v2722_v53  ;;  %2907 = vrot.lane.b32.xlu1 %v2722_v53, %s8787_s7 }
 0x5bb   :  { %v2675_v12 = vmax.f32 %v2637_v55, 0.0  ;;  %v2978_v55 = vld [vmem:[#allocation3 + $0x68] sm:$0xff] }
 0x5bd   :  { %v2699_v14 = vmul.f32 %v10146_v47, %v2675_v12  ;;  %2777 = vrot.lane.b32.xlu0 %v2721_v49, %s8789_s5  ;;  %v2641_v58 = vpop.f32.mrb[70].mxu0 }
 0x5be   :  { %v2642_v59 = vadd.f32 %v10133_v33, %v2641_v58  ;;  %2843 = vrot.lane.b32.xlu1 %v2722_v53, %s8788_s8  ;;  %v2643_v60 = vpop.f32.mrb[71].mxu0  ;;  %v2980_v58 = vld [vmem:[#allocation3 + $0x78] sm:$0xff] }
 0x5bf   :  { %v2723_v61 = vadd.f32 %v10158_v51, %v2699_v14 }
 0x5c0   :  { %v2676_v62 = vmax.f32 %v2642_v59, 0.0 }
 0x5c1   :  { %2963 = vst.msk [vmem:[#allocation3 + $0xa8] sm:$0xff] %vm12369_vm4, %v2723_v61  ;;  %2739 = vst.msk [vmem:[#allocation3 + $0xe0] sm:$0xff] %vm12369_vm4, %v2723_v61  ;;  %2909 = vrot.lane.b32.xlu0 %v2723_v61, %s8787_s7 }
 0x5c2   :  { %v2700_v63 = vmul.f32 %v10146_v47, %v2676_v62  ;;  %2779 = vrot.lane.b32.xlu1 %v2722_v53, %s8789_s5 }
 0x5c4   :  { %v2724_v1 = vadd.f32 %v10158_v51, %v2700_v63  ;;  %v2646_v2 = vpop.f32.mrb[72].mxu0 }
 0x5c5   :  { %v2647_v4 = vadd.f32 %v10133_v33, %v2646_v2  ;;  %v2648_v5 = vpop.f32.mrb[73].mxu0  ;;  %2845 = vrot.lane.b32.xlu0 %v2723_v61, %s8788_s8 }
 0x5c6   :  { %2964 = vst.msk [vmem:[#allocation3 + $0xb8] sm:$0xff] %vm12369_vm4, %v2724_v1  ;;  %2740 = vst.msk [vmem:[#allocation3 + $0xf0] sm:$0xff] %vm12369_vm4, %v2724_v1  ;;  %2911 = vrot.lane.b32.xlu1 %v2724_v1, %s8787_s7 }
 0x5c7   :  { %v2677_v6 = vmax.f32 %v2647_v4, 0.0 }
 0x5c9   :  { %v2701_v8 = vmul.f32 %v10146_v47, %v2677_v6  ;;  %v2651_v9 = vpop.f32.mrb[74].mxu0  ;;  %2781 = vrot.lane.b32.xlu0 %v2723_v61, %s8789_s5  ;;  %v2984_v6 = vld [vmem:[#allocation3 + $0x98] sm:$0xff] }
 0x5ca   :  { %v2652_v11 = vadd.f32 %v10133_v33, %v2651_v9  ;;  %v2653_v13 = vpop.f32.mrb[75].mxu0  ;;  %2847 = vrot.lane.b32.xlu1 %v2724_v1, %s8788_s8 }
 0x5cb   :  { %v2725_v15 = vadd.f32 %v10158_v51, %v2701_v8 }
 0x5cc   :  { %v2678_v16 = vmax.f32 %v2652_v11, 0.0 }
 0x5cd   :  { %2965 = vst.msk [vmem:[#allocation3 + $0xc8] sm:$0xff] %vm12369_vm4, %v2725_v15  ;;  %2741 = vst.msk [vmem:[#allocation3 + $0x100] sm:$0xff] %vm12369_vm4, %v2725_v15  ;;  %2913 = vrot.lane.b32.xlu0 %v2725_v15, %s8787_s7 }
 0x5ce   :  { %v2702_v44 = vmul.f32 %v10146_v47, %v2678_v16  ;;  %2783 = vrot.lane.b32.xlu1 %v2724_v1, %s8789_s5  ;;  %v2982_v1 = vld [vmem:[#allocation3 + $0x88] sm:$0xff] }
 0x5cf   :  { %v2986_v16 = vld [vmem:[#allocation3 + $0xa8] sm:$0xff] }
 0x5d0   :  { %v2726_v34 = vadd.f32 %v10158_v51, %v2702_v44  ;;  %v2656_v38 = vpop.f32.mrb[76].mxu0 }
 0x5d1   :  { %v2657_v17 = vadd.f32 %v10133_v33, %v2656_v38  ;;  %2849 = vrot.lane.b32.xlu0 %v2725_v15, %s8788_s8  ;;  %v2658_v20 = vpop.f32.mrb[77].mxu0 }
 0x5d2   :  { %2966 = vst.msk [vmem:[#allocation3 + $0xd8] sm:$0xff] %vm12369_vm4, %v2726_v34  ;;  %2742 = vst.msk [vmem:[#allocation3 + $0x110] sm:$0xff] %vm12369_vm4, %v2726_v34  ;;  %2915 = vrot.lane.b32.xlu1 %v2726_v34, %s8787_s7 }
 0x5d3   :  { %v2679_v21 = vmax.f32 %v2657_v17, 0.0  ;;  %v2988_v17 = vld [vmem:[#allocation3 + $0xb8] sm:$0xff] }
 0x5d4   :  { %v2661_v22 = vpop.f32.mrb[78].mxu0 }
 0x5d5   :  { %v2703_v23 = vmul.f32 %v10146_v47, %v2679_v21  ;;  %v2662_v0 = vadd.f32 %v10133_v33, %v2661_v22  ;;  %2785 = vrot.lane.b32.xlu0 %v2725_v15, %s8789_s5  ;;  %v2663_v25 = vpop.f32.mrb[79].mxu0 }
 0x5d6   :  { %2851 = vrot.lane.b32.xlu1 %v2726_v34, %s8788_s8  ;;  %v2990_v25 = vld [vmem:[#allocation3 + $0xc8] sm:$0xff] }
 0x5d7   :  { %v2727_v7 = vadd.f32 %v10158_v51, %v2703_v23  ;;  %v2680_v10 = vmax.f32 %v2662_v0, 0.0 }
 0x5d9   :  { %2967 = vst.msk [vmem:[#allocation3 + $0xe8] sm:$0xff] %vm12369_vm4, %v2727_v7  ;;  %v2704_v26 = vmul.f32 %v10146_v47, %v2680_v10  ;;  %2917 = vrot.lane.b32.xlu0 %v2727_v7, %s8787_s7 }
 0x5da   :  { %2787 = vrot.lane.b32.xlu1 %v2726_v34, %s8789_s5 }
 0x5db   :  { %v10282_v27 = vadd.f32 %v10158_v51, %v2704_v26 }
 0x5dd   :  { %12382 = vst [vmem:[#allocation11_spill] sm:$0xff] %v10282_v27  ;;  %2968 = vst.msk [vmem:[#allocation3 + $0xf8] sm:$0xff] %vm12369_vm4, %v10282_v27  ;;  %2853 = vrot.lane.b32.xlu0 %v2727_v7, %s8788_s8 }
 0x5de   :  { %2919 = vrot.lane.b32.xlu1 %v10282_v27, %s8787_s7 }
 0x5e1   :  { %2789 = vrot.lane.b32.xlu0 %v2727_v7, %s8789_s5 }
 0x5e2   :  { %2855 = vrot.lane.b32.xlu1 %v10282_v27, %s8788_s8 }
 0x5f7   :  { %v2826_v33 = vpop.permute.xlu0 %2825 }
 0x5f8   :  { %2873 = vst.msk [vmem:[#allocation3 + $0x20] sm:$0xff] %vm1759_vm5, %v2826_v33  ;;  %v2992_v33 = vld [vmem:[#allocation3 + $0xd8] sm:$0xff] }
 0x5fb   :  { %v2762_v47 = vpop.permute.xlu0 %2761 }
 0x5fc   :  { %2809 = vst.msk [vmem:[#allocation3 + $0x30] sm:$0xff] %vm12359_vm7, %v2762_v47  ;;  %v2892_v51 = vpop.permute.xlu1 %2891 }
 0x5fd   :  { %2938 = vst.msk [vmem:[#allocation3 + $0x20] sm:$0xff] %vm1824_vm6, %v2892_v51 }
 0x600   :  { %v2828_v28 = vpop.permute.xlu1 %2827 }
 0x601   :  { %2874 = vst.msk [vmem:[#allocation3 + $0x30] sm:$0xff] %vm1759_vm5, %v2828_v28 }
 0x603   :  { %v2894_v29 = vpop.permute.xlu0 %2893 }
 0x604   :  { %2939 = vst.msk [vmem:[#allocation3 + $0x30] sm:$0xff] %vm1824_vm6, %v2894_v29  ;;  %v2764_v30 = vpop.permute.xlu1 %2763  ;;  %v2969_v31 = vld [vmem:[#allocation3 + $0x20] sm:$0xff] }
 0x605   :  { %2810 = vst.msk [vmem:[#allocation3 + $0x40] sm:$0xff] %vm12359_vm7, %v2764_v30  ;;  %3143 = vmatmul.mubr.f32.vlgmr.msra.gmra.mrb[16].mxu1 %v2969_v31  ;;  %v2994_v31 = vld [vmem:[#allocation3 + $0xe8] sm:$0xff] }
 0x606   :  { %7451 = vmatprep.mubr.msk.f32.mxu1 %vm12369_vm4, %v2972_v32 }
 0x607   :  { %v2830_v35 = vpop.permute.xlu0 %2829 }
 0x608   :  { %2875 = vst.msk [vmem:[#allocation3 + $0x40] sm:$0xff] %vm1759_vm5, %v2830_v35  ;;  %v2896_v36 = vpop.permute.xlu1 %2895 }
 0x609   :  { %2940 = vst.msk [vmem:[#allocation3 + $0x40] sm:$0xff] %vm1824_vm6, %v2896_v36 }
 0x60b   :  { %v2766_v37 = vpop.permute.xlu0 %2765  ;;  %v2971_v40 = vld [vmem:[#allocation3 + $0x30] sm:$0xff] }
 0x60c   :  { %2811 = vst.msk [vmem:[#allocation3 + $0x50] sm:$0xff] %vm12359_vm7, %v2766_v37  ;;  %v2832_v41 = vpop.permute.xlu1 %2831  ;;  %3148 = vmatmul.mubr.f32.gmra.mrb[18].mxu1 %v2971_v40  ;;  %v2996_v37 = vld [vmem:[#allocation3 + $0xf8] sm:$0xff] }
 0x60d   :  { %2876 = vst.msk [vmem:[#allocation3 + $0x50] sm:$0xff] %vm1759_vm5, %v2832_v41  ;;  %7452 = vmatprep.mubr.msk.f32.mxu1 %vm12369_vm4, %v2974_v42  ;;  %v10349_v42 = vld [vmem:[#allocation3 + $0x108] sm:$0xff] }
 0x60f   :  { %v2898_v43 = vpop.permute.xlu0 %2897 }
 0x610   :  { %2941 = vst.msk [vmem:[#allocation3 + $0x50] sm:$0xff] %vm1824_vm6, %v2898_v43  ;;  %v2768_v45 = vpop.permute.xlu1 %2767  ;;  %v2973_v46 = vld [vmem:[#allocation3 + $0x40] sm:$0xff] }
 0x611   :  { %2812 = vst.msk [vmem:[#allocation3 + $0x60] sm:$0xff] %vm12359_vm7, %v2768_v45  ;;  %3153 = vmatmul.mubr.f32.gmra.mrb[20].mxu1 %v2973_v46 }
 0x612   :  { %7453 = vmatprep.mubr.msk.f32.mxu1 %vm12369_vm4, %v2976_v48  ;;  %v10355_v48 = vld [vmem:[#allocation3 + $0x118] sm:$0xff] }
 0x613   :  { %v2834_v49 = vpop.permute.xlu0 %2833 }
 0x614   :  { %2877 = vst.msk [vmem:[#allocation3 + $0x60] sm:$0xff] %vm1759_vm5, %v2834_v49  ;;  %v2900_v50 = vpop.permute.xlu1 %2899 }
 0x615   :  { %2942 = vst.msk [vmem:[#allocation3 + $0x60] sm:$0xff] %vm1824_vm6, %v2900_v50 }
 0x617   :  { %v2770_v52 = vpop.permute.xlu0 %2769  ;;  %v2975_v53 = vld [vmem:[#allocation3 + $0x50] sm:$0xff] }
 0x618   :  { %2813 = vst.msk [vmem:[#allocation3 + $0x70] sm:$0xff] %vm12359_vm7, %v2770_v52  ;;  %v2836_v54 = vpop.permute.xlu1 %2835  ;;  %3158 = vmatmul.mubr.f32.gmra.mrb[22].mxu1 %v2975_v53  ;;  %v10359_v52 = vld [vmem:[#allocation3] sm:$0xff] }
 0x619   :  { %2878 = vst.msk [vmem:[#allocation3 + $0x70] sm:$0xff] %vm1759_vm5, %v2836_v54  ;;  %7454 = vmatprep.mubr.msk.f32.mxu1 %vm12369_vm4, %v2978_v55  ;;  %v7470_v53 = vld [vmem:[%s12313_s9 + $0x1e0] sm:$0xff]  ;;  %v7471_v54 = vld [vmem:[%s12313_s9 + $0x1e8] sm:$0xff] }
 0x61a   :  { %v8202_v55 = vpack.c.bf16 %v7471_v54, %v7470_v53 }
 0x61b   :  { %v2902_v56 = vpop.permute.xlu0 %2901 }
 0x61c   :  { %2943 = vst.msk [vmem:[#allocation3 + $0x70] sm:$0xff] %vm1824_vm6, %v2902_v56  ;;  %v2772_v12 = vpop.permute.xlu1 %2771  ;;  %v2977_v14 = vld [vmem:[#allocation3 + $0x60] sm:$0xff]  ;;  %8203 = vmatpush1.bf16.msra.mxu0 %v8202_v55  ;;  %v7472_v56 = vld [vmem:[%s12313_s9 + $0x1f0] sm:$0xff] }
 0x61d   :  { %2814 = vst.msk [vmem:[#allocation3 + $0x80] sm:$0xff] %vm12359_vm7, %v2772_v12  ;;  %3163 = vmatmul.mubr.f32.gmra.mrb[24].mxu1 %v2977_v14  ;;  %8204 = vmatprep.subr.bf16.mxu0 %v8786_v39  ;;  %v7473_v12 = vld [vmem:[%s12313_s9 + $0x1f8] sm:$0xff] }
 0x61e   :  { %7455 = vmatprep.mubr.msk.f32.mxu1 %vm12369_vm4, %v2980_v58  ;;  %v8205_v14 = vpack.c.bf16 %v7473_v12, %v7472_v56  ;;  %v7474_v58 = vld [vmem:[%s12313_s9 + $0x200] sm:$0xff] }
 0x61f   :  { %v2838_v59 = vpop.permute.xlu0 %2837 }
 0x620   :  { %2879 = vst.msk [vmem:[#allocation3 + $0x80] sm:$0xff] %vm1759_vm5, %v2838_v59  ;;  %v2904_v60 = vpop.permute.xlu1 %2903  ;;  %8206 = vmatpush1.bf16.msra.mxu0 %v8205_v14  ;;  %v7475_v59 = vld [vmem:[%s12313_s9 + $0x208] sm:$0xff] }
 0x621   :  { %2944 = vst.msk [vmem:[#allocation3 + $0x80] sm:$0xff] %vm1824_vm6, %v2904_v60  ;;  %8207 = vmatprep.subr.bf16.mxu0 %v8786_v39  ;;  %v8208_v60 = vpack.c.bf16 %v7475_v59, %v7474_v58 }
 0x623   :  { %v2774_v61 = vpop.permute.xlu0 %2773  ;;  %v2979_v62 = vld [vmem:[#allocation3 + $0x70] sm:$0xff] }
 0x624   :  { %2815 = vst.msk [vmem:[#allocation3 + $0x90] sm:$0xff] %vm12359_vm7, %v2774_v61  ;;  %v2840_v63 = vpop.permute.xlu1 %2839  ;;  %3168 = vmatmul.mubr.f32.gmra.mrb[26].mxu1 %v2979_v62  ;;  %v7476_v61 = vld [vmem:[%s12313_s9 + $0x210] sm:$0xff]  ;;  %v7477_v62 = vld [vmem:[%s12313_s9 + $0x218] sm:$0xff]  ;;  %8209 = vmatpush1.bf16.msra.mxu0 %v8208_v60 }
 0x625   :  { %2880 = vst.msk [vmem:[#allocation3 + $0x90] sm:$0xff] %vm1759_vm5, %v2840_v63  ;;  %7456 = vmatprep.mubr.msk.f32.mxu1 %vm12369_vm4, %v2982_v1  ;;  %v8211_v63 = vpack.c.bf16 %v7477_v62, %v7476_v61  ;;  %8210 = vmatprep.subr.bf16.mxu0 %v8786_v39  ;;  %v7478_v1 = vld [vmem:[%s12313_s9 + $0x220] sm:$0xff] }
 0x627   :  { %v2906_v2 = vpop.permute.xlu0 %2905 }
 0x628   :  { %2945 = vst.msk [vmem:[#allocation3 + $0x90] sm:$0xff] %vm1824_vm6, %v2906_v2  ;;  %v2776_v4 = vpop.permute.xlu1 %2775  ;;  %v2981_v5 = vld [vmem:[#allocation3 + $0x80] sm:$0xff]  ;;  %v7479_v2 = vld [vmem:[%s12313_s9 + $0x228] sm:$0xff]  ;;  %8212 = vmatpush1.bf16.msra.mxu0 %v8211_v63 }
 0x629   :  { %2816 = vst.msk [vmem:[#allocation3 + $0xa0] sm:$0xff] %vm12359_vm7, %v2776_v4  ;;  %3173 = vmatmul.mubr.f32.gmra.mrb[28].mxu1 %v2981_v5  ;;  %v8214_v4 = vpack.c.bf16 %v7479_v2, %v7478_v1  ;;  %8213 = vmatprep.subr.bf16.mxu0 %v8786_v39  ;;  %v7480_v5 = vld [vmem:[%s12313_s9 + $0x230] sm:$0xff] }
 0x62a   :  { %7457 = vmatprep.mubr.msk.f32.mxu1 %vm12369_vm4, %v2984_v6  ;;  %v7481_v6 = vld [vmem:[%s12313_s9 + $0x238] sm:$0xff] }
 0x62b   :  { %v2842_v8 = vpop.permute.xlu0 %2841 }
 0x62c   :  { %2881 = vst.msk [vmem:[#allocation3 + $0xa0] sm:$0xff] %vm1759_vm5, %v2842_v8  ;;  %v2908_v9 = vpop.permute.xlu1 %2907  ;;  %8215 = vmatpush1.bf16.msra.mxu0 %v8214_v4  ;;  %v8217_v8 = vpack.c.bf16 %v7481_v6, %v7480_v5 }
 0x62d   :  { %2946 = vst.msk [vmem:[#allocation3 + $0xa0] sm:$0xff] %vm1824_vm6, %v2908_v9  ;;  %8216 = vmatprep.subr.bf16.mxu0 %v8786_v39  ;;  %v7482_v9 = vld [vmem:[%s12313_s9 + $0x240] sm:$0xff] }
 0x62f   :  { %v2778_v11 = vpop.permute.xlu0 %2777  ;;  %v2983_v13 = vld [vmem:[#allocation3 + $0x90] sm:$0xff] }
 0x630   :  { %2817 = vst.msk [vmem:[#allocation3 + $0xb0] sm:$0xff] %vm12359_vm7, %v2778_v11  ;;  %v2844_v15 = vpop.permute.xlu1 %2843  ;;  %3178 = vmatmul.mubr.f32.gmra.mrb[30].mxu1 %v2983_v13  ;;  %8218 = vmatpush1.bf16.msra.mxu0 %v8217_v8  ;;  %v7483_v11 = vld [vmem:[%s12313_s9 + $0x248] sm:$0xff] }
 0x631   :  { %2882 = vst.msk [vmem:[#allocation3 + $0xb0] sm:$0xff] %vm1759_vm5, %v2844_v15  ;;  %7458 = vmatprep.mubr.msk.f32.mxu1 %vm12369_vm4, %v2986_v16  ;;  %8219 = vmatprep.subr.bf16.mxu0 %v8786_v39  ;;  %v8220_v13 = vpack.c.bf16 %v7483_v11, %v7482_v9  ;;  %v7484_v15 = vld [vmem:[%s12313_s9 + $0x250] sm:$0xff]  ;;  %v7485_v16 = vld [vmem:[%s12313_s9 + $0x258] sm:$0xff] }
 0x633   :  { %v2910_v44 = vpop.permute.xlu0 %2909 }
 0x634   :  { %2947 = vst.msk [vmem:[#allocation3 + $0xb0] sm:$0xff] %vm1824_vm6, %v2910_v44  ;;  %v2780_v34 = vpop.permute.xlu1 %2779  ;;  %v2985_v38 = vld [vmem:[#allocation3 + $0xa0] sm:$0xff]  ;;  %8221 = vmatpush1.bf16.msra.mxu0 %v8220_v13 }
 0x635   :  { %2818 = vst.msk [vmem:[#allocation3 + $0xc0] sm:$0xff] %vm12359_vm7, %v2780_v34  ;;  %3183 = vmatmul.mubr.f32.gmra.mrb[32].mxu1 %v2985_v38  ;;  %8222 = vmatprep.subr.bf16.mxu0 %v8786_v39  ;;  %v10420_v44 = vld [vmem:[%s12317_s10 + $0x2] ss:$0 sm:$0xff]  ;;  %v8223_v34 = vpack.c.bf16 %v7485_v16, %v7484_v15 }
 0x636   :  { %7459 = vmatprep.mubr.msk.f32.mxu1 %vm12369_vm4, %v2988_v17 }
 0x637   :  { %v2846_v20 = vpop.permute.xlu0 %2845 }
 0x638   :  { %2883 = vst.msk [vmem:[#allocation3 + $0xc0] sm:$0xff] %vm1759_vm5, %v2846_v20  ;;  %v2912_v21 = vpop.permute.xlu1 %2911  ;;  %8224 = vmatpush1.bf16.msra.mxu0 %v8223_v34 }
 0x639   :  { %2948 = vst.msk [vmem:[#allocation3 + $0xc0] sm:$0xff] %vm1824_vm6, %v2912_v21  ;;  %8225 = vmatprep.subr.bf16.mxu0 %v8786_v39  ;;  %v7486_v21 = vld [vmem:[%s12313_s9 + $0x260] sm:$0xff] }
 0x63b   :  { %v2782_v22 = vpop.permute.xlu0 %2781  ;;  %v2987_v23 = vld [vmem:[#allocation3 + $0xb0] sm:$0xff] }
 0x63c   :  { %2819 = vst.msk [vmem:[#allocation3 + $0xd0] sm:$0xff] %vm12359_vm7, %v2782_v22  ;;  %v2848_v0 = vpop.permute.xlu1 %2847  ;;  %3188 = vmatmul.mubr.f32.gmra.mrb[34].mxu1 %v2987_v23  ;;  %v7487_v22 = vld [vmem:[%s12313_s9 + $0x268] sm:$0xff]  ;;  %v10433_v23 = vld [vmem:[%s12318_s11 + $0x2] ss:$0 sm:$0xff] }
 0x63d   :  { %2884 = vst.msk [vmem:[#allocation3 + $0xd0] sm:$0xff] %vm1759_vm5, %v2848_v0  ;;  %7460 = vmatprep.mubr.msk.f32.mxu1 %vm12369_vm4, %v2990_v25  ;;  %v8226_v0 = vpack.c.bf16 %v7487_v22, %v7486_v21 }
 0x63f   :  { %v2914_v7 = vpop.permute.xlu0 %2913  ;;  %8227 = vmatpush1.bf16.msra.mxu0 %v8226_v0 }
 0x640   :  { %2949 = vst.msk [vmem:[#allocation3 + $0xd0] sm:$0xff] %vm1824_vm6, %v2914_v7  ;;  %v2784_v10 = vpop.permute.xlu1 %2783  ;;  %v2989_v26 = vld [vmem:[#allocation3 + $0xc0] sm:$0xff]  ;;  %8228 = vmatprep.subr.bf16.mxu0 %v8786_v39 }
 0x641   :  { %2820 = vst.msk [vmem:[#allocation3 + $0xe0] sm:$0xff] %vm12359_vm7, %v2784_v10  ;;  %3193 = vmatmul.mubr.f32.gmra.mrb[36].mxu1 %v2989_v26  ;;  %v10438_v7 = vld [vmem:[%s12319_s12 + $0x2] ss:$0 sm:$0xff]  ;;  %v7488_v26 = vld [vmem:[%s12313_s9 + $0x270] sm:$0xff] }
 0x642   :  { %7461 = vmatprep.mubr.msk.f32.mxu1 %vm12369_vm4, %v2992_v33  ;;  %v7489_v33 = vld [vmem:[%s12313_s9 + $0x278] sm:$0xff] }
 0x643   :  { %v2850_v47 = vpop.permute.xlu0 %2849 }
 0x644   :  { %2885 = vst.msk [vmem:[#allocation3 + $0xe0] sm:$0xff] %vm1759_vm5, %v2850_v47  ;;  %v2916_v51 = vpop.permute.xlu1 %2915  ;;  %v8229_v47 = vpack.c.bf16 %v7489_v33, %v7488_v26 }
 0x645   :  { %2950 = vst.msk [vmem:[#allocation3 + $0xe0] sm:$0xff] %vm1824_vm6, %v2916_v51 }
 0x646   :  { %8230 = vmatpush1.bf16.msra.mxu0 %v8229_v47 }
 0x647   :  { %v2786_v28 = vpop.permute.xlu0 %2785  ;;  %v2991_v29 = vld [vmem:[#allocation3 + $0xd0] sm:$0xff] }
 0x648   :  { %2821 = vst.msk [vmem:[#allocation3 + $0xf0] sm:$0xff] %vm12359_vm7, %v2786_v28  ;;  %v2852_v30 = vpop.permute.xlu1 %2851  ;;  %3198 = vmatmul.mubr.f32.gmra.mrb[38].mxu1 %v2991_v29 }
 0x649   :  { %2886 = vst.msk [vmem:[#allocation3 + $0xf0] sm:$0xff] %vm1759_vm5, %v2852_v30  ;;  %7462 = vmatprep.mubr.msk.f32.mxu1 %vm12369_vm4, %v2994_v31 }
 0x64b   :  { %v2918_v32 = vpop.permute.xlu0 %2917 }
 0x64c   :  { %2951 = vst.msk [vmem:[#allocation3 + $0xf0] sm:$0xff] %vm1824_vm6, %v2918_v32  ;;  %v2788_v35 = vpop.permute.xlu1 %2787  ;;  %v2993_v36 = vld [vmem:[#allocation3 + $0xe0] sm:$0xff] }
 0x64d   :  { %2822 = vst.msk [vmem:[#allocation3 + $0x100] sm:$0xff] %vm12359_vm7, %v2788_v35  ;;  %3203 = vmatmul.mubr.f32.gmra.mrb[40].mxu1 %v2993_v36 }
 0x64e   :  { %7463 = vmatprep.mubr.msk.f32.mxu1 %vm12369_vm4, %v2996_v37 }
 0x64f   :  { %v2854_v40 = vpop.permute.xlu0 %2853 }
 0x650   :  { %2887 = vst.msk [vmem:[#allocation3 + $0x100] sm:$0xff] %vm1759_vm5, %v2854_v40  ;;  %v2920_v41 = vpop.permute.xlu1 %2919 }
 0x651   :  { %2952 = vst.msk [vmem:[#allocation3 + $0x100] sm:$0xff] %vm1824_vm6, %v2920_v41 }
 0x653   :  { %v2790_v43 = vpop.permute.xlu0 %2789  ;;  %v2995_v45 = vld [vmem:[#allocation3 + $0xf0] sm:$0xff] }
 0x654   :  { %2823 = vst.msk [vmem:[#allocation3 + $0x110] sm:$0xff] %vm12359_vm7, %v2790_v43  ;;  %v2856_v46 = vpop.permute.xlu1 %2855  ;;  %3208 = vmatmul.mubr.f32.gmra.mrb[42].mxu1 %v2995_v45 }
 0x655   :  { %2888 = vst.msk [vmem:[#allocation3 + $0x110] sm:$0xff] %vm1759_vm5, %v2856_v46  ;;  %7464 = vmatprep.mubr.msk.f32.mxu1 %vm12369_vm4, %v10349_v42 }
 0x658   :  { %v2997_v49 = vld [vmem:[#allocation3 + $0x100] sm:$0xff] }
 0x659   :  { %3213 = vmatmul.mubr.f32.gmra.mrb[44].mxu1 %v2997_v49 }
 0x65a   :  { %7465 = vmatprep.mubr.msk.f32.mxu1 %vm12369_vm4, %v10355_v48 }
 0x65c   :  { %v2999_v50 = vld [vmem:[#allocation3 + $0x110] sm:$0xff] }
 0x65d   :  { %3218 = vmatmul.mubr.f32.gmra.mrb[46].mxu1 %v2999_v50 }
 0x65e   :  { %4001 = vmatprep.mubr.f32.mxu1 %v10359_v52 }
 0x6d8   :  { %v3144_v38 = vpop.f32.mrb[16].mxu1 }
 0x6d9   :  { %v3145_v17 = vadd.f32 %v10420_v44, %v3144_v38  ;;  %v3146_v20 = vpop.f32.mrb[17].mxu1 }
 0x6db   :  { %v3223_v25 = vmax.f32 %v3145_v17, 0.0 }
 0x6dd   :  { %v3247_v10 = vmul.f32 %v10433_v23, %v3223_v25 }
 0x6df   :  { %v10449_v51 = vadd.f32 %v10438_v7, %v3247_v10  ;;  %v3149_v28 = vpop.f32.mrb[18].mxu1 }
 0x6e0   :  { %v3150_v29 = vadd.f32 %v10420_v44, %v3149_v28  ;;  %v3151_v30 = vpop.f32.mrb[19].mxu1 }
 0x6e1   :  { %12383 = vst [vmem:[#allocation12_spill] sm:$0xff] %v10449_v51  ;;  %3287 = vst.msk [vmem:[#allocation3 + $0x40] sm:$0xff] %vm12369_vm4, %v10449_v51  ;;  %3383 = vrot.lane.b32.xlu0 %v10449_v51, %s8788_s8 }
 0x6e2   :  { %v3224_v39 = vmax.f32 %v3150_v29, 0.0 }
 0x6e4   :  { %v3248_v31 = vmul.f32 %v10433_v23, %v3224_v39  ;;  %v3154_v32 = vpop.f32.mrb[20].mxu1 }
 0x6e5   :  { %v3155_v35 = vadd.f32 %v10420_v44, %v3154_v32  ;;  %v3156_v36 = vpop.f32.mrb[21].mxu1  ;;  %3319 = vrot.lane.b32.xlu0 %v10449_v51, %s8789_s5 }
 0x6e6   :  { %v3272_v37 = vadd.f32 %v10438_v7, %v3248_v31 }
 0x6e7   :  { %v3225_v40 = vmax.f32 %v3155_v35, 0.0 }
 0x6e8   :  { %3288 = vst.msk [vmem:[#allocation3 + $0x50] sm:$0xff] %vm12369_vm4, %v3272_v37  ;;  %3449 = vrot.lane.b32.xlu1 %v3272_v37, %s8787_s7 }
 0x6e9   :  { %v3249_v41 = vmul.f32 %v10433_v23, %v3225_v40 }
 0x6eb   :  { %v3273_v43 = vadd.f32 %v10438_v7, %v3249_v41  ;;  %v3159_v45 = vpop.f32.mrb[22].mxu1 }
 0x6ec   :  { %v3160_v46 = vadd.f32 %v10420_v44, %v3159_v45  ;;  %v3161_v49 = vpop.f32.mrb[23].mxu1  ;;  %3385 = vrot.lane.b32.xlu1 %v3272_v37, %s8788_s8 }
 0x6ed   :  { %3513 = vst.msk [vmem:[#allocation3 + $0x28] sm:$0xff] %vm12369_vm4, %v3273_v43  ;;  %3289 = vst.msk [vmem:[#allocation3 + $0x60] sm:$0xff] %vm12369_vm4, %v3273_v43  ;;  %3451 = vrot.lane.b32.xlu0 %v3273_v43, %s8787_s7 }
 0x6ee   :  { %v3226_v50 = vmax.f32 %v3160_v46, 0.0 }
 0x6f0   :  { %v3250_v53 = vmul.f32 %v10433_v23, %v3226_v50  ;;  %v3164_v54 = vpop.f32.mrb[24].mxu1  ;;  %3321 = vrot.lane.b32.xlu1 %v3272_v37, %s8789_s5 }
 0x6f1   :  { %v3165_v55 = vadd.f32 %v10420_v44, %v3164_v54  ;;  %v3166_v56 = vpop.f32.mrb[25].mxu1  ;;  %3387 = vrot.lane.b32.xlu0 %v3273_v43, %s8788_s8 }
 0x6f2   :  { %v3274_v12 = vadd.f32 %v10438_v7, %v3250_v53 }
 0x6f3   :  { %v3227_v14 = vmax.f32 %v3165_v55, 0.0 }
 0x6f4   :  { %3514 = vst.msk [vmem:[#allocation3 + $0x38] sm:$0xff] %vm12369_vm4, %v3274_v12  ;;  %3290 = vst.msk [vmem:[#allocation3 + $0x70] sm:$0xff] %vm12369_vm4, %v3274_v12  ;;  %3453 = vrot.lane.b32.xlu1 %v3274_v12, %s8787_s7  ;;  %v3528_v58 = vld [vmem:[#allocation3 + $0x28] sm:$0xff] }
 0x6f5   :  { %v3251_v59 = vmul.f32 %v10433_v23, %v3227_v14  ;;  %7492 = vmatprep.mubr.msk.f32.mxu0 %vm12369_vm4, %v3528_v58  ;;  %3323 = vrot.lane.b32.xlu0 %v3273_v43, %s8789_s5 }
 0x6f7   :  { %v3275_v60 = vadd.f32 %v10438_v7, %v3251_v59  ;;  %v3169_v61 = vpop.f32.mrb[26].mxu1 }
 0x6f8   :  { %v3170_v62 = vadd.f32 %v10420_v44, %v3169_v61  ;;  %v3171_v63 = vpop.f32.mrb[27].mxu1  ;;  %3389 = vrot.lane.b32.xlu1 %v3274_v12, %s8788_s8 }
 0x6f9   :  { %3515 = vst.msk [vmem:[#allocation3 + $0x48] sm:$0xff] %vm12369_vm4, %v3275_v60  ;;  %3291 = vst.msk [vmem:[#allocation3 + $0x80] sm:$0xff] %vm12369_vm4, %v3275_v60  ;;  %3455 = vrot.lane.b32.xlu0 %v3275_v60, %s8787_s7 }
 0x6fa   :  { %v3228_v1 = vmax.f32 %v3170_v62, 0.0 }
 0x6fc   :  { %v3252_v2 = vmul.f32 %v10433_v23, %v3228_v1  ;;  %v3174_v4 = vpop.f32.mrb[28].mxu1  ;;  %3325 = vrot.lane.b32.xlu1 %v3274_v12, %s8789_s5 }
 0x6fd   :  { %v3175_v5 = vadd.f32 %v10420_v44, %v3174_v4  ;;  %v3176_v6 = vpop.f32.mrb[29].mxu1  ;;  %3391 = vrot.lane.b32.xlu0 %v3275_v60, %s8788_s8 }
 0x6fe   :  { %v3276_v8 = vadd.f32 %v10438_v7, %v3252_v2 }
 0x6ff   :  { %v3229_v9 = vmax.f32 %v3175_v5, 0.0 }
 0x700   :  { %3516 = vst.msk [vmem:[#allocation3 + $0x58] sm:$0xff] %vm12369_vm4, %v3276_v8  ;;  %3292 = vst.msk [vmem:[#allocation3 + $0x90] sm:$0xff] %vm12369_vm4, %v3276_v8  ;;  %3457 = vrot.lane.b32.xlu1 %v3276_v8, %s8787_s7 }
 0x701   :  { %v3253_v11 = vmul.f32 %v10433_v23, %v3229_v9  ;;  %3327 = vrot.lane.b32.xlu0 %v3275_v60, %s8789_s5 }
 0x703   :  { %v3277_v13 = vadd.f32 %v10438_v7, %v3253_v11  ;;  %v3179_v15 = vpop.f32.mrb[30].mxu1 }
 0x704   :  { %v3180_v16 = vadd.f32 %v10420_v44, %v3179_v15  ;;  %v3181_v34 = vpop.f32.mrb[31].mxu1  ;;  %3393 = vrot.lane.b32.xlu1 %v3276_v8, %s8788_s8 }
 0x705   :  { %3517 = vst.msk [vmem:[#allocation3 + $0x68] sm:$0xff] %vm12369_vm4, %v3277_v13  ;;  %3293 = vst.msk [vmem:[#allocation3 + $0xa0] sm:$0xff] %vm12369_vm4, %v3277_v13  ;;  %3459 = vrot.lane.b32.xlu0 %v3277_v13, %s8787_s7 }
 0x706   :  { %v3230_v38 = vmax.f32 %v3180_v16, 0.0 }
 0x708   :  { %v3254_v17 = vmul.f32 %v10433_v23, %v3230_v38  ;;  %v3184_v20 = vpop.f32.mrb[32].mxu1  ;;  %3329 = vrot.lane.b32.xlu1 %v3276_v8, %s8789_s5  ;;  %v3845_v38 = vld [vmem:[%s12320_s13] sm:$0xff] }
 0x709   :  { %v3185_v21 = vadd.f32 %v10420_v44, %v3184_v20  ;;  %v3186_v22 = vpop.f32.mrb[33].mxu1  ;;  %3395 = vrot.lane.b32.xlu0 %v3277_v13, %s8788_s8 }
 0x70a   :  { %v3278_v0 = vadd.f32 %v10438_v7, %v3254_v17  ;;  %v3847_v17 = vld [vmem:[%s12320_s13 + $0x10] sm:$0xff] }
 0x70b   :  { %v3231_v25 = vmax.f32 %v3185_v21, 0.0  ;;  %v8233_v20 = vpack.c.bf16 %v3847_v17, %v3845_v38 }
 0x70c   :  { %3518 = vst.msk [vmem:[#allocation3 + $0x78] sm:$0xff] %vm12369_vm4, %v3278_v0  ;;  %3294 = vst.msk [vmem:[#allocation3 + $0xb0] sm:$0xff] %vm12369_vm4, %v3278_v0  ;;  %3461 = vrot.lane.b32.xlu1 %v3278_v0, %s8787_s7 }
 0x70d   :  { %v3255_v10 = vmul.f32 %v10433_v23, %v3231_v25  ;;  %3331 = vrot.lane.b32.xlu0 %v3277_v13, %s8789_s5 }
 0x70f   :  { %v3279_v26 = vadd.f32 %v10438_v7, %v3255_v10  ;;  %v3189_v33 = vpop.f32.mrb[34].mxu1 }
 0x710   :  { %v3190_v47 = vadd.f32 %v10420_v44, %v3189_v33  ;;  %v3191_v28 = vpop.f32.mrb[35].mxu1  ;;  %3397 = vrot.lane.b32.xlu1 %v3278_v0, %s8788_s8 }
 0x711   :  { %3519 = vst.msk [vmem:[#allocation3 + $0x88] sm:$0xff] %vm12369_vm4, %v3279_v26  ;;  %3295 = vst.msk [vmem:[#allocation3 + $0xc0] sm:$0xff] %vm12369_vm4, %v3279_v26  ;;  %3463 = vrot.lane.b32.xlu0 %v3279_v26, %s8787_s7  ;;  %v3530_v28 = vld [vmem:[#allocation3 + $0x38] sm:$0xff] }
 0x712   :  { %v3232_v29 = vmax.f32 %v3190_v47, 0.0 }
 0x714   :  { %v3256_v30 = vmul.f32 %v10433_v23, %v3232_v29  ;;  %v3194_v39 = vpop.f32.mrb[36].mxu1  ;;  %3333 = vrot.lane.b32.xlu1 %v3278_v0, %s8789_s5 }
 0x715   :  { %v3195_v31 = vadd.f32 %v10420_v44, %v3194_v39  ;;  %v3196_v32 = vpop.f32.mrb[37].mxu1  ;;  %3399 = vrot.lane.b32.xlu0 %v3279_v26, %s8788_s8 }
 0x716   :  { %v3280_v35 = vadd.f32 %v10438_v7, %v3256_v30 }
 0x717   :  { %v3233_v36 = vmax.f32 %v3195_v31, 0.0  ;;  %v3532_v31 = vld [vmem:[#allocation3 + $0x48] sm:$0xff] }
 0x718   :  { %3520 = vst.msk [vmem:[#allocation3 + $0x98] sm:$0xff] %vm12369_vm4, %v3280_v35  ;;  %3296 = vst.msk [vmem:[#allocation3 + $0xd0] sm:$0xff] %vm12369_vm4, %v3280_v35  ;;  %3465 = vrot.lane.b32.xlu1 %v3280_v35, %s8787_s7 }
 0x719   :  { %v3257_v37 = vmul.f32 %v10433_v23, %v3233_v36  ;;  %3335 = vrot.lane.b32.xlu0 %v3279_v26, %s8789_s5 }
 0x71b   :  { %v3281_v40 = vadd.f32 %v10438_v7, %v3257_v37  ;;  %v3199_v41 = vpop.f32.mrb[38].mxu1 }
 0x71c   :  { %v3200_v43 = vadd.f32 %v10420_v44, %v3199_v41  ;;  %v3201_v45 = vpop.f32.mrb[39].mxu1  ;;  %3401 = vrot.lane.b32.xlu1 %v3280_v35, %s8788_s8  ;;  %v3534_v41 = vld [vmem:[#allocation3 + $0x58] sm:$0xff] }
 0x71d   :  { %3521 = vst.msk [vmem:[#allocation3 + $0xa8] sm:$0xff] %vm12369_vm4, %v3281_v40  ;;  %3297 = vst.msk [vmem:[#allocation3 + $0xe0] sm:$0xff] %vm12369_vm4, %v3281_v40  ;;  %3467 = vrot.lane.b32.xlu0 %v3281_v40, %s8787_s7 }
 0x71e   :  { %v3234_v46 = vmax.f32 %v3200_v43, 0.0 }
 0x720   :  { %v3258_v49 = vmul.f32 %v10433_v23, %v3234_v46  ;;  %3337 = vrot.lane.b32.xlu1 %v3280_v35, %s8789_s5  ;;  %v3204_v50 = vpop.f32.mrb[40].mxu1 }
 0x721   :  { %v3205_v53 = vadd.f32 %v10420_v44, %v3204_v50  ;;  %3403 = vrot.lane.b32.xlu0 %v3281_v40, %s8788_s8  ;;  %v3206_v54 = vpop.f32.mrb[41].mxu1 }
 0x722   :  { %v3282_v55 = vadd.f32 %v10438_v7, %v3258_v49  ;;  %v3536_v49 = vld [vmem:[#allocation3 + $0x68] sm:$0xff] }
 0x723   :  { %v3235_v56 = vmax.f32 %v3205_v53, 0.0 }
 0x724   :  { %3522 = vst.msk [vmem:[#allocation3 + $0xb8] sm:$0xff] %vm12369_vm4, %v3282_v55  ;;  %3298 = vst.msk [vmem:[#allocation3 + $0xf0] sm:$0xff] %vm12369_vm4, %v3282_v55  ;;  %3469 = vrot.lane.b32.xlu1 %v3282_v55, %s8787_s7 }
 0x725   :  { %v3259_v12 = vmul.f32 %v10433_v23, %v3235_v56  ;;  %3339 = vrot.lane.b32.xlu0 %v3281_v40, %s8789_s5 }
 0x727   :  { %v3283_v14 = vadd.f32 %v10438_v7, %v3259_v12  ;;  %v3209_v58 = vpop.f32.mrb[42].mxu1  ;;  %v3538_v12 = vld [vmem:[#allocation3 + $0x78] sm:$0xff] }
 0x728   :  { %v3210_v59 = vadd.f32 %v10420_v44, %v3209_v58  ;;  %3405 = vrot.lane.b32.xlu1 %v3282_v55, %s8788_s8  ;;  %v3211_v60 = vpop.f32.mrb[43].mxu1 }
 0x729   :  { %3523 = vst.msk [vmem:[#allocation3 + $0xc8] sm:$0xff] %vm12369_vm4, %v3283_v14  ;;  %3299 = vst.msk [vmem:[#allocation3 + $0x100] sm:$0xff] %vm12369_vm4, %v3283_v14  ;;  %3471 = vrot.lane.b32.xlu0 %v3283_v14, %s8787_s7  ;;  %v3540_v60 = vld [vmem:[#allocation3 + $0x88] sm:$0xff] }
 0x72a   :  { %v3236_v61 = vmax.f32 %v3210_v59, 0.0 }
 0x72c   :  { %v3260_v62 = vmul.f32 %v10433_v23, %v3236_v61  ;;  %3341 = vrot.lane.b32.xlu1 %v3282_v55, %s8789_s5  ;;  %v3214_v63 = vpop.f32.mrb[44].mxu1 }
 0x72d   :  { %v3215_v1 = vadd.f32 %v10420_v44, %v3214_v63  ;;  %v3216_v2 = vpop.f32.mrb[45].mxu1  ;;  %3407 = vrot.lane.b32.xlu0 %v3283_v14, %s8788_s8 }
 0x72e   :  { %v3284_v4 = vadd.f32 %v10438_v7, %v3260_v62 }
 0x72f   :  { %v3237_v5 = vmax.f32 %v3215_v1, 0.0 }
 0x730   :  { %3524 = vst.msk [vmem:[#allocation3 + $0xd8] sm:$0xff] %vm12369_vm4, %v3284_v4  ;;  %3300 = vst.msk [vmem:[#allocation3 + $0x110] sm:$0xff] %vm12369_vm4, %v3284_v4  ;;  %v3219_v6 = vpop.f32.mrb[46].mxu1  ;;  %3473 = vrot.lane.b32.xlu1 %v3284_v4, %s8787_s7 }
 0x731   :  { %v3261_v8 = vmul.f32 %v10433_v23, %v3237_v5  ;;  %v3220_v9 = vadd.f32 %v10420_v44, %v3219_v6  ;;  %v3221_v11 = vpop.f32.mrb[47].mxu1  ;;  %3343 = vrot.lane.b32.xlu0 %v3283_v14, %s8789_s5  ;;  %v3846_v44 = vld [vmem:[%s12320_s13 + $0x8] sm:$0xff] }
 0x733   :  { %v3285_v13 = vadd.f32 %v10438_v7, %v3261_v8  ;;  %v3238_v15 = vmax.f32 %v3220_v9, 0.0  ;;  %v3544_v9 = vld [vmem:[#allocation3 + $0xa8] sm:$0xff] }
 0x734   :  { %3409 = vrot.lane.b32.xlu1 %v3284_v4, %s8788_s8 }
 0x735   :  { %3525 = vst.msk [vmem:[#allocation3 + $0xe8] sm:$0xff] %vm12369_vm4, %v3285_v13  ;;  %v3262_v16 = vmul.f32 %v10433_v23, %v3238_v15  ;;  %3475 = vrot.lane.b32.xlu0 %v3285_v13, %s8787_s7  ;;  %v3848_v23 = vld [vmem:[%s12320_s13 + $0x18] sm:$0xff] }
 0x737   :  { %v10568_v34 = vadd.f32 %v10438_v7, %v3262_v16  ;;  %v8231_v7 = vpack.c.bf16 %v3848_v23, %v3846_v44  ;;  %v3546_v23 = vld [vmem:[#allocation3 + $0xb8] sm:$0xff] }
 0x738   :  { %3345 = vrot.lane.b32.xlu1 %v3284_v4, %s8789_s5  ;;  %v3542_v4 = vld [vmem:[#allocation3 + $0x98] sm:$0xff] }
 0x739   :  { %12384 = vst [vmem:[#allocation13_spill] sm:$0xff] %v10568_v34  ;;  %3526 = vst.msk [vmem:[#allocation3 + $0xf8] sm:$0xff] %vm12369_vm4, %v10568_v34  ;;  %3411 = vrot.lane.b32.xlu0 %v3285_v13, %s8788_s8  ;;  %8383 = vmatprep.subr.bf16.mxu1 %v8231_v7 }
 0x73a   :  { %8232 = vmatprep.subr.bf16.mxu0 %v8231_v7  ;;  %8385 = vmatpush1.bf16.msra.mxu1 %v8233_v20 }
 0x73c   :  { %3477 = vrot.lane.b32.xlu1 %v10568_v34, %s8787_s7 }
 0x73d   :  { %3347 = vrot.lane.b32.xlu0 %v3285_v13, %s8789_s5 }
 0x740   :  { %3413 = vrot.lane.b32.xlu1 %v10568_v34, %s8788_s8 }
 0x753   :  { %v3384_v21 = vpop.permute.xlu0 %3383 }
 0x754   :  { %3431 = vst.msk [vmem:[#allocation3 + $0x20] sm:$0xff] %vm1759_vm5, %v3384_v21 }
 0x757   :  { %v3320_v22 = vpop.permute.xlu0 %3319 }
 0x758   :  { %3367 = vst.msk [vmem:[#allocation3 + $0x30] sm:$0xff] %vm12359_vm7, %v3320_v22 }
 0x75a   :  { %v3450_v0 = vpop.permute.xlu1 %3449 }
 0x75b   :  { %3496 = vst.msk [vmem:[#allocation3 + $0x20] sm:$0xff] %vm1824_vm6, %v3450_v0 }
 0x75e   :  { %v3386_v25 = vpop.permute.xlu1 %3385 }
 0x75f   :  { %3432 = vst.msk [vmem:[#allocation3 + $0x30] sm:$0xff] %vm1759_vm5, %v3386_v25  ;;  %v3452_v10 = vpop.permute.xlu0 %3451 }
 0x760   :  { %3497 = vst.msk [vmem:[#allocation3 + $0x30] sm:$0xff] %vm1824_vm6, %v3452_v10 }
 0x762   :  { %v3322_v26 = vpop.permute.xlu1 %3321  ;;  %v3527_v33 = vld [vmem:[#allocation3 + $0x20] sm:$0xff] }
 0x763   :  { %3368 = vst.msk [vmem:[#allocation3 + $0x40] sm:$0xff] %vm12359_vm7, %v3322_v26  ;;  %3701 = vmatmul.mubr.f32.vlgmr.msra.gmra.mrb[80].mxu0 %v3527_v33  ;;  %v3388_v47 = vpop.permute.xlu0 %3387  ;;  %v3550_v26 = vld [vmem:[#allocation3 + $0xd8] sm:$0xff] }
 0x764   :  { %3433 = vst.msk [vmem:[#allocation3 + $0x40] sm:$0xff] %vm1759_vm5, %v3388_v47  ;;  %7493 = vmatprep.mubr.msk.f32.mxu0 %vm12369_vm4, %v3530_v28  ;;  %8234 = vmatpush1.bf16.msra.mxu0 %v8233_v20  ;;  %v3548_v20 = vld [vmem:[#allocation3 + $0xc8] sm:$0xff] }
 0x766   :  { %v3454_v29 = vpop.permute.xlu1 %3453 }
 0x767   :  { %3498 = vst.msk [vmem:[#allocation3 + $0x40] sm:$0xff] %vm1824_vm6, %v3454_v29  ;;  %v3324_v30 = vpop.permute.xlu0 %3323  ;;  %v3529_v39 = vld [vmem:[#allocation3 + $0x30] sm:$0xff]  ;;  %v3552_v29 = vld [vmem:[#allocation3 + $0xe8] sm:$0xff] }
 0x768   :  { %3369 = vst.msk [vmem:[#allocation3 + $0x50] sm:$0xff] %vm12359_vm7, %v3324_v30  ;;  %3706 = vmatmul.mubr.f32.gmra.mrb[82].mxu0 %v3529_v39 }
 0x769   :  { %7494 = vmatprep.mubr.msk.f32.mxu0 %vm12369_vm4, %v3532_v31 }
 0x76a   :  { %v3390_v32 = vpop.permute.xlu1 %3389 }
 0x76b   :  { %3434 = vst.msk [vmem:[#allocation3 + $0x50] sm:$0xff] %vm1759_vm5, %v3390_v32  ;;  %v3456_v35 = vpop.permute.xlu0 %3455 }
 0x76c   :  { %3499 = vst.msk [vmem:[#allocation3 + $0x50] sm:$0xff] %vm1824_vm6, %v3456_v35 }
 0x76e   :  { %v3326_v36 = vpop.permute.xlu1 %3325  ;;  %v3531_v37 = vld [vmem:[#allocation3 + $0x40] sm:$0xff] }
 0x76f   :  { %3370 = vst.msk [vmem:[#allocation3 + $0x60] sm:$0xff] %vm12359_vm7, %v3326_v36  ;;  %3711 = vmatmul.mubr.f32.gmra.mrb[84].mxu0 %v3531_v37  ;;  %v3392_v40 = vpop.permute.xlu0 %3391  ;;  %v3554_v36 = vld [vmem:[#allocation3 + $0xf8] sm:$0xff] }
 0x770   :  { %3435 = vst.msk [vmem:[#allocation3 + $0x60] sm:$0xff] %vm1759_vm5, %v3392_v40  ;;  %7495 = vmatprep.mubr.msk.f32.mxu0 %vm12369_vm4, %v3534_v41 }
 0x772   :  { %v3458_v43 = vpop.permute.xlu1 %3457 }
 0x773   :  { %3500 = vst.msk [vmem:[#allocation3 + $0x60] sm:$0xff] %vm1824_vm6, %v3458_v43  ;;  %v3328_v45 = vpop.permute.xlu0 %3327  ;;  %v3533_v46 = vld [vmem:[#allocation3 + $0x50] sm:$0xff] }
 0x774   :  { %3371 = vst.msk [vmem:[#allocation3 + $0x70] sm:$0xff] %vm12359_vm7, %v3328_v45  ;;  %3716 = vmatmul.mubr.f32.gmra.mrb[86].mxu0 %v3533_v46  ;;  %v3850_v46 = vld [vmem:[%s12320_s13 + $0x28] sm:$0xff] }
 0x775   :  { %7496 = vmatprep.mubr.msk.f32.mxu0 %vm12369_vm4, %v3536_v49  ;;  %v3852_v49 = vld [vmem:[%s12320_s13 + $0x38] sm:$0xff] }
 0x776   :  { %v3394_v50 = vpop.permute.xlu1 %3393 }
 0x777   :  { %3436 = vst.msk [vmem:[#allocation3 + $0x70] sm:$0xff] %vm1759_vm5, %v3394_v50  ;;  %v3460_v53 = vpop.permute.xlu0 %3459  ;;  %v8235_v50 = vpack.c.bf16 %v3852_v49, %v3850_v46 }
 0x778   :  { %3501 = vst.msk [vmem:[#allocation3 + $0x70] sm:$0xff] %vm1824_vm6, %v3460_v53  ;;  %v3851_v53 = vld [vmem:[%s12320_s13 + $0x30] sm:$0xff] }
 0x779   :  { %8236 = vmatprep.subr.bf16.mxu0 %v8235_v50  ;;  %8384 = vmatprep.subr.bf16.mxu1 %v8235_v50 }
 0x77a   :  { %v3330_v54 = vpop.permute.xlu1 %3329  ;;  %v3535_v55 = vld [vmem:[#allocation3 + $0x60] sm:$0xff] }
 0x77b   :  { %3372 = vst.msk [vmem:[#allocation3 + $0x80] sm:$0xff] %vm12359_vm7, %v3330_v54  ;;  %3721 = vmatmul.mubr.f32.gmra.mrb[88].mxu0 %v3535_v55  ;;  %v3396_v56 = vpop.permute.xlu0 %3395 }
 0x77c   :  { %3437 = vst.msk [vmem:[#allocation3 + $0x80] sm:$0xff] %vm1759_vm5, %v3396_v56  ;;  %7497 = vmatprep.mubr.msk.f32.mxu0 %vm12369_vm4, %v3538_v12  ;;  %v4109_v56 = vld [vmem:[%s12321_s14 + $0x18] sm:$0xff] }
 0x77e   :  { %v3462_v14 = vpop.permute.xlu1 %3461 }
 0x77f   :  { %3502 = vst.msk [vmem:[#allocation3 + $0x80] sm:$0xff] %vm1824_vm6, %v3462_v14  ;;  %v3332_v58 = vpop.permute.xlu0 %3331  ;;  %v3537_v59 = vld [vmem:[#allocation3 + $0x70] sm:$0xff]  ;;  %v10680_v14 = vld [vmem:[%s12317_s10 + $0x3] ss:$0 sm:$0xff] }
 0x780   :  { %3373 = vst.msk [vmem:[#allocation3 + $0x90] sm:$0xff] %vm12359_vm7, %v3332_v58  ;;  %3726 = vmatmul.mubr.f32.gmra.mrb[90].mxu0 %v3537_v59 }
 0x781   :  { %7498 = vmatprep.mubr.msk.f32.mxu0 %vm12369_vm4, %v3540_v60 }
 0x782   :  { %v3398_v61 = vpop.permute.xlu1 %3397 }
 0x783   :  { %3438 = vst.msk [vmem:[#allocation3 + $0x90] sm:$0xff] %vm1759_vm5, %v3398_v61  ;;  %v3464_v62 = vpop.permute.xlu0 %3463  ;;  %v10686_v61 = vld [vmem:[%s12318_s11 + $0x3] ss:$0 sm:$0xff] }
 0x784   :  { %3503 = vst.msk [vmem:[#allocation3 + $0x90] sm:$0xff] %vm1824_vm6, %v3464_v62 }
 0x786   :  { %v3334_v63 = vpop.permute.xlu1 %3333  ;;  %v3539_v1 = vld [vmem:[#allocation3 + $0x80] sm:$0xff] }
 0x787   :  { %3374 = vst.msk [vmem:[#allocation3 + $0xa0] sm:$0xff] %vm12359_vm7, %v3334_v63  ;;  %3731 = vmatmul.mubr.f32.gmra.mrb[92].mxu0 %v3539_v1  ;;  %v3400_v2 = vpop.permute.xlu0 %3399  ;;  %v4106_v63 = vld [vmem:[%s12321_s14] sm:$0xff]  ;;  %v4108_v1 = vld [vmem:[%s12321_s14 + $0x10] sm:$0xff] }
 0x788   :  { %3439 = vst.msk [vmem:[#allocation3 + $0xa0] sm:$0xff] %vm1759_vm5, %v3400_v2  ;;  %7499 = vmatprep.mubr.msk.f32.mxu0 %vm12369_vm4, %v3542_v4  ;;  %v10697_v2 = vld [vmem:[%s12319_s12 + $0x3] ss:$0 sm:$0xff]  ;;  %v4111_v4 = vld [vmem:[%s12321_s14 + $0x28] sm:$0xff] }
 0x78a   :  { %v3466_v5 = vpop.permute.xlu1 %3465 }
 0x78b   :  { %3504 = vst.msk [vmem:[#allocation3 + $0xa0] sm:$0xff] %vm1824_vm6, %v3466_v5  ;;  %v3336_v6 = vpop.permute.xlu0 %3335  ;;  %v3541_v8 = vld [vmem:[#allocation3 + $0x90] sm:$0xff]  ;;  %v4113_v5 = vld [vmem:[%s12321_s14 + $0x38] sm:$0xff] }
 0x78c   :  { %3375 = vst.msk [vmem:[#allocation3 + $0xb0] sm:$0xff] %vm12359_vm7, %v3336_v6  ;;  %3736 = vmatmul.mubr.f32.gmra.mrb[94].mxu0 %v3541_v8 }
 0x78d   :  { %7500 = vmatprep.mubr.msk.f32.mxu0 %vm12369_vm4, %v3544_v9 }
 0x78e   :  { %v3402_v11 = vpop.permute.xlu1 %3401 }
 0x78f   :  { %3440 = vst.msk [vmem:[#allocation3 + $0xb0] sm:$0xff] %vm1759_vm5, %v3402_v11  ;;  %v3468_v13 = vpop.permute.xlu0 %3467 }
 0x790   :  { %3505 = vst.msk [vmem:[#allocation3 + $0xb0] sm:$0xff] %vm1824_vm6, %v3468_v13  ;;  %v10707_v13 = vpack.c.bf16 %v4108_v1, %v4106_v63 }
 0x792   :  { %v3338_v15 = vpop.permute.xlu1 %3337  ;;  %v3543_v16 = vld [vmem:[#allocation3 + $0xa0] sm:$0xff] }
 0x793   :  { %3376 = vst.msk [vmem:[#allocation3 + $0xc0] sm:$0xff] %vm12359_vm7, %v3338_v15  ;;  %3741 = vmatmul.mubr.f32.gmra.mrb[96].mxu0 %v3543_v16  ;;  %v3404_v44 = vpop.permute.xlu0 %3403  ;;  %v10710_v16 = vpack.c.bf16 %v4113_v5, %v4111_v4 }
 0x794   :  { %3441 = vst.msk [vmem:[#allocation3 + $0xc0] sm:$0xff] %vm1759_vm5, %v3404_v44  ;;  %7501 = vmatprep.mubr.msk.f32.mxu0 %vm12369_vm4, %v3546_v23  ;;  %v4110_v23 = vld [vmem:[%s12321_s14 + $0x20] sm:$0xff] }
 0x796   :  { %v3470_v7 = vpop.permute.xlu1 %3469 }
 0x797   :  { %3506 = vst.msk [vmem:[#allocation3 + $0xc0] sm:$0xff] %vm1824_vm6, %v3470_v7  ;;  %v3340_v38 = vpop.permute.xlu0 %3339  ;;  %v3545_v17 = vld [vmem:[#allocation3 + $0xb0] sm:$0xff] }
 0x798   :  { %3377 = vst.msk [vmem:[#allocation3 + $0xd0] sm:$0xff] %vm12359_vm7, %v3340_v38  ;;  %3746 = vmatmul.mubr.f32.gmra.mrb[98].mxu0 %v3545_v17  ;;  %v4112_v7 = vld [vmem:[%s12321_s14 + $0x30] sm:$0xff] }
 0x799   :  { %7502 = vmatprep.mubr.msk.f32.mxu0 %vm12369_vm4, %v3548_v20  ;;  %v10723_v17 = vpack.c.bf16 %v4112_v7, %v4110_v23 }
 0x79a   :  { %v3406_v21 = vpop.permute.xlu1 %3405 }
 0x79b   :  { %3442 = vst.msk [vmem:[#allocation3 + $0xd0] sm:$0xff] %vm1759_vm5, %v3406_v21  ;;  %v3472_v22 = vpop.permute.xlu0 %3471 }
 0x79c   :  { %3507 = vst.msk [vmem:[#allocation3 + $0xd0] sm:$0xff] %vm1824_vm6, %v3472_v22 }
 0x79e   :  { %v3342_v0 = vpop.permute.xlu1 %3341  ;;  %v3547_v25 = vld [vmem:[#allocation3 + $0xc0] sm:$0xff] }
 0x79f   :  { %3378 = vst.msk [vmem:[#allocation3 + $0xe0] sm:$0xff] %vm12359_vm7, %v3342_v0  ;;  %v3408_v10 = vpop.permute.xlu0 %3407  ;;  %3751 = vmatmul.mubr.f32.gmra.mrb[100].mxu0 %v3547_v25 }
 0x7a0   :  { %3443 = vst.msk [vmem:[#allocation3 + $0xe0] sm:$0xff] %vm1759_vm5, %v3408_v10  ;;  %7503 = vmatprep.mubr.msk.f32.mxu0 %vm12369_vm4, %v3550_v26 }
 0x7a2   :  { %v3474_v33 = vpop.permute.xlu1 %3473 }
 0x7a3   :  { %3508 = vst.msk [vmem:[#allocation3 + $0xe0] sm:$0xff] %vm1824_vm6, %v3474_v33  ;;  %v3344_v47 = vpop.permute.xlu0 %3343  ;;  %v3549_v28 = vld [vmem:[#allocation3 + $0xd0] sm:$0xff] }
 0x7a4   :  { %3379 = vst.msk [vmem:[#allocation3 + $0xf0] sm:$0xff] %vm12359_vm7, %v3344_v47  ;;  %3756 = vmatmul.mubr.f32.gmra.mrb[102].mxu0 %v3549_v28 }
 0x7a5   :  { %7504 = vmatprep.mubr.msk.f32.mxu0 %vm12369_vm4, %v3552_v29 }
 0x7a6   :  { %v3410_v30 = vpop.permute.xlu1 %3409 }
 0x7a7   :  { %3444 = vst.msk [vmem:[#allocation3 + $0xf0] sm:$0xff] %vm1759_vm5, %v3410_v30  ;;  %v3476_v39 = vpop.permute.xlu0 %3475 }
 0x7a8   :  { %3509 = vst.msk [vmem:[#allocation3 + $0xf0] sm:$0xff] %vm1824_vm6, %v3476_v39 }
 0x7aa   :  { %v3346_v31 = vpop.permute.xlu1 %3345  ;;  %v3551_v32 = vld [vmem:[#allocation3 + $0xe0] sm:$0xff] }
 0x7ab   :  { %3380 = vst.msk [vmem:[#allocation3 + $0x100] sm:$0xff] %vm12359_vm7, %v3346_v31  ;;  %v3412_v35 = vpop.permute.xlu0 %3411  ;;  %3761 = vmatmul.mubr.f32.gmra.mrb[104].mxu0 %v3551_v32 }
 0x7ac   :  { %3445 = vst.msk [vmem:[#allocation3 + $0x100] sm:$0xff] %vm1759_vm5, %v3412_v35  ;;  %7505 = vmatprep.mubr.msk.f32.mxu0 %vm12369_vm4, %v3554_v36 }
 0x7ae   :  { %v3478_v37 = vpop.permute.xlu1 %3477 }
 0x7af   :  { %3510 = vst.msk [vmem:[#allocation3 + $0x100] sm:$0xff] %vm1824_vm6, %v3478_v37  ;;  %v3348_v40 = vpop.permute.xlu0 %3347  ;;  %v3553_v41 = vld [vmem:[#allocation3 + $0xf0] sm:$0xff] }
 0x7b0   :  { %3381 = vst.msk [vmem:[#allocation3 + $0x110] sm:$0xff] %vm12359_vm7, %v3348_v40  ;;  %3766 = vmatmul.mubr.f32.gmra.mrb[106].mxu0 %v3553_v41 }
 0x7b1   :  { %7506 = vmatprep.mubr.msk.f32.mxu0 %vm12369_vm4, %v10349_v42  ;;  %v3849_v42 = vld [vmem:[%s12320_s13 + $0x20] sm:$0xff] }
 0x7b2   :  { %v3414_v43 = vpop.permute.xlu1 %3413  ;;  %v8237_v55 = vpack.c.bf16 %v3851_v53, %v3849_v42 }
 0x7b3   :  { %3446 = vst.msk [vmem:[#allocation3 + $0x110] sm:$0xff] %vm1759_vm5, %v3414_v43 }
 0x7b4   :  { %8238 = vmatpush1.bf16.msra.mxu0 %v8237_v55  ;;  %8386 = vmatpush1.bf16.msra.mxu1 %v8237_v55 }
 0x7b6   :  { %v3555_v45 = vld [vmem:[#allocation3 + $0x100] sm:$0xff] }
 0x7b7   :  { %3771 = vmatmul.mubr.f32.gmra.mrb[108].mxu0 %v3555_v45 }
 0x7b8   :  { %7507 = vmatprep.mubr.msk.f32.mxu0 %vm12369_vm4, %v10355_v48  ;;  %v4107_v48 = vld [vmem:[%s12321_s14 + $0x8] sm:$0xff] }
 0x7b9   :  { %v10673_v12 = vpack.c.bf16 %v4109_v56, %v4107_v48 }
 0x7ba   :  { %v3557_v54 = vld [vmem:[#allocation3 + $0x110] sm:$0xff] }
 0x7bb   :  { %3776 = vmatmul.mubr.f32.gmra.mrb[110].mxu0 %v3557_v54  ;;  %8240 = vmatprep.subr.bf16.mxu0 %v10673_v12 }
 0x7bc   :  { %3977 = vmatprep.mubr.f32.mxu0 %v10359_v52  ;;  %8304 = vmatprep.subr.bf16.mxu1 %v10673_v12 }
 0x836   :  { %v3702_v58 = vpop.f32.mrb[80].mxu0 }
 0x837   :  { %v3703_v59 = vadd.f32 %v10680_v14, %v3702_v58  ;;  %v3704_v60 = vpop.f32.mrb[81].mxu0 }
 0x839   :  { %v3781_v62 = vmax.f32 %v3703_v59, 0.0 }
 0x83b   :  { %v3805_v6 = vmul.f32 %v10686_v61, %v3781_v62  ;;  %v3707_v8 = vpop.f32.mrb[82].mxu0 }
 0x83c   :  { %v3708_v9 = vadd.f32 %v10680_v14, %v3707_v8  ;;  %v3709_v11 = vpop.f32.mrb[83].mxu0 }
 0x83d   :  { %v3829_v15 = vadd.f32 %v10697_v2, %v3805_v6 }
 0x83e   :  { %v3782_v44 = vmax.f32 %v3708_v9, 0.0 }
 0x83f   :  { %7512 = vmatmul.mubr.msk.f32.vlgmr.msra.gmra.mrb[112].mxu0 %vm12369_vm4, %v3829_v15 }
 0x840   :  { %v3806_v38 = vmul.f32 %v10686_v61, %v3782_v44  ;;  %3983 = vmatprep.mubr.f32.mxu0 %v10359_v52  ;;  %8242 = vmatpush1.bf16.msra.mxu0 %v10707_v13 }
 0x841   :  { %8244 = vmatprep.subr.bf16.mxu0 %v10710_v16 }
 0x842   :  { %v3830_v20 = vadd.f32 %v10697_v2, %v3806_v38  ;;  %v3712_v21 = vpop.f32.mrb[84].mxu0 }
 0x843   :  { %v3713_v22 = vadd.f32 %v10680_v14, %v3712_v21  ;;  %v3714_v0 = vpop.f32.mrb[85].mxu0 }
 0x844   :  { %7513 = vmatmul.mubr.msk.f32.gmra.mrb[114].mxu0 %vm12369_vm4, %v3830_v20  ;;  %v10778_v20 = vld [vmem:[#allocation3] sm:$0xff] }
 0x845   :  { %v3783_v25 = vmax.f32 %v3713_v22, 0.0  ;;  %3989 = vmatprep.mubr.f32.mxu0 %v10359_v52  ;;  %8246 = vmatpush1.bf16.msra.mxu0 %v10723_v17 }
 0x846   :  { %8248 = vmatprep.subr.bf16.mxu0 %v10673_v12 }
 0x847   :  { %v3807_v10 = vmul.f32 %v10686_v61, %v3783_v25  ;;  %v3717_v26 = vpop.f32.mrb[86].mxu0 }
 0x848   :  { %v3718_v33 = vadd.f32 %v10680_v14, %v3717_v26  ;;  %v3719_v47 = vpop.f32.mrb[87].mxu0 }
 0x849   :  { %v3831_v28 = vadd.f32 %v10697_v2, %v3807_v10 }
 0x84a   :  { %v3784_v29 = vmax.f32 %v3718_v33, 0.0 }
 0x84b   :  { %7514 = vmatmul.mubr.msk.f32.gmra.mrb[116].mxu0 %vm12369_vm4, %v3831_v28 }
 0x84c   :  { %v3808_v30 = vmul.f32 %v10686_v61, %v3784_v29  ;;  %3995 = vmatprep.mubr.f32.mxu0 %v10359_v52 }
 0x84e   :  { %v3832_v39 = vadd.f32 %v10697_v2, %v3808_v30  ;;  %v3722_v31 = vpop.f32.mrb[88].mxu0 }
 0x84f   :  { %v3723_v32 = vadd.f32 %v10680_v14, %v3722_v31  ;;  %v3724_v35 = vpop.f32.mrb[89].mxu0 }
 0x850   :  { %7515 = vmatmul.mubr.msk.f32.gmra.mrb[118].mxu0 %vm12369_vm4, %v3832_v39 }
 0x851   :  { %v3785_v36 = vmax.f32 %v3723_v32, 0.0  ;;  %4186 = vmatprep.mubr.f32.mxu0 %v10359_v52 }
 0x853   :  { %v3809_v37 = vmul.f32 %v10686_v61, %v3785_v36  ;;  %v3727_v40 = vpop.f32.mrb[90].mxu0 }
 0x854   :  { %v3728_v41 = vadd.f32 %v10680_v14, %v3727_v40  ;;  %v3729_v43 = vpop.f32.mrb[91].mxu0  ;;  %4187 = vmatmul.mubr.f32.vlgmr.msra.gmra.mrb[120].mxu0 %v10359_v52 }
 0x855   :  { %v3833_v45 = vadd.f32 %v10697_v2, %v3809_v37  ;;  %4192 = vmatprep.mubr.f32.mxu0 %v10359_v52  ;;  %8250 = vmatpush1.bf16.msra.mxu0 %v10707_v13 }
 0x856   :  { %v3786_v46 = vmax.f32 %v3728_v41, 0.0  ;;  %8252 = vmatprep.subr.bf16.mxu0 %v10710_v16 }
 0x857   :  { %7516 = vmatmul.mubr.msk.f32.vlgmr.msra.gmra.mrb[48].mxu1 %vm12369_vm4, %v3833_v45 }
 0x858   :  { %v3810_v49 = vmul.f32 %v10686_v61, %v3786_v46  ;;  %4007 = vmatprep.mubr.f32.mxu1 %v10359_v52  ;;  %4193 = vmatmul.mubr.f32.gmra.mrb[122].mxu0 %v10359_v52 }
 0x859   :  { %8254 = vmatpush1.bf16.msra.mxu0 %v10723_v17  ;;  %4351 = vmatprep.mubr.f32.mxu0 %v10359_v52 }
 0x85a   :  { %v3834_v50 = vadd.f32 %v10697_v2, %v3810_v49  ;;  %v3732_v42 = vpop.f32.mrb[92].mxu0  ;;  %8256 = vmatprep.subr.bf16.mxu0 %v10673_v12  ;;  %8306 = vmatpush1.bf16.msra.mxu1 %v10707_v13 }
 0x85b   :  { %v3733_v53 = vadd.f32 %v10680_v14, %v3732_v42  ;;  %v3734_v54 = vpop.f32.mrb[93].mxu0  ;;  %8308 = vmatprep.subr.bf16.mxu1 %v10710_v16 }
 0x85c   :  { %7517 = vmatmul.mubr.msk.f32.gmra.mrb[50].mxu1 %vm12369_vm4, %v3834_v50 }
 0x85d   :  { %v3787_v55 = vmax.f32 %v3733_v53, 0.0  ;;  %4013 = vmatprep.mubr.f32.mxu1 %v10359_v52 }
 0x85e   :  { %8310 = vmatpush1.bf16.msra.mxu1 %v10723_v17 }
 0x85f   :  { %v3811_v48 = vmul.f32 %v10686_v61, %v3787_v55  ;;  %v3737_v56 = vpop.f32.mrb[94].mxu0  ;;  %8320 = vmatprep.subr.bf16.mxu1 %v10673_v12 }
 0x860   :  { %v3738_v58 = vadd.f32 %v10680_v14, %v3737_v56  ;;  %v3739_v59 = vpop.f32.mrb[95].mxu0 }
 0x861   :  { %v3835_v60 = vadd.f32 %v10697_v2, %v3811_v48 }
 0x862   :  { %v3788_v62 = vmax.f32 %v3738_v58, 0.0 }
 0x863   :  { %7518 = vmatmul.mubr.msk.f32.gmra.mrb[52].mxu1 %vm12369_vm4, %v3835_v60 }
 0x864   :  { %v3812_v63 = vmul.f32 %v10686_v61, %v3788_v62  ;;  %4019 = vmatprep.mubr.f32.mxu1 %v10359_v52 }
 0x866   :  { %v3836_v1 = vadd.f32 %v10697_v2, %v3812_v63  ;;  %v3742_v4 = vpop.f32.mrb[96].mxu0 }
 0x867   :  { %v3743_v5 = vadd.f32 %v10680_v14, %v3742_v4  ;;  %v3744_v6 = vpop.f32.mrb[97].mxu0 }
 0x868   :  { %7519 = vmatmul.mubr.msk.f32.gmra.mrb[54].mxu1 %vm12369_vm4, %v3836_v1 }
 0x869   :  { %v3789_v8 = vmax.f32 %v3743_v5, 0.0  ;;  %4025 = vmatprep.mubr.f32.mxu1 %v10359_v52 }
 0x86b   :  { %v3813_v9 = vmul.f32 %v10686_v61, %v3789_v8  ;;  %v3747_v11 = vpop.f32.mrb[98].mxu0 }
 0x86c   :  { %v3748_v15 = vadd.f32 %v10680_v14, %v3747_v11  ;;  %v3749_v44 = vpop.f32.mrb[99].mxu0 }
 0x86d   :  { %v3837_v23 = vadd.f32 %v10697_v2, %v3813_v9 }
 0x86e   :  { %v3790_v7 = vmax.f32 %v3748_v15, 0.0 }
 0x86f   :  { %7520 = vmatmul.mubr.msk.f32.gmra.mrb[56].mxu1 %vm12369_vm4, %v3837_v23 }
 0x870   :  { %v3814_v38 = vmul.f32 %v10686_v61, %v3790_v7  ;;  %4031 = vmatprep.mubr.f32.mxu1 %v10778_v20 }
 0x872   :  { %v3838_v21 = vadd.f32 %v10697_v2, %v3814_v38  ;;  %v3752_v52 = vpop.f32.mrb[100].mxu0 }
 0x873   :  { %v3753_v22 = vadd.f32 %v10680_v14, %v3752_v52  ;;  %v3754_v0 = vpop.f32.mrb[101].mxu0 }
 0x874   :  { %7521 = vmatmul.mubr.msk.f32.gmra.mrb[58].mxu1 %vm12369_vm4, %v3838_v21 }
 0x875   :  { %v3791_v25 = vmax.f32 %v3753_v22, 0.0  ;;  %4037 = vmatprep.mubr.f32.mxu1 %v10778_v20 }
 0x877   :  { %v3815_v10 = vmul.f32 %v10686_v61, %v3791_v25  ;;  %v3757_v26 = vpop.f32.mrb[102].mxu0 }
 0x878   :  { %v3758_v33 = vadd.f32 %v10680_v14, %v3757_v26  ;;  %v3759_v47 = vpop.f32.mrb[103].mxu0  ;;  %v12330_v26 = vmov 0  }
 0x879   :  { %v3839_v28 = vadd.f32 %v10697_v2, %v3815_v10  ;;  %8458 = vset.pattern.permute.xlu0 %v12330_v26  ;;  %8459 = vset.pattern.permute.xlu1 %v12330_v26 }
 0x87a   :  { %v3792_v29 = vmax.f32 %v3758_v33, 0.0 }
 0x87b   :  { %7522 = vmatmul.mubr.msk.f32.gmra.mrb[60].mxu1 %vm12369_vm4, %v3839_v28 }
 0x87c   :  { %v3816_v30 = vmul.f32 %v10686_v61, %v3792_v29  ;;  %4043 = vmatprep.mubr.f32.mxu1 %v10778_v20 }
 0x87e   :  { %v3840_v39 = vadd.f32 %v10697_v2, %v3816_v30  ;;  %v3762_v31 = vpop.f32.mrb[104].mxu0 }
 0x87f   :  { %v3763_v32 = vadd.f32 %v10680_v14, %v3762_v31  ;;  %v3764_v35 = vpop.f32.mrb[105].mxu0 }
 0x880   :  { %7523 = vmatmul.mubr.msk.f32.gmra.mrb[62].mxu1 %vm12369_vm4, %v3840_v39 }
 0x881   :  { %v3793_v36 = vmax.f32 %v3763_v32, 0.0  ;;  %4049 = vmatprep.mubr.f32.mxu1 %v10778_v20 }
 0x883   :  { %v3817_v37 = vmul.f32 %v10686_v61, %v3793_v36  ;;  %v3767_v40 = vpop.f32.mrb[106].mxu0 }
 0x884   :  { %v3768_v41 = vadd.f32 %v10680_v14, %v3767_v40  ;;  %v3769_v43 = vpop.f32.mrb[107].mxu0 }
 0x885   :  { %v3841_v45 = vadd.f32 %v10697_v2, %v3817_v37 }
 0x886   :  { %v3794_v46 = vmax.f32 %v3768_v41, 0.0 }
 0x887   :  { %7524 = vmatmul.mubr.msk.f32.gmra.mrb[64].mxu1 %vm12369_vm4, %v3841_v45 }
 0x888   :  { %v3818_v49 = vmul.f32 %v10686_v61, %v3794_v46  ;;  %4055 = vmatprep.mubr.f32.mxu1 %v10778_v20 }
 0x88a   :  { %v3842_v50 = vadd.f32 %v10697_v2, %v3818_v49  ;;  %v3772_v42 = vpop.f32.mrb[108].mxu0 }
 0x88b   :  { %v3773_v53 = vadd.f32 %v10680_v14, %v3772_v42  ;;  %v3774_v54 = vpop.f32.mrb[109].mxu0 }
 0x88c   :  { %7525 = vmatmul.mubr.msk.f32.gmra.mrb[66].mxu1 %vm12369_vm4, %v3842_v50 }
 0x88d   :  { %v3795_v55 = vmax.f32 %v3773_v53, 0.0  ;;  %4061 = vmatprep.mubr.f32.mxu1 %v10778_v20 }
 0x88e   :  { %v3777_v48 = vpop.f32.mrb[110].mxu0 }
 0x88f   :  { %v3819_v56 = vmul.f32 %v10686_v61, %v3795_v55  ;;  %v3778_v58 = vadd.f32 %v10680_v14, %v3777_v48  ;;  %v3779_v59 = vpop.f32.mrb[111].mxu0  ;;  %v3855_v14 = vlaneseq }
 0x891   :  { %v3843_v60 = vadd.f32 %v10697_v2, %v3819_v56  ;;  %v3796_v62 = vmax.f32 %v3778_v58, 0.0  ;;  %v3856_v9 = vshrl.u32 %v3855_v14, 7 }
 0x893   :  { %v3820_v63 = vmul.f32 %v10686_v61, %v3796_v62  ;;  %7526 = vmatmul.mubr.msk.f32.gmra.mrb[68].mxu1 %vm12369_vm4, %v3843_v60  ;;  %v3857_v61 = vsub.s32 0, %v3856_v9  ;;  %v3861_v54 = vsub.s32 1, %v3856_v9  ;;  %v4253_v9 = vld [vmem:[%s12323_s2] sm:$0xff] }
 0x894   :  { %4067 = vmatprep.mubr.f32.mxu1 %v10778_v20  ;;  %vm4255_vm8 = vcmp.gt.f32.partialorder %v4253_v9, 0.5 }
 0x895   :  { %v3844_v1 = vadd.f32 %v10697_v2, %v3820_v63  ;;  %v3853_v2 = vld [vmem:[%s12322_s15] sm:$0x3] }
 0x896   :  { %v10827_v44 = vrot.slane %v3853_v2, %v3857_v61  ;;  %v10881_v56 = vrot.slane %v3853_v2, %v3861_v54 }
 0x897   :  { %7527 = vmatmul.mubr.msk.f32.gmra.mrb[70].mxu1 %vm12369_vm4, %v3844_v1 }
 0x898   :  { %5548 = vmatprep.mubr.f32.mxu1 %v10778_v20 }
 0x912   :  { %v3979_v4 = vpop.f32.mrb[112].mxu0 }
 0x913   :  { %v10814_v5 = vpop.f32.mrb[113].mxu0  ;;  %v3980_v38 = vadd.f32 %v3979_v4, %v10827_v44 }
 0x917   :  { %v10816_v6 = vpop.f32.mrb[114].mxu0 }
 0x918   :  { %v10818_v8 = vpop.f32.mrb[115].mxu0 }
 0x91e   :  { %v10820_v11 = vpop.f32.mrb[116].mxu0 }
 0x91f   :  { %v10825_v15 = vpop.f32.mrb[117].mxu0 }
 0x923   :  { %v10829_v23 = vpop.f32.mrb[118].mxu0 }
 0x924   :  { %v10831_v7 = vpop.f32.mrb[119].mxu0 }
 0x927   :  { %v4188_v21 = vpop.f32.mrb[120].mxu0 }
 0x928   :  { %v4203_v52 = vadd.f32 %v4188_v21, %v3980_v38  ;;  %v4190_v22 = vpop.f32.mrb[121].mxu0  ;;  %v4257_v21 = vsel %vm4255_vm8, 1, %v12330_v26 }
 0x92a   :  { %8460 = vtanh.f32 %v4203_v52  ;;  %v10834_v0 = vpop.f32.mrb[48].mxu1  ;;  %v7528_v1 = vmul.f32 -1.442695, %v4203_v52 }
 0x92b   :  { %v10836_v25 = vpop.f32.mrb[49].mxu1  ;;  %v4194_v10 = vpop.f32.mrb[122].mxu0 }
 0x92c   :  { %v4196_v33 = vpop.f32.mrb[123].mxu0 }
 0x92f   :  { %v10840_v47 = vpop.f32.mrb[50].mxu1 }
 0x930   :  { %v10842_v28 = vpop.f32.mrb[51].mxu1 }
 0x934   :  { %v8461_v29 = vpop.eup %8460 }
 0x935   :  { %4223 = vrot.lane.b32.xlu0 %v8461_v29, %s8788_s8 }
 0x936   :  { %v10845_v30 = vpop.f32.mrb[52].mxu1 }
 0x937   :  { %v10847_v39 = vpop.f32.mrb[53].mxu1 }
 0x93b   :  { %v10849_v31 = vpop.f32.mrb[54].mxu1 }
 0x93c   :  { %v10851_v32 = vpop.f32.mrb[55].mxu1 }
 0x942   :  { %v10853_v35 = vpop.f32.mrb[56].mxu1 }
 0x943   :  { %v10855_v36 = vpop.f32.mrb[57].mxu1 }
 0x947   :  { %v10857_v37 = vpop.f32.mrb[58].mxu1 }
 0x948   :  { %v10859_v40 = vpop.f32.mrb[59].mxu1 }
 0x94e   :  { %v10861_v41 = vpop.f32.mrb[60].mxu1 }
 0x94f   :  { %v10863_v43 = vpop.f32.mrb[61].mxu1 }
 0x953   :  { %v10865_v45 = vpop.f32.mrb[62].mxu1 }
 0x954   :  { %v10867_v46 = vpop.f32.mrb[63].mxu1 }
 0x95a   :  { %v10869_v49 = vpop.f32.mrb[64].mxu1 }
 0x95b   :  { %v10871_v50 = vpop.f32.mrb[65].mxu1 }
 0x95f   :  { %v10873_v42 = vpop.f32.mrb[66].mxu1 }
 0x960   :  { %v10875_v53 = vpop.f32.mrb[67].mxu1 }
 0x966   :  { %v10877_v55 = vpop.f32.mrb[68].mxu1 }
 0x967   :  { %v10879_v48 = vpop.f32.mrb[69].mxu1 }
 0x96a   :  { %v10883_v58 = vpop.f32.mrb[70].mxu1 }
 0x96b   :  { %v4071_v59 = vpop.f32.mrb[71].mxu1 }
 0x96c   :  { %v4072_v60 = vadd.f32 %v4071_v59, %v10881_v56 }
 0x96e   :  { %v4204_v62 = vadd.f32 %v4196_v33, %v4072_v60  ;;  %v4254_v33 = vld [vmem:[%s12323_s2 + $0x8] sm:$0xff] }
 0x96f   :  { %vm4256_vm9 = vcmp.gt.f32.partialorder %v4254_v33, 0.5 }
 0x970   :  { %8462 = vtanh.f32 %v4204_v62  ;;  %v7529_v22 = vmul.f32 -1.442695, %v4204_v62  ;;  %v4258_v60 = vsel %vm4256_vm9, 1, %v12330_v26 }
 0x971   :  { %8464 = vpow2.f32 %v7528_v1 }
 0x97a   :  { %v8463_v63 = vpop.eup %8462 }
 0x97b   :  { %4225 = vrot.lane.b32.xlu1 %v8463_v63, %s8788_s8  ;;  %v8465_v4 = vpop.eup %8464 }
 0x97c   :  { %v4211_v14 = vadd.f32 1.0, %v8465_v4 }
 0x97e   :  { %8466 = vrcp.f32 %v4211_v14 }
 0x97f   :  { %8468 = vpow2.f32 %v7529_v22 }
 0x988   :  { %v8467_v61 = vpop.eup %8466 }
 0x989   :  { %v8469_v52 = vpop.eup %8468  ;;  %v4219_v63 = vmul.f32 0.0, %v8467_v61 }
 0x98a   :  { %v4212_v10 = vadd.f32 1.0, %v8469_v52 }
 0x98c   :  { %8470 = vrcp.f32 %v4212_v10 }
 0x996   :  { %v8471_v29 = vpop.eup %8470 }
 0x997   :  { %v4220_v14 = vmul.f32 0.0, %v8471_v29 }
 0x9a7   :  { %v4224_v2 = vpop.permute.xlu0 %4223 }
 0x9a8   :  { %v4229_v38 = vmul.f32 %v8467_v61, %v4224_v2 }
 0x9aa   :  { %4233 = vrot.lane.b32.xlu0 %v4229_v38, %s8789_s5 }
 0x9ae   :  { %4260 = vperm.xlu0 %8458, %v4257_v21  }
 0x9ed   :  { %v4226_v54 = vpop.permute.xlu1 %4225 }
 0x9ee   :  { %v4230_v59 = vmul.f32 %v8471_v29, %v4226_v54 }
 0x9f0   :  { %4235 = vrot.lane.b32.xlu1 %v4230_v59, %s8789_s5 }
 0x9f4   :  { %4263 = vperm.xlu1 %8459, %v4258_v60  }
 0xa1c   :  { %v4234_v1 = vpop.permute.xlu0 %4233 }
 0xa1d   :  { %v10897_v62 = vadd.f32 %v4234_v1, %v4219_v63  ;;  %v3986_v63 = vadd.f32 %v10816_v6, %v10827_v44 }
 0xa1f   :  { %8472 = vtanh.f32 %v10897_v62 }
 0xa29   :  { %v8473_v4 = vpop.eup %8472 }
 0xa2a   :  { %4245 = vrot.lane.b32.xlu1 %v8473_v4, %s8788_s8 }
 0xa2d   :  { %v10907_v22 = vpop.permute.xlu0 %4260 }
 0xa2e   :  { %vm4265_vm10 = vcmp.eq.s32.totalorder %v10907_v22, 1 }
 0xa62   :  { %v4236_v9 = vpop.permute.xlu1 %4235 }
 0xa63   :  { %v10901_v2 = vadd.f32 %v4236_v9, %v4220_v14 }
 0xa65   :  { %8474 = vtanh.f32 %v10901_v2 }
 0xa6f   :  { %v8475_v38 = vpop.eup %8474 }
 0xa70   :  { %4247 = vrot.lane.b32.xlu0 %v8475_v38, %s8788_s8  ;;  %v4066_v38 = vadd.f32 %v10879_v48, %v10881_v56 }
 0xa73   :  { %v10905_v21 = vpop.permute.xlu1 %4263 }
 0xa74   :  { %vm4266_vm11 = vcmp.eq.s32.totalorder %v10905_v21, 1 }
 0xa9c   :  { %v4246_v52 = vpop.permute.xlu1 %4245 }
 0xa9d   :  { %v4251_v10 = vmul.f32 %v8467_v61, %v4246_v52 }
 0xa9f   :  { %v10912_v33 = vsel %vm4265_vm10, %v4251_v10, 0.0 }
 0xaa0   :  { %4272 = vrot.lane.b32.xlu1 %v10912_v33, %s8789_s5 }
 0xae2   :  { %v4248_v54 = vpop.permute.xlu0 %4247 }
 0xae3   :  { %v4252_v59 = vmul.f32 %v8471_v29, %v4248_v54 }
 0xae5   :  { %v10919_v60 = vsel %vm4266_vm11, %v4252_v59, 0.0 }
 0xae6   :  { %4281 = vrot.lane.b32.xlu0 %v10919_v60, %s8789_s5 }
 0xb12   :  { %v4273_v61 = vpop.permute.xlu1 %4272 }
 0xb13   :  { %4275 = vst.msk [vmem:[#allocation5] sm:$0xff] %vm12369_vm4, %v4273_v61  ;;  %7530 = vmatmul.mubr.msk.f32.vlgmr.msra.gmra.mrb[124].mxu0 %vm12369_vm4, %v4273_v61 }
 0xb14   :  { %4357 = vmatprep.mubr.f32.mxu0 %v10778_v20  ;;  %8258 = vmatpush1.bf16.msra.mxu0 %v10707_v13 }
 0xb15   :  { %8260 = vmatprep.subr.bf16.mxu0 %v10710_v16 }
 0xb18   :  { %8262 = vmatpush1.bf16.msra.mxu0 %v10723_v17 }
 0xb19   :  { %8264 = vmatprep.subr.bf16.mxu0 %v10673_v12 }
 0xb58   :  { %v4282_v29 = vpop.permute.xlu0 %4281 }
 0xb59   :  { %7531 = vmatmul.mubr.msk.f32.gmra.mrb[126].mxu0 %vm12369_vm4, %v4282_v29 }
 0xb5a   :  { %4522 = vmatprep.mubr.f32.mxu0 %v10778_v20 }
 0xbe6   :  { %v4353_v1 = vpop.f32.mrb[124].mxu0 }
 0xbe7   :  { %v4368_v4 = vadd.f32 %v4353_v1, %v3986_v63  ;;  %v4355_v14 = vpop.f32.mrb[125].mxu0  ;;  %v4418_v63 = vld [vmem:[%s12323_s2 + $0x10] sm:$0xff] }
 0xbe8   :  { %vm4420_vm12 = vcmp.gt.f32.partialorder %v4418_v63, 0.5 }
 0xbe9   :  { %8476 = vtanh.f32 %v4368_v4  ;;  %v7532_v61 = vmul.f32 -1.442695, %v4368_v4  ;;  %v4422_v48 = vsel %vm4420_vm12, 1, %v12330_v26 }
 0xbf3   :  { %v8477_v9 = vpop.eup %8476 }
 0xbf4   :  { %4388 = vrot.lane.b32.xlu1 %v8477_v9, %s8788_s8 }
 0xc2c   :  { %v4359_v52 = vpop.f32.mrb[126].mxu0 }
 0xc2d   :  { %v4361_v10 = vpop.f32.mrb[127].mxu0 }
 0xc2e   :  { %v4369_v54 = vadd.f32 %v4361_v10, %v4066_v38  ;;  %v4419_v10 = vld [vmem:[%s12323_s2 + $0x18] sm:$0xff] }
 0xc2f   :  { %vm4421_vm13 = vcmp.gt.f32.partialorder %v4419_v10, 0.5 }
 0xc30   :  { %8478 = vtanh.f32 %v4369_v54  ;;  %v7533_v38 = vmul.f32 -1.442695, %v4369_v54  ;;  %v10951_v54 = vsel %vm4265_vm10, %v10897_v62, 0.0 }
 0xc31   :  { %8480 = vpow2.f32 %v7532_v61 }
 0xc3a   :  { %v8479_v59 = vpop.eup %8478 }
 0xc3b   :  { %4390 = vrot.lane.b32.xlu0 %v8479_v59, %s8788_s8  ;;  %v8481_v6 = vpop.eup %8480 }
 0xc3c   :  { %v4376_v29 = vadd.f32 1.0, %v8481_v6 }
 0xc3e   :  { %8482 = vrcp.f32 %v4376_v29  ;;  %v4423_v29 = vsel %vm4421_vm13, 1, %v12330_v26 }
 0xc3f   :  { %8484 = vpow2.f32 %v7533_v38  ;;  %v10961_v38 = vsel %vm4266_vm11, %v10901_v2, 0.0 }
 0xc48   :  { %v8483_v1 = vpop.eup %8482 }
 0xc49   :  { %v8485_v4 = vpop.eup %8484  ;;  %v4384_v63 = vmul.f32 %v8483_v1, %v10951_v54 }
 0xc4a   :  { %v4377_v52 = vadd.f32 1.0, %v8485_v4 }
 0xc4c   :  { %8486 = vrcp.f32 %v4377_v52 }
 0xc56   :  { %v8487_v59 = vpop.eup %8486 }
 0xc57   :  { %v4385_v4 = vmul.f32 %v8487_v59, %v10961_v38 }
 0xc66   :  { %v4389_v14 = vpop.permute.xlu1 %4388 }
 0xc67   :  { %v4394_v9 = vmul.f32 %v8483_v1, %v4389_v14 }
 0xc69   :  { %4398 = vrot.lane.b32.xlu1 %v4394_v9, %s8789_s5 }
 0xc6d   :  { %4425 = vperm.xlu1 %8459, %v4422_v48  }
 0xcad   :  { %v4391_v61 = vpop.permute.xlu0 %4390 }
 0xcae   :  { %v4395_v6 = vmul.f32 %v8487_v59, %v4391_v61 }
 0xcb0   :  { %4400 = vrot.lane.b32.xlu0 %v4395_v6, %s8789_s5 }
 0xcb4   :  { %4428 = vperm.xlu0 %8458, %v4423_v29  }
 0xcdb   :  { %v4399_v14 = vpop.permute.xlu1 %4398 }
 0xcdc   :  { %v10954_v9 = vadd.f32 %v4399_v14, %v4384_v63  ;;  %v3992_v14 = vadd.f32 %v10820_v11, %v10827_v44 }
 0xcde   :  { %8488 = vtanh.f32 %v10954_v9 }
 0xce8   :  { %v8489_v48 = vpop.eup %8488 }
 0xce9   :  { %4410 = vrot.lane.b32.xlu1 %v8489_v48, %s8788_s8 }
 0xcec   :  { %v10968_v10 = vpop.permute.xlu1 %4425 }
 0xced   :  { %vm4430_vm14 = vcmp.eq.s32.totalorder %v10968_v10, 1 }
 0xd22   :  { %v4401_v22 = vpop.permute.xlu0 %4400 }
 0xd23   :  { %v10964_v62 = vadd.f32 %v4401_v22, %v4385_v4 }
 0xd25   :  { %8490 = vtanh.f32 %v10964_v62 }
 0xd2f   :  { %v8491_v52 = vpop.eup %8490 }
 0xd30   :  { %4412 = vrot.lane.b32.xlu0 %v8491_v52, %s8788_s8 }
 0xd33   :  { %v10981_v21 = vpop.permute.xlu0 %4428 }
 0xd34   :  { %12385 = vst [vmem:[#allocation14_spill] sm:$0xff] %v10981_v21  ;;  %vm12347_vm15 = vcmp.eq.s32.totalorder %v10981_v21, 1 }
 0xd5b   :  { %v4411_v61 = vpop.permute.xlu1 %4410 }
 0xd5c   :  { %v10970_v6 = vmul.f32 %v8483_v1, %v4411_v61  ;;  %v4060_v61 = vadd.f32 %v10875_v53, %v10881_v56  ;;  %v12387_v53 = vmov 0  }
 0xd5e   :  { %v10977_v2 = vsel %vm4430_vm14, %v10970_v6, %v10912_v33 }
 0xd5f   :  { %4450 = vrot.lane.b32.xlu1 %v10977_v2, %s8789_s5 }
 0xda2   :  { %v4413_v29 = vpop.permute.xlu0 %4412 }
 0xda3   :  { %v10983_v63 = vmul.f32 %v8487_v59, %v4413_v29 }
 0xda5   :  { %12386 = vst [vmem:[#allocation15_spill] sm:$0xff] %v10983_v63  ;;  %v10990_v1 = vsel %vm12347_vm15, %v10983_v63, %v10919_v60 }
 0xda6   :  { %4452 = vrot.lane.b32.xlu0 %v10990_v1, %s8789_s5 }
 0xdd1   :  { %v4451_v33 = vpop.permute.xlu1 %4450 }
 0xdd2   :  { %7534 = vmatmul.mubr.msk.f32.vlgmr.msra.gmra.mrb[128].mxu0 %vm12369_vm4, %v4451_v33 }
 0xdd3   :  { %4528 = vmatprep.mubr.f32.mxu0 %v10778_v20  ;;  %8266 = vmatpush1.bf16.msra.mxu0 %v10707_v13 }
 0xdd4   :  { %8268 = vmatprep.subr.bf16.mxu0 %v10710_v16 }
 0xdd7   :  { %8270 = vmatpush1.bf16.msra.mxu0 %v10723_v17 }
 0xdd8   :  { %8272 = vmatprep.subr.bf16.mxu0 %v10673_v12 }
 0xe18   :  { %v4453_v59 = vpop.permute.xlu0 %4452 }
 0xe19   :  { %7535 = vmatmul.mubr.msk.f32.gmra.mrb[130].mxu0 %vm12369_vm4, %v4453_v59 }
 0xe1a   :  { %4693 = vmatprep.mubr.f32.mxu0 %v10778_v20 }
 0xea5   :  { %v4524_v48 = vpop.f32.mrb[128].mxu0 }
 0xea6   :  { %v4539_v4 = vadd.f32 %v4524_v48, %v3992_v14  ;;  %v4526_v22 = vpop.f32.mrb[129].mxu0  ;;  %v4589_v14 = vld [vmem:[%s12323_s2 + $0x20] sm:$0xff] }
 0xea7   :  { %vm4591_vm0 = vcmp.gt.f32.partialorder %v4589_v14, 0.5 }
 0xea8   :  { %8492 = vtanh.f32 %v4539_v4  ;;  %v7536_v51 = vmul.f32 -1.442695, %v4539_v4 }
 0xeb2   :  { %v8493_v52 = vpop.eup %8492 }
 0xeb3   :  { %4559 = vrot.lane.b32.xlu1 %v8493_v52, %s8788_s8 }
 0xeec   :  { %v4530_v29 = vpop.f32.mrb[130].mxu0 }
 0xeed   :  { %v4532_v33 = vpop.f32.mrb[131].mxu0 }
 0xeee   :  { %v4540_v26 = vadd.f32 %v4532_v33, %v4060_v61  ;;  %v4593_v61 = vsel %vm4591_vm0, 1, %v12387_v53 }
 0xef0   :  { %8494 = vtanh.f32 %v4540_v26  ;;  %v7537_v29 = vmul.f32 -1.442695, %v4540_v26  ;;  %v11022_v26 = vsel %vm4430_vm14, %v10954_v9, %v10951_v54 }
 0xef1   :  { %8496 = vpow2.f32 %v7536_v51 }
 0xefa   :  { %v8495_v59 = vpop.eup %8494 }
 0xefb   :  { %4561 = vrot.lane.b32.xlu0 %v8495_v59, %s8788_s8  ;;  %v8497_v11 = vpop.eup %8496 }
 0xefc   :  { %v4547_v34 = vadd.f32 1.0, %v8497_v11 }
 0xefe   :  { %8498 = vrcp.f32 %v4547_v34  ;;  %v4590_v34 = vld [vmem:[%s12323_s2 + $0x28] sm:$0xff] }
 0xeff   :  { %8500 = vpow2.f32 %v7537_v29  ;;  %vm4592_vm1 = vcmp.gt.f32.partialorder %v4590_v34, 0.5 }
 0xf00   :  { %v4594_v14 = vsel %vm4592_vm1, 1, %v12387_v53 }
 0xf08   :  { %v8499_v48 = vpop.eup %8498 }
 0xf09   :  { %v8501_v4 = vpop.eup %8500 }
 0xf0a   :  { %v4548_v51 = vadd.f32 1.0, %v8501_v4  ;;  %v11033_v4 = vsel %vm12347_vm15, %v10964_v62, %v10961_v38 }
 0xf0c   :  { %8502 = vrcp.f32 %v4548_v51 }
 0xf16   :  { %v8503_v33 = vpop.eup %8502 }
 0xf17   :  { %v4556_v51 = vmul.f32 %v8503_v33, %v11033_v4 }
 0xf25   :  { %v4560_v22 = vpop.permute.xlu1 %4559 }
 0xf26   :  { %v4565_v52 = vmul.f32 %v8499_v48, %v4560_v22  ;;  %v4555_v22 = vmul.f32 %v8499_v48, %v11022_v26 }
 0xf28   :  { %4569 = vrot.lane.b32.xlu1 %v4565_v52, %s8789_s5 }
 0xf2c   :  { %4596 = vperm.xlu1 %8459, %v4593_v61  }
 0xf6d   :  { %v4562_v59 = vpop.permute.xlu0 %4561 }
 0xf6e   :  { %v4566_v11 = vmul.f32 %v8503_v33, %v4562_v59 }
 0xf70   :  { %4571 = vrot.lane.b32.xlu0 %v4566_v11, %s8789_s5 }
 0xf74   :  { %4599 = vperm.xlu0 %8458, %v4594_v14  }
 0xf9a   :  { %v4570_v52 = vpop.permute.xlu1 %4569 }
 0xf9b   :  { %v11025_v61 = vadd.f32 %v4570_v52, %v4555_v22 }
 0xf9d   :  { %8504 = vtanh.f32 %v11025_v61 }
 0xfa7   :  { %v8505_v29 = vpop.eup %8504 }
 0xfa8   :  { %4581 = vrot.lane.b32.xlu1 %v8505_v29, %s8788_s8 }
 0xfab   :  { %v11040_v59 = vpop.permute.xlu1 %4596 }
 0xfac   :  { %vm12364_vm2 = vcmp.eq.s32.totalorder %v11040_v59, 1 }
 0xfe2   :  { %v4572_v54 = vpop.permute.xlu0 %4571 }
 0xfe3   :  { %v11036_v9 = vadd.f32 %v4572_v54, %v4556_v51 }
 0xfe5   :  { %8506 = vtanh.f32 %v11036_v9 }
 0xfef   :  { %v8507_v34 = vpop.eup %8506 }
 0xff0   :  { %4583 = vrot.lane.b32.xlu0 %v8507_v34, %s8788_s8 }
 0xff3   :  { %v11053_v62 = vpop.permute.xlu0 %4599 }
 0xff4   :  { %vm12368_vm3 = vcmp.eq.s32.totalorder %v11053_v62, 1 }
0x101a   :  { %v4582_v11 = vpop.permute.xlu1 %4581 }
0x101b   :  { %v11042_v14 = vmul.f32 %v8499_v48, %v4582_v11  ;;  %v4054_v11 = vadd.f32 %v10871_v50, %v10881_v56 }
0x101d   :  { %v11049_v38 = vsel %vm12364_vm2, %v11042_v14, %v10977_v2 }
0x101e   :  { %4621 = vrot.lane.b32.xlu1 %v11049_v38, %s8789_s5 }
0x1062   :  { %v4584_v22 = vpop.permute.xlu0 %4583 }
0x1063   :  { %v11055_v52 = vmul.f32 %v8503_v33, %v4584_v22 }
0x1065   :  { %v11062_v48 = vsel %vm12368_vm3, %v11055_v52, %v10990_v1  ;;  %v3998_v1 = vadd.f32 %v10829_v23, %v10827_v44 }
0x1066   :  { %4623 = vrot.lane.b32.xlu0 %v11062_v48, %s8789_s5 }
0x1090   :  { %v4622_v2 = vpop.permute.xlu1 %4621 }
0x1091   :  { %7538 = vmatmul.mubr.msk.f32.vlgmr.msra.gmra.mrb[132].mxu0 %vm12369_vm4, %v4622_v2 }
0x1092   :  { %4699 = vmatprep.mubr.f32.mxu0 %v10778_v20  ;;  %8274 = vmatpush1.bf16.msra.mxu0 %v10707_v13 }
0x1093   :  { %8276 = vmatprep.subr.bf16.mxu0 %v10710_v16 }
0x1096   :  { %8278 = vmatpush1.bf16.msra.mxu0 %v10723_v17 }
0x1097   :  { %8280 = vmatprep.subr.bf16.mxu0 %v10673_v12 }
0x10d8   :  { %v4624_v33 = vpop.permute.xlu0 %4623 }
0x10d9   :  { %7539 = vmatmul.mubr.msk.f32.gmra.mrb[134].mxu0 %vm12369_vm4, %v4624_v33 }
0x10da   :  { %4864 = vmatprep.mubr.f32.mxu0 %v10778_v20 }
0x1164   :  { %v4695_v29 = vpop.f32.mrb[132].mxu0 }
0x1165   :  { %v4710_v51 = vadd.f32 %v4695_v29, %v3998_v1  ;;  %v4697_v54 = vpop.f32.mrb[133].mxu0  ;;  %v4760_v1 = vld [vmem:[%s12323_s2 + $0x30] sm:$0xff] }
0x1166   :  { %vm4762_vm5 = vcmp.gt.f32.partialorder %v4760_v1, 0.5 }
0x1167   :  { %8508 = vtanh.f32 %v4710_v51  ;;  %v7540_v27 = vmul.f32 -1.442695, %v4710_v51  ;;  %v4764_v50 = vsel %vm4762_vm5, 1, %v12387_v53 }
0x1171   :  { %v8509_v34 = vpop.eup %8508 }
0x1172   :  { %4730 = vrot.lane.b32.xlu1 %v8509_v34, %s8788_s8 }
0x11ac   :  { %v4701_v22 = vpop.f32.mrb[134].mxu0 }
0x11ad   :  { %v4703_v2 = vpop.f32.mrb[135].mxu0 }
0x11ae   :  { %v4711_v3 = vadd.f32 %v4703_v2, %v4054_v11 }
0x11b0   :  { %8510 = vtanh.f32 %v4711_v3  ;;  %v7541_v11 = vmul.f32 -1.442695, %v4711_v3  ;;  %v11094_v3 = vsel %vm12364_vm2, %v11025_v61, %v11022_v26 }
0x11b1   :  { %8512 = vpow2.f32 %v7540_v27 }
0x11ba   :  { %v8511_v33 = vpop.eup %8510 }
0x11bb   :  { %4732 = vrot.lane.b32.xlu0 %v8511_v33, %s8788_s8  ;;  %v8513_v23 = vpop.eup %8512 }
0x11bc   :  { %v4718_v57 = vadd.f32 1.0, %v8513_v23 }
0x11be   :  { %8514 = vrcp.f32 %v4718_v57  ;;  %v4761_v57 = vld [vmem:[%s12323_s2 + $0x38] sm:$0xff] }
0x11bf   :  { %8516 = vpow2.f32 %v7541_v11  ;;  %vm4763_vm6 = vcmp.gt.f32.partialorder %v4761_v57, 0.5  ;;  %v11105_v11 = vsel %vm12368_vm3, %v11036_v9, %v11033_v4 }
0x11c0   :  { %v4765_v23 = vsel %vm4763_vm6, 1, %v12387_v53 }
0x11c8   :  { %v8515_v29 = vpop.eup %8514 }
0x11c9   :  { %v8517_v51 = vpop.eup %8516  ;;  %v4726_v1 = vmul.f32 %v8515_v29, %v11094_v3 }
0x11ca   :  { %v4719_v27 = vadd.f32 1.0, %v8517_v51 }
0x11cc   :  { %8518 = vrcp.f32 %v4719_v27 }
0x11d6   :  { %v8519_v22 = vpop.eup %8518 }
0x11d7   :  { %v4727_v51 = vmul.f32 %v8519_v22, %v11105_v11 }
0x11e4   :  { %v4731_v54 = vpop.permute.xlu1 %4730 }
0x11e5   :  { %v4736_v34 = vmul.f32 %v8515_v29, %v4731_v54 }
0x11e7   :  { %4740 = vrot.lane.b32.xlu1 %v4736_v34, %s8789_s5 }
0x11eb   :  { %4767 = vperm.xlu1 %8459, %v4764_v50  }
0x122d   :  { %v4733_v2 = vpop.permute.xlu0 %4732 }
0x122e   :  { %v4737_v33 = vmul.f32 %v8519_v22, %v4733_v2 }
0x1230   :  { %4742 = vrot.lane.b32.xlu0 %v4737_v33, %s8789_s5 }
0x1234   :  { %4770 = vperm.xlu0 %8458, %v4765_v23  }
0x1259   :  { %v4741_v54 = vpop.permute.xlu1 %4740 }
0x125a   :  { %v11097_v34 = vadd.f32 %v4741_v54, %v4726_v1 }
0x125c   :  { %8520 = vtanh.f32 %v11097_v34 }
0x1266   :  { %v8521_v50 = vpop.eup %8520 }
0x1267   :  { %4752 = vrot.lane.b32.xlu1 %v8521_v50, %s8788_s8 }
0x126a   :  { %v11112_v57 = vpop.permute.xlu1 %4767 }
0x126b   :  { %vm4772_vm8 = vcmp.eq.s32.totalorder %v11112_v57, 1 }
0x12a2   :  { %v4743_v26 = vpop.permute.xlu0 %4742 }
0x12a3   :  { %v11108_v61 = vadd.f32 %v4743_v26, %v4727_v51 }
0x12a5   :  { %8522 = vtanh.f32 %v11108_v61 }
0x12af   :  { %v8523_v27 = vpop.eup %8522 }
0x12b0   :  { %4754 = vrot.lane.b32.xlu0 %v8523_v27, %s8788_s8  ;;  %v4048_v27 = vadd.f32 %v10867_v46, %v10881_v56 }
0x12b3   :  { %v11125_v9 = vpop.permute.xlu0 %4770 }
0x12b4   :  { %12388 = vst [vmem:[#allocation16_spill] sm:$0xff] %v11125_v9  ;;  %vm12348_vm9 = vcmp.eq.s32.totalorder %v11125_v9, 1 }
0x12d9   :  { %v4753_v2 = vpop.permute.xlu1 %4752 }
0x12da   :  { %v11114_v33 = vmul.f32 %v8515_v29, %v4753_v2 }
0x12dc   :  { %v11121_v4 = vsel %vm4772_vm8, %v11114_v33, %v11049_v38 }
0x12dd   :  { %4792 = vrot.lane.b32.xlu1 %v11121_v4, %s8789_s5 }
0x1322   :  { %v4755_v23 = vpop.permute.xlu0 %4754 }
0x1323   :  { %v11127_v1 = vmul.f32 %v8519_v22, %v4755_v23 }
0x1325   :  { %12389 = vst [vmem:[#allocation17_spill] sm:$0xff] %v11127_v1  ;;  %v11134_v29 = vsel %vm12348_vm9, %v11127_v1, %v11062_v48  ;;  %v4004_v48 = vadd.f32 %v10834_v0, %v10827_v44 }
0x1326   :  { %4794 = vrot.lane.b32.xlu0 %v11134_v29, %s8789_s5 }
0x134f   :  { %v4793_v38 = vpop.permute.xlu1 %4792 }
0x1350   :  { %7542 = vmatmul.mubr.msk.f32.vlgmr.msra.gmra.mrb[136].mxu0 %vm12369_vm4, %v4793_v38 }
0x1351   :  { %4870 = vmatprep.mubr.f32.mxu0 %v10778_v20  ;;  %8282 = vmatpush1.bf16.msra.mxu0 %v10707_v13 }
0x1352   :  { %8284 = vmatprep.subr.bf16.mxu0 %v10710_v16 }
0x1355   :  { %8286 = vmatpush1.bf16.msra.mxu0 %v10723_v17 }
0x1356   :  { %8288 = vmatprep.subr.bf16.mxu0 %v10673_v12 }
0x1398   :  { %v4795_v22 = vpop.permute.xlu0 %4794 }
0x1399   :  { %7543 = vmatmul.mubr.msk.f32.gmra.mrb[138].mxu0 %vm12369_vm4, %v4795_v22 }
0x139a   :  { %5035 = vmatprep.mubr.f32.mxu0 %v10778_v20 }
0x1423   :  { %v4866_v54 = vpop.f32.mrb[136].mxu0 }
0x1424   :  { %v4881_v50 = vadd.f32 %v4866_v54, %v4004_v48  ;;  %v4868_v51 = vpop.f32.mrb[137].mxu0  ;;  %v4931_v48 = vld [vmem:[%s12323_s2 + $0x40] sm:$0xff] }
0x1425   :  { %vm4933_vm10 = vcmp.gt.f32.partialorder %v4931_v48, 0.5 }
0x1426   :  { %8524 = vtanh.f32 %v4881_v50  ;;  %v7544_v18 = vmul.f32 -1.442695, %v4881_v50  ;;  %v4935_v46 = vsel %vm4933_vm10, 1, %v12387_v53 }
0x1430   :  { %v8525_v26 = vpop.eup %8524 }
0x1431   :  { %4901 = vrot.lane.b32.xlu1 %v8525_v26, %s8788_s8 }
0x146c   :  { %v4872_v2 = vpop.f32.mrb[138].mxu0 }
0x146d   :  { %v4874_v23 = vpop.f32.mrb[139].mxu0 }
0x146e   :  { %v4882_v38 = vadd.f32 %v4874_v23, %v4048_v27 }
0x1470   :  { %8526 = vtanh.f32 %v4882_v38  ;;  %v7545_v27 = vmul.f32 -1.442695, %v4882_v38  ;;  %v11166_v38 = vsel %vm4772_vm8, %v11097_v34, %v11094_v3 }
0x1471   :  { %8528 = vpow2.f32 %v7544_v18 }
0x147a   :  { %v8527_v22 = vpop.eup %8526 }
0x147b   :  { %4903 = vrot.lane.b32.xlu0 %v8527_v22, %s8788_s8  ;;  %v8529_v0 = vpop.eup %8528 }
0x147c   :  { %v4889_v19 = vadd.f32 1.0, %v8529_v0 }
0x147e   :  { %8530 = vrcp.f32 %v4889_v19  ;;  %v4932_v19 = vld [vmem:[%s12323_s2 + $0x48] sm:$0xff] }
0x147f   :  { %8532 = vpow2.f32 %v7545_v27  ;;  %vm4934_vm11 = vcmp.gt.f32.partialorder %v4932_v19, 0.5  ;;  %v11177_v27 = vsel %vm12348_vm9, %v11108_v61, %v11105_v11 }
0x1480   :  { %v4936_v0 = vsel %vm4934_vm11, 1, %v12387_v53 }
0x1488   :  { %v8531_v54 = vpop.eup %8530 }
0x1489   :  { %v8533_v50 = vpop.eup %8532  ;;  %v4897_v48 = vmul.f32 %v8531_v54, %v11166_v38 }
0x148a   :  { %v4890_v18 = vadd.f32 1.0, %v8533_v50 }
0x148c   :  { %8534 = vrcp.f32 %v4890_v18 }
0x1496   :  { %v8535_v2 = vpop.eup %8534 }
0x1497   :  { %v4898_v50 = vmul.f32 %v8535_v2, %v11177_v27 }
0x14a3   :  { %v4902_v51 = vpop.permute.xlu1 %4901 }
0x14a4   :  { %v4907_v26 = vmul.f32 %v8531_v54, %v4902_v51 }
0x14a6   :  { %4911 = vrot.lane.b32.xlu1 %v4907_v26, %s8789_s5 }
0x14aa   :  { %4938 = vperm.xlu1 %8459, %v4935_v46  }
0x14ed   :  { %v4904_v23 = vpop.permute.xlu0 %4903 }
0x14ee   :  { %v4908_v22 = vmul.f32 %v8535_v2, %v4904_v23 }
0x14f0   :  { %4913 = vrot.lane.b32.xlu0 %v4908_v22, %s8789_s5 }
0x14f4   :  { %4941 = vperm.xlu0 %8458, %v4936_v0  }
0x1518   :  { %v4912_v51 = vpop.permute.xlu1 %4911 }
0x1519   :  { %v11169_v26 = vadd.f32 %v4912_v51, %v4897_v48 }
0x151b   :  { %8536 = vtanh.f32 %v11169_v26 }
0x1525   :  { %v8537_v46 = vpop.eup %8536 }
0x1526   :  { %4923 = vrot.lane.b32.xlu1 %v8537_v46, %s8788_s8 }
0x1529   :  { %v11184_v19 = vpop.permute.xlu1 %4938 }
0x152a   :  { %vm12362_vm12 = vcmp.eq.s32.totalorder %v11184_v19, 1 }
0x1562   :  { %v4914_v3 = vpop.permute.xlu0 %4913 }
0x1563   :  { %v11180_v34 = vadd.f32 %v4914_v3, %v4898_v50 }
0x1565   :  { %8538 = vtanh.f32 %v11180_v34 }
0x156f   :  { %v8539_v18 = vpop.eup %8538 }
0x1570   :  { %4925 = vrot.lane.b32.xlu0 %v8539_v18, %s8788_s8  ;;  %v4042_v18 = vadd.f32 %v10863_v43, %v10881_v56 }
0x1573   :  { %v11197_v61 = vpop.permute.xlu0 %4941 }
0x1574   :  { %vm4944_vm13 = vcmp.eq.s32.totalorder %v11197_v61, 1 }
0x1598   :  { %v4924_v23 = vpop.permute.xlu1 %4923 }
0x1599   :  { %v11186_v22 = vmul.f32 %v8531_v54, %v4924_v23 }
0x159b   :  { %v11193_v11 = vsel %vm12362_vm12, %v11186_v22, %v11121_v4 }
0x159c   :  { %4963 = vrot.lane.b32.xlu1 %v11193_v11, %s8789_s5 }
0x15e2   :  { %v4926_v0 = vpop.permute.xlu0 %4925 }
0x15e3   :  { %v11199_v48 = vmul.f32 %v8535_v2, %v4926_v0 }
0x15e5   :  { %v11206_v54 = vsel %vm4944_vm13, %v11199_v48, %v11134_v29  ;;  %v4010_v29 = vadd.f32 %v10840_v47, %v10827_v44 }
0x15e6   :  { %4965 = vrot.lane.b32.xlu0 %v11206_v54, %s8789_s5 }
0x160e   :  { %v4964_v4 = vpop.permute.xlu1 %4963 }
0x160f   :  { %7546 = vmatmul.mubr.msk.f32.vlgmr.msra.gmra.mrb[140].mxu0 %vm12369_vm4, %v4964_v4 }
0x1610   :  { %5041 = vmatprep.mubr.f32.mxu0 %v10778_v20  ;;  %8290 = vmatpush1.bf16.msra.mxu0 %v10707_v13 }
0x1611   :  { %8292 = vmatprep.subr.bf16.mxu0 %v10710_v16 }
0x1614   :  { %8294 = vmatpush1.bf16.msra.mxu0 %v10723_v17 }
0x1615   :  { %8296 = vmatprep.subr.bf16.mxu0 %v10673_v12 }
0x1658   :  { %v4966_v2 = vpop.permute.xlu0 %4965 }
0x1659   :  { %7547 = vmatmul.mubr.msk.f32.gmra.mrb[142].mxu0 %vm12369_vm4, %v4966_v2 }
0x165a   :  { %5206 = vmatprep.mubr.f32.mxu0 %v10778_v20 }
0x16e2   :  { %v5037_v51 = vpop.f32.mrb[140].mxu0 }
0x16e3   :  { %v5052_v46 = vadd.f32 %v5037_v51, %v4010_v29  ;;  %v5039_v50 = vpop.f32.mrb[141].mxu0  ;;  %v5102_v29 = vld [vmem:[%s12323_s2 + $0x50] sm:$0xff] }
0x16e4   :  { %vm5104_vm0 = vcmp.gt.f32.partialorder %v5102_v29, 0.5 }
0x16e5   :  { %8540 = vtanh.f32 %v5052_v46  ;;  %v7548_v20 = vmul.f32 -1.442695, %v5052_v46  ;;  %v5106_v43 = vsel %vm5104_vm0, 1, %v12387_v53 }
0x16ef   :  { %v8541_v3 = vpop.eup %8540 }
0x16f0   :  { %5072 = vrot.lane.b32.xlu1 %v8541_v3, %s8788_s8 }
0x172c   :  { %v5043_v23 = vpop.f32.mrb[142].mxu0 }
0x172d   :  { %v5045_v0 = vpop.f32.mrb[143].mxu0 }
0x172e   :  { %v5053_v4 = vadd.f32 %v5045_v0, %v4042_v18 }
0x1730   :  { %8542 = vtanh.f32 %v5053_v4  ;;  %v7549_v18 = vmul.f32 -1.442695, %v5053_v4  ;;  %v11238_v4 = vsel %vm12362_vm12, %v11169_v26, %v11166_v38 }
0x1731   :  { %8544 = vpow2.f32 %v7548_v20 }
0x173a   :  { %v8543_v2 = vpop.eup %8542 }
0x173b   :  { %5074 = vrot.lane.b32.xlu0 %v8543_v2, %s8788_s8  ;;  %v8545_v47 = vpop.eup %8544 }
0x173c   :  { %v5060_v21 = vadd.f32 1.0, %v8545_v47 }
0x173e   :  { %8546 = vrcp.f32 %v5060_v21  ;;  %v5103_v21 = vld [vmem:[%s12323_s2 + $0x58] sm:$0xff] }
0x173f   :  { %8548 = vpow2.f32 %v7549_v18  ;;  %vm5105_vm1 = vcmp.gt.f32.partialorder %v5103_v21, 0.5  ;;  %v11249_v18 = vsel %vm4944_vm13, %v11180_v34, %v11177_v27 }
0x1740   :  { %v5107_v47 = vsel %vm5105_vm1, 1, %v12387_v53 }
0x1748   :  { %v8547_v51 = vpop.eup %8546 }
0x1749   :  { %v8549_v46 = vpop.eup %8548  ;;  %v5068_v29 = vmul.f32 %v8547_v51, %v11238_v4 }
0x174a   :  { %v5061_v23 = vadd.f32 1.0, %v8549_v46 }
0x174c   :  { %8550 = vrcp.f32 %v5061_v23 }
0x1756   :  { %v8551_v0 = vpop.eup %8550 }
0x1757   :  { %v5069_v46 = vmul.f32 %v8551_v0, %v11249_v18 }
0x1762   :  { %v5073_v50 = vpop.permute.xlu1 %5072 }
0x1763   :  { %v5078_v3 = vmul.f32 %v8547_v51, %v5073_v50 }
0x1765   :  { %5082 = vrot.lane.b32.xlu1 %v5078_v3, %s8789_s5 }
0x1769   :  { %5109 = vperm.xlu1 %8459, %v5106_v43  }
0x17ad   :  { %v5075_v2 = vpop.permute.xlu0 %5074 }
0x17ae   :  { %v5079_v20 = vmul.f32 %v8551_v0, %v5075_v2 }
0x17b0   :  { %5084 = vrot.lane.b32.xlu0 %v5079_v20, %s8789_s5 }
0x17b4   :  { %5112 = vperm.xlu0 %8458, %v5107_v47  }
0x17d7   :  { %v5083_v50 = vpop.permute.xlu1 %5082 }
0x17d8   :  { %v11241_v3 = vadd.f32 %v5083_v50, %v5068_v29  ;;  %v11283_v50 = vld [vmem:[#allocation3] sm:$0xff] }
0x17da   :  { %8552 = vtanh.f32 %v11241_v3 }
0x17e4   :  { %v8553_v43 = vpop.eup %8552 }
0x17e5   :  { %5094 = vrot.lane.b32.xlu1 %v8553_v43, %s8788_s8 }
0x17e8   :  { %v11256_v21 = vpop.permute.xlu1 %5109 }
0x17e9   :  { %vm5114_vm5 = vcmp.eq.s32.totalorder %v11256_v21, 1 }
0x1822   :  { %v5085_v38 = vpop.permute.xlu0 %5084 }
0x1823   :  { %v11252_v26 = vadd.f32 %v5085_v38, %v5069_v46 }
0x1825   :  { %8554 = vtanh.f32 %v11252_v26 }
0x182f   :  { %v8555_v23 = vpop.eup %8554 }
0x1830   :  { %5096 = vrot.lane.b32.xlu0 %v8555_v23, %s8788_s8 }
0x1833   :  { %v11269_v34 = vpop.permute.xlu0 %5112 }
0x1834   :  { %12390 = vst [vmem:[#allocation18_spill] sm:$0xff] %v11269_v34  ;;  %vm12351_vm6 = vcmp.eq.s32.totalorder %v11269_v34, 1 }
0x1857   :  { %v5095_v2 = vpop.permute.xlu1 %5094 }
0x1858   :  { %v11258_v20 = vmul.f32 %v8547_v51, %v5095_v2  ;;  %v4036_v2 = vadd.f32 %v10859_v40, %v10881_v56 }
0x185a   :  { %v11265_v27 = vsel %vm5114_vm5, %v11258_v20, %v11193_v11  ;;  %v5120_v10 = vsel %vm5114_vm5, %v11258_v20, 0.0 }
0x185b   :  { %5134 = vrot.lane.b32.xlu1 %v11265_v27, %s8789_s5 }
0x18a2   :  { %v5097_v47 = vpop.permute.xlu0 %5096 }
0x18a3   :  { %v11271_v29 = vmul.f32 %v8551_v0, %v5097_v47  ;;  %v4016_v0 = vadd.f32 %v10845_v30, %v10827_v44 }
0x18a5   :  { %12391 = vst [vmem:[#allocation19_spill] sm:$0xff] %v11271_v29  ;;  %v11278_v51 = vsel %vm12351_vm6, %v11271_v29, %v11206_v54 }
0x18a6   :  { %5136 = vrot.lane.b32.xlu0 %v11278_v51, %s8789_s5 }
0x18cd   :  { %v5135_v11 = vpop.permute.xlu1 %5134 }
0x18ce   :  { %7550 = vmatmul.mubr.msk.f32.vlgmr.msra.gmra.mrb[144].mxu0 %vm12369_vm4, %v5135_v11 }
0x18cf   :  { %5212 = vmatprep.mubr.f32.mxu0 %v11283_v50  ;;  %8298 = vmatpush1.bf16.msra.mxu0 %v10707_v13 }
0x18d0   :  { %8300 = vmatprep.subr.bf16.mxu0 %v10710_v16 }
0x18d3   :  { %8302 = vmatpush1.bf16.msra.mxu0 %v10723_v17 }
0x18d4   :  { %8312 = vmatprep.subr.bf16.mxu0 %v10673_v12 }
0x1918   :  { %v5137_v54 = vpop.permute.xlu0 %5136 }
0x1919   :  { %7551 = vmatmul.mubr.msk.f32.gmra.mrb[146].mxu0 %vm12369_vm4, %v5137_v54 }
0x191a   :  { %5377 = vmatprep.mubr.f32.mxu0 %v11283_v50 }
0x19a1   :  { %v5208_v43 = vpop.f32.mrb[144].mxu0 }
0x19a2   :  { %v5223_v46 = vadd.f32 %v5208_v43, %v4016_v0  ;;  %v5210_v38 = vpop.f32.mrb[145].mxu0  ;;  %v5273_v0 = vld [vmem:[%s12323_s2 + $0x60] sm:$0xff] }
0x19a3   :  { %vm5275_vm10 = vcmp.gt.f32.partialorder %v5273_v0, 0.5 }
0x19a4   :  { %8556 = vtanh.f32 %v5223_v46  ;;  %v7552_v9 = vmul.f32 -1.442695, %v5223_v46  ;;  %v5277_v40 = vsel %vm5275_vm10, 1, %v12387_v53 }
0x19ae   :  { %v8557_v23 = vpop.eup %8556 }
0x19af   :  { %5243 = vrot.lane.b32.xlu1 %v8557_v23, %s8788_s8 }
0x19ec   :  { %v5214_v47 = vpop.f32.mrb[146].mxu0 }
0x19ed   :  { %v5216_v11 = vpop.f32.mrb[147].mxu0 }
0x19ee   :  { %v5224_v63 = vadd.f32 %v5216_v11, %v4036_v2 }
0x19f0   :  { %8558 = vtanh.f32 %v5224_v63  ;;  %v7553_v2 = vmul.f32 -1.442695, %v5224_v63  ;;  %v11312_v63 = vsel %vm5114_vm5, %v11241_v3, %v11238_v4  ;;  %vm12405_vm5 = vcmp.eq.s32.totalorder %v11184_v19, 1  ;;  %v6855_v19 = vld [vmem:[%s12324_s16 + $0x8] sm:$0xff] }
0x19f1   :  { %8560 = vpow2.f32 %v7552_v9 }
0x19fa   :  { %v8559_v54 = vpop.eup %8558 }
0x19fb   :  { %5245 = vrot.lane.b32.xlu0 %v8559_v54, %s8788_s8  ;;  %v8561_v30 = vpop.eup %8560 }
0x19fc   :  { %v5231_v1 = vadd.f32 1.0, %v8561_v30 }
0x19fe   :  { %8562 = vrcp.f32 %v5231_v1  ;;  %v5274_v1 = vld [vmem:[%s12323_s2 + $0x68] sm:$0xff] }
0x19ff   :  { %8564 = vpow2.f32 %v7553_v2  ;;  %vm5276_vm11 = vcmp.gt.f32.partialorder %v5274_v1, 0.5  ;;  %v11323_v2 = vsel %vm12351_vm6, %v11252_v26, %v11249_v18 }
0x1a00   :  { %v5278_v30 = vsel %vm5276_vm11, 1, %v12387_v53 }
0x1a08   :  { %v8563_v43 = vpop.eup %8562 }
0x1a09   :  { %v8565_v46 = vpop.eup %8564  ;;  %v5239_v0 = vmul.f32 %v8563_v43, %v11312_v63 }
0x1a0a   :  { %v5232_v9 = vadd.f32 1.0, %v8565_v46 }
0x1a0c   :  { %8566 = vrcp.f32 %v5232_v9 }
0x1a16   :  { %v8567_v47 = vpop.eup %8566 }
0x1a17   :  { %v5240_v46 = vmul.f32 %v8567_v47, %v11323_v2 }
0x1a21   :  { %v5244_v38 = vpop.permute.xlu1 %5243 }
0x1a22   :  { %v5249_v23 = vmul.f32 %v8563_v43, %v5244_v38 }
0x1a24   :  { %5253 = vrot.lane.b32.xlu1 %v5249_v23, %s8789_s5 }
0x1a28   :  { %5280 = vperm.xlu1 %8459, %v5277_v40  }
0x1a6d   :  { %v5246_v11 = vpop.permute.xlu0 %5245 }
0x1a6e   :  { %v5250_v54 = vmul.f32 %v8567_v47, %v5246_v11 }
0x1a70   :  { %5255 = vrot.lane.b32.xlu0 %v5250_v54, %s8789_s5 }
0x1a74   :  { %5283 = vperm.xlu0 %8458, %v5278_v30  }
0x1a96   :  { %v5254_v38 = vpop.permute.xlu1 %5253 }
0x1a97   :  { %v11315_v23 = vadd.f32 %v5254_v38, %v5239_v0 }
0x1a99   :  { %8568 = vtanh.f32 %v11315_v23 }
0x1aa3   :  { %v8569_v40 = vpop.eup %8568 }
0x1aa4   :  { %5265 = vrot.lane.b32.xlu1 %v8569_v40, %s8788_s8 }
0x1aa7   :  { %v11330_v1 = vpop.permute.xlu1 %5280 }
0x1aa8   :  { %vm12356_vm0 = vcmp.eq.s32.totalorder %v11330_v1, 1 }
0x1ae2   :  { %v5256_v4 = vpop.permute.xlu0 %5255 }
0x1ae3   :  { %v11326_v3 = vadd.f32 %v5256_v4, %v5240_v46 }
0x1ae5   :  { %8570 = vtanh.f32 %v11326_v3 }
0x1aef   :  { %v8571_v9 = vpop.eup %8570 }
0x1af0   :  { %5267 = vrot.lane.b32.xlu0 %v8571_v9, %s8788_s8  ;;  %v4030_v9 = vadd.f32 %v10855_v36, %v10881_v56 }
0x1af3   :  { %v11343_v26 = vpop.permute.xlu0 %5283 }
0x1af4   :  { %vm5286_vm1 = vcmp.eq.s32.totalorder %v11343_v26, 1 }
0x1b16   :  { %v5266_v11 = vpop.permute.xlu1 %5265 }
0x1b17   :  { %v11332_v54 = vmul.f32 %v8563_v43, %v5266_v11 }
0x1b19   :  { %v11339_v18 = vsel %vm12356_vm0, %v11332_v54, %v11265_v27 }
0x1b1a   :  { %5305 = vrot.lane.b32.xlu1 %v11339_v18, %s8789_s5 }
0x1b62   :  { %v5268_v30 = vpop.permute.xlu0 %5267 }
0x1b63   :  { %v11345_v0 = vmul.f32 %v8567_v47, %v5268_v30 }
0x1b65   :  { %v11352_v43 = vsel %vm5286_vm1, %v11345_v0, %v11278_v51  ;;  %v4022_v51 = vadd.f32 %v10849_v31, %v10827_v44  ;;  %v5292_v21 = vsel %vm5286_vm1, %v11345_v0, 0.0 }
0x1b66   :  { %5307 = vrot.lane.b32.xlu0 %v11352_v43, %s8789_s5 }
0x1b8c   :  { %v5306_v27 = vpop.permute.xlu1 %5305 }
0x1b8d   :  { %7554 = vmatmul.mubr.msk.f32.vlgmr.msra.gmra.mrb[148].mxu0 %vm12369_vm4, %v5306_v27 }
0x1b8e   :  { %5383 = vmatprep.mubr.f32.mxu0 %v11283_v50  ;;  %8314 = vmatpush1.bf16.msra.mxu0 %v10707_v13 }
0x1b8f   :  { %8316 = vmatprep.subr.bf16.mxu0 %v10710_v16 }
0x1b92   :  { %8318 = vmatpush1.bf16.msra.mxu0 %v10723_v17 }
0x1b93   :  { %8328 = vmatprep.subr.bf16.mxu0 %v10673_v12 }
0x1bd8   :  { %v5308_v47 = vpop.permute.xlu0 %5307 }
0x1bd9   :  { %7555 = vmatmul.mubr.msk.f32.gmra.mrb[150].mxu0 %vm12369_vm4, %v5308_v47 }
0x1bda   :  { %5719 = vmatprep.mubr.f32.mxu0 %v11283_v50 }
0x1c60   :  { %v5379_v38 = vpop.f32.mrb[148].mxu0 }
0x1c61   :  { %v5394_v40 = vadd.f32 %v5379_v38, %v4022_v51  ;;  %v5381_v46 = vpop.f32.mrb[149].mxu0  ;;  %v5444_v51 = vld [vmem:[%s12323_s2 + $0x70] sm:$0xff] }
0x1c62   :  { %vm5446_vm10 = vcmp.gt.f32.partialorder %v5444_v51, 0.5 }
0x1c63   :  { %8572 = vtanh.f32 %v5394_v40  ;;  %v7556_v24 = vmul.f32 -1.442695, %v5394_v40  ;;  %v5448_v36 = vsel %vm5446_vm10, 1, %v12387_v53 }
0x1c6d   :  { %v8573_v4 = vpop.eup %8572 }
0x1c6e   :  { %5414 = vrot.lane.b32.xlu1 %v8573_v4, %s8788_s8 }
0x1cac   :  { %v5385_v11 = vpop.f32.mrb[150].mxu0 }
0x1cad   :  { %v5387_v30 = vpop.f32.mrb[151].mxu0 }
0x1cae   :  { %v5395_v27 = vadd.f32 %v5387_v30, %v4030_v9 }
0x1cb0   :  { %8574 = vtanh.f32 %v5395_v27  ;;  %v7557_v9 = vmul.f32 -1.442695, %v5395_v27  ;;  %v11384_v27 = vsel %vm12356_vm0, %v11315_v23, %v11312_v63 }
0x1cb1   :  { %8576 = vpow2.f32 %v7556_v24 }
0x1cba   :  { %v8575_v47 = vpop.eup %8574 }
0x1cbb   :  { %5416 = vrot.lane.b32.xlu0 %v8575_v47, %s8788_s8  ;;  %v8577_v31 = vpop.eup %8576 }
0x1cbc   :  { %v5402_v34 = vadd.f32 1.0, %v8577_v31 }
0x1cbe   :  { %8578 = vrcp.f32 %v5402_v34  ;;  %v5445_v34 = vld [vmem:[%s12323_s2 + $0x78] sm:$0xff] }
0x1cbf   :  { %8580 = vpow2.f32 %v7557_v9  ;;  %vm5447_vm11 = vcmp.gt.f32.partialorder %v5445_v34, 0.5  ;;  %v11395_v9 = vsel %vm5286_vm1, %v11326_v3, %v11323_v2  ;;  %vm12406_vm1 = vcmask 523520  }
0x1cc0   :  { %v5449_v31 = vsel %vm5447_vm11, 1, %v12387_v53 }
0x1cc8   :  { %v8579_v38 = vpop.eup %8578 }
0x1cc9   :  { %v8581_v40 = vpop.eup %8580  ;;  %v5410_v51 = vmul.f32 %v8579_v38, %v11384_v27 }
0x1cca   :  { %v5403_v24 = vadd.f32 1.0, %v8581_v40 }
0x1ccc   :  { %8582 = vrcp.f32 %v5403_v24 }
0x1cd6   :  { %v8583_v11 = vpop.eup %8582 }
0x1cd7   :  { %v5411_v40 = vmul.f32 %v8583_v11, %v11395_v9 }
0x1ce0   :  { %v5415_v46 = vpop.permute.xlu1 %5414 }
0x1ce1   :  { %v5420_v4 = vmul.f32 %v8579_v38, %v5415_v46 }
0x1ce3   :  { %5424 = vrot.lane.b32.xlu1 %v5420_v4, %s8789_s5 }
0x1ce7   :  { %5451 = vperm.xlu1 %8459, %v5448_v36  }
0x1d2d   :  { %v5417_v30 = vpop.permute.xlu0 %5416 }
0x1d2e   :  { %v5421_v47 = vmul.f32 %v8583_v11, %v5417_v30 }
0x1d30   :  { %5426 = vrot.lane.b32.xlu0 %v5421_v47, %s8789_s5 }
0x1d34   :  { %5454 = vperm.xlu0 %8458, %v5449_v31  }
0x1d55   :  { %v5425_v46 = vpop.permute.xlu1 %5424 }
0x1d56   :  { %v11387_v4 = vadd.f32 %v5425_v46, %v5410_v51 }
0x1d58   :  { %8584 = vtanh.f32 %v11387_v4 }
0x1d62   :  { %v8585_v36 = vpop.eup %8584 }
0x1d63   :  { %5436 = vrot.lane.b32.xlu1 %v8585_v36, %s8788_s8 }
0x1d66   :  { %v11402_v34 = vpop.permute.xlu1 %5451 }
0x1d67   :  { %vm5456_vm10 = vcmp.eq.s32.totalorder %v11402_v34, 1  ;;  %v4950_v34 = vsel %vm4944_vm13, %v11199_v48, 0.0  ;;  %vm12404_vm13 = vcmask 261120  }
0x1da2   :  { %v5427_v63 = vpop.permute.xlu0 %5426 }
0x1da3   :  { %v11398_v23 = vadd.f32 %v5427_v63, %v5411_v40 }
0x1da5   :  { %8586 = vtanh.f32 %v11398_v23 }
0x1daf   :  { %v8587_v24 = vpop.eup %8586 }
0x1db0   :  { %5438 = vrot.lane.b32.xlu0 %v8587_v24, %s8788_s8  ;;  %v4024_v24 = vadd.f32 %v10851_v32, %v10881_v56 }
0x1db3   :  { %v11415_v3 = vpop.permute.xlu0 %5454 }
0x1db4   :  { %12392 = vst [vmem:[#allocation20_spill] sm:$0xff] %v11415_v3  ;;  %vm12352_vm11 = vcmp.eq.s32.totalorder %v11415_v3, 1 }
0x1dd5   :  { %v5437_v30 = vpop.permute.xlu1 %5436 }
0x1dd6   :  { %v11404_v47 = vmul.f32 %v8579_v38, %v5437_v30 }
0x1dd8   :  { %v11411_v2 = vsel %vm5456_vm10, %v11404_v47, %v11339_v18  ;;  %v5462_v57 = vsel %vm5456_vm10, %v11404_v47, 0.0 }
0x1dd9   :  { %5476 = vrot.lane.b32.xlu1 %v11411_v2, %s8789_s5 }
0x1e22   :  { %v5439_v31 = vpop.permute.xlu0 %5438 }
0x1e23   :  { %v11417_v51 = vmul.f32 %v8583_v11, %v5439_v31 }
0x1e25   :  { %12393 = vst [vmem:[#allocation21_spill] sm:$0xff] %v11417_v51  ;;  %v11424_v38 = vsel %vm12352_vm11, %v11417_v51, %v11352_v43  ;;  %v4028_v43 = vadd.f32 %v10853_v35, %v10827_v44 }
0x1e26   :  { %5478 = vrot.lane.b32.xlu0 %v11424_v38, %s8789_s5 }
0x1e4b   :  { %v5477_v18 = vpop.permute.xlu1 %5476 }
0x1e4c   :  { %7558 = vmatmul.mubr.msk.f32.vlgmr.msra.gmra.mrb[72].mxu1 %vm12369_vm4, %v5477_v18 }
0x1e4d   :  { %5554 = vmatprep.mubr.f32.mxu1 %v11283_v50  ;;  %8322 = vmatpush1.bf16.msra.mxu1 %v10707_v13 }
0x1e4e   :  { %8324 = vmatprep.subr.bf16.mxu1 %v10710_v16 }
0x1e51   :  { %8326 = vmatpush1.bf16.msra.mxu1 %v10723_v17 }
0x1e52   :  { %8336 = vmatprep.subr.bf16.mxu1 %v10673_v12 }
0x1e98   :  { %v5479_v11 = vpop.permute.xlu0 %5478 }
0x1e99   :  { %7559 = vmatmul.mubr.msk.f32.gmra.mrb[74].mxu1 %vm12369_vm4, %v5479_v11 }
0x1e9a   :  { %5890 = vmatprep.mubr.f32.mxu1 %v11283_v50 }
0x1f1f   :  { %v5550_v46 = vpop.f32.mrb[72].mxu1 }
0x1f20   :  { %v5565_v36 = vadd.f32 %v5550_v46, %v4028_v43  ;;  %v5552_v40 = vpop.f32.mrb[73].mxu1  ;;  %v5615_v43 = vld [vmem:[%s12323_s2 + $0x80] sm:$0xff] }
0x1f21   :  { %vm5617_vm15 = vcmp.gt.f32.partialorder %v5615_v43, 0.5 }
0x1f22   :  { %8588 = vtanh.f32 %v5565_v36  ;;  %v7560_v29 = vmul.f32 -1.442695, %v5565_v36  ;;  %v5619_v32 = vsel %vm5617_vm15, 1, %v12387_v53 }
0x1f2c   :  { %v8589_v63 = vpop.eup %8588 }
0x1f2d   :  { %5585 = vrot.lane.b32.xlu1 %v8589_v63, %s8788_s8 }
0x1f6c   :  { %v5556_v30 = vpop.f32.mrb[74].mxu1 }
0x1f6d   :  { %v5558_v31 = vpop.f32.mrb[75].mxu1 }
0x1f6e   :  { %v5566_v18 = vadd.f32 %v5558_v31, %v4024_v24 }
0x1f70   :  { %8590 = vtanh.f32 %v5566_v18  ;;  %v7561_v24 = vmul.f32 -1.442695, %v5566_v18  ;;  %v11456_v18 = vsel %vm5456_vm10, %v11387_v4, %v11384_v27 }
0x1f71   :  { %8592 = vpow2.f32 %v7560_v29 }
0x1f7a   :  { %v8591_v11 = vpop.eup %8590 }
0x1f7b   :  { %5587 = vrot.lane.b32.xlu0 %v8591_v11, %s8788_s8  ;;  %v8593_v35 = vpop.eup %8592 }
0x1f7c   :  { %v5573_v51 = vadd.f32 1.0, %v8593_v35 }
0x1f7e   :  { %8594 = vrcp.f32 %v5573_v51  ;;  %v5616_v51 = vld [vmem:[%s12323_s2 + $0x88] sm:$0xff] }
0x1f7f   :  { %8596 = vpow2.f32 %v7561_v24  ;;  %vm5618_vm9 = vcmp.gt.f32.partialorder %v5616_v51, 0.5  ;;  %v11467_v24 = vsel %vm12352_vm11, %v11398_v23, %v11395_v9 }
0x1f80   :  { %v5620_v35 = vsel %vm5618_vm9, 1, %v12387_v53 }
0x1f88   :  { %v8595_v46 = vpop.eup %8594 }
0x1f89   :  { %v8597_v36 = vpop.eup %8596  ;;  %v5581_v43 = vmul.f32 %v8595_v46, %v11456_v18 }
0x1f8a   :  { %v5574_v29 = vadd.f32 1.0, %v8597_v36 }
0x1f8c   :  { %8598 = vrcp.f32 %v5574_v29 }
0x1f96   :  { %v8599_v30 = vpop.eup %8598 }
0x1f97   :  { %v5582_v36 = vmul.f32 %v8599_v30, %v11467_v24 }
0x1f9f   :  { %v5586_v40 = vpop.permute.xlu1 %5585 }
0x1fa0   :  { %v5591_v63 = vmul.f32 %v8595_v46, %v5586_v40 }
0x1fa2   :  { %5595 = vrot.lane.b32.xlu1 %v5591_v63, %s8789_s5 }
0x1fa6   :  { %5622 = vperm.xlu1 %8459, %v5619_v32  }
0x1fed   :  { %v5588_v31 = vpop.permute.xlu0 %5587 }
0x1fee   :  { %v5592_v11 = vmul.f32 %v8599_v30, %v5588_v31 }
0x1ff0   :  { %5597 = vrot.lane.b32.xlu0 %v5592_v11, %s8789_s5 }
0x1ff4   :  { %5625 = vperm.xlu0 %8458, %v5620_v35  }
0x2014   :  { %v5596_v40 = vpop.permute.xlu1 %5595 }
0x2015   :  { %v11459_v63 = vadd.f32 %v5596_v40, %v5581_v43 }
0x2017   :  { %8600 = vtanh.f32 %v11459_v63 }
0x2021   :  { %v8601_v32 = vpop.eup %8600 }
0x2022   :  { %5607 = vrot.lane.b32.xlu1 %v8601_v32, %s8788_s8 }
0x2025   :  { %v11474_v51 = vpop.permute.xlu1 %5622 }
0x2026   :  { %12394 = vst [vmem:[#allocation22_spill] sm:$0xff] %v11474_v51  ;;  %vm12355_vm15 = vcmp.eq.s32.totalorder %v11474_v51, 1 }
0x2062   :  { %v5598_v27 = vpop.permute.xlu0 %5597 }
0x2063   :  { %v11470_v4 = vadd.f32 %v5598_v27, %v5582_v36 }
0x2065   :  { %8602 = vtanh.f32 %v11470_v4 }
0x206f   :  { %v8603_v29 = vpop.eup %8602 }
0x2070   :  { %5609 = vrot.lane.b32.xlu0 %v8603_v29, %s8788_s8  ;;  %v4018_v29 = vadd.f32 %v10847_v39, %v10881_v56 }
0x2073   :  { %v11487_v23 = vpop.permute.xlu0 %5625 }
0x2074   :  { %vm5628_vm9 = vcmp.eq.s32.totalorder %v11487_v23, 1 }
0x2094   :  { %v5608_v31 = vpop.permute.xlu1 %5607 }
0x2095   :  { %v11476_v11 = vmul.f32 %v8595_v46, %v5608_v31 }
0x2097   :  { %12395 = vst [vmem:[#allocation23_spill] sm:$0xff] %v11476_v11  ;;  %v11483_v9 = vsel %vm12355_vm15, %v11476_v11, %v11411_v2 }
0x2098   :  { %5647 = vrot.lane.b32.xlu1 %v11483_v9, %s8789_s5 }
0x20e2   :  { %v5610_v35 = vpop.permute.xlu0 %5609 }
0x20e3   :  { %v11489_v43 = vmul.f32 %v8599_v30, %v5610_v35 }
0x20e5   :  { %v11496_v46 = vsel %vm5628_vm9, %v11489_v43, %v11424_v38  ;;  %v4034_v38 = vadd.f32 %v10857_v37, %v10827_v44 }
0x20e6   :  { %5649 = vrot.lane.b32.xlu0 %v11496_v46, %s8789_s5 }
0x210a   :  { %v5648_v2 = vpop.permute.xlu1 %5647 }
0x210b   :  { %7562 = vmatmul.mubr.msk.f32.vlgmr.msra.gmra.mrb[152].mxu0 %vm12369_vm4, %v5648_v2 }
0x210c   :  { %5725 = vmatprep.mubr.f32.mxu0 %v11283_v50  ;;  %8330 = vmatpush1.bf16.msra.mxu0 %v10707_v13 }
0x210d   :  { %8332 = vmatprep.subr.bf16.mxu0 %v10710_v16 }
0x2110   :  { %8334 = vmatpush1.bf16.msra.mxu0 %v10723_v17 }
0x2111   :  { %8344 = vmatprep.subr.bf16.mxu0 %v10673_v12 }
0x2158   :  { %v5650_v30 = vpop.permute.xlu0 %5649 }
0x2159   :  { %7563 = vmatmul.mubr.msk.f32.gmra.mrb[154].mxu0 %vm12369_vm4, %v5650_v30 }
0x215a   :  { %6061 = vmatprep.mubr.f32.mxu0 %v11283_v50 }
0x21de   :  { %v5721_v40 = vpop.f32.mrb[152].mxu0 }
0x21df   :  { %v5736_v32 = vadd.f32 %v5721_v40, %v4034_v38  ;;  %v5723_v36 = vpop.f32.mrb[153].mxu0  ;;  %v5786_v38 = vld [vmem:[%s12323_s2 + $0x90] sm:$0xff] }
0x21e0   :  { %vm5788_vm6 = vcmp.gt.f32.partialorder %v5786_v38, 0.5 }
0x21e1   :  { %8604 = vtanh.f32 %v5736_v32  ;;  %v7564_v11 = vmul.f32 -1.442695, %v5736_v32  ;;  %v5790_v39 = vsel %vm5788_vm6, 1, %v12387_v53 }
0x21eb   :  { %v8605_v27 = vpop.eup %8604 }
0x21ec   :  { %5756 = vrot.lane.b32.xlu1 %v8605_v27, %s8788_s8 }
0x222c   :  { %v5727_v31 = vpop.f32.mrb[154].mxu0 }
0x222d   :  { %v5729_v35 = vpop.f32.mrb[155].mxu0 }
0x222e   :  { %v5737_v2 = vadd.f32 %v5729_v35, %v4018_v29 }
0x2230   :  { %8606 = vtanh.f32 %v5737_v2  ;;  %v7565_v29 = vmul.f32 -1.442695, %v5737_v2  ;;  %v11528_v2 = vsel %vm12355_vm15, %v11459_v63, %v11456_v18 }
0x2231   :  { %8608 = vpow2.f32 %v7564_v11 }
0x223a   :  { %v8607_v30 = vpop.eup %8606 }
0x223b   :  { %5758 = vrot.lane.b32.xlu0 %v8607_v30, %s8788_s8  ;;  %v8609_v37 = vpop.eup %8608 }
0x223c   :  { %v5744_v3 = vadd.f32 1.0, %v8609_v37 }
0x223e   :  { %8610 = vrcp.f32 %v5744_v3  ;;  %v5787_v3 = vld [vmem:[%s12323_s2 + $0x98] sm:$0xff] }
0x223f   :  { %8612 = vpow2.f32 %v7565_v29  ;;  %vm5789_vm11 = vcmp.gt.f32.partialorder %v5787_v3, 0.5  ;;  %v11539_v29 = vsel %vm5628_vm9, %v11470_v4, %v11467_v24 }
0x2240   :  { %v5791_v37 = vsel %vm5789_vm11, 1, %v12387_v53 }
0x2248   :  { %v8611_v40 = vpop.eup %8610 }
0x2249   :  { %v8613_v32 = vpop.eup %8612  ;;  %v5752_v38 = vmul.f32 %v8611_v40, %v11528_v2 }
0x224a   :  { %v5745_v11 = vadd.f32 1.0, %v8613_v32 }
0x224c   :  { %8614 = vrcp.f32 %v5745_v11 }
0x2256   :  { %v8615_v31 = vpop.eup %8614 }
0x2257   :  { %v5753_v32 = vmul.f32 %v8615_v31, %v11539_v29 }
0x225e   :  { %v5757_v36 = vpop.permute.xlu1 %5756 }
0x225f   :  { %v5762_v27 = vmul.f32 %v8611_v40, %v5757_v36 }
0x2261   :  { %5766 = vrot.lane.b32.xlu1 %v5762_v27, %s8789_s5 }
0x2265   :  { %5793 = vperm.xlu1 %8459, %v5790_v39  }
0x22ad   :  { %v5759_v35 = vpop.permute.xlu0 %5758 }
0x22ae   :  { %v5763_v30 = vmul.f32 %v8615_v31, %v5759_v35 }
0x22b0   :  { %5768 = vrot.lane.b32.xlu0 %v5763_v30, %s8789_s5 }
0x22b4   :  { %5796 = vperm.xlu0 %8458, %v5791_v37  }
0x22d3   :  { %v5767_v36 = vpop.permute.xlu1 %5766 }
0x22d4   :  { %v11531_v27 = vadd.f32 %v5767_v36, %v5752_v38 }
0x22d6   :  { %8616 = vtanh.f32 %v11531_v27 }
0x22e0   :  { %v8617_v39 = vpop.eup %8616 }
0x22e1   :  { %5778 = vrot.lane.b32.xlu1 %v8617_v39, %s8788_s8 }
0x22e4   :  { %v11546_v3 = vpop.permute.xlu1 %5793 }
0x22e5   :  { %vm5798_vm6 = vcmp.eq.s32.totalorder %v11546_v3, 1 }
0x2322   :  { %v5769_v18 = vpop.permute.xlu0 %5768 }
0x2323   :  { %v11542_v63 = vadd.f32 %v5769_v18, %v5753_v32 }
0x2325   :  { %8618 = vtanh.f32 %v11542_v63 }
0x232f   :  { %v8619_v11 = vpop.eup %8618 }
0x2330   :  { %5780 = vrot.lane.b32.xlu0 %v8619_v11, %s8788_s8  ;;  %v4012_v11 = vadd.f32 %v10842_v28, %v10881_v56 }
0x2333   :  { %v11559_v4 = vpop.permute.xlu0 %5796 }
0x2334   :  { %vm12358_vm11 = vcmp.eq.s32.totalorder %v11559_v4, 1 }
0x2353   :  { %v5779_v35 = vpop.permute.xlu1 %5778 }
0x2354   :  { %v11548_v30 = vmul.f32 %v8611_v40, %v5779_v35 }
0x2356   :  { %v11555_v24 = vsel %vm5798_vm6, %v11548_v30, %v11483_v9  ;;  %v5804_v20 = vsel %vm5798_vm6, %v11548_v30, 0.0 }
0x2357   :  { %5818 = vrot.lane.b32.xlu1 %v11555_v24, %s8789_s5 }
0x23a2   :  { %v5781_v37 = vpop.permute.xlu0 %5780 }
0x23a3   :  { %v11561_v38 = vmul.f32 %v8615_v31, %v5781_v37 }
0x23a5   :  { %12396 = vst [vmem:[#allocation24_spill] sm:$0xff] %v11561_v38  ;;  %v11568_v40 = vsel %vm12358_vm11, %v11561_v38, %v11496_v46  ;;  %v4040_v46 = vadd.f32 %v10861_v41, %v10827_v44 }
0x23a6   :  { %5820 = vrot.lane.b32.xlu0 %v11568_v40, %s8789_s5 }
0x23c9   :  { %v5819_v9 = vpop.permute.xlu1 %5818 }
0x23ca   :  { %7566 = vmatmul.mubr.msk.f32.vlgmr.msra.gmra.mrb[76].mxu1 %vm12369_vm4, %v5819_v9 }
0x23cb   :  { %5896 = vmatprep.mubr.f32.mxu1 %v11283_v50  ;;  %8338 = vmatpush1.bf16.msra.mxu1 %v10707_v13 }
0x23cc   :  { %8340 = vmatprep.subr.bf16.mxu1 %v10710_v16 }
0x23cf   :  { %8342 = vmatpush1.bf16.msra.mxu1 %v10723_v17 }
0x23d0   :  { %8352 = vmatprep.subr.bf16.mxu1 %v10673_v12 }
0x2418   :  { %v5821_v31 = vpop.permute.xlu0 %5820 }
0x2419   :  { %7567 = vmatmul.mubr.msk.f32.gmra.mrb[78].mxu1 %vm12369_vm4, %v5821_v31 }
0x241a   :  { %6232 = vmatprep.mubr.f32.mxu1 %v11283_v50 }
0x249d   :  { %v5892_v36 = vpop.f32.mrb[76].mxu1 }
0x249e   :  { %v5907_v39 = vadd.f32 %v5892_v36, %v4040_v46  ;;  %v5894_v32 = vpop.f32.mrb[77].mxu1  ;;  %v5957_v46 = vld [vmem:[%s12323_s2 + $0xa0] sm:$0xff] }
0x249f   :  { %vm5959_vm15 = vcmp.gt.f32.partialorder %v5957_v46, 0.5 }
0x24a0   :  { %8620 = vtanh.f32 %v5907_v39  ;;  %v7568_v51 = vmul.f32 -1.442695, %v5907_v39  ;;  %v5961_v28 = vsel %vm5959_vm15, 1, %v12387_v53 }
0x24aa   :  { %v8621_v18 = vpop.eup %8620 }
0x24ab   :  { %5927 = vrot.lane.b32.xlu1 %v8621_v18, %s8788_s8 }
0x24ec   :  { %v5898_v35 = vpop.f32.mrb[78].mxu1 }
0x24ed   :  { %v5900_v37 = vpop.f32.mrb[79].mxu1 }
0x24ee   :  { %v5908_v9 = vadd.f32 %v5900_v37, %v4012_v11 }
0x24f0   :  { %8622 = vtanh.f32 %v5908_v9  ;;  %v7569_v11 = vmul.f32 -1.442695, %v5908_v9  ;;  %v11600_v9 = vsel %vm5798_vm6, %v11531_v27, %v11528_v2  ;;  %vm12409_vm6 = vcmp.eq.s32.totalorder %v11330_v1, 1  ;;  %v12414_v1 = vld [vmem:[#allocation21_spill] sm:$0xff] }
0x24f1   :  { %8624 = vpow2.f32 %v7568_v51 }
0x24fa   :  { %v8623_v31 = vpop.eup %8622 }
0x24fb   :  { %5929 = vrot.lane.b32.xlu0 %v8623_v31, %s8788_s8  ;;  %v8625_v41 = vpop.eup %8624 }
0x24fc   :  { %v5915_v38 = vadd.f32 1.0, %v8625_v41 }
0x24fe   :  { %8626 = vrcp.f32 %v5915_v38  ;;  %v5958_v38 = vld [vmem:[%s12323_s2 + $0xa8] sm:$0xff] }
0x24ff   :  { %8628 = vpow2.f32 %v7569_v11  ;;  %vm5960_vm0 = vcmp.gt.f32.partialorder %v5958_v38, 0.5  ;;  %v11611_v11 = vsel %vm12358_vm11, %v11542_v63, %v11539_v29 }
0x2500   :  { %v5962_v41 = vsel %vm5960_vm0, 1, %v12387_v53 }
0x2508   :  { %v8627_v36 = vpop.eup %8626 }
0x2509   :  { %v8629_v39 = vpop.eup %8628  ;;  %v5923_v46 = vmul.f32 %v8627_v36, %v11600_v9 }
0x250a   :  { %v5916_v51 = vadd.f32 1.0, %v8629_v39 }
0x250c   :  { %8630 = vrcp.f32 %v5916_v51 }
0x2516   :  { %v8631_v35 = vpop.eup %8630 }
0x2517   :  { %v5924_v39 = vmul.f32 %v8631_v35, %v11611_v11 }
0x251d   :  { %v5928_v32 = vpop.permute.xlu1 %5927 }
0x251e   :  { %v5933_v18 = vmul.f32 %v8627_v36, %v5928_v32 }
0x2520   :  { %5937 = vrot.lane.b32.xlu1 %v5933_v18, %s8789_s5 }
0x2524   :  { %5964 = vperm.xlu1 %8459, %v5961_v28  }
0x256d   :  { %v5930_v37 = vpop.permute.xlu0 %5929 }
0x256e   :  { %v5934_v31 = vmul.f32 %v8631_v35, %v5930_v37 }
0x2570   :  { %5939 = vrot.lane.b32.xlu0 %v5934_v31, %s8789_s5 }
0x2574   :  { %5967 = vperm.xlu0 %8458, %v5962_v41  }
0x2592   :  { %v5938_v32 = vpop.permute.xlu1 %5937 }
0x2593   :  { %v11603_v18 = vadd.f32 %v5938_v32, %v5923_v46 }
0x2595   :  { %8632 = vtanh.f32 %v11603_v18 }
0x259f   :  { %v8633_v28 = vpop.eup %8632 }
0x25a0   :  { %5949 = vrot.lane.b32.xlu1 %v8633_v28, %s8788_s8 }
0x25a3   :  { %v11618_v38 = vpop.permute.xlu1 %5964 }
0x25a4   :  { %12397 = vst [vmem:[#allocation25_spill] sm:$0xff] %v11618_v38  ;;  %vm12361_vm0 = vcmp.eq.s32.totalorder %v11618_v38, 1 }
0x25e2   :  { %v5940_v2 = vpop.permute.xlu0 %5939 }
0x25e3   :  { %v11614_v27 = vadd.f32 %v5940_v2, %v5924_v39 }
0x25e5   :  { %8634 = vtanh.f32 %v11614_v27 }
0x25ef   :  { %v8635_v51 = vpop.eup %8634 }
0x25f0   :  { %5951 = vrot.lane.b32.xlu0 %v8635_v51, %s8788_s8  ;;  %v4006_v51 = vadd.f32 %v10836_v25, %v10881_v56 }
0x25f3   :  { %v11631_v63 = vpop.permute.xlu0 %5967 }
0x25f4   :  { %vm5970_vm15 = vcmp.eq.s32.totalorder %v11631_v63, 1 }
0x2612   :  { %v5950_v37 = vpop.permute.xlu1 %5949 }
0x2613   :  { %v11620_v31 = vmul.f32 %v8627_v36, %v5950_v37 }
0x2615   :  { %12398 = vst [vmem:[#allocation26_spill] sm:$0xff] %v11620_v31  ;;  %v11627_v29 = vsel %vm12361_vm0, %v11620_v31, %v11555_v24 }
0x2616   :  { %5989 = vrot.lane.b32.xlu1 %v11627_v29, %s8789_s5 }
0x2662   :  { %v5952_v41 = vpop.permute.xlu0 %5951 }
0x2663   :  { %v11633_v46 = vmul.f32 %v8631_v35, %v5952_v41 }
0x2665   :  { %v11640_v36 = vsel %vm5970_vm15, %v11633_v46, %v11568_v40  ;;  %v4046_v40 = vadd.f32 %v10865_v45, %v10827_v44 }
0x2666   :  { %5991 = vrot.lane.b32.xlu0 %v11640_v36, %s8789_s5 }
0x2688   :  { %v5990_v24 = vpop.permute.xlu1 %5989 }
0x2689   :  { %7570 = vmatmul.mubr.msk.f32.vlgmr.msra.gmra.mrb[156].mxu0 %vm12369_vm4, %v5990_v24 }
0x268a   :  { %6067 = vmatprep.mubr.f32.mxu0 %v11283_v50  ;;  %8346 = vmatpush1.bf16.msra.mxu0 %v10707_v13 }
0x268b   :  { %8348 = vmatprep.subr.bf16.mxu0 %v10710_v16 }
0x268e   :  { %8350 = vmatpush1.bf16.msra.mxu0 %v10723_v17 }
0x268f   :  { %8360 = vmatprep.subr.bf16.mxu0 %v10673_v12 }
0x26d8   :  { %v5992_v35 = vpop.permute.xlu0 %5991 }
0x26d9   :  { %7571 = vmatmul.mubr.msk.f32.gmra.mrb[158].mxu0 %vm12369_vm4, %v5992_v35 }
0x26da   :  { %6403 = vmatprep.mubr.f32.mxu0 %v11283_v50 }
0x275c   :  { %v6063_v32 = vpop.f32.mrb[156].mxu0 }
0x275d   :  { %v6078_v28 = vadd.f32 %v6063_v32, %v4046_v40  ;;  %v6065_v39 = vpop.f32.mrb[157].mxu0  ;;  %v6128_v40 = vld [vmem:[%s12323_s2 + $0xb0] sm:$0xff] }
0x275e   :  { %vm6130_vm11 = vcmp.gt.f32.partialorder %v6128_v40, 0.5 }
0x275f   :  { %8636 = vtanh.f32 %v6078_v28  ;;  %v7572_v35 = vmul.f32 -1.442695, %v6078_v28  ;;  %v6132_v25 = vsel %vm6130_vm11, 1, %v12387_v53 }
0x2769   :  { %v8637_v2 = vpop.eup %8636 }
0x276a   :  { %6098 = vrot.lane.b32.xlu1 %v8637_v2, %s8788_s8 }
0x27ac   :  { %v6069_v37 = vpop.f32.mrb[158].mxu0 }
0x27ad   :  { %v6071_v12 = vpop.f32.mrb[159].mxu0 }
0x27ae   :  { %v6079_v41 = vadd.f32 %v6071_v12, %v4006_v51 }
0x27b0   :  { %8638 = vtanh.f32 %v6079_v41  ;;  %v7573_v51 = vmul.f32 -1.442695, %v6079_v41  ;;  %v11672_v41 = vsel %vm12361_vm0, %v11603_v18, %v11600_v9 }
0x27b1   :  { %8640 = vpow2.f32 %v7572_v35 }
0x27ba   :  { %v8639_v24 = vpop.eup %8638 }
0x27bb   :  { %6100 = vrot.lane.b32.xlu0 %v8639_v24, %s8788_s8  ;;  %v8641_v45 = vpop.eup %8640 }
0x27bc   :  { %v6086_v31 = vadd.f32 1.0, %v8641_v45 }
0x27be   :  { %8642 = vrcp.f32 %v6086_v31  ;;  %v6129_v31 = vld [vmem:[%s12323_s2 + $0xb8] sm:$0xff] }
0x27bf   :  { %8644 = vpow2.f32 %v7573_v51  ;;  %vm6131_vm7 = vcmp.gt.f32.partialorder %v6129_v31, 0.5  ;;  %v11683_v51 = vsel %vm5970_vm15, %v11614_v27, %v11611_v11 }
0x27c0   :  { %v6133_v45 = vsel %vm6131_vm7, 1, %v12387_v53 }
0x27c8   :  { %v8643_v32 = vpop.eup %8642 }
0x27c9   :  { %v8645_v28 = vpop.eup %8644  ;;  %v6094_v40 = vmul.f32 %v8643_v32, %v11672_v41 }
0x27ca   :  { %v6087_v37 = vadd.f32 1.0, %v8645_v28 }
0x27cc   :  { %8646 = vrcp.f32 %v6087_v37 }
0x27d6   :  { %v8647_v12 = vpop.eup %8646 }
0x27d7   :  { %v6095_v28 = vmul.f32 %v8647_v12, %v11683_v51 }
0x27dc   :  { %v6099_v39 = vpop.permute.xlu1 %6098 }
0x27dd   :  { %v6104_v2 = vmul.f32 %v8643_v32, %v6099_v39 }
0x27df   :  { %6108 = vrot.lane.b32.xlu1 %v6104_v2, %s8789_s5 }
0x27e3   :  { %6135 = vperm.xlu1 %8459, %v6132_v25  }
0x282d   :  { %v6101_v24 = vpop.permute.xlu0 %6100 }
0x282e   :  { %v6105_v35 = vmul.f32 %v8647_v12, %v6101_v24 }
0x2830   :  { %6110 = vrot.lane.b32.xlu0 %v6105_v35, %s8789_s5 }
0x2834   :  { %6138 = vperm.xlu0 %8458, %v6133_v45  }
0x2851   :  { %v6109_v39 = vpop.permute.xlu1 %6108 }
0x2852   :  { %v11675_v2 = vadd.f32 %v6109_v39, %v6094_v40 }
0x2854   :  { %8648 = vtanh.f32 %v11675_v2 }
0x285e   :  { %v8649_v25 = vpop.eup %8648 }
0x285f   :  { %6120 = vrot.lane.b32.xlu1 %v8649_v25, %s8788_s8 }
0x2862   :  { %v11690_v31 = vpop.permute.xlu1 %6135 }
0x2863   :  { %vm6140_vm7 = vcmp.eq.s32.totalorder %v11690_v31, 1 }
0x28a2   :  { %v6111_v9 = vpop.permute.xlu0 %6110 }
0x28a3   :  { %v11686_v18 = vadd.f32 %v6111_v9, %v6095_v28 }
0x28a5   :  { %8650 = vtanh.f32 %v11686_v18 }
0x28af   :  { %v8651_v37 = vpop.eup %8650 }
0x28b0   :  { %6122 = vrot.lane.b32.xlu0 %v8651_v37, %s8788_s8  ;;  %v4000_v37 = vadd.f32 %v10831_v7, %v10881_v56 }
0x28b3   :  { %v11703_v27 = vpop.permute.xlu0 %6138 }
0x28b4   :  { %vm12363_vm11 = vcmp.eq.s32.totalorder %v11703_v27, 1  ;;  %vm12407_vm10 = vcmp.eq.s32.totalorder %v11703_v27, 1  ;;  %v6857_v27 = vld [vmem:[%s12324_s16 + $0x18] sm:$0xff] }
0x28d1   :  { %v6121_v24 = vpop.permute.xlu1 %6120 }
0x28d2   :  { %v11692_v35 = vmul.f32 %v8643_v32, %v6121_v24 }
0x28d4   :  { %v11699_v11 = vsel %vm6140_vm7, %v11692_v35, %v11627_v29  ;;  %v6146_v47 = vsel %vm6140_vm7, %v11692_v35, 0.0 }
0x28d5   :  { %6160 = vrot.lane.b32.xlu1 %v11699_v11, %s8789_s5 }
0x2922   :  { %v6123_v45 = vpop.permute.xlu0 %6122 }
0x2923   :  { %v11705_v40 = vmul.f32 %v8647_v12, %v6123_v45 }
0x2925   :  { %v11712_v32 = vsel %vm12363_vm11, %v11705_v40, %v11640_v36  ;;  %v4052_v36 = vadd.f32 %v10869_v49, %v10827_v44 }
0x2926   :  { %6162 = vrot.lane.b32.xlu0 %v11712_v32, %s8789_s5 }
0x2947   :  { %v6161_v29 = vpop.permute.xlu1 %6160 }
0x2948   :  { %7574 = vmatmul.mubr.msk.f32.vlgmr.msra.gmra.mrb[80].mxu1 %vm12369_vm4, %v6161_v29 }
0x2949   :  { %6238 = vmatprep.mubr.f32.mxu1 %v11283_v50  ;;  %8354 = vmatpush1.bf16.msra.mxu1 %v10707_v13 }
0x294a   :  { %8356 = vmatprep.subr.bf16.mxu1 %v10710_v16 }
0x294d   :  { %8358 = vmatpush1.bf16.msra.mxu1 %v10723_v17 }
0x2998   :  { %v6163_v12 = vpop.permute.xlu0 %6162 }
0x2999   :  { %7575 = vmatmul.mubr.msk.f32.gmra.mrb[82].mxu1 %vm12369_vm4, %v6163_v12 }
0x299a   :  { %6574 = vmatprep.mubr.f32.mxu1 %v11283_v50 }
0x2a1b   :  { %v6234_v39 = vpop.f32.mrb[80].mxu1 }
0x2a1c   :  { %v6249_v25 = vadd.f32 %v6234_v39, %v4052_v36  ;;  %v6236_v28 = vpop.f32.mrb[81].mxu1  ;;  %v6299_v36 = vld [vmem:[%s12323_s2 + $0xc0] sm:$0xff] }
0x2a1d   :  { %vm6301_vm0 = vcmp.gt.f32.partialorder %v6299_v36, 0.5 }
0x2a1e   :  { %8652 = vtanh.f32 %v6249_v25  ;;  %v7576_v50 = vmul.f32 -1.442695, %v6249_v25  ;;  %v6303_v7 = vsel %vm6301_vm0, 1, %v12387_v53 }
0x2a28   :  { %v8653_v9 = vpop.eup %8652 }
0x2a29   :  { %6269 = vrot.lane.b32.xlu1 %v8653_v9, %s8788_s8 }
0x2a6c   :  { %v6240_v24 = vpop.f32.mrb[82].mxu1 }
0x2a6d   :  { %v6242_v45 = vpop.f32.mrb[83].mxu1 }
0x2a6e   :  { %v6250_v29 = vadd.f32 %v6242_v45, %v4000_v37 }
0x2a70   :  { %8654 = vtanh.f32 %v6250_v29  ;;  %v7577_v37 = vmul.f32 -1.442695, %v6250_v29  ;;  %v11743_v29 = vsel %vm6140_vm7, %v11675_v2, %v11672_v41  ;;  %vm12412_vm7 = vcmp.eq.s32.totalorder %v11559_v4, 1 }
0x2a71   :  { %8656 = vpow2.f32 %v7576_v50 }
0x2a7a   :  { %v8655_v12 = vpop.eup %8654 }
0x2a7b   :  { %6271 = vrot.lane.b32.xlu0 %v8655_v12, %s8788_s8  ;;  %v8657_v49 = vpop.eup %8656 }
0x2a7c   :  { %v6257_v38 = vadd.f32 1.0, %v8657_v49 }
0x2a7e   :  { %8658 = vrcp.f32 %v6257_v38  ;;  %v6300_v38 = vld [vmem:[%s12323_s2 + $0xc8] sm:$0xff] }
0x2a7f   :  { %8660 = vpow2.f32 %v7577_v37  ;;  %vm6302_vm12 = vcmp.gt.f32.partialorder %v6300_v38, 0.5  ;;  %v11754_v37 = vsel %vm12363_vm11, %v11686_v18, %v11683_v51 }
0x2a80   :  { %v6304_v49 = vsel %vm6302_vm12, 1, %v12387_v53 }
0x2a88   :  { %v8659_v39 = vpop.eup %8658 }
0x2a89   :  { %v8661_v25 = vpop.eup %8660  ;;  %v6265_v36 = vmul.f32 %v8659_v39, %v11743_v29 }
0x2a8a   :  { %v6258_v24 = vadd.f32 1.0, %v8661_v25 }
0x2a8c   :  { %8662 = vrcp.f32 %v6258_v24 }
0x2a96   :  { %v8663_v45 = vpop.eup %8662 }
0x2a97   :  { %v6266_v25 = vmul.f32 %v8663_v45, %v11754_v37 }
0x2a9b   :  { %v6270_v28 = vpop.permute.xlu1 %6269 }
0x2a9c   :  { %v6275_v9 = vmul.f32 %v8659_v39, %v6270_v28 }
0x2a9e   :  { %6279 = vrot.lane.b32.xlu1 %v6275_v9, %s8789_s5 }
0x2aa2   :  { %6306 = vperm.xlu1 %8459, %v6303_v7  }
0x2aed   :  { %v6272_v12 = vpop.permute.xlu0 %6271 }
0x2aee   :  { %v6276_v50 = vmul.f32 %v8663_v45, %v6272_v12 }
0x2af0   :  { %6281 = vrot.lane.b32.xlu0 %v6276_v50, %s8789_s5 }
0x2af4   :  { %6309 = vperm.xlu0 %8458, %v6304_v49  }
0x2b10   :  { %v6280_v28 = vpop.permute.xlu1 %6279 }
0x2b11   :  { %v11746_v9 = vadd.f32 %v6280_v28, %v6265_v36  ;;  %v11788_v28 = vld [vmem:[#allocation3] sm:$0xff] }
0x2b13   :  { %8664 = vtanh.f32 %v11746_v9 }
0x2b1d   :  { %v8665_v7 = vpop.eup %8664 }
0x2b1e   :  { %6291 = vrot.lane.b32.xlu1 %v8665_v7, %s8788_s8 }
0x2b21   :  { %v11761_v38 = vpop.permute.xlu1 %6306 }
0x2b22   :  { %12399 = vst [vmem:[#allocation27_spill] sm:$0xff] %v11761_v38  ;;  %vm12367_vm12 = vcmp.eq.s32.totalorder %v11761_v38, 1 }
0x2b62   :  { %v6282_v41 = vpop.permute.xlu0 %6281 }
0x2b63   :  { %v11757_v2 = vadd.f32 %v6282_v41, %v6266_v25 }
0x2b65   :  { %8666 = vtanh.f32 %v11757_v2 }
0x2b6f   :  { %v8667_v24 = vpop.eup %8666 }
0x2b70   :  { %6293 = vrot.lane.b32.xlu0 %v8667_v24, %s8788_s8 }
0x2b73   :  { %v11774_v18 = vpop.permute.xlu0 %6309 }
0x2b74   :  { %vm6312_vm0 = vcmp.eq.s32.totalorder %v11774_v18, 1 }
0x2b90   :  { %v6292_v12 = vpop.permute.xlu1 %6291 }
0x2b91   :  { %v11763_v50 = vmul.f32 %v8659_v39, %v6292_v12 }
0x2b93   :  { %12400 = vst [vmem:[#allocation28_spill] sm:$0xff] %v11763_v50  ;;  %v11770_v51 = vsel %vm12367_vm12, %v11763_v50, %v11699_v11 }
0x2b94   :  { %6331 = vrot.lane.b32.xlu1 %v11770_v51, %s8789_s5 }
0x2be2   :  { %v6294_v49 = vpop.permute.xlu0 %6293 }
0x2be3   :  { %v11776_v36 = vmul.f32 %v8663_v45, %v6294_v49 }
0x2be5   :  { %v11783_v39 = vsel %vm6312_vm0, %v11776_v36, %v11712_v32  ;;  %v4058_v32 = vadd.f32 %v10873_v42, %v10827_v44 }
0x2be6   :  { %6333 = vrot.lane.b32.xlu0 %v11783_v39, %s8789_s5 }
0x2c06   :  { %v6332_v11 = vpop.permute.xlu1 %6331 }
0x2c07   :  { %7578 = vmatmul.mubr.msk.f32.vlgmr.msra.gmra.mrb[160].mxu0 %vm12369_vm4, %v6332_v11 }
0x2c08   :  { %6409 = vmatprep.mubr.f32.mxu0 %v11788_v28  ;;  %8362 = vmatpush1.bf16.msra.mxu0 %v10707_v13  ;;  %v3994_v13 = vadd.f32 %v10825_v15, %v10881_v56 }
0x2c09   :  { %8364 = vmatprep.subr.bf16.mxu0 %v10710_v16 }
0x2c0c   :  { %8366 = vmatpush1.bf16.msra.mxu0 %v10723_v17 }
0x2c58   :  { %v6334_v45 = vpop.permute.xlu0 %6333 }
0x2c59   :  { %7579 = vmatmul.mubr.msk.f32.gmra.mrb[162].mxu0 %vm12369_vm4, %v6334_v45 }
0x2c5a   :  { %6745 = vmatprep.mubr.f32.mxu0 %v11788_v28 }
0x2cda   :  { %v6405_v7 = vpop.f32.mrb[160].mxu0 }
0x2cdb   :  { %v6420_v25 = vadd.f32 %v6405_v7, %v4058_v32  ;;  %v6407_v41 = vpop.f32.mrb[161].mxu0  ;;  %v6470_v32 = vld [vmem:[%s12323_s2 + $0xd0] sm:$0xff] }
0x2cdc   :  { %vm6472_vm11 = vcmp.gt.f32.partialorder %v6470_v32, 0.5 }
0x2cdd   :  { %8668 = vtanh.f32 %v6420_v25  ;;  %v7580_v11 = vmul.f32 -1.442695, %v6420_v25  ;;  %v6474_v15 = vsel %vm6472_vm11, 1, %v12387_v53 }
0x2ce7   :  { %v8669_v24 = vpop.eup %8668 }
0x2ce8   :  { %6440 = vrot.lane.b32.xlu1 %v8669_v24, %s8788_s8 }
0x2d2c   :  { %v6411_v16 = vpop.f32.mrb[162].mxu0 }
0x2d2d   :  { %v6413_v17 = vpop.f32.mrb[163].mxu0 }
0x2d2e   :  { %v6421_v12 = vadd.f32 %v6413_v17, %v3994_v13  ;;  %v6471_v17 = vld [vmem:[%s12323_s2 + $0xd8] sm:$0xff] }
0x2d2f   :  { %vm6473_vm2 = vcmp.gt.f32.partialorder %v6471_v17, 0.5 }
0x2d30   :  { %8670 = vtanh.f32 %v6421_v12  ;;  %v7581_v25 = vmul.f32 -1.442695, %v6421_v12  ;;  %v11816_v12 = vsel %vm12367_vm12, %v11746_v9, %v11743_v29 }
0x2d31   :  { %8672 = vpow2.f32 %v7580_v11 }
0x2d3a   :  { %v8671_v49 = vpop.eup %8670 }
0x2d3b   :  { %6442 = vrot.lane.b32.xlu0 %v8671_v49, %s8788_s8  ;;  %v8673_v42 = vpop.eup %8672 }
0x2d3c   :  { %v6428_v45 = vadd.f32 1.0, %v8673_v42 }
0x2d3e   :  { %8674 = vrcp.f32 %v6428_v45  ;;  %v6475_v45 = vsel %vm6473_vm2, 1, %v12387_v53 }
0x2d3f   :  { %8676 = vpow2.f32 %v7581_v25  ;;  %v11827_v25 = vsel %vm6312_vm0, %v11757_v2, %v11754_v37 }
0x2d48   :  { %v8675_v7 = vpop.eup %8674 }
0x2d49   :  { %v8677_v13 = vpop.eup %8676  ;;  %v6436_v32 = vmul.f32 %v8675_v7, %v11816_v12 }
0x2d4a   :  { %v6429_v16 = vadd.f32 1.0, %v8677_v13 }
0x2d4c   :  { %8678 = vrcp.f32 %v6429_v16 }
0x2d56   :  { %v8679_v49 = vpop.eup %8678 }
0x2d57   :  { %v6437_v13 = vmul.f32 %v8679_v49, %v11827_v25 }
0x2d5a   :  { %v6441_v41 = vpop.permute.xlu1 %6440 }
0x2d5b   :  { %v6446_v24 = vmul.f32 %v8675_v7, %v6441_v41 }
0x2d5d   :  { %6450 = vrot.lane.b32.xlu1 %v6446_v24, %s8789_s5 }
0x2d61   :  { %6477 = vperm.xlu1 %8459, %v6474_v15  }
0x2dad   :  { %v6443_v11 = vpop.permute.xlu0 %6442 }
0x2dae   :  { %v6447_v42 = vmul.f32 %v8679_v49, %v6443_v11 }
0x2db0   :  { %6452 = vrot.lane.b32.xlu0 %v6447_v42, %s8789_s5 }
0x2db4   :  { %6480 = vperm.xlu0 %8458, %v6475_v45  }
0x2dcf   :  { %v6451_v41 = vpop.permute.xlu1 %6450 }
0x2dd0   :  { %v11819_v24 = vadd.f32 %v6451_v41, %v6436_v32 }
0x2dd2   :  { %8680 = vtanh.f32 %v11819_v24 }
0x2ddc   :  { %v8681_v15 = vpop.eup %8680 }
0x2ddd   :  { %6462 = vrot.lane.b32.xlu1 %v8681_v15, %s8788_s8 }
0x2de0   :  { %v11834_v17 = vpop.permute.xlu1 %6477 }
0x2de1   :  { %vm6482_vm2 = vcmp.eq.s32.totalorder %v11834_v17, 1 }
0x2e22   :  { %v6453_v29 = vpop.permute.xlu0 %6452 }
0x2e23   :  { %v11830_v9 = vadd.f32 %v6453_v29, %v6437_v13 }
0x2e25   :  { %8682 = vtanh.f32 %v11830_v9 }
0x2e2f   :  { %v8683_v16 = vpop.eup %8682 }
0x2e30   :  { %6464 = vrot.lane.b32.xlu0 %v8683_v16, %s8788_s8  ;;  %v3988_v16 = vadd.f32 %v10818_v8, %v10881_v56 }
0x2e33   :  { %v11847_v2 = vpop.permute.xlu0 %6480 }
0x2e34   :  { %vm12370_vm11 = vcmp.eq.s32.totalorder %v11847_v2, 1 }
0x2e4f   :  { %v6463_v11 = vpop.permute.xlu1 %6462 }
0x2e50   :  { %v11836_v42 = vmul.f32 %v8675_v7, %v6463_v11 }
0x2e52   :  { %v11843_v37 = vsel %vm6482_vm2, %v11836_v42, %v11770_v51  ;;  %v6488_v0 = vsel %vm6482_vm2, %v11836_v42, 0.0  ;;  %v4949_v42 = vsel %vm12405_vm5, %v11186_v22, 0.0  ;;  %v6856_v22 = vld [vmem:[%s12324_s16 + $0x10] sm:$0xff] }
0x2e53   :  { %6502 = vrot.lane.b32.xlu1 %v11843_v37, %s8789_s5 }
0x2ea2   :  { %v6465_v45 = vpop.permute.xlu0 %6464 }
0x2ea3   :  { %v11849_v32 = vmul.f32 %v8679_v49, %v6465_v45  ;;  %v4064_v49 = vadd.f32 %v10877_v55, %v10827_v44 }
0x2ea5   :  { %v11856_v7 = vsel %vm12370_vm11, %v11849_v32, %v11783_v39 }
0x2ea6   :  { %6504 = vrot.lane.b32.xlu0 %v11856_v7, %s8789_s5 }
0x2ec5   :  { %v6503_v51 = vpop.permute.xlu1 %6502 }
0x2ec6   :  { %7582 = vmatmul.mubr.msk.f32.vlgmr.msra.gmra.mrb[84].mxu1 %vm12369_vm4, %v6503_v51 }
0x2ec7   :  { %6580 = vmatprep.mubr.f32.mxu1 %v11788_v28 }
0x2f18   :  { %v6505_v41 = vpop.permute.xlu0 %6504 }
0x2f19   :  { %7583 = vmatmul.mubr.msk.f32.gmra.mrb[86].mxu1 %vm12369_vm4, %v6505_v41 }
0x2f99   :  { %v6576_v15 = vpop.f32.mrb[84].mxu1 }
0x2f9a   :  { %v6591_v13 = vadd.f32 %v6576_v15, %v4064_v49  ;;  %v6578_v29 = vpop.f32.mrb[85].mxu1  ;;  %v6641_v49 = vld [vmem:[%s12323_s2 + $0xe0] sm:$0xff] }
0x2f9b   :  { %vm6643_vm12 = vcmp.gt.f32.partialorder %v6641_v49, 0.5 }
0x2f9c   :  { %8684 = vtanh.f32 %v6591_v13  ;;  %v7584_v50 = vmul.f32 -1.442695, %v6591_v13  ;;  %v6645_v8 = vsel %vm6643_vm12, 1, %v12387_v53 }
0x2fa6   :  { %v8685_v39 = vpop.eup %8684 }
0x2fa7   :  { %6611 = vrot.lane.b32.xlu1 %v8685_v39, %s8788_s8 }
0x2fec   :  { %v6582_v11 = vpop.f32.mrb[86].mxu1 }
0x2fed   :  { %v6584_v45 = vpop.f32.mrb[87].mxu1 }
0x2fee   :  { %v6592_v51 = vadd.f32 %v6584_v45, %v3988_v16  ;;  %v6642_v16 = vld [vmem:[%s12323_s2 + $0xe8] sm:$0xff] }
0x2fef   :  { %vm6644_vm3 = vcmp.gt.f32.partialorder %v6642_v16, 0.5 }
0x2ff0   :  { %8686 = vtanh.f32 %v6592_v51  ;;  %v7585_v13 = vmul.f32 -1.442695, %v6592_v51  ;;  %v11883_v51 = vsel %vm6482_vm2, %v11819_v24, %v11816_v12 }
0x2ff1   :  { %8688 = vpow2.f32 %v7584_v50 }
0x2ffa   :  { %v8687_v38 = vpop.eup %8686 }
0x2ffb   :  { %6613 = vrot.lane.b32.xlu0 %v8687_v38, %s8788_s8  ;;  %v8689_v55 = vpop.eup %8688 }
0x2ffc   :  { %v6599_v41 = vadd.f32 1.0, %v8689_v55 }
0x2ffe   :  { %8690 = vrcp.f32 %v6599_v41  ;;  %v6646_v41 = vsel %vm6644_vm3, 1, %v12387_v53 }
0x2fff   :  { %8692 = vpow2.f32 %v7585_v13  ;;  %v11894_v13 = vsel %vm12370_vm11, %v11830_v9, %v11827_v25 }
0x3008   :  { %v8691_v15 = vpop.eup %8690 }
0x3009   :  { %v8693_v38 = vpop.eup %8692  ;;  %v6607_v49 = vmul.f32 %v8691_v15, %v11883_v51 }
0x300a   :  { %v6600_v50 = vadd.f32 1.0, %v8693_v38 }
0x300c   :  { %8694 = vrcp.f32 %v6600_v50 }
0x3016   :  { %v8695_v11 = vpop.eup %8694 }
0x3017   :  { %v6608_v38 = vmul.f32 %v8695_v11, %v11894_v13 }
0x3019   :  { %v6612_v29 = vpop.permute.xlu1 %6611 }
0x301a   :  { %v6617_v39 = vmul.f32 %v8691_v15, %v6612_v29 }
0x301c   :  { %6621 = vrot.lane.b32.xlu1 %v6617_v39, %s8789_s5 }
0x3020   :  { %6648 = vperm.xlu1 %8459, %v6645_v8  }
0x306d   :  { %v6614_v45 = vpop.permute.xlu0 %6613 }
0x306e   :  { %v6618_v55 = vmul.f32 %v8695_v11, %v6614_v45 }
0x3070   :  { %6623 = vrot.lane.b32.xlu0 %v6618_v55, %s8789_s5 }
0x3074   :  { %6651 = vperm.xlu0 %8458, %v6646_v41  }
0x308e   :  { %v6622_v29 = vpop.permute.xlu1 %6621 }
0x308f   :  { %v11886_v39 = vadd.f32 %v6622_v29, %v6607_v49 }
0x3091   :  { %8696 = vtanh.f32 %v11886_v39 }
0x309b   :  { %v8697_v8 = vpop.eup %8696 }
0x309c   :  { %6633 = vrot.lane.b32.xlu1 %v8697_v8, %s8788_s8  ;;  %v4070_v8 = vadd.f32 %v10883_v58, %v10827_v44 }
0x309f   :  { %v11901_v16 = vpop.permute.xlu1 %6648 }
0x30a0   :  { %vm6653_vm3 = vcmp.eq.s32.totalorder %v11901_v16, 1 }
0x30e2   :  { %v6624_v12 = vpop.permute.xlu0 %6623 }
0x30e3   :  { %v11897_v24 = vadd.f32 %v6624_v12, %v6608_v38 }
0x30e5   :  { %8698 = vtanh.f32 %v11897_v24 }
0x30ef   :  { %v8699_v50 = vpop.eup %8698 }
0x30f0   :  { %6635 = vrot.lane.b32.xlu0 %v8699_v50, %s8788_s8 }
0x30f3   :  { %v11911_v9 = vpop.permute.xlu0 %6651 }
0x30f4   :  { %vm6654_vm12 = vcmp.eq.s32.totalorder %v11911_v9, 1 }
0x30f5   :  { %v6658_v61 = vsel %vm6654_vm12, %v11897_v24, %v11894_v13  ;;  %v12411_v24 = vld [vmem:[#allocation24_spill] sm:$0xff] }
0x30f6   :  { %v5805_v9 = vsel %vm12412_vm7, %v12411_v24, 0.0 }
0x310e   :  { %v6634_v45 = vpop.permute.xlu1 %6633 }
0x310f   :  { %v11903_v55 = vmul.f32 %v8691_v15, %v6634_v45 }
0x3111   :  { %v6655_v25 = vsel %vm6653_vm3, %v11903_v55, %v11843_v37 }
0x3112   :  { %6673 = vrot.lane.b32.xlu1 %v6655_v25, %s8789_s5 }
0x3162   :  { %v6636_v41 = vpop.permute.xlu0 %6635 }
0x3163   :  { %v6640_v49 = vmul.f32 %v8695_v11, %v6636_v41 }
0x3165   :  { %v6656_v15 = vsel %vm6654_vm12, %v6640_v49, %v11856_v7  ;;  %v3982_v7 = vadd.f32 %v10814_v5, %v10881_v56 }
0x3166   :  { %6675 = vrot.lane.b32.xlu0 %v6656_v15, %s8789_s5 }
0x3184   :  { %v6674_v29 = vpop.permute.xlu1 %6673 }
0x3185   :  { %7586 = vmatmul.mubr.msk.f32.vlgmr.msra.gmra.mrb[164].mxu0 %vm12369_vm4, %v6674_v29 }
0x3186   :  { %6751 = vmatprep.mubr.f32.mxu0 %v11788_v28 }
0x31d8   :  { %v6676_v37 = vpop.permute.xlu0 %6675 }
0x31d9   :  { %7587 = vmatmul.mubr.msk.f32.gmra.mrb[166].mxu0 %vm12369_vm4, %v6676_v37 }
0x3258   :  { %v6747_v11 = vpop.f32.mrb[164].mxu0 }
0x3259   :  { %v6762_v38 = vadd.f32 %v6747_v11, %v4070_v8  ;;  %v6749_v12 = vpop.f32.mrb[165].mxu0 }
0x325b   :  { %8700 = vtanh.f32 %v6762_v38  ;;  %v7588_v28 = vmul.f32 -1.442695, %v6762_v38  ;;  %v6813_v38 = vld [vmem:[%s12323_s2 + $0xf8] sm:$0xff] }
0x325c   :  { %vm6815_vm4 = vcmp.gt.f32.partialorder %v6813_v38, 0.5 }
0x3265   :  { %v8701_v50 = vpop.eup %8700 }
0x3266   :  { %6782 = vrot.lane.b32.xlu0 %v8701_v50, %s8788_s8 }
0x32ac   :  { %v6753_v45 = vpop.f32.mrb[166].mxu0 }
0x32ad   :  { %v6755_v25 = vpop.f32.mrb[167].mxu0  ;;  %v6812_v45 = vld [vmem:[%s12323_s2 + $0xf0] sm:$0xff] }
0x32ae   :  { %v6763_v41 = vadd.f32 %v6755_v25, %v3982_v7  ;;  %v6817_v25 = vsel %vm6815_vm4, 1, %v12387_v53  ;;  %vm6814_vm11 = vcmp.gt.f32.partialorder %v6812_v45, 0.5  ;;  %vm12401_vm4 = vcmp.eq.s32.totalorder %v11053_v62, 1  ;;  %v6858_v45 = vld [vmem:[%s12324_s16 + $0x20] sm:$0xff] }
0x32af   :  { %v4608_v26 = vsel %vm12401_vm4, %v11055_v52, 0.0  ;;  %v6657_v62 = vsel %vm6653_vm3, %v11886_v39, %v11883_v51  ;;  %v5291_v39 = vsel %vm12409_vm6, %v11332_v54, 0.0  ;;  %v12415_v54 = vld [vmem:[#allocation20_spill] sm:$0xff]  ;;  %vm12419_vm4 = vmmov %vm12406_vm1 }
0x32b0   :  { %8702 = vtanh.f32 %v6763_v41  ;;  %v7589_v5 = vmul.f32 -1.442695, %v6763_v41  ;;  %v6816_v41 = vsel %vm6814_vm11, 1, %v12387_v53  ;;  %v6318_v53 = vsel %vm6312_vm0, %v11776_v36, 0.0  ;;  %vm12417_vm11 = vmmov %vm12406_vm1 }
0x32b1   :  { %8704 = vpow2.f32 %v7588_v28  ;;  %v4436_v28 = vsel %vm4430_vm14, %v10970_v6, 0.0  ;;  %v5976_v6 = vsel %vm5970_vm15, %v11633_v46, 0.0  ;;  %vm12402_vm14 = vcmp.eq.s32.totalorder %v11040_v59, 1  ;;  %vm12410_vm15 = vmmov %vm12406_vm1 }
0x32b2   :  { %v4607_v35 = vsel %vm12402_vm14, %v11042_v14, 0.0  ;;  %v6147_v14 = vsel %vm12407_vm10, %v11705_v40, 0.0  ;;  %v8371_v40 = vpack.c.bf16 %v6857_v27, %v6856_v22  ;;  %vm12416_vm2 = vcmp.eq.s32.totalorder %v12415_v54, 1  ;;  %vm12420_vm14 = vmmov %vm12406_vm1 }
0x32ba   :  { %v8703_v15 = vpop.eup %8702 }
0x32bb   :  { %6784 = vrot.lane.b32.xlu1 %v8703_v15, %s8788_s8  ;;  %v8705_v44 = vpop.eup %8704  ;;  %v6660_v15 = vsel %vm6654_vm12, %v6640_v49, 0.0 }
0x32bc   :  { %v6770_v58 = vadd.f32 1.0, %v8705_v44  ;;  %v4778_v44 = vsel %vm4772_vm8, %v11114_v33, 0.0  ;;  %v5634_v33 = vsel %vm5628_vm9, %v11489_v43, 0.0  ;;  %vm12403_vm8 = vcmp.eq.s32.totalorder %v11847_v2, 1  ;;  %vm12408_vm9 = vmmov %vm12404_vm13  ;;  %v6854_v2 = vld [vmem:[%s12324_s16] sm:$0xff] }
0x32bd   :  { %v6489_v18 = vsel %vm12403_vm8, %v11849_v32, 0.0  ;;  %v8367_v32 = vpack.c.bf16 %v6855_v19, %v6854_v2  ;;  %vm12413_vm0 = vmmov %vm12408_vm9 }
0x32be   :  { %8706 = vrcp.f32 %v6770_v58  ;;  %v5463_v58 = vsel %vm12416_vm2, %v12414_v1, 0.0  ;;  %vm12418_vm12 = vmmov %vm12413_vm0 }
0x32bf   :  { %8708 = vpow2.f32 %v7589_v5  ;;  %8368 = vmatprep.subr.bf16.mxu1 %v8367_v32  ;;  %vm12421_vm8 = vmmov %vm12413_vm0 }
0x32c0   :  { %8370 = vmatpush3.bf16.msra.mxu1 %v8367_v32  ;;  %vm12423_vm5 = vmmov %vm12413_vm0 }
0x32c1   :  { %8372 = vmatprep.subr.bf16.mxu1 %v8371_v40  ;;  %vm12424_vm10 = vmmov %vm12413_vm0 }
0x32c4   :  { %8374 = vmatpush3.bf16.msra.mxu1 %v8371_v40 }
0x32c8   :  { %v11927_v29 = vpop.eup %8706 }
0x32c9   :  { %v8709_v56 = vpop.eup %8708  ;;  %v6778_v43 = vmul.f32 %v11927_v29, %v6657_v62  ;;  %v12434_v62 = vld [vmem:[#allocation26_spill] sm:$0xff] }
0x32ca   :  { %v6771_v11 = vadd.f32 1.0, %v8709_v56 }
0x32cc   :  { %8710 = vrcp.f32 %v6771_v11 }
0x32d6   :  { %v11934_v12 = vpop.eup %8710 }
0x32d7   :  { %v6779_v48 = vmul.f32 %v11934_v12, %v6658_v61 }
0x32d8   :  { %v6783_v37 = vpop.permute.xlu0 %6782 }
0x32d9   :  { %v6788_v8 = vmul.f32 %v11927_v29, %v6783_v37 }
0x32db   :  { %6792 = vrot.lane.b32.xlu0 %v6788_v8, %s8789_s5 }
0x332d   :  { %v6785_v50 = vpop.permute.xlu1 %6784 }
0x332e   :  { %v6789_v7 = vmul.f32 %v11934_v12, %v6785_v50 }
0x3330   :  { %6794 = vrot.lane.b32.xlu1 %v6789_v7, %s8789_s5 }
0x3334   :  { %6822 = vperm.xlu1 %8459, %v6817_v25   ;;  %v6859_v25 = vld [vmem:[%s12324_s16 + $0x28] sm:$0xff] }
0x3338   :  { %6819 = vperm.xlu1 %8459, %v6816_v41   ;;  %v8375_v41 = vpack.c.bf16 %v6859_v25, %v6858_v45  ;;  %v7590_v25 = vld [vmem:[%s12325_s17] ss:$0 sm:$0xff] }
0x333a   :  { %8376 = vmatprep.subr.bf16.mxu1 %v8375_v41 }
0x333b   :  { %8378 = vmatpush3.bf16.msra.mxu1 %v8375_v41 }
0x333c   :  { %4439 = vrot.lane.b32.xlu1 %v4436_v28, %s8789_s5  ;;  %v6860_v28 = vld [vmem:[%s12324_s16 + $0x30] sm:$0xff] }
0x3340   :  { %6667 = vrot.lane.b32.xlu1 %v6660_v15, %s8788_s8  ;;  %v6861_v15 = vld [vmem:[%s12324_s16 + $0x38] sm:$0xff] }
0x3344   :  { %4781 = vrot.lane.b32.xlu1 %v4778_v44, %s8789_s5  ;;  %v8379_v44 = vpack.c.bf16 %v6861_v15, %v6860_v28 }
0x3346   :  { %8380 = vmatprep.subr.bf16.mxu1 %v8379_v44 }
0x3347   :  { %8382 = vmatpush3.bf16.msra.mxu1 %v8379_v44 }
0x3348   :  { %6325 = vrot.lane.b32.xlu1 %v6318_v53, %s8788_s8 }
0x334c   :  { %5123 = vrot.lane.b32.xlu1 %v5120_v10, %s8789_s5 }
0x334d   :  { %v6793_v52 = vpop.permute.xlu0 %6792 }
0x334e   :  { %v6798_v30 = vadd.f32 %v6793_v52, %v6778_v43  ;;  %v12435_v52 = vld [vmem:[#allocation25_spill] sm:$0xff] }
0x3350   :  { %5983 = vrot.lane.b32.xlu1 %v5976_v6, %s8788_s8 }
0x3354   :  { %5465 = vrot.lane.b32.xlu1 %v5462_v57, %s8789_s5 }
0x3358   :  { %5641 = vrot.lane.b32.xlu1 %v5634_v33, %s8788_s8 }
0x335c   :  { %5299 = vrot.lane.b32.xlu1 %v5292_v21, %s8788_s8 }
0x3360   :  { %5807 = vrot.lane.b32.xlu1 %v5804_v20, %s8789_s5  ;;  %v12426_v20 = vld [vmem:[#allocation23_spill] sm:$0xff] }
0x3364   :  { %4957 = vrot.lane.b32.xlu1 %v4950_v34, %s8788_s8  ;;  %v12427_v34 = vld [vmem:[#allocation22_spill] sm:$0xff] }
0x3365   :  { %vm12428_vm7 = vcmp.eq.s32.totalorder %v12427_v34, 1 }
0x3368   :  { %6149 = vrot.lane.b32.xlu1 %v6146_v47, %s8789_s5  ;;  %v5633_v47 = vsel %vm12428_vm7, %v12426_v20, 0.0  ;;  %vm12453_vm7 = vmmov %vm12413_vm0 }
0x336c   :  { %4615 = vrot.lane.b32.xlu1 %v4608_v26, %s8788_s8  ;;  %v12429_v26 = vld [vmem:[#allocation19_spill] sm:$0xff] }
0x3370   :  { %6491 = vrot.lane.b32.xlu1 %v6488_v0, %s8789_s5  ;;  %v12430_v0 = vld [vmem:[#allocation18_spill] sm:$0xff] }
0x3371   :  { %vm12431_vm2 = vcmp.eq.s32.totalorder %v12430_v0, 1 }
0x3372   :  { %v5121_v61 = vsel %vm12431_vm2, %v12429_v26, 0.0 }
0x3374   :  { %4277 = vrot.lane.b32.xlu1 %v10919_v60, %s8788_s8 }
0x33a2   :  { %v6795_v23 = vpop.permute.xlu1 %6794 }
0x33a3   :  { %v6799_v3 = vadd.f32 %v6795_v23, %v6779_v48 }
0x33a5   :  { %8712 = vtanh.f32 %v6799_v3  ;;  %v12438_v3 = vld [vmem:[#allocation17_spill] sm:$0xff] }
0x33a6   :  { %8714 = vtanh.f32 %v6798_v30  ;;  %v12439_v30 = vld [vmem:[#allocation16_spill] sm:$0xff] }
0x33af   :  { %v8713_v60 = vpop.eup %8712 }
0x33b0   :  { %6806 = vrot.lane.b32.xlu0 %v8713_v60, %s8788_s8  ;;  %v8715_v63 = vpop.eup %8714 }
0x33b3   :  { %v12011_v46 = vpop.permute.xlu1 %6822 }
0x33b4   :  { %6804 = vrot.lane.b32.xlu0 %v8715_v63, %s8788_s8  ;;  %vm6825_vm6 = vcmp.eq.s32.totalorder %v12011_v46, 1  ;;  %v12442_v46 = vld [vmem:[#allocation28_spill] sm:$0xff] }
0x33b7   :  { %v12014_v31 = vpop.permute.xlu1 %6819 }
0x33b8   :  { %4610 = vrot.lane.b32.xlu0 %v4607_v35, %s8789_s5 }
0x33bb   :  { %v4440_v36 = vpop.permute.xlu1 %4439 }
0x33bc   :  { %4442 = vst.msk [vmem:[#allocation5 + $0x8] sm:$0xff] %vm12404_vm13, %v4440_v36  ;;  %6496 = vrot.lane.b32.xlu0 %v6489_v18, %s8788_s8  ;;  %vm12422_vm13 = vmmov %vm12406_vm1  ;;  %v12446_v36 = vld [vmem:[#allocation15_spill] sm:$0xff] }
0x33bf   :  { %v6668_v17 = vpop.permute.xlu1 %6667 }
0x33c0   :  { %6670 = vst.msk [vmem:[#allocation5 + $0x8] sm:$0xff] %vm12406_vm1, %v6668_v17  ;;  %4952 = vrot.lane.b32.xlu0 %v4949_v42, %s8789_s5  ;;  %v12447_v17 = vld [vmem:[#allocation14_spill] sm:$0xff] }
0x33c3   :  { %v4782_v59 = vpop.permute.xlu1 %4781 }
0x33c4   :  { %4784 = vst.msk [vmem:[#allocation5 + $0x18] sm:$0xff] %vm12408_vm9, %v4782_v59  ;;  %6154 = vrot.lane.b32.xlu0 %v6147_v14, %s8788_s8  ;;  %vm12425_vm9 = vmmov %vm12406_vm1  ;;  %v6659_v14 = vsel %vm6653_vm3, %v11903_v55, 0.0 }
0x33c7   :  { %v6326_v51 = vpop.permute.xlu1 %6325  ;;  %v6839_v16 = vld [vmem:[#allocation5 + $0x8] sm:$0xff] }
0x33c8   :  { %6328 = vst.msk [vmem:[#allocation5 + $0x18] sm:$0xff] %vm12410_vm15, %v6326_v51  ;;  %5294 = vrot.lane.b32.xlu0 %v5291_v39, %s8789_s5  ;;  %vm6824_vm15 = vcmp.eq.s32.totalorder %v12014_v31, 1  ;;  %v12443_v31 = vld [vmem:[#allocation27_spill] sm:$0xff] }
0x33cb   :  { %v5124_v13 = vpop.permute.xlu1 %5123 }
0x33cc   :  { %5126 = vst.msk [vmem:[#allocation5 + $0x28] sm:$0xff] %vm12413_vm0, %v5124_v13  ;;  %5812 = vrot.lane.b32.xlu0 %v5805_v9, %s8788_s8 }
0x33cf   :  { %v5984_v49 = vpop.permute.xlu1 %5983  ;;  %v6841_v13 = vld [vmem:[#allocation5 + $0x18] sm:$0xff] }
0x33d0   :  { %5986 = vst.msk [vmem:[#allocation5 + $0x28] sm:$0xff] %vm12417_vm11, %v5984_v49  ;;  %5470 = vrot.lane.b32.xlu0 %v5463_v58, %s8788_s8  ;;  %vm12433_vm11 = vmmov %vm12406_vm1 }
0x33d3   :  { %v5466_v37 = vpop.permute.xlu1 %5465 }
0x33d4   :  { %5468 = vst.msk [vmem:[#allocation5 + $0x38] sm:$0xff] %vm12418_vm12, %v5466_v37  ;;  %vm12436_vm12 = vcmp.eq.s32.totalorder %v12435_v52, 1 }
0x33d5   :  { %v5975_v23 = vsel %vm12436_vm12, %v12434_v62, 0.0 }
0x33d7   :  { %v5642_v8 = vpop.permute.xlu1 %5641  ;;  %v6843_v49 = vld [vmem:[#allocation5 + $0x28] sm:$0xff] }
0x33d8   :  { %5644 = vst.msk [vmem:[#allocation5 + $0x38] sm:$0xff] %vm12419_vm4, %v5642_v8  ;;  %vm12437_vm4 = vmmov %vm12413_vm0 }
0x33d9   :  { %vm12455_vm3 = vmmov %vm12437_vm4 }
0x33da   :  { %vm12457_vm12 = vmmov %vm12455_vm3 }
0x33db   :  { %v5300_v4 = vpop.permute.xlu1 %5299 }
0x33dc   :  { %5302 = vst.msk [vmem:[#allocation5 + $0x48] sm:$0xff] %vm12420_vm14, %v5300_v4  ;;  %vm12440_vm14 = vcmp.eq.s32.totalorder %v12439_v30, 1 }
0x33dd   :  { %v4779_v60 = vsel %vm12440_vm14, %v12438_v3, 0.0  ;;  %vm12459_vm14 = vmmov %vm12455_vm3 }
0x33df   :  { %v5808_v5 = vpop.permute.xlu1 %5807  ;;  %v6845_v58 = vld [vmem:[#allocation5 + $0x38] sm:$0xff] }
0x33e0   :  { %5810 = vst.msk [vmem:[#allocation5 + $0x48] sm:$0xff] %vm12421_vm8, %v5808_v5  ;;  %vm12441_vm8 = vmmov %vm12406_vm1 }
0x33e3   :  { %v4958_v56 = vpop.permute.xlu1 %4957 }
0x33e4   :  { %4960 = vst.msk [vmem:[#allocation5 + $0x58] sm:$0xff] %vm12422_vm13, %v4958_v56  ;;  %vm12444_vm13 = vcmp.eq.s32.totalorder %v12443_v31, 1 }
0x33e5   :  { %v6317_v35 = vsel %vm12444_vm13, %v12442_v46, 0.0 }
0x33e7   :  { %v6150_v11 = vpop.permute.xlu1 %6149  ;;  %v6847_v4 = vld [vmem:[#allocation5 + $0x48] sm:$0xff] }
0x33e8   :  { %6152 = vst.msk [vmem:[#allocation5 + $0x58] sm:$0xff] %vm12423_vm5, %v6150_v11  ;;  %vm12445_vm5 = vmmov %vm12413_vm0 }
0x33eb   :  { %v4616_v38 = vpop.permute.xlu1 %4615 }
0x33ec   :  { %4618 = vst.msk [vmem:[#allocation5 + $0x68] sm:$0xff] %vm12406_vm1, %v4616_v38  ;;  %vm12448_vm1 = vcmp.eq.s32.totalorder %v12447_v17, 1  ;;  %v12460_v17 = vld [vmem:[#allocation6_spill] sm:$0xff] }
0x33ed   :  { %v4437_v42 = vsel %vm12448_vm1, %v12446_v36, 0.0 }
0x33ef   :  { %v6492_v50 = vpop.permute.xlu1 %6491  ;;  %v6849_v11 = vld [vmem:[#allocation5 + $0x58] sm:$0xff] }
0x33f0   :  { %6494 = vst.msk [vmem:[#allocation5 + $0x68] sm:$0xff] %vm12424_vm10, %v6492_v50  ;;  %vm12449_vm10 = vmmov %vm12441_vm8 }
0x33f3   :  { %v4278_v7 = vpop.permute.xlu1 %4277 }
0x33f4   :  { %4280 = vst.msk [vmem:[#allocation5 + $0x78] sm:$0xff] %vm12425_vm9, %v4278_v7  ;;  %vm12450_vm9 = vmmov %vm12441_vm8 }
0x33f7   :  { %v6851_v50 = vld [vmem:[#allocation5 + $0x68] sm:$0xff] }
0x3422   :  { %v6807_v53 = vpop.permute.xlu0 %6806 }
0x3423   :  { %v6811_v10 = vmul.f32 %v11934_v12, %v6807_v53 }
0x3425   :  { %v6827_v6 = vsel %vm6825_vm6, %v6811_v10, 0.0  ;;  %vm12451_vm6 = vmmov %vm12441_vm8 }
0x3426   :  { %6834 = vrot.lane.b32.xlu0 %v6827_v6, %s8788_s8  ;;  %v6805_v57 = vpop.permute.xlu0 %6804  ;;  %vm12454_vm2 = vmmov %vm12451_vm6 }
0x3427   :  { %v6810_v33 = vmul.f32 %v11927_v29, %v6805_v57  ;;  %v12432_v29 = vld [vmem:[#allocation7_spill] sm:$0xff] }
0x3429   :  { %v6826_v21 = vsel %vm6824_vm15, %v6810_v33, 0.0  ;;  %vm12452_vm15 = vmmov %vm12413_vm0 }
0x342a   :  { %5636 = vrot.lane.b32.xlu0 %v5633_v47, %s8789_s5  ;;  %6829 = vrot.lane.b32.xlu1 %v6826_v21, %s8789_s5  ;;  %v4611_v12 = vpop.permute.xlu0 %4610 }
0x342b   :  { %4613 = vst.msk [vmem:[#allocation5 + $0x10] sm:$0xff] %vm12413_vm0, %v4611_v12  ;;  %vm6869_vm0 = vcmask 523264  }
0x342e   :  { %5128 = vrot.lane.b32.xlu0 %v5121_v61, %s8788_s8  ;;  %1676 = vrot.lane.b32.xlu1 %v12432_v29, %s8789_s5  ;;  %v6497_v48 = vpop.permute.xlu0 %6496 }
0x342f   :  { %6499 = vst.msk [vmem:[#allocation5 + $0x10] sm:$0xff] %vm12433_vm11, %v6497_v48  ;;  %vm12456_vm11 = vmmov %vm12454_vm2 }
0x3432   :  { %5978 = vrot.lane.b32.xlu0 %v5975_v23, %s8789_s5  ;;  %v4953_v43 = vpop.permute.xlu0 %4952 }
0x3433   :  { %4955 = vst.msk [vmem:[#allocation5 + $0x20] sm:$0xff] %vm12437_vm4, %v4953_v43  ;;  %vm12458_vm4 = vmmov %vm12454_vm2 }
0x3436   :  { %4786 = vrot.lane.b32.xlu0 %v4779_v60, %s8788_s8  ;;  %v6155_v63 = vpop.permute.xlu0 %6154  ;;  %v6840_v55 = vld [vmem:[#allocation5 + $0x10] sm:$0xff] }
0x3437   :  { %6157 = vst.msk [vmem:[#allocation5 + $0x20] sm:$0xff] %vm12441_vm8, %v6155_v63 }
0x343a   :  { %6320 = vrot.lane.b32.xlu0 %v6317_v35, %s8789_s5  ;;  %v5295_v18 = vpop.permute.xlu0 %5294 }
0x343b   :  { %5297 = vst.msk [vmem:[#allocation5 + $0x30] sm:$0xff] %vm12445_vm5, %v5295_v18 }
0x343e   :  { %4444 = vrot.lane.b32.xlu0 %v4437_v42, %s8788_s8  ;;  %v5813_v59 = vpop.permute.xlu0 %5812  ;;  %v6842_v24 = vld [vmem:[#allocation5 + $0x20] sm:$0xff]  ;;  %v12461_v42 = vld [vmem:[#allocation8_spill] sm:$0xff] }
0x343f   :  { %5815 = vst.msk [vmem:[#allocation5 + $0x30] sm:$0xff] %vm12449_vm10, %v5813_v59  ;;  %v12462_v59 = vld [vmem:[#allocation9_spill] sm:$0xff] }
0x3442   :  { %6662 = vrot.lane.b32.xlu0 %v6659_v14, %s8789_s5  ;;  %v5471_v2 = vpop.permute.xlu0 %5470  ;;  %v12463_v14 = vld [vmem:[#allocation11_spill] sm:$0xff] }
0x3443   :  { %5473 = vst.msk [vmem:[#allocation5 + $0x40] sm:$0xff] %vm12450_vm9, %v5471_v2  ;;  %v12464_v2 = vld [vmem:[#allocation10_spill] sm:$0xff] }
0x3446   :  { %v6844_v1 = vld [vmem:[#allocation5 + $0x30] sm:$0xff] }
0x3498   :  { %v6835_v19 = vpop.permute.xlu0 %6834 }
0x3499   :  { %6837 = vst.msk [vmem:[#allocation5] sm:$0xff] %vm12451_vm6, %v6835_v19 }
0x349c   :  { %v6830_v22 = vpop.permute.xlu1 %6829  ;;  %v5637_v32 = vpop.permute.xlu0 %5636 }
0x349d   :  { %6832 = vst.msk [vmem:[#allocation5 + $0x78] sm:$0xff] %vm12452_vm15, %v6830_v22 }
0x349e   :  { %5639 = vst.msk [vmem:[#allocation5 + $0x40] sm:$0xff] %vm12453_vm7, %v5637_v32 }
0x34a0   :  { %v1677_v27 = vpop.permute.xlu1 %1676  ;;  %v5129_v40 = vpop.permute.xlu0 %5128  ;;  %v6838_v51 = vld [vmem:[#allocation5] sm:$0xff] }
0x34a1   :  { %5131 = vst.msk [vmem:[#allocation5 + $0x50] sm:$0xff] %vm12454_vm2, %v5129_v40  ;;  %8007 = vmatprep.mubr.msk.f32.mxu1 %vm6869_vm0, %v6838_v51 }
0x34a2   :  { %8008 = vmatmul.mubr.msk.f32.vlgmr.msra.gmra.mrb[88].mxu1 %vm6869_vm0, %v6839_v16 }
0x34a3   :  { %8010 = vmatprep.mubr.msk.f32.mxu1 %vm6869_vm0, %v6840_v55 }
0x34a4   :  { %v5979_v39 = vpop.permute.xlu0 %5978  ;;  %v6853_v45 = vld [vmem:[#allocation5 + $0x78] sm:$0xff] }
0x34a5   :  { %5981 = vst.msk [vmem:[#allocation5 + $0x50] sm:$0xff] %vm12455_vm3, %v5979_v39  ;;  %v6846_v37 = vld [vmem:[#allocation5 + $0x40] sm:$0xff] }
0x34a6   :  { %8011 = vmatmul.mubr.msk.f32.gmra.mrb[90].mxu1 %vm6869_vm0, %v6841_v13 }
0x34a7   :  { %8013 = vmatprep.mubr.msk.f32.mxu1 %vm6869_vm0, %v6842_v24 }
0x34a8   :  { %v4787_v9 = vpop.permute.xlu0 %4786 }
0x34a9   :  { %4789 = vst.msk [vmem:[#allocation5 + $0x60] sm:$0xff] %vm12456_vm11, %v4787_v9 }
0x34aa   :  { %8014 = vmatmul.mubr.msk.f32.gmra.mrb[92].mxu1 %vm6869_vm0, %v6843_v49 }
0x34ab   :  { %8016 = vmatprep.mubr.msk.f32.mxu1 %vm6869_vm0, %v6844_v1 }
0x34ac   :  { %v6321_v54 = vpop.permute.xlu0 %6320  ;;  %v6848_v5 = vld [vmem:[#allocation5 + $0x50] sm:$0xff] }
0x34ad   :  { %6323 = vst.msk [vmem:[#allocation5 + $0x60] sm:$0xff] %vm12457_vm12, %v6321_v54 }
0x34ae   :  { %8017 = vmatmul.mubr.msk.f32.gmra.mrb[94].mxu1 %vm6869_vm0, %v6845_v58 }
0x34af   :  { %8019 = vmatprep.mubr.msk.f32.mxu1 %vm6869_vm0, %v6846_v37 }
0x34b0   :  { %v4445_v8 = vpop.permute.xlu0 %4444 }
0x34b1   :  { %4447 = vst.msk [vmem:[#allocation5 + $0x70] sm:$0xff] %vm12458_vm4, %v4445_v8 }
0x34b2   :  { %8020 = vmatmul.mubr.msk.f32.gmra.mrb[96].mxu1 %vm6869_vm0, %v6847_v4 }
0x34b3   :  { %8022 = vmatprep.mubr.msk.f32.mxu1 %vm6869_vm0, %v6848_v5 }
0x34b4   :  { %v6663_v56 = vpop.permute.xlu0 %6662  ;;  %v6850_v38 = vld [vmem:[#allocation5 + $0x60] sm:$0xff] }
0x34b5   :  { %6665 = vst.msk [vmem:[#allocation5 + $0x70] sm:$0xff] %vm12459_vm14, %v6663_v56 }
0x34b6   :  { %8023 = vmatmul.mubr.msk.f32.gmra.mrb[98].mxu1 %vm6869_vm0, %v6849_v11 }
0x34b7   :  { %8025 = vmatprep.mubr.msk.f32.mxu1 %vm6869_vm0, %v6850_v38 }
0x34ba   :  { %8026 = vmatmul.mubr.msk.f32.gmra.mrb[100].mxu1 %vm6869_vm0, %v6851_v50 }
0x34bc   :  { %v6852_v7 = vld [vmem:[#allocation5 + $0x70] sm:$0xff] }
0x34bd   :  { %8028 = vmatprep.mubr.msk.f32.mxu1 %vm6869_vm0, %v6852_v7 }
0x34be   :  { %8029 = vmatmul.mubr.msk.f32.gmra.mrb[102].mxu1 %vm6869_vm0, %v6853_v45 }
0x3575   :  { %v8009_v41 = vpop.f32.mrb[88].mxu1 }
0x3576   :  { %v6990_v28 = vadd.f32 %v8009_v41, %v7590_v25  ;;  %v6984_v15 = vpop.f32.mrb[89].mxu1 }
0x3577   :  { %v6985_v44 = vadd.f32 %v7590_v25, %v6984_v15 }
0x3578   :  { %7065 = vmax.xlane.f32.xlu1 %v6990_v28 }
0x3579   :  { %v8012_v53 = vpop.f32.mrb[90].mxu1  ;;  %7063 = vmax.xlane.f32.xlu0 %v6985_v44 }
0x357a   :  { %v7000_v10 = vadd.f32 %v8012_v53, %v7590_v25  ;;  %v6994_v6 = vpop.f32.mrb[91].mxu1 }
0x357b   :  { %v6995_v21 = vadd.f32 %v7590_v25, %v6994_v6 }
0x357d   :  { %v8015_v57 = vpop.f32.mrb[92].mxu1  ;;  %7069 = vmax.xlane.f32.xlu0 %v7000_v10 }
0x357e   :  { %v7004_v33 = vpop.f32.mrb[93].mxu1  ;;  %v7010_v12 = vadd.f32 %v8015_v57, %v7590_v25 }
0x357f   :  { %v7005_v20 = vadd.f32 %v7590_v25, %v7004_v33 }
0x3581   :  { %v8018_v34 = vpop.f32.mrb[94].mxu1  ;;  %7071 = vmax.xlane.f32.xlu1 %v7005_v20  ;;  %7067 = vmax.xlane.f32.xlu0 %v6995_v21 }
0x3582   :  { %v7014_v47 = vpop.f32.mrb[95].mxu1  ;;  %v7020_v29 = vadd.f32 %v8018_v34, %v7590_v25 }
0x3583   :  { %v7015_v26 = vadd.f32 %v7590_v25, %v7014_v47 }
0x3585   :  { %7075 = vmax.xlane.f32.xlu1 %v7015_v26  ;;  %7073 = vmax.xlane.f32.xlu0 %v7010_v12  ;;  %v8021_v0 = vpop.f32.mrb[96].mxu1 }
0x3586   :  { %v7024_v61 = vpop.f32.mrb[97].mxu1  ;;  %v12154_v23 = vadd.f32 %v8021_v0, %v7590_v25 }
0x3587   :  { %v7025_v48 = vadd.f32 %v7590_v25, %v7024_v61 }
0x3589   :  { %7077 = vmax.xlane.f32.xlu0 %v7020_v29  ;;  %7079 = vmax.xlane.f32.xlu1 %v7025_v48  ;;  %v8024_v62 = vpop.f32.mrb[98].mxu1 }
0x358a   :  { %v7034_v52 = vpop.f32.mrb[99].mxu1  ;;  %v12160_v60 = vadd.f32 %v8024_v62, %v7590_v25 }
0x358b   :  { %v12156_v43 = vadd.f32 %v7590_v25, %v7034_v52 }
0x358d   :  { %7081 = vmax.xlane.f32.xlu0 %v12154_v23  ;;  %7083 = vmax.xlane.f32.xlu1 %v12156_v43  ;;  %v8027_v3 = vpop.f32.mrb[100].mxu1 }
0x358e   :  { %v7044_v30 = vpop.f32.mrb[101].mxu1  ;;  %v12166_v35 = vadd.f32 %v8027_v3, %v7590_v25 }
0x358f   :  { %v12162_v63 = vadd.f32 %v7590_v25, %v7044_v30 }
0x3591   :  { %7085 = vmax.xlane.f32.xlu0 %v12160_v60  ;;  %7087 = vmax.xlane.f32.xlu1 %v12162_v63  ;;  %v8030_v46 = vpop.f32.mrb[102].mxu1 }
0x3592   :  { %v7054_v31 = vpop.f32.mrb[103].mxu1  ;;  %v12171_v36 = vadd.f32 %v8030_v46, %v7590_v25 }
0x3593   :  { %v12168_v18 = vadd.f32 %v7590_v25, %v7054_v31 }
0x3595   :  { %7089 = vmax.xlane.f32.xlu0 %v12166_v35 }
0x3599   :  { %7093 = vmax.xlane.f32.xlu0 %v12171_v36 }
0x35a2   :  { %1776 = vrot.lane.b32.xlu1 %v12460_v17, %s8787_s7 }
0x35a6   :  { %2331 = vrot.lane.b32.xlu1 %v12461_v42, %s8787_s7 }
0x35af   :  { %2233 = vrot.lane.b32.xlu0 %v12462_v59, %s8789_s5 }
0x35b3   :  { %2791 = vrot.lane.b32.xlu0 %v12463_v14, %s8789_s5 }
0x35ca   :  { %7091 = vmax.xlane.f32.xlu1 %v12168_v18 }
0x35db   :  { %2889 = vrot.lane.b32.xlu1 %v12464_v2, %s8787_s7 }
0x3605   :  { %v7066_v19 = vpop.xlane.xlu1 %7065 }
0x3606   :  { %v12185_v22 = vsub.f32 %v6990_v28, %v7066_v19  ;;  %v7064_v32 = vpop.xlane.xlu0 %7063 }
0x3607   :  { %v12187_v27 = vsub.f32 %v6985_v44, %v7064_v32  ;;  %v12465_v32 = vld [vmem:[#allocation13_spill] sm:$0xff] }
0x3608   :  { %v7113_v40 = vmul.f32 1.442695, %v12185_v22 }
0x3609   :  { %v7111_v51 = vmul.f32 1.442695, %v12187_v27 }
0x360a   :  { %8716 = vpow2.f32 %v7113_v40  ;;  %v7070_v16 = vpop.xlane.xlu0 %7069 }
0x360b   :  { %8718 = vpow2.f32 %v7111_v51  ;;  %v12191_v55 = vsub.f32 %v7000_v10, %v7070_v16 }
0x360d   :  { %v7117_v39 = vmul.f32 1.442695, %v12191_v55 }
0x360e   :  { %v7072_v13 = vpop.xlane.xlu1 %7071  ;;  %v7068_v24 = vpop.xlane.xlu0 %7067 }
0x360f   :  { %8720 = vpow2.f32 %v7117_v39  ;;  %v12194_v9 = vsub.f32 %v7005_v20, %v7072_v13  ;;  %v12196_v49 = vsub.f32 %v6995_v21, %v7068_v24  ;;  %v12466_v24 = vld [vmem:[#allocation12_spill] sm:$0xff] }
0x3611   :  { %v7115_v1 = vmul.f32 1.442695, %v12196_v49  ;;  %v7119_v37 = vmul.f32 1.442695, %v12194_v9 }
0x3612   :  { %v7076_v54 = vpop.xlane.xlu1 %7075  ;;  %v7074_v58 = vpop.xlane.xlu0 %7073 }
0x3613   :  { %v12200_v8 = vsub.f32 %v7015_v26, %v7076_v54  ;;  %v12202_v4 = vsub.f32 %v7010_v12, %v7074_v58  ;;  %8722 = vpow2.f32 %v7115_v1 }
0x3614   :  { %v8717_v5 = vpop.eup %8716  ;;  %8724 = vpow2.f32 %v7119_v37 }
0x3615   :  { %v8719_v56 = vpop.eup %8718  ;;  %v7121_v11 = vmul.f32 1.442695, %v12202_v4  ;;  %7145 = vadd.xlane.f32.xlu0 %v8717_v5  ;;  %v7123_v7 = vmul.f32 1.442695, %v12200_v8 }
0x3616   :  { %v7080_v38 = vpop.xlane.xlu1 %7079  ;;  %7143 = vadd.xlane.f32.xlu1 %v8719_v56  ;;  %v7078_v50 = vpop.xlane.xlu0 %7077 }
0x3617   :  { %v12206_v45 = vsub.f32 %v7025_v48, %v7080_v38  ;;  %v12208_v25 = vsub.f32 %v7020_v29, %v7078_v50  ;;  %8726 = vpow2.f32 %v7121_v11 }
0x3618   :  { %8728 = vpow2.f32 %v7123_v7 }
0x3619   :  { %v8721_v41 = vpop.eup %8720  ;;  %v7125_v28 = vmul.f32 1.442695, %v12208_v25  ;;  %v7127_v53 = vmul.f32 1.442695, %v12206_v45 }
0x361a   :  { %v7084_v15 = vpop.xlane.xlu1 %7083  ;;  %7149 = vadd.xlane.f32.xlu0 %v8721_v41  ;;  %v7082_v44 = vpop.xlane.xlu0 %7081 }
0x361b   :  { %v12213_v10 = vsub.f32 %v12156_v43, %v7084_v15  ;;  %v12216_v6 = vsub.f32 %v12154_v23, %v7082_v44  ;;  %8730 = vpow2.f32 %v7125_v28 }
0x361c   :  { %8732 = vpow2.f32 %v7127_v53 }
0x361d   :  { %v7129_v57 = vmul.f32 1.442695, %v12216_v6  ;;  %v8723_v33 = vpop.eup %8722  ;;  %v7131_v34 = vmul.f32 1.442695, %v12213_v10 }
0x361e   :  { %v7088_v21 = vpop.xlane.xlu1 %7087  ;;  %v7086_v20 = vpop.xlane.xlu0 %7085  ;;  %7147 = vadd.xlane.f32.xlu1 %v8723_v33 }
0x361f   :  { %v12221_v47 = vsub.f32 %v12160_v60, %v7086_v20  ;;  %8734 = vpow2.f32 %v7129_v57  ;;  %v12224_v12 = vsub.f32 %v12162_v63, %v7088_v21  ;;  %v8725_v26 = vpop.eup %8724 }
0x3620   :  { %8736 = vpow2.f32 %v7131_v34 }
0x3621   :  { %v7133_v0 = vmul.f32 1.442695, %v12221_v47  ;;  %v8727_v61 = vpop.eup %8726  ;;  %v7135_v52 = vmul.f32 1.442695, %v12224_v12 }
0x3622   :  { %v1777_v29 = vpop.permute.xlu1 %1776  ;;  %v7090_v48 = vpop.xlane.xlu0 %7089  ;;  %7151 = vadd.xlane.f32.xlu1 %v8725_v26  ;;  %7153 = vadd.xlane.f32.xlu0 %v8727_v61 }
0x3623   :  { %v12228_v62 = vsub.f32 %v12166_v35, %v7090_v48  ;;  %8738 = vpow2.f32 %v7133_v0  ;;  %v8729_v23 = vpop.eup %8728 }
0x3625   :  { %v7137_v43 = vmul.f32 1.442695, %v12228_v62  ;;  %v8731_v3 = vpop.eup %8730 }
0x3626   :  { %v2332_v30 = vpop.permute.xlu1 %2331  ;;  %v7094_v60 = vpop.xlane.xlu0 %7093  ;;  %7155 = vadd.xlane.f32.xlu1 %v8729_v23  ;;  %7157 = vadd.xlane.f32.xlu0 %v8731_v3 }
0x3627   :  { %8740 = vpow2.f32 %v7137_v43  ;;  %v12233_v63 = vsub.f32 %v12171_v36, %v7094_v60  ;;  %v8733_v46 = vpop.eup %8732 }
0x3628   :  { %8742 = vpow2.f32 %v7135_v52 }
0x3629   :  { %v7141_v31 = vmul.f32 1.442695, %v12233_v63  ;;  %v8735_v35 = vpop.eup %8734 }
0x362a   :  { %v2234_v17 = vpop.permute.xlu0 %2233  ;;  %7159 = vadd.xlane.f32.xlu1 %v8733_v46  ;;  %7161 = vadd.xlane.f32.xlu0 %v8735_v35  ;;  %v8737_v42 = vpop.eup %8736 }
0x362b   :  { %8744 = vpow2.f32 %v7141_v31 }
0x362d   :  { %v8739_v59 = vpop.eup %8738 }
0x362e   :  { %v2792_v14 = vpop.permute.xlu0 %2791  ;;  %7163 = vadd.xlane.f32.xlu1 %v8737_v42  ;;  %7165 = vadd.xlane.f32.xlu0 %v8739_v59 }
0x3631   :  { %v8741_v2 = vpop.eup %8740 }
0x3632   :  { %v8743_v19 = vpop.eup %8742  ;;  %7169 = vadd.xlane.f32.xlu0 %v8741_v2 }
0x3633   :  { %7167 = vadd.xlane.f32.xlu1 %v8743_v19 }
0x3635   :  { %v8745_v36 = vpop.eup %8744 }
0x3636   :  { %7173 = vadd.xlane.f32.xlu0 %v8745_v36 }
0x364c   :  { %3349 = vrot.lane.b32.xlu0 %v12465_v32, %s8789_s5 }
0x3657   :  { %v7092_v40 = vpop.xlane.xlu1 %7091 }
0x3658   :  { %v12239_v51 = vsub.f32 %v12168_v18, %v7092_v40 }
0x365a   :  { %v7139_v16 = vmul.f32 1.442695, %v12239_v51 }
0x365b   :  { %v2890_v39 = vpop.permute.xlu1 %2889 }
0x365c   :  { %8746 = vpow2.f32 %v7139_v16 }
0x3666   :  { %v8747_v13 = vpop.eup %8746 }
0x3667   :  { %7171 = vadd.xlane.f32.xlu1 %v8747_v13 }
0x3678   :  { %3447 = vrot.lane.b32.xlu1 %v12466_v24, %s8787_s7 }
0x36a2   :  { %v7146_v1 = vpop.xlane.xlu0 %7145 }
0x36a3   :  { %8748 = vlog2.f32 %v7146_v1  ;;  %v7144_v54 = vpop.xlane.xlu1 %7143 }
0x36a4   :  { %8750 = vlog2.f32 %v7144_v54 }
0x36a7   :  { %v7150_v58 = vpop.xlane.xlu0 %7149 }
0x36a8   :  { %8752 = vlog2.f32 %v7150_v58 }
0x36ab   :  { %v7148_v37 = vpop.xlane.xlu1 %7147 }
0x36ac   :  { %8754 = vlog2.f32 %v7148_v37 }
0x36ad   :  { %v8749_v5 = vpop.eup %8748 }
0x36ae   :  { %v8751_v18 = vpop.eup %8750  ;;  %v7178_v56 = vmul.f32 0.6931472, %v8749_v5 }
0x36af   :  { %v7176_v11 = vmul.f32 0.6931472, %v8751_v18  ;;  %v7152_v50 = vpop.xlane.xlu1 %7151  ;;  %v7154_v7 = vpop.xlane.xlu0 %7153 }
0x36b0   :  { %v7208_v38 = vsub.f32 %v12185_v22, %v7178_v56  ;;  %8756 = vlog2.f32 %v7152_v50 }
0x36b1   :  { %v7207_v41 = vsub.f32 %v12187_v27, %v7176_v11  ;;  %8758 = vlog2.f32 %v7154_v7 }
0x36b2   :  { %v8753_v28 = vpop.eup %8752  ;;  %7224 = vst [vmem:[%s12326_s18 + $0x8] sm:$0xff] %v7208_v38 }
0x36b3   :  { %7223 = vst [vmem:[%s12326_s18] sm:$0xff] %v7207_v41  ;;  %v7182_v15 = vmul.f32 0.6931472, %v8753_v28  ;;  %v7156_v44 = vpop.xlane.xlu1 %7155  ;;  %v7158_v53 = vpop.xlane.xlu0 %7157 }
0x36b4   :  { %8760 = vlog2.f32 %v7156_v44 }
0x36b5   :  { %v7210_v22 = vsub.f32 %v12191_v55, %v7182_v15  ;;  %8762 = vlog2.f32 %v7158_v53 }
0x36b6   :  { %v8755_v57 = vpop.eup %8754 }
0x36b7   :  { %7226 = vst [vmem:[%s12326_s18 + $0x18] sm:$0xff] %v7210_v22  ;;  %v7180_v27 = vmul.f32 0.6931472, %v8755_v57  ;;  %v7160_v33 = vpop.xlane.xlu1 %7159  ;;  %v7162_v21 = vpop.xlane.xlu0 %7161 }
0x36b8   :  { %8764 = vlog2.f32 %v7160_v33 }
0x36b9   :  { %v7209_v20 = vsub.f32 %v12196_v49, %v7180_v27  ;;  %8766 = vlog2.f32 %v7162_v21 }
0x36ba   :  { %v8757_v34 = vpop.eup %8756 }
0x36bb   :  { %v8759_v26 = vpop.eup %8758  ;;  %7225 = vst [vmem:[%s12326_s18 + $0x10] sm:$0xff] %v7209_v20  ;;  %v7184_v55 = vmul.f32 0.6931472, %v8757_v34  ;;  %v7164_v0 = vpop.xlane.xlu1 %7163 }
0x36bc   :  { %v7166_v61 = vpop.xlane.xlu0 %7165  ;;  %v7186_v29 = vmul.f32 0.6931472, %v8759_v26  ;;  %8768 = vlog2.f32 %v7164_v0 }
0x36bd   :  { %v7211_v48 = vsub.f32 %v12194_v9, %v7184_v55  ;;  %8770 = vlog2.f32 %v7166_v61 }
0x36be   :  { %v8761_v52 = vpop.eup %8760  ;;  %v7212_v23 = vsub.f32 %v12202_v4, %v7186_v29 }
0x36bf   :  { %v8763_v43 = vpop.eup %8762  ;;  %7227 = vst [vmem:[%s12326_s18 + $0x20] sm:$0xff] %v7211_v48  ;;  %v7188_v49 = vmul.f32 0.6931472, %v8761_v52 }
0x36c0   :  { %v7168_v3 = vpop.xlane.xlu1 %7167  ;;  %v7170_v30 = vpop.xlane.xlu0 %7169  ;;  %7228 = vst [vmem:[%s12326_s18 + $0x28] sm:$0xff] %v7212_v23  ;;  %v7190_v60 = vmul.f32 0.6931472, %v8763_v43 }
0x36c1   :  { %8772 = vlog2.f32 %v7168_v3  ;;  %v7213_v9 = vsub.f32 %v12200_v8, %v7188_v49 }
0x36c2   :  { %8774 = vlog2.f32 %v7170_v30  ;;  %v8765_v46 = vpop.eup %8764  ;;  %v7214_v4 = vsub.f32 %v12208_v25, %v7190_v60 }
0x36c3   :  { %v8767_v31 = vpop.eup %8766  ;;  %7229 = vst [vmem:[%s12326_s18 + $0x30] sm:$0xff] %v7213_v9  ;;  %v7192_v35 = vmul.f32 0.6931472, %v8765_v46 }
0x36c4   :  { %v7174_v17 = vpop.xlane.xlu0 %7173  ;;  %7230 = vst [vmem:[%s12326_s18 + $0x38] sm:$0xff] %v7214_v4  ;;  %v7194_v42 = vmul.f32 0.6931472, %v8767_v31 }
0x36c5   :  { %8776 = vlog2.f32 %v7174_v17  ;;  %v7215_v59 = vsub.f32 %v12206_v45, %v7192_v35 }
0x36c6   :  { %v8769_v8 = vpop.eup %8768  ;;  %v7216_v14 = vsub.f32 %v12216_v6, %v7194_v42 }
0x36c7   :  { %v8771_v2 = vpop.eup %8770  ;;  %7231 = vst [vmem:[%s12326_s18 + $0x40] sm:$0xff] %v7215_v59  ;;  %v7196_v25 = vmul.f32 0.6931472, %v8769_v8 }
0x36c8   :  { %v3350_v19 = vpop.permute.xlu0 %3349  ;;  %7232 = vst [vmem:[%s12326_s18 + $0x48] sm:$0xff] %v7216_v14  ;;  %v7198_v36 = vmul.f32 0.6931472, %v8771_v2 }
0x36c9   :  { %v7217_v32 = vsub.f32 %v12213_v10, %v7196_v25 }
0x36ca   :  { %v7218_v45 = vsub.f32 %v12221_v47, %v7198_v36 }
0x36cb   :  { %v8773_v40 = vpop.eup %8772  ;;  %7233 = vst [vmem:[%s12326_s18 + $0x50] sm:$0xff] %v7217_v32 }
0x36cc   :  { %v8775_v16 = vpop.eup %8774  ;;  %v7200_v6 = vmul.f32 0.6931472, %v8773_v40  ;;  %7234 = vst [vmem:[%s12326_s18 + $0x58] sm:$0xff] %v7218_v45 }
0x36cd   :  { %v7202_v39 = vmul.f32 0.6931472, %v8775_v16 }
0x36ce   :  { %v7219_v13 = vsub.f32 %v12224_v12, %v7200_v6 }
0x36cf   :  { %v8777_v24 = vpop.eup %8776  ;;  %v7220_v1 = vsub.f32 %v12228_v62, %v7202_v39 }
0x36d0   :  { %7235 = vst [vmem:[%s12326_s18 + $0x60] sm:$0xff] %v7219_v13  ;;  %v7206_v10 = vmul.f32 0.6931472, %v8777_v24 }
0x36d1   :  { %7236 = vst [vmem:[%s12326_s18 + $0x68] sm:$0xff] %v7220_v1 }
0x36d2   :  { %v7222_v47 = vsub.f32 %v12233_v63, %v7206_v10 }
0x36d4   :  { %7238 = vst [vmem:[%s12326_s18 + $0x78] sm:$0xff] %v7222_v47 }
0x36f4   :  { %v7172_v54 = vpop.xlane.xlu1 %7171 }
0x36f5   :  { %8778 = vlog2.f32 %v7172_v54 }
0x36f8   :  { %v3448_v12 = vpop.permute.xlu1 %3447 }
0x36ff   :  { %v8779_v58 = vpop.eup %8778 }
0x3700   :  { %v7204_v62 = vmul.f32 0.6931472, %v8779_v58 }
0x3702   :  { %v7221_v37 = vsub.f32 %v12239_v51, %v7204_v62 }
0x3704   :  { %7237 = vst [vmem:[%s12326_s18 + $0x70] sm:$0xff] %v7221_v37 }

</bundles_post_ra>
